<compile_context>
chip_gen: v7x
topology: tpu7x:2x2x1
jax: 0.10.0
libtpu: 0.0.40
codegen_flags: <defaults>
</compile_context>

<pallas_src>
import functools

import jax
import jax.numpy as jnp
from jax.experimental import pallas as pl
from jax.experimental.pallas import tpu as pltpu

# Deterministic stand-ins for configs.* (spec uses configs.ParamsConfig /
# configs.InputsConfig; small shapes consistent with the forward pass).
FREQ_BINS = 64        # configs.InputsConfig.FREQ_BINS   (input='cqt')
N_FRAMES = 16         # configs.InputsConfig.N_FRAMES
GRU_UNITS = 32        # configs.ParamsConfig.GRU_UNITS
GRU_LAYERS = 2        # configs.ParamsConfig.GRU_LAYERS
LATENT_DIMS = 8       # configs.ParamsConfig.LATENT_DIMS
BATCH = 2
CHANNELS = 1


def _round_up(x, m):
    return (x + m - 1) // m * m


# ---------------------------------------------------------------------------
# Fused kernel: for each GRU layer, one input-projection GEMM (all timesteps,
# both directions), then the unrolled bidirectional recurrence; finally the
# fc head + fused fc_mu/fc_logvar.  Grid-less, everything resident in VMEM.
# ---------------------------------------------------------------------------
def _timbre_encoder_kernel(*refs, num_layers, T, npad, H, LD):
    H2, H3, H6 = 2 * H, 3 * H, 6 * H
    n_in = 1 + 4 * num_layers + 4
    x_ref = refs[0]                                   # (T*npad, F) time-major
    layer_refs = refs[1:1 + 4 * num_layers]
    fcw_ref, fcb_ref, mw_ref, mb_ref = refs[1 + 4 * num_layers:n_in]
    out_ref = refs[n_in]                              # (npad, 2*LD)
    hbuf = refs[n_in + 1]                             # VMEM (T*npad, 2H) layer output
    pbuf = refs[n_in + 2]                             # VMEM (T*npad, 6H) projections

    for layer in range(num_layers):
        wih_ref, bih_ref, whh_ref, bhn_ref = layer_refs[4 * layer:4 * layer + 4]
        last = layer == num_layers - 1

        # -- input projection for ALL timesteps & BOTH directions: one GEMM --
        xin = x_ref[...] if layer == 0 else hbuf[...]
        pbuf[...] = (jnp.dot(xin, wih_ref[...],
                             preferred_element_type=jnp.float32)
                     + bih_ref[...])

        whh_f = whh_ref[0]          # (H, 3H), gate columns [r | z | n]
        whh_b = whh_ref[1]
        bhn_f = bhn_ref[0]          # (1, H)
        bhn_b = bhn_ref[1]

        def cell(gx, h_prev, whh_d, bhn_d):
            # single merged hidden-state matmul per direction (gates r, z, n)
            gh = jnp.dot(h_prev, whh_d, preferred_element_type=jnp.float32)
            r = jax.nn.sigmoid(gx[:, 0:H] + gh[:, 0:H])
            z = jax.nn.sigmoid(gx[:, H:H2] + gh[:, H:H2])
            n = jnp.tanh(gx[:, H2:H3] + r * (gh[:, H2:H3] + bhn_d))
            return (1.0 - z) * n + z * h_prev

        hf = jnp.zeros((npad, H), jnp.float32)
        hb = jnp.zeros((npad, H), jnp.float32)

        # fully unrolled time loop; fwd reads timestep t, bwd reads T-1-t
        for t in range(T):
            tb = T - 1 - t
            gx_f = pbuf[t * npad:(t + 1) * npad, 0:H3]
            gx_b = pbuf[tb * npad:(tb + 1) * npad, H3:H6]
            hf = cell(gx_f, hf, whh_f, bhn_f)
            hb = cell(gx_b, hb, whh_b, bhn_b)
            of = jnp.maximum(hf, 0.0) if last else hf   # fuse F.relu(x_gru)
            ob = jnp.maximum(hb, 0.0) if last else hb
            hbuf[t * npad:(t + 1) * npad, 0:H] = of
            hbuf[tb * npad:(tb + 1) * npad, H:H2] = ob

    # ---- head: x = relu(fc(relu(x_gru))); x_flat = x.view(-1, T);
    #      [mu | logvar] = relu(x_flat @ [Wmu^T | Wlv^T] + [bmu | blv]) ------
    fcw = fcw_ref[...]              # (1, 2H)
    fcb = fcb_ref[...]              # (1, 1)
    mw = mw_ref[...]                # (T, 2*LD)
    acc = jnp.zeros((npad, 2 * LD), jnp.float32)
    for t in range(T):
        h_t = hbuf[t * npad:(t + 1) * npad, :]                         # (npad, 2H)
        y_t = jnp.maximum(
            jnp.sum(h_t * fcw, axis=1, keepdims=True) + fcb, 0.0)      # (npad, 1)
        acc = acc + y_t * mw[t:t + 1, :]   # x_flat @ mulv_w as rank-1 updates
    out_ref[...] = jnp.maximum(acc + mb_ref[...], 0.0)


# ---------------------------------------------------------------------------
# Parameters: PyTorch-equivalent GRU / Linear weights.  `packed` is the
# pre-transposed / pre-folded layout the kernel consumes; `raw` keeps the
# PyTorch layout for the pure-JAX reference check.
# ---------------------------------------------------------------------------
def init_params(key):
    H, T, L, LD, F = GRU_UNITS, N_FRAMES, GRU_LAYERS, LATENT_DIMS, FREQ_BINS
    keys = iter(jax.random.split(key, L * 8 + 6))

    def rnd(shape, fan_in):
        return jax.random.normal(next(keys), shape, jnp.float32) / jnp.sqrt(float(fan_in))

    raw_layers, packed_layers = [], []
    in_dim = F
    for _ in range(L):
        layer = {}
        for d in ("f", "b"):
            layer["wih_" + d] = rnd((3 * H, in_dim), in_dim)   # PyTorch [W_ir; W_iz; W_in]
            layer["whh_" + d] = rnd((3 * H, H), H)             # [W_hr; W_hz; W_hn]
            layer["bih_" + d] = rnd((3 * H,), H)
            layer["bhh_" + d] = rnd((3 * H,), H)
        raw_layers.append(layer)

        def pack_dir(d):
            wih, whh = layer["wih_" + d], layer["whh_" + d]
            bih, bhh = layer["bih_" + d], layer["bhh_" + d]
            # fold b_hr / b_hz into the input-projection bias; keep b_hn separate
            bias = jnp.concatenate([bih[0:H] + bhh[0:H],
                                    bih[H:2 * H] + bhh[H:2 * H],
                                    bih[2 * H:3 * H]])
            return wih.T, whh.T, bias, bhh[2 * H:3 * H]

        wf, whf, bf, bhnf = pack_dir("f")
        wb, whb, bb, bhnb = pack_dir("b")
        packed_layers.append({
            "wih": jnp.concatenate([wf, wb], axis=1),                      # (in_dim, 6H)
            "bih": jnp.concatenate([bf, bb]).reshape(1, 6 * H),
            "whh": jnp.stack([whf, whb], axis=0),                          # (2, H, 3H)
            "bhn": jnp.stack([bhnf.reshape(1, H), bhnb.reshape(1, H)]),    # (2, 1, H)
        })
        in_dim = 2 * H

    fc_w = rnd((1, 2 * H), 2 * H)      # nn.Linear(2H, 1)
    fc_b = rnd((1,), 2 * H)
    mu_w = rnd((LD, T), T)             # nn.Linear(n_frames, latent_dims)
    mu_b = rnd((LD,), T)
    lv_w = rnd((LD, T), T)
    lv_b = rnd((LD,), T)

    raw = {"gru": raw_layers, "fc_w": fc_w, "fc_b": fc_b,
           "mu_w": mu_w, "mu_b": mu_b, "lv_w": lv_w, "lv_b": lv_b}
    packed = {
        "gru": packed_layers,
        "fc_w": fc_w,                                           # (1, 2H) row for lane reduce
        "fc_b": fc_b.reshape(1, 1),
        "mulv_w": jnp.concatenate([mu_w.T, lv_w.T], axis=1),    # (T, 2*LD) fused mu|logvar
        "mulv_b": jnp.concatenate([mu_b, lv_b]).reshape(1, 2 * LD),
    }
    return packed, raw


# ---------------------------------------------------------------------------
# Forward wrapper: one transpose/pad in XLA, then a single pallas_call.
# ---------------------------------------------------------------------------
def timbre_encoder_forward(params, x):
    B, C, F, T = x.shape
    n_seq = B * C
    H, LD = GRU_UNITS, LATENT_DIMS
    num_layers = len(params["gru"])
    npad = _round_up(n_seq, 8)

    # x.permute(0,1,3,2).view(-1, T, F), laid out time-major and batch-padded
    # to a full 8-sublane tile so every per-timestep slice is tile aligned.
    xt = jnp.transpose(x, (3, 0, 1, 2)).reshape(T, n_seq, F)
    if npad != n_seq:
        xt = jnp.pad(xt, ((0, 0), (0, npad - n_seq), (0, 0)))
    x2d = xt.reshape(T * npad, F)

    inputs = [x2d]
    for lp in params["gru"]:
        inputs += [lp["wih"], lp["bih"], lp["whh"], lp["bhn"]]
    inputs += [params["fc_w"], params["fc_b"], params["mulv_w"], params["mulv_b"]]

    out = pl.pallas_call(
        functools.partial(_timbre_encoder_kernel, num_layers=num_layers,
                          T=T, npad=npad, H=H, LD=LD),
        out_shape=jax.ShapeDtypeStruct((npad, 2 * LD), jnp.float32),
        in_specs=[pl.BlockSpec(memory_space=pltpu.MemorySpace.VMEM)] * len(inputs),
        out_specs=pl.BlockSpec(memory_space=pltpu.MemorySpace.VMEM),
        scratch_shapes=[pltpu.VMEM((T * npad, 2 * H), jnp.float32),   # layer output
                        pltpu.VMEM((T * npad, 6 * H), jnp.float32)],  # projections
    )(*inputs)
    return out[:n_seq, :LD], out[:n_seq, LD:2 * LD]


# ---------------------------------------------------------------------------
# Pure-JAX reference (PyTorch semantics, f32) for correctness validation.
# ---------------------------------------------------------------------------
def ref_forward(raw, x):
    H = GRU_UNITS
    n_seq = x.shape[0] * x.shape[1]
    T, F = x.shape[3], x.shape[2]
    h = jnp.transpose(x, (0, 1, 3, 2)).reshape(n_seq, T, F)

    def run_dir(inp, wih, whh, bih, bhh, reverse):
        def cell(h_prev, x_t):
            gi = x_t @ wih.T + bih
            gh = h_prev @ whh.T + bhh
            r = jax.nn.sigmoid(gi[:, :H] + gh[:, :H])
            z = jax.nn.sigmoid(gi[:, H:2 * H] + gh[:, H:2 * H])
            n = jnp.tanh(gi[:, 2 * H:] + r * gh[:, 2 * H:])
            h_new = (1.0 - z) * n + z * h_prev
            return h_new, h_new
        seq = jnp.transpose(inp, (1, 0, 2))
        h0 = jnp.zeros((inp.shape[0], H), jnp.float32)
        _, ys = jax.lax.scan(cell, h0, seq, reverse=reverse)
        return jnp.transpose(ys, (1, 0, 2))

    for lp in raw["gru"]:
        hf = run_dir(h, lp["wih_f"], lp["whh_f"], lp["bih_f"], lp["bhh_f"], False)
        hb = run_dir(h, lp["wih_b"], lp["whh_b"], lp["bih_b"], lp["bhh_b"], True)
        h = jnp.concatenate([hf, hb], axis=-1)
    h = jax.nn.relu(h)
    y = jax.nn.relu(h @ raw["fc_w"].T + raw["fc_b"])            # (n_seq, T, 1)
    x_flat = y.reshape(n_seq, T)
    mu = jax.nn.relu(x_flat @ raw["mu_w"].T + raw["mu_b"])
    lv = jax.nn.relu(x_flat @ raw["lv_w"].T + raw["lv_b"])
    return mu, lv


# ---------------------------------------------------------------------------
if __name__ == "__main__":
    key = jax.random.PRNGKey(0)
    k_param, k_x = jax.random.split(key)

    params, raw = init_params(k_param)
    x = jax.random.normal(k_x, (BATCH, CHANNELS, FREQ_BINS, N_FRAMES), jnp.float32)

    fwd = jax.jit(timbre_encoder_forward)
    mu, logvar = fwd(params, x)
    jax.block_until_ready((mu, logvar))

    mu_ref, lv_ref = jax.jit(ref_forward)(raw, x)
    jax.block_until_ready((mu_ref, lv_ref))

    n_seq = BATCH * CHANNELS
    assert mu.shape == (n_seq, LATENT_DIMS), mu.shape
    assert logvar.shape == (n_seq, LATENT_DIMS), logvar.shape
    assert bool(jnp.all(jnp.isfinite(mu))) and bool(jnp.all(jnp.isfinite(logvar)))
    assert bool(jnp.all(mu >= 0.0)) and bool(jnp.all(logvar >= 0.0))   # relu heads (per spec)
    assert bool(jnp.allclose(mu, mu_ref, atol=1e-3, rtol=1e-3)), "mu mismatch vs reference"
    assert bool(jnp.allclose(logvar, lv_ref, atol=1e-3, rtol=1e-3)), "logvar mismatch vs reference"

    print("KERNEL_OK")
</pallas_src>

<mosaic_0001>
module attributes {stable_mosaic.version = 11 : i64} {
  func.func @_timbre_encoder_kernel(%arg0: memref<128x64xf32, #tpu.memory_space<vmem>>, %arg1: memref<64x192xf32, #tpu.memory_space<vmem>>, %arg2: memref<1x192xf32, #tpu.memory_space<vmem>>, %arg3: memref<2x32x96xf32, #tpu.memory_space<vmem>>, %arg4: memref<2x1x32xf32, #tpu.memory_space<vmem>>, %arg5: memref<64x192xf32, #tpu.memory_space<vmem>>, %arg6: memref<1x192xf32, #tpu.memory_space<vmem>>, %arg7: memref<2x32x96xf32, #tpu.memory_space<vmem>>, %arg8: memref<2x1x32xf32, #tpu.memory_space<vmem>>, %arg9: memref<1x64xf32, #tpu.memory_space<vmem>>, %arg10: memref<1x1xf32, #tpu.memory_space<vmem>>, %arg11: memref<16x16xf32, #tpu.memory_space<vmem>>, %arg12: memref<1x16xf32, #tpu.memory_space<vmem>>, %arg13: memref<8x16xf32, #tpu.memory_space<vmem>>, %arg14: memref<128x64xf32, #tpu.memory_space<vmem>>, %arg15: memref<128x192xf32, #tpu.memory_space<vmem>>) attributes {dimension_semantics = [], scalar_prefetch = 0 : i64, scratch_operands = 2 : i64, tpu.core_type = #tpu.core_type<tc>} {
    %c0 = arith.constant 0 : index
    %c0_0 = arith.constant 0 : index
    %0 = vector.load %arg0[%c0, %c0_0] : memref<128x64xf32, #tpu.memory_space<vmem>>, vector<128x64xf32>
    %c0_1 = arith.constant 0 : index
    %c0_2 = arith.constant 0 : index
    %1 = vector.load %arg1[%c0_1, %c0_2] : memref<64x192xf32, #tpu.memory_space<vmem>>, vector<64x192xf32>
    %cst = arith.constant dense<0.000000e+00> : vector<128x192xf32>
    %2 = tpu.matmul %0, %1, %cst {dimension_numbers = #tpu.dot_dimension_numbers<[1], [0], [0], [1], [0, 0, 1, 1], [], []>} : vector<128x64xf32>, vector<64x192xf32>, vector<128x192xf32> -> vector<128x192xf32>
    %c0_3 = arith.constant 0 : index
    %c0_4 = arith.constant 0 : index
    %3 = vector.load %arg2[%c0_3, %c0_4] : memref<1x192xf32, #tpu.memory_space<vmem>>, vector<1x192xf32>
    %4 = vector.broadcast %3 : vector<1x192xf32> to vector<128x192xf32>
    %5 = arith.addf %2, %4 : vector<128x192xf32>
    %c0_5 = arith.constant 0 : index
    %c0_6 = arith.constant 0 : index
    %6 = vector.load %arg15[%c0_5, %c0_6] : memref<128x192xf32, #tpu.memory_space<vmem>>, vector<128x192xf32>
    tpu.vector_store %arg15[%c0_5, %c0_6], %5 {strides = array<i32>} : memref<128x192xf32, #tpu.memory_space<vmem>>, vector<128x192xf32>,
    %c0_7 = arith.constant 0 : index
    %c0_8 = arith.constant 0 : index
    %c0_9 = arith.constant 0 : index
    %7 = vector.load %arg3[%c0_7, %c0_8, %c0_9] : memref<2x32x96xf32, #tpu.memory_space<vmem>>, vector<1x32x96xf32>
    %8 = vector.shape_cast %7 : vector<1x32x96xf32> to vector<32x96xf32>
    %c1 = arith.constant 1 : index
    %c0_10 = arith.constant 0 : index
    %c0_11 = arith.constant 0 : index
    %9 = vector.load %arg3[%c1, %c0_10, %c0_11] : memref<2x32x96xf32, #tpu.memory_space<vmem>>, vector<1x32x96xf32>
    %10 = vector.shape_cast %9 : vector<1x32x96xf32> to vector<32x96xf32>
    %c0_12 = arith.constant 0 : index
    %c0_13 = arith.constant 0 : index
    %c0_14 = arith.constant 0 : index
    %11 = vector.load %arg4[%c0_12, %c0_13, %c0_14] : memref<2x1x32xf32, #tpu.memory_space<vmem>>, vector<1x1x32xf32>
    %12 = vector.shape_cast %11 : vector<1x1x32xf32> to vector<1x32xf32>
    %c1_15 = arith.constant 1 : index
    %c0_16 = arith.constant 0 : index
    %c0_17 = arith.constant 0 : index
    %13 = vector.load %arg4[%c1_15, %c0_16, %c0_17] : memref<2x1x32xf32, #tpu.memory_space<vmem>>, vector<1x1x32xf32>
    %14 = vector.shape_cast %13 : vector<1x1x32xf32> to vector<1x32xf32>
    %cst_18 = arith.constant 0.000000e+00 : f32
    %15 = vector.broadcast %cst_18 : f32 to vector<8x32xf32>
    %cst_19 = arith.constant 0.000000e+00 : f32
    %16 = vector.broadcast %cst_19 : f32 to vector<8x32xf32>
    %c0_20 = arith.constant 0 : index
    %c0_21 = arith.constant 0 : index
    %17 = vector.load %arg15[%c0_20, %c0_21] : memref<128x192xf32, #tpu.memory_space<vmem>>, vector<8x96xf32>
    %c120 = arith.constant 120 : index
    %c96 = arith.constant 96 : index
    %18 = vector.load %arg15[%c120, %c96] : memref<128x192xf32, #tpu.memory_space<vmem>>, vector<8x96xf32>
    %cst_22 = arith.constant dense<0.000000e+00> : vector<8x96xf32>
    %19 = tpu.matmul %15, %8, %cst_22 {dimension_numbers = #tpu.dot_dimension_numbers<[1], [0], [0], [1], [0, 0, 1, 1], [], []>} : vector<8x32xf32>, vector<32x96xf32>, vector<8x96xf32> -> vector<8x96xf32>
    %20 = vector.extract_strided_slice %17 {offsets = [0, 0], sizes = [8, 32], strides = [1, 1]} : vector<8x96xf32> to vector<8x32xf32>
    %21 = vector.extract_strided_slice %19 {offsets = [0, 0], sizes = [8, 32], strides = [1, 1]} : vector<8x96xf32> to vector<8x32xf32>
    %22 = arith.addf %20, %21 : vector<8x32xf32>
    %23 = arith.negf %22 : vector<8x32xf32>
    %24 = math.exp %23 : vector<8x32xf32>
    %cst_23 = arith.constant 1.000000e+00 : f32
    %25 = vector.broadcast %cst_23 : f32 to vector<8x32xf32>
    %26 = arith.addf %25, %24 : vector<8x32xf32>
    %27 = arith.divf %25, %26 : vector<8x32xf32>
    %28 = vector.extract_strided_slice %17 {offsets = [0, 32], sizes = [8, 32], strides = [1, 1]} : vector<8x96xf32> to vector<8x32xf32>
    %29 = vector.extract_strided_slice %19 {offsets = [0, 32], sizes = [8, 32], strides = [1, 1]} : vector<8x96xf32> to vector<8x32xf32>
    %30 = arith.addf %28, %29 : vector<8x32xf32>
    %31 = arith.negf %30 : vector<8x32xf32>
    %32 = math.exp %31 : vector<8x32xf32>
    %cst_24 = arith.constant 1.000000e+00 : f32
    %33 = vector.broadcast %cst_24 : f32 to vector<8x32xf32>
    %34 = arith.addf %33, %32 : vector<8x32xf32>
    %35 = arith.divf %33, %34 : vector<8x32xf32>
    %36 = vector.extract_strided_slice %17 {offsets = [0, 64], sizes = [8, 32], strides = [1, 1]} : vector<8x96xf32> to vector<8x32xf32>
    %37 = vector.extract_strided_slice %19 {offsets = [0, 64], sizes = [8, 32], strides = [1, 1]} : vector<8x96xf32> to vector<8x32xf32>
    %38 = vector.broadcast %12 : vector<1x32xf32> to vector<8x32xf32>
    %39 = arith.addf %37, %38 : vector<8x32xf32>
    %40 = arith.mulf %27, %39 : vector<8x32xf32>
    %41 = arith.addf %36, %40 : vector<8x32xf32>
    %42 = math.tanh %41 : vector<8x32xf32>
    %cst_25 = arith.constant 1.000000e+00 : f32
    %43 = vector.broadcast %cst_25 : f32 to vector<8x32xf32>
    %44 = arith.subf %43, %35 : vector<8x32xf32>
    %45 = arith.mulf %44, %42 : vector<8x32xf32>
    %46 = arith.mulf %35, %15 : vector<8x32xf32>
    %47 = arith.addf %45, %46 : vector<8x32xf32>
    %cst_26 = arith.constant dense<0.000000e+00> : vector<8x96xf32>
    %48 = tpu.matmul %16, %10, %cst_26 {dimension_numbers = #tpu.dot_dimension_numbers<[1], [0], [0], [1], [0, 0, 1, 1], [], []>} : vector<8x32xf32>, vector<32x96xf32>, vector<8x96xf32> -> vector<8x96xf32>
    %49 = vector.extract_strided_slice %18 {offsets = [0, 0], sizes = [8, 32], strides = [1, 1]} : vector<8x96xf32> to vector<8x32xf32>
    %50 = vector.extract_strided_slice %48 {offsets = [0, 0], sizes = [8, 32], strides = [1, 1]} : vector<8x96xf32> to vector<8x32xf32>
    %51 = arith.addf %49, %50 : vector<8x32xf32>
    %52 = arith.negf %51 : vector<8x32xf32>
    %53 = math.exp %52 : vector<8x32xf32>
    %cst_27 = arith.constant 1.000000e+00 : f32
    %54 = vector.broadcast %cst_27 : f32 to vector<8x32xf32>
    %55 = arith.addf %54, %53 : vector<8x32xf32>
    %56 = arith.divf %54, %55 : vector<8x32xf32>
    %57 = vector.extract_strided_slice %18 {offsets = [0, 32], sizes = [8, 32], strides = [1, 1]} : vector<8x96xf32> to vector<8x32xf32>
    %58 = vector.extract_strided_slice %48 {offsets = [0, 32], sizes = [8, 32], strides = [1, 1]} : vector<8x96xf32> to vector<8x32xf32>
    %59 = arith.addf %57, %58 : vector<8x32xf32>
    %60 = arith.negf %59 : vector<8x32xf32>
    %61 = math.exp %60 : vector<8x32xf32>
    %cst_28 = arith.constant 1.000000e+00 : f32
    %62 = vector.broadcast %cst_28 : f32 to vector<8x32xf32>
    %63 = arith.addf %62, %61 : vector<8x32xf32>
    %64 = arith.divf %62, %63 : vector<8x32xf32>
    %65 = vector.extract_strided_slice %18 {offsets = [0, 64], sizes = [8, 32], strides = [1, 1]} : vector<8x96xf32> to vector<8x32xf32>
    %66 = vector.extract_strided_slice %48 {offsets = [0, 64], sizes = [8, 32], strides = [1, 1]} : vector<8x96xf32> to vector<8x32xf32>
    %67 = vector.broadcast %14 : vector<1x32xf32> to vector<8x32xf32>
    %68 = arith.addf %66, %67 : vector<8x32xf32>
    %69 = arith.mulf %56, %68 : vector<8x32xf32>
    %70 = arith.addf %65, %69 : vector<8x32xf32>
    %71 = math.tanh %70 : vector<8x32xf32>
    %cst_29 = arith.constant 1.000000e+00 : f32
    %72 = vector.broadcast %cst_29 : f32 to vector<8x32xf32>
    %73 = arith.subf %72, %64 : vector<8x32xf32>
    %74 = arith.mulf %73, %71 : vector<8x32xf32>
    %75 = arith.mulf %64, %16 : vector<8x32xf32>
    %76 = arith.addf %74, %75 : vector<8x32xf32>
    %c0_30 = arith.constant 0 : index
    %c0_31 = arith.constant 0 : index
    %77 = vector.load %arg14[%c0_30, %c0_31] : memref<128x64xf32, #tpu.memory_space<vmem>>, vector<8x32xf32>
    tpu.vector_store %arg14[%c0_30, %c0_31], %47 {strides = array<i32>} : memref<128x64xf32, #tpu.memory_space<vmem>>, vector<8x32xf32>,
    %c120_32 = arith.constant 120 : index
    %c32 = arith.constant 32 : index
    %78 = vector.load %arg14[%c120_32, %c32] : memref<128x64xf32, #tpu.memory_space<vmem>>, vector<8x32xf32>
    tpu.vector_store %arg14[%c120_32, %c32], %76 {strides = array<i32>} : memref<128x64xf32, #tpu.memory_space<vmem>>, vector<8x32xf32>,
    %c8 = arith.constant 8 : index
    %c0_33 = arith.constant 0 : index
    %79 = vector.load %arg15[%c8, %c0_33] : memref<128x192xf32, #tpu.memory_space<vmem>>, vector<8x96xf32>
    %c112 = arith.constant 112 : index
    %c96_34 = arith.constant 96 : index
    %80 = vector.load %arg15[%c112, %c96_34] : memref<128x192xf32, #tpu.memory_space<vmem>>, vector<8x96xf32>
    %cst_35 = arith.constant dense<0.000000e+00> : vector<8x96xf32>
    %81 = tpu.matmul %47, %8, %cst_35 {dimension_numbers = #tpu.dot_dimension_numbers<[1], [0], [0], [1], [0, 0, 1, 1], [], []>} : vector<8x32xf32>, vector<32x96xf32>, vector<8x96xf32> -> vector<8x96xf32>
    %82 = vector.extract_strided_slice %79 {offsets = [0, 0], sizes = [8, 32], strides = [1, 1]} : vector<8x96xf32> to vector<8x32xf32>
    %83 = vector.extract_strided_slice %81 {offsets = [0, 0], sizes = [8, 32], strides = [1, 1]} : vector<8x96xf32> to vector<8x32xf32>
    %84 = arith.addf %82, %83 : vector<8x32xf32>
    %85 = arith.negf %84 : vector<8x32xf32>
    %86 = math.exp %85 : vector<8x32xf32>
    %cst_36 = arith.constant 1.000000e+00 : f32
    %87 = vector.broadcast %cst_36 : f32 to vector<8x32xf32>
    %88 = arith.addf %87, %86 : vector<8x32xf32>
    %89 = arith.divf %87, %88 : vector<8x32xf32>
    %90 = vector.extract_strided_slice %79 {offsets = [0, 32], sizes = [8, 32], strides = [1, 1]} : vector<8x96xf32> to vector<8x32xf32>
    %91 = vector.extract_strided_slice %81 {offsets = [0, 32], sizes = [8, 32], strides = [1, 1]} : vector<8x96xf32> to vector<8x32xf32>
    %92 = arith.addf %90, %91 : vector<8x32xf32>
    %93 = arith.negf %92 : vector<8x32xf32>
    %94 = math.exp %93 : vector<8x32xf32>
    %cst_37 = arith.constant 1.000000e+00 : f32
    %95 = vector.broadcast %cst_37 : f32 to vector<8x32xf32>
    %96 = arith.addf %95, %94 : vector<8x32xf32>
    %97 = arith.divf %95, %96 : vector<8x32xf32>
    %98 = vector.extract_strided_slice %79 {offsets = [0, 64], sizes = [8, 32], strides = [1, 1]} : vector<8x96xf32> to vector<8x32xf32>
    %99 = vector.extract_strided_slice %81 {offsets = [0, 64], sizes = [8, 32], strides = [1, 1]} : vector<8x96xf32> to vector<8x32xf32>
    %100 = vector.broadcast %12 : vector<1x32xf32> to vector<8x32xf32>
    %101 = arith.addf %99, %100 : vector<8x32xf32>
    %102 = arith.mulf %89, %101 : vector<8x32xf32>
    %103 = arith.addf %98, %102 : vector<8x32xf32>
    %104 = math.tanh %103 : vector<8x32xf32>
    %cst_38 = arith.constant 1.000000e+00 : f32
    %105 = vector.broadcast %cst_38 : f32 to vector<8x32xf32>
    %106 = arith.subf %105, %97 : vector<8x32xf32>
    %107 = arith.mulf %106, %104 : vector<8x32xf32>
    %108 = arith.mulf %97, %47 : vector<8x32xf32>
    %109 = arith.addf %107, %108 : vector<8x32xf32>
    %cst_39 = arith.constant dense<0.000000e+00> : vector<8x96xf32>
    %110 = tpu.matmul %76, %10, %cst_39 {dimension_numbers = #tpu.dot_dimension_numbers<[1], [0], [0], [1], [0, 0, 1, 1], [], []>} : vector<8x32xf32>, vector<32x96xf32>, vector<8x96xf32> -> vector<8x96xf32>
    %111 = vector.extract_strided_slice %80 {offsets = [0, 0], sizes = [8, 32], strides = [1, 1]} : vector<8x96xf32> to vector<8x32xf32>
    %112 = vector.extract_strided_slice %110 {offsets = [0, 0], sizes = [8, 32], strides = [1, 1]} : vector<8x96xf32> to vector<8x32xf32>
    %113 = arith.addf %111, %112 : vector<8x32xf32>
    %114 = arith.negf %113 : vector<8x32xf32>
    %115 = math.exp %114 : vector<8x32xf32>
    %cst_40 = arith.constant 1.000000e+00 : f32
    %116 = vector.broadcast %cst_40 : f32 to vector<8x32xf32>
    %117 = arith.addf %116, %115 : vector<8x32xf32>
    %118 = arith.divf %116, %117 : vector<8x32xf32>
    %119 = vector.extract_strided_slice %80 {offsets = [0, 32], sizes = [8, 32], strides = [1, 1]} : vector<8x96xf32> to vector<8x32xf32>
    %120 = vector.extract_strided_slice %110 {offsets = [0, 32], sizes = [8, 32], strides = [1, 1]} : vector<8x96xf32> to vector<8x32xf32>
    %121 = arith.addf %119, %120 : vector<8x32xf32>
    %122 = arith.negf %121 : vector<8x32xf32>
    %123 = math.exp %122 : vector<8x32xf32>
    %cst_41 = arith.constant 1.000000e+00 : f32
    %124 = vector.broadcast %cst_41 : f32 to vector<8x32xf32>
    %125 = arith.addf %124, %123 : vector<8x32xf32>
    %126 = arith.divf %124, %125 : vector<8x32xf32>
    %127 = vector.extract_strided_slice %80 {offsets = [0, 64], sizes = [8, 32], strides = [1, 1]} : vector<8x96xf32> to vector<8x32xf32>
    %128 = vector.extract_strided_slice %110 {offsets = [0, 64], sizes = [8, 32], strides = [1, 1]} : vector<8x96xf32> to vector<8x32xf32>
    %129 = vector.broadcast %14 : vector<1x32xf32> to vector<8x32xf32>
    %130 = arith.addf %128, %129 : vector<8x32xf32>
    %131 = arith.mulf %118, %130 : vector<8x32xf32>
    %132 = arith.addf %127, %131 : vector<8x32xf32>
    %133 = math.tanh %132 : vector<8x32xf32>
    %cst_42 = arith.constant 1.000000e+00 : f32
    %134 = vector.broadcast %cst_42 : f32 to vector<8x32xf32>
    %135 = arith.subf %134, %126 : vector<8x32xf32>
    %136 = arith.mulf %135, %133 : vector<8x32xf32>
    %137 = arith.mulf %126, %76 : vector<8x32xf32>
    %138 = arith.addf %136, %137 : vector<8x32xf32>
    %c8_43 = arith.constant 8 : index
    %c0_44 = arith.constant 0 : index
    %139 = vector.load %arg14[%c8_43, %c0_44] : memref<128x64xf32, #tpu.memory_space<vmem>>, vector<8x32xf32>
    tpu.vector_store %arg14[%c8_43, %c0_44], %109 {strides = array<i32>} : memref<128x64xf32, #tpu.memory_space<vmem>>, vector<8x32xf32>,
    %c112_45 = arith.constant 112 : index
    %c32_46 = arith.constant 32 : index
    %140 = vector.load %arg14[%c112_45, %c32_46] : memref<128x64xf32, #tpu.memory_space<vmem>>, vector<8x32xf32>
    tpu.vector_store %arg14[%c112_45, %c32_46], %138 {strides = array<i32>} : memref<128x64xf32, #tpu.memory_space<vmem>>, vector<8x32xf32>,
    %c16 = arith.constant 16 : index
    %c0_47 = arith.constant 0 : index
    %141 = vector.load %arg15[%c16, %c0_47] : memref<128x192xf32, #tpu.memory_space<vmem>>, vector<8x96xf32>
    %c104 = arith.constant 104 : index
    %c96_48 = arith.constant 96 : index
    %142 = vector.load %arg15[%c104, %c96_48] : memref<128x192xf32, #tpu.memory_space<vmem>>, vector<8x96xf32>
    %cst_49 = arith.constant dense<0.000000e+00> : vector<8x96xf32>
    %143 = tpu.matmul %109, %8, %cst_49 {dimension_numbers = #tpu.dot_dimension_numbers<[1], [0], [0], [1], [0, 0, 1, 1], [], []>} : vector<8x32xf32>, vector<32x96xf32>, vector<8x96xf32> -> vector<8x96xf32>
    %144 = vector.extract_strided_slice %141 {offsets = [0, 0], sizes = [8, 32], strides = [1, 1]} : vector<8x96xf32> to vector<8x32xf32>
    %145 = vector.extract_strided_slice %143 {offsets = [0, 0], sizes = [8, 32], strides = [1, 1]} : vector<8x96xf32> to vector<8x32xf32>
    %146 = arith.addf %144, %145 : vector<8x32xf32>
    %147 = arith.negf %146 : vector<8x32xf32>
    %148 = math.exp %147 : vector<8x32xf32>
    %cst_50 = arith.constant 1.000000e+00 : f32
    %149 = vector.broadcast %cst_50 : f32 to vector<8x32xf32>
    %150 = arith.addf %149, %148 : vector<8x32xf32>
    %151 = arith.divf %149, %150 : vector<8x32xf32>
    %152 = vector.extract_strided_slice %141 {offsets = [0, 32], sizes = [8, 32], strides = [1, 1]} : vector<8x96xf32> to vector<8x32xf32>
    %153 = vector.extract_strided_slice %143 {offsets = [0, 32], sizes = [8, 32], strides = [1, 1]} : vector<8x96xf32> to vector<8x32xf32>
    %154 = arith.addf %152, %153 : vector<8x32xf32>
    %155 = arith.negf %154 : vector<8x32xf32>
    %156 = math.exp %155 : vector<8x32xf32>
    %cst_51 = arith.constant 1.000000e+00 : f32
    %157 = vector.broadcast %cst_51 : f32 to vector<8x32xf32>
    %158 = arith.addf %157, %156 : vector<8x32xf32>
    %159 = arith.divf %157, %158 : vector<8x32xf32>
    %160 = vector.extract_strided_slice %141 {offsets = [0, 64], sizes = [8, 32], strides = [1, 1]} : vector<8x96xf32> to vector<8x32xf32>
    %161 = vector.extract_strided_slice %143 {offsets = [0, 64], sizes = [8, 32], strides = [1, 1]} : vector<8x96xf32> to vector<8x32xf32>
    %162 = vector.broadcast %12 : vector<1x32xf32> to vector<8x32xf32>
    %163 = arith.addf %161, %162 : vector<8x32xf32>
    %164 = arith.mulf %151, %163 : vector<8x32xf32>
    %165 = arith.addf %160, %164 : vector<8x32xf32>
    %166 = math.tanh %165 : vector<8x32xf32>
    %cst_52 = arith.constant 1.000000e+00 : f32
    %167 = vector.broadcast %cst_52 : f32 to vector<8x32xf32>
    %168 = arith.subf %167, %159 : vector<8x32xf32>
    %169 = arith.mulf %168, %166 : vector<8x32xf32>
    %170 = arith.mulf %159, %109 : vector<8x32xf32>
    %171 = arith.addf %169, %170 : vector<8x32xf32>
    %cst_53 = arith.constant dense<0.000000e+00> : vector<8x96xf32>
    %172 = tpu.matmul %138, %10, %cst_53 {dimension_numbers = #tpu.dot_dimension_numbers<[1], [0], [0], [1], [0, 0, 1, 1], [], []>} : vector<8x32xf32>, vector<32x96xf32>, vector<8x96xf32> -> vector<8x96xf32>
    %173 = vector.extract_strided_slice %142 {offsets = [0, 0], sizes = [8, 32], strides = [1, 1]} : vector<8x96xf32> to vector<8x32xf32>
    %174 = vector.extract_strided_slice %172 {offsets = [0, 0], sizes = [8, 32], strides = [1, 1]} : vector<8x96xf32> to vector<8x32xf32>
    %175 = arith.addf %173, %174 : vector<8x32xf32>
    %176 = arith.negf %175 : vector<8x32xf32>
    %177 = math.exp %176 : vector<8x32xf32>
    %cst_54 = arith.constant 1.000000e+00 : f32
    %178 = vector.broadcast %cst_54 : f32 to vector<8x32xf32>
    %179 = arith.addf %178, %177 : vector<8x32xf32>
    %180 = arith.divf %178, %179 : vector<8x32xf32>
    %181 = vector.extract_strided_slice %142 {offsets = [0, 32], sizes = [8, 32], strides = [1, 1]} : vector<8x96xf32> to vector<8x32xf32>
    %182 = vector.extract_strided_slice %172 {offsets = [0, 32], sizes = [8, 32], strides = [1, 1]} : vector<8x96xf32> to vector<8x32xf32>
    %183 = arith.addf %181, %182 : vector<8x32xf32>
    %184 = arith.negf %183 : vector<8x32xf32>
    %185 = math.exp %184 : vector<8x32xf32>
    %cst_55 = arith.constant 1.000000e+00 : f32
    %186 = vector.broadcast %cst_55 : f32 to vector<8x32xf32>
    %187 = arith.addf %186, %185 : vector<8x32xf32>
    %188 = arith.divf %186, %187 : vector<8x32xf32>
    %189 = vector.extract_strided_slice %142 {offsets = [0, 64], sizes = [8, 32], strides = [1, 1]} : vector<8x96xf32> to vector<8x32xf32>
    %190 = vector.extract_strided_slice %172 {offsets = [0, 64], sizes = [8, 32], strides = [1, 1]} : vector<8x96xf32> to vector<8x32xf32>
    %191 = vector.broadcast %14 : vector<1x32xf32> to vector<8x32xf32>
    %192 = arith.addf %190, %191 : vector<8x32xf32>
    %193 = arith.mulf %180, %192 : vector<8x32xf32>
    %194 = arith.addf %189, %193 : vector<8x32xf32>
    %195 = math.tanh %194 : vector<8x32xf32>
    %cst_56 = arith.constant 1.000000e+00 : f32
    %196 = vector.broadcast %cst_56 : f32 to vector<8x32xf32>
    %197 = arith.subf %196, %188 : vector<8x32xf32>
    %198 = arith.mulf %197, %195 : vector<8x32xf32>
    %199 = arith.mulf %188, %138 : vector<8x32xf32>
    %200 = arith.addf %198, %199 : vector<8x32xf32>
    %c16_57 = arith.constant 16 : index
    %c0_58 = arith.constant 0 : index
    %201 = vector.load %arg14[%c16_57, %c0_58] : memref<128x64xf32, #tpu.memory_space<vmem>>, vector<8x32xf32>
    tpu.vector_store %arg14[%c16_57, %c0_58], %171 {strides = array<i32>} : memref<128x64xf32, #tpu.memory_space<vmem>>, vector<8x32xf32>,
    %c104_59 = arith.constant 104 : index
    %c32_60 = arith.constant 32 : index
    %202 = vector.load %arg14[%c104_59, %c32_60] : memref<128x64xf32, #tpu.memory_space<vmem>>, vector<8x32xf32>
    tpu.vector_store %arg14[%c104_59, %c32_60], %200 {strides = array<i32>} : memref<128x64xf32, #tpu.memory_space<vmem>>, vector<8x32xf32>,
    %c24 = arith.constant 24 : index
    %c0_61 = arith.constant 0 : index
    %203 = vector.load %arg15[%c24, %c0_61] : memref<128x192xf32, #tpu.memory_space<vmem>>, vector<8x96xf32>
    %c96_62 = arith.constant 96 : index
    %c96_63 = arith.constant 96 : index
    %204 = vector.load %arg15[%c96_62, %c96_63] : memref<128x192xf32, #tpu.memory_space<vmem>>, vector<8x96xf32>
    %cst_64 = arith.constant dense<0.000000e+00> : vector<8x96xf32>
    %205 = tpu.matmul %171, %8, %cst_64 {dimension_numbers = #tpu.dot_dimension_numbers<[1], [0], [0], [1], [0, 0, 1, 1], [], []>} : vector<8x32xf32>, vector<32x96xf32>, vector<8x96xf32> -> vector<8x96xf32>
    %206 = vector.extract_strided_slice %203 {offsets = [0, 0], sizes = [8, 32], strides = [1, 1]} : vector<8x96xf32> to vector<8x32xf32>
    %207 = vector.extract_strided_slice %205 {offsets = [0, 0], sizes = [8, 32], strides = [1, 1]} : vector<8x96xf32> to vector<8x32xf32>
    %208 = arith.addf %206, %207 : vector<8x32xf32>
    %209 = arith.negf %208 : vector<8x32xf32>
    %210 = math.exp %209 : vector<8x32xf32>
    %cst_65 = arith.constant 1.000000e+00 : f32
    %211 = vector.broadcast %cst_65 : f32 to vector<8x32xf32>
    %212 = arith.addf %211, %210 : vector<8x32xf32>
    %213 = arith.divf %211, %212 : vector<8x32xf32>
    %214 = vector.extract_strided_slice %203 {offsets = [0, 32], sizes = [8, 32], strides = [1, 1]} : vector<8x96xf32> to vector<8x32xf32>
    %215 = vector.extract_strided_slice %205 {offsets = [0, 32], sizes = [8, 32], strides = [1, 1]} : vector<8x96xf32> to vector<8x32xf32>
    %216 = arith.addf %214, %215 : vector<8x32xf32>
    %217 = arith.negf %216 : vector<8x32xf32>
    %218 = math.exp %217 : vector<8x32xf32>
    %cst_66 = arith.constant 1.000000e+00 : f32
    %219 = vector.broadcast %cst_66 : f32 to vector<8x32xf32>
    %220 = arith.addf %219, %218 : vector<8x32xf32>
    %221 = arith.divf %219, %220 : vector<8x32xf32>
    %222 = vector.extract_strided_slice %203 {offsets = [0, 64], sizes = [8, 32], strides = [1, 1]} : vector<8x96xf32> to vector<8x32xf32>
    %223 = vector.extract_strided_slice %205 {offsets = [0, 64], sizes = [8, 32], strides = [1, 1]} : vector<8x96xf32> to vector<8x32xf32>
    %224 = vector.broadcast %12 : vector<1x32xf32> to vector<8x32xf32>
    %225 = arith.addf %223, %224 : vector<8x32xf32>
    %226 = arith.mulf %213, %225 : vector<8x32xf32>
    %227 = arith.addf %222, %226 : vector<8x32xf32>
    %228 = math.tanh %227 : vector<8x32xf32>
    %cst_67 = arith.constant 1.000000e+00 : f32
    %229 = vector.broadcast %cst_67 : f32 to vector<8x32xf32>
    %230 = arith.subf %229, %221 : vector<8x32xf32>
    %231 = arith.mulf %230, %228 : vector<8x32xf32>
    %232 = arith.mulf %221, %171 : vector<8x32xf32>
    %233 = arith.addf %231, %232 : vector<8x32xf32>
    %cst_68 = arith.constant dense<0.000000e+00> : vector<8x96xf32>
    %234 = tpu.matmul %200, %10, %cst_68 {dimension_numbers = #tpu.dot_dimension_numbers<[1], [0], [0], [1], [0, 0, 1, 1], [], []>} : vector<8x32xf32>, vector<32x96xf32>, vector<8x96xf32> -> vector<8x96xf32>
    %235 = vector.extract_strided_slice %204 {offsets = [0, 0], sizes = [8, 32], strides = [1, 1]} : vector<8x96xf32> to vector<8x32xf32>
    %236 = vector.extract_strided_slice %234 {offsets = [0, 0], sizes = [8, 32], strides = [1, 1]} : vector<8x96xf32> to vector<8x32xf32>
    %237 = arith.addf %235, %236 : vector<8x32xf32>
    %238 = arith.negf %237 : vector<8x32xf32>
    %239 = math.exp %238 : vector<8x32xf32>
    %cst_69 = arith.constant 1.000000e+00 : f32
    %240 = vector.broadcast %cst_69 : f32 to vector<8x32xf32>
    %241 = arith.addf %240, %239 : vector<8x32xf32>
    %242 = arith.divf %240, %241 : vector<8x32xf32>
    %243 = vector.extract_strided_slice %204 {offsets = [0, 32], sizes = [8, 32], strides = [1, 1]} : vector<8x96xf32> to vector<8x32xf32>
    %244 = vector.extract_strided_slice %234 {offsets = [0, 32], sizes = [8, 32], strides = [1, 1]} : vector<8x96xf32> to vector<8x32xf32>
    %245 = arith.addf %243, %244 : vector<8x32xf32>
    %246 = arith.negf %245 : vector<8x32xf32>
    %247 = math.exp %246 : vector<8x32xf32>
    %cst_70 = arith.constant 1.000000e+00 : f32
    %248 = vector.broadcast %cst_70 : f32 to vector<8x32xf32>
    %249 = arith.addf %248, %247 : vector<8x32xf32>
    %250 = arith.divf %248, %249 : vector<8x32xf32>
    %251 = vector.extract_strided_slice %204 {offsets = [0, 64], sizes = [8, 32], strides = [1, 1]} : vector<8x96xf32> to vector<8x32xf32>
    %252 = vector.extract_strided_slice %234 {offsets = [0, 64], sizes = [8, 32], strides = [1, 1]} : vector<8x96xf32> to vector<8x32xf32>
    %253 = vector.broadcast %14 : vector<1x32xf32> to vector<8x32xf32>
    %254 = arith.addf %252, %253 : vector<8x32xf32>
    %255 = arith.mulf %242, %254 : vector<8x32xf32>
    %256 = arith.addf %251, %255 : vector<8x32xf32>
    %257 = math.tanh %256 : vector<8x32xf32>
    %cst_71 = arith.constant 1.000000e+00 : f32
    %258 = vector.broadcast %cst_71 : f32 to vector<8x32xf32>
    %259 = arith.subf %258, %250 : vector<8x32xf32>
    %260 = arith.mulf %259, %257 : vector<8x32xf32>
    %261 = arith.mulf %250, %200 : vector<8x32xf32>
    %262 = arith.addf %260, %261 : vector<8x32xf32>
    %c24_72 = arith.constant 24 : index
    %c0_73 = arith.constant 0 : index
    %263 = vector.load %arg14[%c24_72, %c0_73] : memref<128x64xf32, #tpu.memory_space<vmem>>, vector<8x32xf32>
    tpu.vector_store %arg14[%c24_72, %c0_73], %233 {strides = array<i32>} : memref<128x64xf32, #tpu.memory_space<vmem>>, vector<8x32xf32>,
    %c96_74 = arith.constant 96 : index
    %c32_75 = arith.constant 32 : index
    %264 = vector.load %arg14[%c96_74, %c32_75] : memref<128x64xf32, #tpu.memory_space<vmem>>, vector<8x32xf32>
    tpu.vector_store %arg14[%c96_74, %c32_75], %262 {strides = array<i32>} : memref<128x64xf32, #tpu.memory_space<vmem>>, vector<8x32xf32>,
    %c32_76 = arith.constant 32 : index
    %c0_77 = arith.constant 0 : index
    %265 = vector.load %arg15[%c32_76, %c0_77] : memref<128x192xf32, #tpu.memory_space<vmem>>, vector<8x96xf32>
    %c88 = arith.constant 88 : index
    %c96_78 = arith.constant 96 : index
    %266 = vector.load %arg15[%c88, %c96_78] : memref<128x192xf32, #tpu.memory_space<vmem>>, vector<8x96xf32>
    %cst_79 = arith.constant dense<0.000000e+00> : vector<8x96xf32>
    %267 = tpu.matmul %233, %8, %cst_79 {dimension_numbers = #tpu.dot_dimension_numbers<[1], [0], [0], [1], [0, 0, 1, 1], [], []>} : vector<8x32xf32>, vector<32x96xf32>, vector<8x96xf32> -> vector<8x96xf32>
    %268 = vector.extract_strided_slice %265 {offsets = [0, 0], sizes = [8, 32], strides = [1, 1]} : vector<8x96xf32> to vector<8x32xf32>
    %269 = vector.extract_strided_slice %267 {offsets = [0, 0], sizes = [8, 32], strides = [1, 1]} : vector<8x96xf32> to vector<8x32xf32>
    %270 = arith.addf %268, %269 : vector<8x32xf32>
    %271 = arith.negf %270 : vector<8x32xf32>
    %272 = math.exp %271 : vector<8x32xf32>
    %cst_80 = arith.constant 1.000000e+00 : f32
    %273 = vector.broadcast %cst_80 : f32 to vector<8x32xf32>
    %274 = arith.addf %273, %272 : vector<8x32xf32>
    %275 = arith.divf %273, %274 : vector<8x32xf32>
    %276 = vector.extract_strided_slice %265 {offsets = [0, 32], sizes = [8, 32], strides = [1, 1]} : vector<8x96xf32> to vector<8x32xf32>
    %277 = vector.extract_strided_slice %267 {offsets = [0, 32], sizes = [8, 32], strides = [1, 1]} : vector<8x96xf32> to vector<8x32xf32>
    %278 = arith.addf %276, %277 : vector<8x32xf32>
    %279 = arith.negf %278 : vector<8x32xf32>
    %280 = math.exp %279 : vector<8x32xf32>
    %cst_81 = arith.constant 1.000000e+00 : f32
    %281 = vector.broadcast %cst_81 : f32 to vector<8x32xf32>
    %282 = arith.addf %281, %280 : vector<8x32xf32>
    %283 = arith.divf %281, %282 : vector<8x32xf32>
    %284 = vector.extract_strided_slice %265 {offsets = [0, 64], sizes = [8, 32], strides = [1, 1]} : vector<8x96xf32> to vector<8x32xf32>
    %285 = vector.extract_strided_slice %267 {offsets = [0, 64], sizes = [8, 32], strides = [1, 1]} : vector<8x96xf32> to vector<8x32xf32>
    %286 = vector.broadcast %12 : vector<1x32xf32> to vector<8x32xf32>
    %287 = arith.addf %285, %286 : vector<8x32xf32>
    %288 = arith.mulf %275, %287 : vector<8x32xf32>
    %289 = arith.addf %284, %288 : vector<8x32xf32>
    %290 = math.tanh %289 : vector<8x32xf32>
    %cst_82 = arith.constant 1.000000e+00 : f32
    %291 = vector.broadcast %cst_82 : f32 to vector<8x32xf32>
    %292 = arith.subf %291, %283 : vector<8x32xf32>
    %293 = arith.mulf %292, %290 : vector<8x32xf32>
    %294 = arith.mulf %283, %233 : vector<8x32xf32>
    %295 = arith.addf %293, %294 : vector<8x32xf32>
    %cst_83 = arith.constant dense<0.000000e+00> : vector<8x96xf32>
    %296 = tpu.matmul %262, %10, %cst_83 {dimension_numbers = #tpu.dot_dimension_numbers<[1], [0], [0], [1], [0, 0, 1, 1], [], []>} : vector<8x32xf32>, vector<32x96xf32>, vector<8x96xf32> -> vector<8x96xf32>
    %297 = vector.extract_strided_slice %266 {offsets = [0, 0], sizes = [8, 32], strides = [1, 1]} : vector<8x96xf32> to vector<8x32xf32>
    %298 = vector.extract_strided_slice %296 {offsets = [0, 0], sizes = [8, 32], strides = [1, 1]} : vector<8x96xf32> to vector<8x32xf32>
    %299 = arith.addf %297, %298 : vector<8x32xf32>
    %300 = arith.negf %299 : vector<8x32xf32>
    %301 = math.exp %300 : vector<8x32xf32>
    %cst_84 = arith.constant 1.000000e+00 : f32
    %302 = vector.broadcast %cst_84 : f32 to vector<8x32xf32>
    %303 = arith.addf %302, %301 : vector<8x32xf32>
    %304 = arith.divf %302, %303 : vector<8x32xf32>
    %305 = vector.extract_strided_slice %266 {offsets = [0, 32], sizes = [8, 32], strides = [1, 1]} : vector<8x96xf32> to vector<8x32xf32>
    %306 = vector.extract_strided_slice %296 {offsets = [0, 32], sizes = [8, 32], strides = [1, 1]} : vector<8x96xf32> to vector<8x32xf32>
    %307 = arith.addf %305, %306 : vector<8x32xf32>
    %308 = arith.negf %307 : vector<8x32xf32>
    %309 = math.exp %308 : vector<8x32xf32>
    %cst_85 = arith.constant 1.000000e+00 : f32
    %310 = vector.broadcast %cst_85 : f32 to vector<8x32xf32>
    %311 = arith.addf %310, %309 : vector<8x32xf32>
    %312 = arith.divf %310, %311 : vector<8x32xf32>
    %313 = vector.extract_strided_slice %266 {offsets = [0, 64], sizes = [8, 32], strides = [1, 1]} : vector<8x96xf32> to vector<8x32xf32>
    %314 = vector.extract_strided_slice %296 {offsets = [0, 64], sizes = [8, 32], strides = [1, 1]} : vector<8x96xf32> to vector<8x32xf32>
    %315 = vector.broadcast %14 : vector<1x32xf32> to vector<8x32xf32>
    %316 = arith.addf %314, %315 : vector<8x32xf32>
    %317 = arith.mulf %304, %316 : vector<8x32xf32>
    %318 = arith.addf %313, %317 : vector<8x32xf32>
    %319 = math.tanh %318 : vector<8x32xf32>
    %cst_86 = arith.constant 1.000000e+00 : f32
    %320 = vector.broadcast %cst_86 : f32 to vector<8x32xf32>
    %321 = arith.subf %320, %312 : vector<8x32xf32>
    %322 = arith.mulf %321, %319 : vector<8x32xf32>
    %323 = arith.mulf %312, %262 : vector<8x32xf32>
    %324 = arith.addf %322, %323 : vector<8x32xf32>
    %c32_87 = arith.constant 32 : index
    %c0_88 = arith.constant 0 : index
    %325 = vector.load %arg14[%c32_87, %c0_88] : memref<128x64xf32, #tpu.memory_space<vmem>>, vector<8x32xf32>
    tpu.vector_store %arg14[%c32_87, %c0_88], %295 {strides = array<i32>} : memref<128x64xf32, #tpu.memory_space<vmem>>, vector<8x32xf32>,
    %c88_89 = arith.constant 88 : index
    %c32_90 = arith.constant 32 : index
    %326 = vector.load %arg14[%c88_89, %c32_90] : memref<128x64xf32, #tpu.memory_space<vmem>>, vector<8x32xf32>
    tpu.vector_store %arg14[%c88_89, %c32_90], %324 {strides = array<i32>} : memref<128x64xf32, #tpu.memory_space<vmem>>, vector<8x32xf32>,
    %c40 = arith.constant 40 : index
    %c0_91 = arith.constant 0 : index
    %327 = vector.load %arg15[%c40, %c0_91] : memref<128x192xf32, #tpu.memory_space<vmem>>, vector<8x96xf32>
    %c80 = arith.constant 80 : index
    %c96_92 = arith.constant 96 : index
    %328 = vector.load %arg15[%c80, %c96_92] : memref<128x192xf32, #tpu.memory_space<vmem>>, vector<8x96xf32>
    %cst_93 = arith.constant dense<0.000000e+00> : vector<8x96xf32>
    %329 = tpu.matmul %295, %8, %cst_93 {dimension_numbers = #tpu.dot_dimension_numbers<[1], [0], [0], [1], [0, 0, 1, 1], [], []>} : vector<8x32xf32>, vector<32x96xf32>, vector<8x96xf32> -> vector<8x96xf32>
    %330 = vector.extract_strided_slice %327 {offsets = [0, 0], sizes = [8, 32], strides = [1, 1]} : vector<8x96xf32> to vector<8x32xf32>
    %331 = vector.extract_strided_slice %329 {offsets = [0, 0], sizes = [8, 32], strides = [1, 1]} : vector<8x96xf32> to vector<8x32xf32>
    %332 = arith.addf %330, %331 : vector<8x32xf32>
    %333 = arith.negf %332 : vector<8x32xf32>
    %334 = math.exp %333 : vector<8x32xf32>
    %cst_94 = arith.constant 1.000000e+00 : f32
    %335 = vector.broadcast %cst_94 : f32 to vector<8x32xf32>
    %336 = arith.addf %335, %334 : vector<8x32xf32>
    %337 = arith.divf %335, %336 : vector<8x32xf32>
    %338 = vector.extract_strided_slice %327 {offsets = [0, 32], sizes = [8, 32], strides = [1, 1]} : vector<8x96xf32> to vector<8x32xf32>
    %339 = vector.extract_strided_slice %329 {offsets = [0, 32], sizes = [8, 32], strides = [1, 1]} : vector<8x96xf32> to vector<8x32xf32>
    %340 = arith.addf %338, %339 : vector<8x32xf32>
    %341 = arith.negf %340 : vector<8x32xf32>
    %342 = math.exp %341 : vector<8x32xf32>
    %cst_95 = arith.constant 1.000000e+00 : f32
    %343 = vector.broadcast %cst_95 : f32 to vector<8x32xf32>
    %344 = arith.addf %343, %342 : vector<8x32xf32>
    %345 = arith.divf %343, %344 : vector<8x32xf32>
    %346 = vector.extract_strided_slice %327 {offsets = [0, 64], sizes = [8, 32], strides = [1, 1]} : vector<8x96xf32> to vector<8x32xf32>
    %347 = vector.extract_strided_slice %329 {offsets = [0, 64], sizes = [8, 32], strides = [1, 1]} : vector<8x96xf32> to vector<8x32xf32>
    %348 = vector.broadcast %12 : vector<1x32xf32> to vector<8x32xf32>
    %349 = arith.addf %347, %348 : vector<8x32xf32>
    %350 = arith.mulf %337, %349 : vector<8x32xf32>
    %351 = arith.addf %346, %350 : vector<8x32xf32>
    %352 = math.tanh %351 : vector<8x32xf32>
    %cst_96 = arith.constant 1.000000e+00 : f32
    %353 = vector.broadcast %cst_96 : f32 to vector<8x32xf32>
    %354 = arith.subf %353, %345 : vector<8x32xf32>
    %355 = arith.mulf %354, %352 : vector<8x32xf32>
    %356 = arith.mulf %345, %295 : vector<8x32xf32>
    %357 = arith.addf %355, %356 : vector<8x32xf32>
    %cst_97 = arith.constant dense<0.000000e+00> : vector<8x96xf32>
    %358 = tpu.matmul %324, %10, %cst_97 {dimension_numbers = #tpu.dot_dimension_numbers<[1], [0], [0], [1], [0, 0, 1, 1], [], []>} : vector<8x32xf32>, vector<32x96xf32>, vector<8x96xf32> -> vector<8x96xf32>
    %359 = vector.extract_strided_slice %328 {offsets = [0, 0], sizes = [8, 32], strides = [1, 1]} : vector<8x96xf32> to vector<8x32xf32>
    %360 = vector.extract_strided_slice %358 {offsets = [0, 0], sizes = [8, 32], strides = [1, 1]} : vector<8x96xf32> to vector<8x32xf32>
    %361 = arith.addf %359, %360 : vector<8x32xf32>
    %362 = arith.negf %361 : vector<8x32xf32>
    %363 = math.exp %362 : vector<8x32xf32>
    %cst_98 = arith.constant 1.000000e+00 : f32
    %364 = vector.broadcast %cst_98 : f32 to vector<8x32xf32>
    %365 = arith.addf %364, %363 : vector<8x32xf32>
    %366 = arith.divf %364, %365 : vector<8x32xf32>
    %367 = vector.extract_strided_slice %328 {offsets = [0, 32], sizes = [8, 32], strides = [1, 1]} : vector<8x96xf32> to vector<8x32xf32>
    %368 = vector.extract_strided_slice %358 {offsets = [0, 32], sizes = [8, 32], strides = [1, 1]} : vector<8x96xf32> to vector<8x32xf32>
    %369 = arith.addf %367, %368 : vector<8x32xf32>
    %370 = arith.negf %369 : vector<8x32xf32>
    %371 = math.exp %370 : vector<8x32xf32>
    %cst_99 = arith.constant 1.000000e+00 : f32
    %372 = vector.broadcast %cst_99 : f32 to vector<8x32xf32>
    %373 = arith.addf %372, %371 : vector<8x32xf32>
    %374 = arith.divf %372, %373 : vector<8x32xf32>
    %375 = vector.extract_strided_slice %328 {offsets = [0, 64], sizes = [8, 32], strides = [1, 1]} : vector<8x96xf32> to vector<8x32xf32>
    %376 = vector.extract_strided_slice %358 {offsets = [0, 64], sizes = [8, 32], strides = [1, 1]} : vector<8x96xf32> to vector<8x32xf32>
    %377 = vector.broadcast %14 : vector<1x32xf32> to vector<8x32xf32>
    %378 = arith.addf %376, %377 : vector<8x32xf32>
    %379 = arith.mulf %366, %378 : vector<8x32xf32>
    %380 = arith.addf %375, %379 : vector<8x32xf32>
    %381 = math.tanh %380 : vector<8x32xf32>
    %cst_100 = arith.constant 1.000000e+00 : f32
    %382 = vector.broadcast %cst_100 : f32 to vector<8x32xf32>
    %383 = arith.subf %382, %374 : vector<8x32xf32>
    %384 = arith.mulf %383, %381 : vector<8x32xf32>
    %385 = arith.mulf %374, %324 : vector<8x32xf32>
    %386 = arith.addf %384, %385 : vector<8x32xf32>
    %c40_101 = arith.constant 40 : index
    %c0_102 = arith.constant 0 : index
    %387 = vector.load %arg14[%c40_101, %c0_102] : memref<128x64xf32, #tpu.memory_space<vmem>>, vector<8x32xf32>
    tpu.vector_store %arg14[%c40_101, %c0_102], %357 {strides = array<i32>} : memref<128x64xf32, #tpu.memory_space<vmem>>, vector<8x32xf32>,
    %c80_103 = arith.constant 80 : index
    %c32_104 = arith.constant 32 : index
    %388 = vector.load %arg14[%c80_103, %c32_104] : memref<128x64xf32, #tpu.memory_space<vmem>>, vector<8x32xf32>
    tpu.vector_store %arg14[%c80_103, %c32_104], %386 {strides = array<i32>} : memref<128x64xf32, #tpu.memory_space<vmem>>, vector<8x32xf32>,
    %c48 = arith.constant 48 : index
    %c0_105 = arith.constant 0 : index
    %389 = vector.load %arg15[%c48, %c0_105] : memref<128x192xf32, #tpu.memory_space<vmem>>, vector<8x96xf32>
    %c72 = arith.constant 72 : index
    %c96_106 = arith.constant 96 : index
    %390 = vector.load %arg15[%c72, %c96_106] : memref<128x192xf32, #tpu.memory_space<vmem>>, vector<8x96xf32>
    %cst_107 = arith.constant dense<0.000000e+00> : vector<8x96xf32>
    %391 = tpu.matmul %357, %8, %cst_107 {dimension_numbers = #tpu.dot_dimension_numbers<[1], [0], [0], [1], [0, 0, 1, 1], [], []>} : vector<8x32xf32>, vector<32x96xf32>, vector<8x96xf32> -> vector<8x96xf32>
    %392 = vector.extract_strided_slice %389 {offsets = [0, 0], sizes = [8, 32], strides = [1, 1]} : vector<8x96xf32> to vector<8x32xf32>
    %393 = vector.extract_strided_slice %391 {offsets = [0, 0], sizes = [8, 32], strides = [1, 1]} : vector<8x96xf32> to vector<8x32xf32>
    %394 = arith.addf %392, %393 : vector<8x32xf32>
    %395 = arith.negf %394 : vector<8x32xf32>
    %396 = math.exp %395 : vector<8x32xf32>
    %cst_108 = arith.constant 1.000000e+00 : f32
    %397 = vector.broadcast %cst_108 : f32 to vector<8x32xf32>
    %398 = arith.addf %397, %396 : vector<8x32xf32>
    %399 = arith.divf %397, %398 : vector<8x32xf32>
    %400 = vector.extract_strided_slice %389 {offsets = [0, 32], sizes = [8, 32], strides = [1, 1]} : vector<8x96xf32> to vector<8x32xf32>
    %401 = vector.extract_strided_slice %391 {offsets = [0, 32], sizes = [8, 32], strides = [1, 1]} : vector<8x96xf32> to vector<8x32xf32>
    %402 = arith.addf %400, %401 : vector<8x32xf32>
    %403 = arith.negf %402 : vector<8x32xf32>
    %404 = math.exp %403 : vector<8x32xf32>
    %cst_109 = arith.constant 1.000000e+00 : f32
    %405 = vector.broadcast %cst_109 : f32 to vector<8x32xf32>
    %406 = arith.addf %405, %404 : vector<8x32xf32>
    %407 = arith.divf %405, %406 : vector<8x32xf32>
    %408 = vector.extract_strided_slice %389 {offsets = [0, 64], sizes = [8, 32], strides = [1, 1]} : vector<8x96xf32> to vector<8x32xf32>
    %409 = vector.extract_strided_slice %391 {offsets = [0, 64], sizes = [8, 32], strides = [1, 1]} : vector<8x96xf32> to vector<8x32xf32>
    %410 = vector.broadcast %12 : vector<1x32xf32> to vector<8x32xf32>
    %411 = arith.addf %409, %410 : vector<8x32xf32>
    %412 = arith.mulf %399, %411 : vector<8x32xf32>
    %413 = arith.addf %408, %412 : vector<8x32xf32>
    %414 = math.tanh %413 : vector<8x32xf32>
    %cst_110 = arith.constant 1.000000e+00 : f32
    %415 = vector.broadcast %cst_110 : f32 to vector<8x32xf32>
    %416 = arith.subf %415, %407 : vector<8x32xf32>
    %417 = arith.mulf %416, %414 : vector<8x32xf32>
    %418 = arith.mulf %407, %357 : vector<8x32xf32>
    %419 = arith.addf %417, %418 : vector<8x32xf32>
    %cst_111 = arith.constant dense<0.000000e+00> : vector<8x96xf32>
    %420 = tpu.matmul %386, %10, %cst_111 {dimension_numbers = #tpu.dot_dimension_numbers<[1], [0], [0], [1], [0, 0, 1, 1], [], []>} : vector<8x32xf32>, vector<32x96xf32>, vector<8x96xf32> -> vector<8x96xf32>
    %421 = vector.extract_strided_slice %390 {offsets = [0, 0], sizes = [8, 32], strides = [1, 1]} : vector<8x96xf32> to vector<8x32xf32>
    %422 = vector.extract_strided_slice %420 {offsets = [0, 0], sizes = [8, 32], strides = [1, 1]} : vector<8x96xf32> to vector<8x32xf32>
    %423 = arith.addf %421, %422 : vector<8x32xf32>
    %424 = arith.negf %423 : vector<8x32xf32>
    %425 = math.exp %424 : vector<8x32xf32>
    %cst_112 = arith.constant 1.000000e+00 : f32
    %426 = vector.broadcast %cst_112 : f32 to vector<8x32xf32>
    %427 = arith.addf %426, %425 : vector<8x32xf32>
    %428 = arith.divf %426, %427 : vector<8x32xf32>
    %429 = vector.extract_strided_slice %390 {offsets = [0, 32], sizes = [8, 32], strides = [1, 1]} : vector<8x96xf32> to vector<8x32xf32>
    %430 = vector.extract_strided_slice %420 {offsets = [0, 32], sizes = [8, 32], strides = [1, 1]} : vector<8x96xf32> to vector<8x32xf32>
    %431 = arith.addf %429, %430 : vector<8x32xf32>
    %432 = arith.negf %431 : vector<8x32xf32>
    %433 = math.exp %432 : vector<8x32xf32>
    %cst_113 = arith.constant 1.000000e+00 : f32
    %434 = vector.broadcast %cst_113 : f32 to vector<8x32xf32>
    %435 = arith.addf %434, %433 : vector<8x32xf32>
    %436 = arith.divf %434, %435 : vector<8x32xf32>
    %437 = vector.extract_strided_slice %390 {offsets = [0, 64], sizes = [8, 32], strides = [1, 1]} : vector<8x96xf32> to vector<8x32xf32>
    %438 = vector.extract_strided_slice %420 {offsets = [0, 64], sizes = [8, 32], strides = [1, 1]} : vector<8x96xf32> to vector<8x32xf32>
    %439 = vector.broadcast %14 : vector<1x32xf32> to vector<8x32xf32>
    %440 = arith.addf %438, %439 : vector<8x32xf32>
    %441 = arith.mulf %428, %440 : vector<8x32xf32>
    %442 = arith.addf %437, %441 : vector<8x32xf32>
    %443 = math.tanh %442 : vector<8x32xf32>
    %cst_114 = arith.constant 1.000000e+00 : f32
    %444 = vector.broadcast %cst_114 : f32 to vector<8x32xf32>
    %445 = arith.subf %444, %436 : vector<8x32xf32>
    %446 = arith.mulf %445, %443 : vector<8x32xf32>
    %447 = arith.mulf %436, %386 : vector<8x32xf32>
    %448 = arith.addf %446, %447 : vector<8x32xf32>
    %c48_115 = arith.constant 48 : index
    %c0_116 = arith.constant 0 : index
    %449 = vector.load %arg14[%c48_115, %c0_116] : memref<128x64xf32, #tpu.memory_space<vmem>>, vector<8x32xf32>
    tpu.vector_store %arg14[%c48_115, %c0_116], %419 {strides = array<i32>} : memref<128x64xf32, #tpu.memory_space<vmem>>, vector<8x32xf32>,
    %c72_117 = arith.constant 72 : index
    %c32_118 = arith.constant 32 : index
    %450 = vector.load %arg14[%c72_117, %c32_118] : memref<128x64xf32, #tpu.memory_space<vmem>>, vector<8x32xf32>
    tpu.vector_store %arg14[%c72_117, %c32_118], %448 {strides = array<i32>} : memref<128x64xf32, #tpu.memory_space<vmem>>, vector<8x32xf32>,
    %c56 = arith.constant 56 : index
    %c0_119 = arith.constant 0 : index
    %451 = vector.load %arg15[%c56, %c0_119] : memref<128x192xf32, #tpu.memory_space<vmem>>, vector<8x96xf32>
    %c64 = arith.constant 64 : index
    %c96_120 = arith.constant 96 : index
    %452 = vector.load %arg15[%c64, %c96_120] : memref<128x192xf32, #tpu.memory_space<vmem>>, vector<8x96xf32>
    %cst_121 = arith.constant dense<0.000000e+00> : vector<8x96xf32>
    %453 = tpu.matmul %419, %8, %cst_121 {dimension_numbers = #tpu.dot_dimension_numbers<[1], [0], [0], [1], [0, 0, 1, 1], [], []>} : vector<8x32xf32>, vector<32x96xf32>, vector<8x96xf32> -> vector<8x96xf32>
    %454 = vector.extract_strided_slice %451 {offsets = [0, 0], sizes = [8, 32], strides = [1, 1]} : vector<8x96xf32> to vector<8x32xf32>
    %455 = vector.extract_strided_slice %453 {offsets = [0, 0], sizes = [8, 32], strides = [1, 1]} : vector<8x96xf32> to vector<8x32xf32>
    %456 = arith.addf %454, %455 : vector<8x32xf32>
    %457 = arith.negf %456 : vector<8x32xf32>
    %458 = math.exp %457 : vector<8x32xf32>
    %cst_122 = arith.constant 1.000000e+00 : f32
    %459 = vector.broadcast %cst_122 : f32 to vector<8x32xf32>
    %460 = arith.addf %459, %458 : vector<8x32xf32>
    %461 = arith.divf %459, %460 : vector<8x32xf32>
    %462 = vector.extract_strided_slice %451 {offsets = [0, 32], sizes = [8, 32], strides = [1, 1]} : vector<8x96xf32> to vector<8x32xf32>
    %463 = vector.extract_strided_slice %453 {offsets = [0, 32], sizes = [8, 32], strides = [1, 1]} : vector<8x96xf32> to vector<8x32xf32>
    %464 = arith.addf %462, %463 : vector<8x32xf32>
    %465 = arith.negf %464 : vector<8x32xf32>
    %466 = math.exp %465 : vector<8x32xf32>
    %cst_123 = arith.constant 1.000000e+00 : f32
    %467 = vector.broadcast %cst_123 : f32 to vector<8x32xf32>
    %468 = arith.addf %467, %466 : vector<8x32xf32>
    %469 = arith.divf %467, %468 : vector<8x32xf32>
    %470 = vector.extract_strided_slice %451 {offsets = [0, 64], sizes = [8, 32], strides = [1, 1]} : vector<8x96xf32> to vector<8x32xf32>
    %471 = vector.extract_strided_slice %453 {offsets = [0, 64], sizes = [8, 32], strides = [1, 1]} : vector<8x96xf32> to vector<8x32xf32>
    %472 = vector.broadcast %12 : vector<1x32xf32> to vector<8x32xf32>
    %473 = arith.addf %471, %472 : vector<8x32xf32>
    %474 = arith.mulf %461, %473 : vector<8x32xf32>
    %475 = arith.addf %470, %474 : vector<8x32xf32>
    %476 = math.tanh %475 : vector<8x32xf32>
    %cst_124 = arith.constant 1.000000e+00 : f32
    %477 = vector.broadcast %cst_124 : f32 to vector<8x32xf32>
    %478 = arith.subf %477, %469 : vector<8x32xf32>
    %479 = arith.mulf %478, %476 : vector<8x32xf32>
    %480 = arith.mulf %469, %419 : vector<8x32xf32>
    %481 = arith.addf %479, %480 : vector<8x32xf32>
    %cst_125 = arith.constant dense<0.000000e+00> : vector<8x96xf32>
    %482 = tpu.matmul %448, %10, %cst_125 {dimension_numbers = #tpu.dot_dimension_numbers<[1], [0], [0], [1], [0, 0, 1, 1], [], []>} : vector<8x32xf32>, vector<32x96xf32>, vector<8x96xf32> -> vector<8x96xf32>
    %483 = vector.extract_strided_slice %452 {offsets = [0, 0], sizes = [8, 32], strides = [1, 1]} : vector<8x96xf32> to vector<8x32xf32>
    %484 = vector.extract_strided_slice %482 {offsets = [0, 0], sizes = [8, 32], strides = [1, 1]} : vector<8x96xf32> to vector<8x32xf32>
    %485 = arith.addf %483, %484 : vector<8x32xf32>
    %486 = arith.negf %485 : vector<8x32xf32>
    %487 = math.exp %486 : vector<8x32xf32>
    %cst_126 = arith.constant 1.000000e+00 : f32
    %488 = vector.broadcast %cst_126 : f32 to vector<8x32xf32>
    %489 = arith.addf %488, %487 : vector<8x32xf32>
    %490 = arith.divf %488, %489 : vector<8x32xf32>
    %491 = vector.extract_strided_slice %452 {offsets = [0, 32], sizes = [8, 32], strides = [1, 1]} : vector<8x96xf32> to vector<8x32xf32>
    %492 = vector.extract_strided_slice %482 {offsets = [0, 32], sizes = [8, 32], strides = [1, 1]} : vector<8x96xf32> to vector<8x32xf32>
    %493 = arith.addf %491, %492 : vector<8x32xf32>
    %494 = arith.negf %493 : vector<8x32xf32>
    %495 = math.exp %494 : vector<8x32xf32>
    %cst_127 = arith.constant 1.000000e+00 : f32
    %496 = vector.broadcast %cst_127 : f32 to vector<8x32xf32>
    %497 = arith.addf %496, %495 : vector<8x32xf32>
    %498 = arith.divf %496, %497 : vector<8x32xf32>
    %499 = vector.extract_strided_slice %452 {offsets = [0, 64], sizes = [8, 32], strides = [1, 1]} : vector<8x96xf32> to vector<8x32xf32>
    %500 = vector.extract_strided_slice %482 {offsets = [0, 64], sizes = [8, 32], strides = [1, 1]} : vector<8x96xf32> to vector<8x32xf32>
    %501 = vector.broadcast %14 : vector<1x32xf32> to vector<8x32xf32>
    %502 = arith.addf %500, %501 : vector<8x32xf32>
    %503 = arith.mulf %490, %502 : vector<8x32xf32>
    %504 = arith.addf %499, %503 : vector<8x32xf32>
    %505 = math.tanh %504 : vector<8x32xf32>
    %cst_128 = arith.constant 1.000000e+00 : f32
    %506 = vector.broadcast %cst_128 : f32 to vector<8x32xf32>
    %507 = arith.subf %506, %498 : vector<8x32xf32>
    %508 = arith.mulf %507, %505 : vector<8x32xf32>
    %509 = arith.mulf %498, %448 : vector<8x32xf32>
    %510 = arith.addf %508, %509 : vector<8x32xf32>
    %c56_129 = arith.constant 56 : index
    %c0_130 = arith.constant 0 : index
    %511 = vector.load %arg14[%c56_129, %c0_130] : memref<128x64xf32, #tpu.memory_space<vmem>>, vector<8x32xf32>
    tpu.vector_store %arg14[%c56_129, %c0_130], %481 {strides = array<i32>} : memref<128x64xf32, #tpu.memory_space<vmem>>, vector<8x32xf32>,
    %c64_131 = arith.constant 64 : index
    %c32_132 = arith.constant 32 : index
    %512 = vector.load %arg14[%c64_131, %c32_132] : memref<128x64xf32, #tpu.memory_space<vmem>>, vector<8x32xf32>
    tpu.vector_store %arg14[%c64_131, %c32_132], %510 {strides = array<i32>} : memref<128x64xf32, #tpu.memory_space<vmem>>, vector<8x32xf32>,
    %c64_133 = arith.constant 64 : index
    %c0_134 = arith.constant 0 : index
    %513 = vector.load %arg15[%c64_133, %c0_134] : memref<128x192xf32, #tpu.memory_space<vmem>>, vector<8x96xf32>
    %c56_135 = arith.constant 56 : index
    %c96_136 = arith.constant 96 : index
    %514 = vector.load %arg15[%c56_135, %c96_136] : memref<128x192xf32, #tpu.memory_space<vmem>>, vector<8x96xf32>
    %cst_137 = arith.constant dense<0.000000e+00> : vector<8x96xf32>
    %515 = tpu.matmul %481, %8, %cst_137 {dimension_numbers = #tpu.dot_dimension_numbers<[1], [0], [0], [1], [0, 0, 1, 1], [], []>} : vector<8x32xf32>, vector<32x96xf32>, vector<8x96xf32> -> vector<8x96xf32>
    %516 = vector.extract_strided_slice %513 {offsets = [0, 0], sizes = [8, 32], strides = [1, 1]} : vector<8x96xf32> to vector<8x32xf32>
    %517 = vector.extract_strided_slice %515 {offsets = [0, 0], sizes = [8, 32], strides = [1, 1]} : vector<8x96xf32> to vector<8x32xf32>
    %518 = arith.addf %516, %517 : vector<8x32xf32>
    %519 = arith.negf %518 : vector<8x32xf32>
    %520 = math.exp %519 : vector<8x32xf32>
    %cst_138 = arith.constant 1.000000e+00 : f32
    %521 = vector.broadcast %cst_138 : f32 to vector<8x32xf32>
    %522 = arith.addf %521, %520 : vector<8x32xf32>
    %523 = arith.divf %521, %522 : vector<8x32xf32>
    %524 = vector.extract_strided_slice %513 {offsets = [0, 32], sizes = [8, 32], strides = [1, 1]} : vector<8x96xf32> to vector<8x32xf32>
    %525 = vector.extract_strided_slice %515 {offsets = [0, 32], sizes = [8, 32], strides = [1, 1]} : vector<8x96xf32> to vector<8x32xf32>
    %526 = arith.addf %524, %525 : vector<8x32xf32>
    %527 = arith.negf %526 : vector<8x32xf32>
    %528 = math.exp %527 : vector<8x32xf32>
    %cst_139 = arith.constant 1.000000e+00 : f32
    %529 = vector.broadcast %cst_139 : f32 to vector<8x32xf32>
    %530 = arith.addf %529, %528 : vector<8x32xf32>
    %531 = arith.divf %529, %530 : vector<8x32xf32>
    %532 = vector.extract_strided_slice %513 {offsets = [0, 64], sizes = [8, 32], strides = [1, 1]} : vector<8x96xf32> to vector<8x32xf32>
    %533 = vector.extract_strided_slice %515 {offsets = [0, 64], sizes = [8, 32], strides = [1, 1]} : vector<8x96xf32> to vector<8x32xf32>
    %534 = vector.broadcast %12 : vector<1x32xf32> to vector<8x32xf32>
    %535 = arith.addf %533, %534 : vector<8x32xf32>
    %536 = arith.mulf %523, %535 : vector<8x32xf32>
    %537 = arith.addf %532, %536 : vector<8x32xf32>
    %538 = math.tanh %537 : vector<8x32xf32>
    %cst_140 = arith.constant 1.000000e+00 : f32
    %539 = vector.broadcast %cst_140 : f32 to vector<8x32xf32>
    %540 = arith.subf %539, %531 : vector<8x32xf32>
    %541 = arith.mulf %540, %538 : vector<8x32xf32>
    %542 = arith.mulf %531, %481 : vector<8x32xf32>
    %543 = arith.addf %541, %542 : vector<8x32xf32>
    %cst_141 = arith.constant dense<0.000000e+00> : vector<8x96xf32>
    %544 = tpu.matmul %510, %10, %cst_141 {dimension_numbers = #tpu.dot_dimension_numbers<[1], [0], [0], [1], [0, 0, 1, 1], [], []>} : vector<8x32xf32>, vector<32x96xf32>, vector<8x96xf32> -> vector<8x96xf32>
    %545 = vector.extract_strided_slice %514 {offsets = [0, 0], sizes = [8, 32], strides = [1, 1]} : vector<8x96xf32> to vector<8x32xf32>
    %546 = vector.extract_strided_slice %544 {offsets = [0, 0], sizes = [8, 32], strides = [1, 1]} : vector<8x96xf32> to vector<8x32xf32>
    %547 = arith.addf %545, %546 : vector<8x32xf32>
    %548 = arith.negf %547 : vector<8x32xf32>
    %549 = math.exp %548 : vector<8x32xf32>
    %cst_142 = arith.constant 1.000000e+00 : f32
    %550 = vector.broadcast %cst_142 : f32 to vector<8x32xf32>
    %551 = arith.addf %550, %549 : vector<8x32xf32>
    %552 = arith.divf %550, %551 : vector<8x32xf32>
    %553 = vector.extract_strided_slice %514 {offsets = [0, 32], sizes = [8, 32], strides = [1, 1]} : vector<8x96xf32> to vector<8x32xf32>
    %554 = vector.extract_strided_slice %544 {offsets = [0, 32], sizes = [8, 32], strides = [1, 1]} : vector<8x96xf32> to vector<8x32xf32>
    %555 = arith.addf %553, %554 : vector<8x32xf32>
    %556 = arith.negf %555 : vector<8x32xf32>
    %557 = math.exp %556 : vector<8x32xf32>
    %cst_143 = arith.constant 1.000000e+00 : f32
    %558 = vector.broadcast %cst_143 : f32 to vector<8x32xf32>
    %559 = arith.addf %558, %557 : vector<8x32xf32>
    %560 = arith.divf %558, %559 : vector<8x32xf32>
    %561 = vector.extract_strided_slice %514 {offsets = [0, 64], sizes = [8, 32], strides = [1, 1]} : vector<8x96xf32> to vector<8x32xf32>
    %562 = vector.extract_strided_slice %544 {offsets = [0, 64], sizes = [8, 32], strides = [1, 1]} : vector<8x96xf32> to vector<8x32xf32>
    %563 = vector.broadcast %14 : vector<1x32xf32> to vector<8x32xf32>
    %564 = arith.addf %562, %563 : vector<8x32xf32>
    %565 = arith.mulf %552, %564 : vector<8x32xf32>
    %566 = arith.addf %561, %565 : vector<8x32xf32>
    %567 = math.tanh %566 : vector<8x32xf32>
    %cst_144 = arith.constant 1.000000e+00 : f32
    %568 = vector.broadcast %cst_144 : f32 to vector<8x32xf32>
    %569 = arith.subf %568, %560 : vector<8x32xf32>
    %570 = arith.mulf %569, %567 : vector<8x32xf32>
    %571 = arith.mulf %560, %510 : vector<8x32xf32>
    %572 = arith.addf %570, %571 : vector<8x32xf32>
    %c64_145 = arith.constant 64 : index
    %c0_146 = arith.constant 0 : index
    %573 = vector.load %arg14[%c64_145, %c0_146] : memref<128x64xf32, #tpu.memory_space<vmem>>, vector<8x32xf32>
    tpu.vector_store %arg14[%c64_145, %c0_146], %543 {strides = array<i32>} : memref<128x64xf32, #tpu.memory_space<vmem>>, vector<8x32xf32>,
    %c56_147 = arith.constant 56 : index
    %c32_148 = arith.constant 32 : index
    %574 = vector.load %arg14[%c56_147, %c32_148] : memref<128x64xf32, #tpu.memory_space<vmem>>, vector<8x32xf32>
    tpu.vector_store %arg14[%c56_147, %c32_148], %572 {strides = array<i32>} : memref<128x64xf32, #tpu.memory_space<vmem>>, vector<8x32xf32>,
    %c72_149 = arith.constant 72 : index
    %c0_150 = arith.constant 0 : index
    %575 = vector.load %arg15[%c72_149, %c0_150] : memref<128x192xf32, #tpu.memory_space<vmem>>, vector<8x96xf32>
    %c48_151 = arith.constant 48 : index
    %c96_152 = arith.constant 96 : index
    %576 = vector.load %arg15[%c48_151, %c96_152] : memref<128x192xf32, #tpu.memory_space<vmem>>, vector<8x96xf32>
    %cst_153 = arith.constant dense<0.000000e+00> : vector<8x96xf32>
    %577 = tpu.matmul %543, %8, %cst_153 {dimension_numbers = #tpu.dot_dimension_numbers<[1], [0], [0], [1], [0, 0, 1, 1], [], []>} : vector<8x32xf32>, vector<32x96xf32>, vector<8x96xf32> -> vector<8x96xf32>
    %578 = vector.extract_strided_slice %575 {offsets = [0, 0], sizes = [8, 32], strides = [1, 1]} : vector<8x96xf32> to vector<8x32xf32>
    %579 = vector.extract_strided_slice %577 {offsets = [0, 0], sizes = [8, 32], strides = [1, 1]} : vector<8x96xf32> to vector<8x32xf32>
    %580 = arith.addf %578, %579 : vector<8x32xf32>
    %581 = arith.negf %580 : vector<8x32xf32>
    %582 = math.exp %581 : vector<8x32xf32>
    %cst_154 = arith.constant 1.000000e+00 : f32
    %583 = vector.broadcast %cst_154 : f32 to vector<8x32xf32>
    %584 = arith.addf %583, %582 : vector<8x32xf32>
    %585 = arith.divf %583, %584 : vector<8x32xf32>
    %586 = vector.extract_strided_slice %575 {offsets = [0, 32], sizes = [8, 32], strides = [1, 1]} : vector<8x96xf32> to vector<8x32xf32>
    %587 = vector.extract_strided_slice %577 {offsets = [0, 32], sizes = [8, 32], strides = [1, 1]} : vector<8x96xf32> to vector<8x32xf32>
    %588 = arith.addf %586, %587 : vector<8x32xf32>
    %589 = arith.negf %588 : vector<8x32xf32>
    %590 = math.exp %589 : vector<8x32xf32>
    %cst_155 = arith.constant 1.000000e+00 : f32
    %591 = vector.broadcast %cst_155 : f32 to vector<8x32xf32>
    %592 = arith.addf %591, %590 : vector<8x32xf32>
    %593 = arith.divf %591, %592 : vector<8x32xf32>
    %594 = vector.extract_strided_slice %575 {offsets = [0, 64], sizes = [8, 32], strides = [1, 1]} : vector<8x96xf32> to vector<8x32xf32>
    %595 = vector.extract_strided_slice %577 {offsets = [0, 64], sizes = [8, 32], strides = [1, 1]} : vector<8x96xf32> to vector<8x32xf32>
    %596 = vector.broadcast %12 : vector<1x32xf32> to vector<8x32xf32>
    %597 = arith.addf %595, %596 : vector<8x32xf32>
    %598 = arith.mulf %585, %597 : vector<8x32xf32>
    %599 = arith.addf %594, %598 : vector<8x32xf32>
    %600 = math.tanh %599 : vector<8x32xf32>
    %cst_156 = arith.constant 1.000000e+00 : f32
    %601 = vector.broadcast %cst_156 : f32 to vector<8x32xf32>
    %602 = arith.subf %601, %593 : vector<8x32xf32>
    %603 = arith.mulf %602, %600 : vector<8x32xf32>
    %604 = arith.mulf %593, %543 : vector<8x32xf32>
    %605 = arith.addf %603, %604 : vector<8x32xf32>
    %cst_157 = arith.constant dense<0.000000e+00> : vector<8x96xf32>
    %606 = tpu.matmul %572, %10, %cst_157 {dimension_numbers = #tpu.dot_dimension_numbers<[1], [0], [0], [1], [0, 0, 1, 1], [], []>} : vector<8x32xf32>, vector<32x96xf32>, vector<8x96xf32> -> vector<8x96xf32>
    %607 = vector.extract_strided_slice %576 {offsets = [0, 0], sizes = [8, 32], strides = [1, 1]} : vector<8x96xf32> to vector<8x32xf32>
    %608 = vector.extract_strided_slice %606 {offsets = [0, 0], sizes = [8, 32], strides = [1, 1]} : vector<8x96xf32> to vector<8x32xf32>
    %609 = arith.addf %607, %608 : vector<8x32xf32>
    %610 = arith.negf %609 : vector<8x32xf32>
    %611 = math.exp %610 : vector<8x32xf32>
    %cst_158 = arith.constant 1.000000e+00 : f32
    %612 = vector.broadcast %cst_158 : f32 to vector<8x32xf32>
    %613 = arith.addf %612, %611 : vector<8x32xf32>
    %614 = arith.divf %612, %613 : vector<8x32xf32>
    %615 = vector.extract_strided_slice %576 {offsets = [0, 32], sizes = [8, 32], strides = [1, 1]} : vector<8x96xf32> to vector<8x32xf32>
    %616 = vector.extract_strided_slice %606 {offsets = [0, 32], sizes = [8, 32], strides = [1, 1]} : vector<8x96xf32> to vector<8x32xf32>
    %617 = arith.addf %615, %616 : vector<8x32xf32>
    %618 = arith.negf %617 : vector<8x32xf32>
    %619 = math.exp %618 : vector<8x32xf32>
    %cst_159 = arith.constant 1.000000e+00 : f32
    %620 = vector.broadcast %cst_159 : f32 to vector<8x32xf32>
    %621 = arith.addf %620, %619 : vector<8x32xf32>
    %622 = arith.divf %620, %621 : vector<8x32xf32>
    %623 = vector.extract_strided_slice %576 {offsets = [0, 64], sizes = [8, 32], strides = [1, 1]} : vector<8x96xf32> to vector<8x32xf32>
    %624 = vector.extract_strided_slice %606 {offsets = [0, 64], sizes = [8, 32], strides = [1, 1]} : vector<8x96xf32> to vector<8x32xf32>
    %625 = vector.broadcast %14 : vector<1x32xf32> to vector<8x32xf32>
    %626 = arith.addf %624, %625 : vector<8x32xf32>
    %627 = arith.mulf %614, %626 : vector<8x32xf32>
    %628 = arith.addf %623, %627 : vector<8x32xf32>
    %629 = math.tanh %628 : vector<8x32xf32>
    %cst_160 = arith.constant 1.000000e+00 : f32
    %630 = vector.broadcast %cst_160 : f32 to vector<8x32xf32>
    %631 = arith.subf %630, %622 : vector<8x32xf32>
    %632 = arith.mulf %631, %629 : vector<8x32xf32>
    %633 = arith.mulf %622, %572 : vector<8x32xf32>
    %634 = arith.addf %632, %633 : vector<8x32xf32>
    %c72_161 = arith.constant 72 : index
    %c0_162 = arith.constant 0 : index
    %635 = vector.load %arg14[%c72_161, %c0_162] : memref<128x64xf32, #tpu.memory_space<vmem>>, vector<8x32xf32>
    tpu.vector_store %arg14[%c72_161, %c0_162], %605 {strides = array<i32>} : memref<128x64xf32, #tpu.memory_space<vmem>>, vector<8x32xf32>,
    %c48_163 = arith.constant 48 : index
    %c32_164 = arith.constant 32 : index
    %636 = vector.load %arg14[%c48_163, %c32_164] : memref<128x64xf32, #tpu.memory_space<vmem>>, vector<8x32xf32>
    tpu.vector_store %arg14[%c48_163, %c32_164], %634 {strides = array<i32>} : memref<128x64xf32, #tpu.memory_space<vmem>>, vector<8x32xf32>,
    %c80_165 = arith.constant 80 : index
    %c0_166 = arith.constant 0 : index
    %637 = vector.load %arg15[%c80_165, %c0_166] : memref<128x192xf32, #tpu.memory_space<vmem>>, vector<8x96xf32>
    %c40_167 = arith.constant 40 : index
    %c96_168 = arith.constant 96 : index
    %638 = vector.load %arg15[%c40_167, %c96_168] : memref<128x192xf32, #tpu.memory_space<vmem>>, vector<8x96xf32>
    %cst_169 = arith.constant dense<0.000000e+00> : vector<8x96xf32>
    %639 = tpu.matmul %605, %8, %cst_169 {dimension_numbers = #tpu.dot_dimension_numbers<[1], [0], [0], [1], [0, 0, 1, 1], [], []>} : vector<8x32xf32>, vector<32x96xf32>, vector<8x96xf32> -> vector<8x96xf32>
    %640 = vector.extract_strided_slice %637 {offsets = [0, 0], sizes = [8, 32], strides = [1, 1]} : vector<8x96xf32> to vector<8x32xf32>
    %641 = vector.extract_strided_slice %639 {offsets = [0, 0], sizes = [8, 32], strides = [1, 1]} : vector<8x96xf32> to vector<8x32xf32>
    %642 = arith.addf %640, %641 : vector<8x32xf32>
    %643 = arith.negf %642 : vector<8x32xf32>
    %644 = math.exp %643 : vector<8x32xf32>
    %cst_170 = arith.constant 1.000000e+00 : f32
    %645 = vector.broadcast %cst_170 : f32 to vector<8x32xf32>
    %646 = arith.addf %645, %644 : vector<8x32xf32>
    %647 = arith.divf %645, %646 : vector<8x32xf32>
    %648 = vector.extract_strided_slice %637 {offsets = [0, 32], sizes = [8, 32], strides = [1, 1]} : vector<8x96xf32> to vector<8x32xf32>
    %649 = vector.extract_strided_slice %639 {offsets = [0, 32], sizes = [8, 32], strides = [1, 1]} : vector<8x96xf32> to vector<8x32xf32>
    %650 = arith.addf %648, %649 : vector<8x32xf32>
    %651 = arith.negf %650 : vector<8x32xf32>
    %652 = math.exp %651 : vector<8x32xf32>
    %cst_171 = arith.constant 1.000000e+00 : f32
    %653 = vector.broadcast %cst_171 : f32 to vector<8x32xf32>
    %654 = arith.addf %653, %652 : vector<8x32xf32>
    %655 = arith.divf %653, %654 : vector<8x32xf32>
    %656 = vector.extract_strided_slice %637 {offsets = [0, 64], sizes = [8, 32], strides = [1, 1]} : vector<8x96xf32> to vector<8x32xf32>
    %657 = vector.extract_strided_slice %639 {offsets = [0, 64], sizes = [8, 32], strides = [1, 1]} : vector<8x96xf32> to vector<8x32xf32>
    %658 = vector.broadcast %12 : vector<1x32xf32> to vector<8x32xf32>
    %659 = arith.addf %657, %658 : vector<8x32xf32>
    %660 = arith.mulf %647, %659 : vector<8x32xf32>
    %661 = arith.addf %656, %660 : vector<8x32xf32>
    %662 = math.tanh %661 : vector<8x32xf32>
    %cst_172 = arith.constant 1.000000e+00 : f32
    %663 = vector.broadcast %cst_172 : f32 to vector<8x32xf32>
    %664 = arith.subf %663, %655 : vector<8x32xf32>
    %665 = arith.mulf %664, %662 : vector<8x32xf32>
    %666 = arith.mulf %655, %605 : vector<8x32xf32>
    %667 = arith.addf %665, %666 : vector<8x32xf32>
    %cst_173 = arith.constant dense<0.000000e+00> : vector<8x96xf32>
    %668 = tpu.matmul %634, %10, %cst_173 {dimension_numbers = #tpu.dot_dimension_numbers<[1], [0], [0], [1], [0, 0, 1, 1], [], []>} : vector<8x32xf32>, vector<32x96xf32>, vector<8x96xf32> -> vector<8x96xf32>
    %669 = vector.extract_strided_slice %638 {offsets = [0, 0], sizes = [8, 32], strides = [1, 1]} : vector<8x96xf32> to vector<8x32xf32>
    %670 = vector.extract_strided_slice %668 {offsets = [0, 0], sizes = [8, 32], strides = [1, 1]} : vector<8x96xf32> to vector<8x32xf32>
    %671 = arith.addf %669, %670 : vector<8x32xf32>
    %672 = arith.negf %671 : vector<8x32xf32>
    %673 = math.exp %672 : vector<8x32xf32>
    %cst_174 = arith.constant 1.000000e+00 : f32
    %674 = vector.broadcast %cst_174 : f32 to vector<8x32xf32>
    %675 = arith.addf %674, %673 : vector<8x32xf32>
    %676 = arith.divf %674, %675 : vector<8x32xf32>
    %677 = vector.extract_strided_slice %638 {offsets = [0, 32], sizes = [8, 32], strides = [1, 1]} : vector<8x96xf32> to vector<8x32xf32>
    %678 = vector.extract_strided_slice %668 {offsets = [0, 32], sizes = [8, 32], strides = [1, 1]} : vector<8x96xf32> to vector<8x32xf32>
    %679 = arith.addf %677, %678 : vector<8x32xf32>
    %680 = arith.negf %679 : vector<8x32xf32>
    %681 = math.exp %680 : vector<8x32xf32>
    %cst_175 = arith.constant 1.000000e+00 : f32
    %682 = vector.broadcast %cst_175 : f32 to vector<8x32xf32>
    %683 = arith.addf %682, %681 : vector<8x32xf32>
    %684 = arith.divf %682, %683 : vector<8x32xf32>
    %685 = vector.extract_strided_slice %638 {offsets = [0, 64], sizes = [8, 32], strides = [1, 1]} : vector<8x96xf32> to vector<8x32xf32>
    %686 = vector.extract_strided_slice %668 {offsets = [0, 64], sizes = [8, 32], strides = [1, 1]} : vector<8x96xf32> to vector<8x32xf32>
    %687 = vector.broadcast %14 : vector<1x32xf32> to vector<8x32xf32>
    %688 = arith.addf %686, %687 : vector<8x32xf32>
    %689 = arith.mulf %676, %688 : vector<8x32xf32>
    %690 = arith.addf %685, %689 : vector<8x32xf32>
    %691 = math.tanh %690 : vector<8x32xf32>
    %cst_176 = arith.constant 1.000000e+00 : f32
    %692 = vector.broadcast %cst_176 : f32 to vector<8x32xf32>
    %693 = arith.subf %692, %684 : vector<8x32xf32>
    %694 = arith.mulf %693, %691 : vector<8x32xf32>
    %695 = arith.mulf %684, %634 : vector<8x32xf32>
    %696 = arith.addf %694, %695 : vector<8x32xf32>
    %c80_177 = arith.constant 80 : index
    %c0_178 = arith.constant 0 : index
    %697 = vector.load %arg14[%c80_177, %c0_178] : memref<128x64xf32, #tpu.memory_space<vmem>>, vector<8x32xf32>
    tpu.vector_store %arg14[%c80_177, %c0_178], %667 {strides = array<i32>} : memref<128x64xf32, #tpu.memory_space<vmem>>, vector<8x32xf32>,
    %c40_179 = arith.constant 40 : index
    %c32_180 = arith.constant 32 : index
    %698 = vector.load %arg14[%c40_179, %c32_180] : memref<128x64xf32, #tpu.memory_space<vmem>>, vector<8x32xf32>
    tpu.vector_store %arg14[%c40_179, %c32_180], %696 {strides = array<i32>} : memref<128x64xf32, #tpu.memory_space<vmem>>, vector<8x32xf32>,
    %c88_181 = arith.constant 88 : index
    %c0_182 = arith.constant 0 : index
    %699 = vector.load %arg15[%c88_181, %c0_182] : memref<128x192xf32, #tpu.memory_space<vmem>>, vector<8x96xf32>
    %c32_183 = arith.constant 32 : index
    %c96_184 = arith.constant 96 : index
    %700 = vector.load %arg15[%c32_183, %c96_184] : memref<128x192xf32, #tpu.memory_space<vmem>>, vector<8x96xf32>
    %cst_185 = arith.constant dense<0.000000e+00> : vector<8x96xf32>
    %701 = tpu.matmul %667, %8, %cst_185 {dimension_numbers = #tpu.dot_dimension_numbers<[1], [0], [0], [1], [0, 0, 1, 1], [], []>} : vector<8x32xf32>, vector<32x96xf32>, vector<8x96xf32> -> vector<8x96xf32>
    %702 = vector.extract_strided_slice %699 {offsets = [0, 0], sizes = [8, 32], strides = [1, 1]} : vector<8x96xf32> to vector<8x32xf32>
    %703 = vector.extract_strided_slice %701 {offsets = [0, 0], sizes = [8, 32], strides = [1, 1]} : vector<8x96xf32> to vector<8x32xf32>
    %704 = arith.addf %702, %703 : vector<8x32xf32>
    %705 = arith.negf %704 : vector<8x32xf32>
    %706 = math.exp %705 : vector<8x32xf32>
    %cst_186 = arith.constant 1.000000e+00 : f32
    %707 = vector.broadcast %cst_186 : f32 to vector<8x32xf32>
    %708 = arith.addf %707, %706 : vector<8x32xf32>
    %709 = arith.divf %707, %708 : vector<8x32xf32>
    %710 = vector.extract_strided_slice %699 {offsets = [0, 32], sizes = [8, 32], strides = [1, 1]} : vector<8x96xf32> to vector<8x32xf32>
    %711 = vector.extract_strided_slice %701 {offsets = [0, 32], sizes = [8, 32], strides = [1, 1]} : vector<8x96xf32> to vector<8x32xf32>
    %712 = arith.addf %710, %711 : vector<8x32xf32>
    %713 = arith.negf %712 : vector<8x32xf32>
    %714 = math.exp %713 : vector<8x32xf32>
    %cst_187 = arith.constant 1.000000e+00 : f32
    %715 = vector.broadcast %cst_187 : f32 to vector<8x32xf32>
    %716 = arith.addf %715, %714 : vector<8x32xf32>
    %717 = arith.divf %715, %716 : vector<8x32xf32>
    %718 = vector.extract_strided_slice %699 {offsets = [0, 64], sizes = [8, 32], strides = [1, 1]} : vector<8x96xf32> to vector<8x32xf32>
    %719 = vector.extract_strided_slice %701 {offsets = [0, 64], sizes = [8, 32], strides = [1, 1]} : vector<8x96xf32> to vector<8x32xf32>
    %720 = vector.broadcast %12 : vector<1x32xf32> to vector<8x32xf32>
    %721 = arith.addf %719, %720 : vector<8x32xf32>
    %722 = arith.mulf %709, %721 : vector<8x32xf32>
    %723 = arith.addf %718, %722 : vector<8x32xf32>
    %724 = math.tanh %723 : vector<8x32xf32>
    %cst_188 = arith.constant 1.000000e+00 : f32
    %725 = vector.broadcast %cst_188 : f32 to vector<8x32xf32>
    %726 = arith.subf %725, %717 : vector<8x32xf32>
    %727 = arith.mulf %726, %724 : vector<8x32xf32>
    %728 = arith.mulf %717, %667 : vector<8x32xf32>
    %729 = arith.addf %727, %728 : vector<8x32xf32>
    %cst_189 = arith.constant dense<0.000000e+00> : vector<8x96xf32>
    %730 = tpu.matmul %696, %10, %cst_189 {dimension_numbers = #tpu.dot_dimension_numbers<[1], [0], [0], [1], [0, 0, 1, 1], [], []>} : vector<8x32xf32>, vector<32x96xf32>, vector<8x96xf32> -> vector<8x96xf32>
    %731 = vector.extract_strided_slice %700 {offsets = [0, 0], sizes = [8, 32], strides = [1, 1]} : vector<8x96xf32> to vector<8x32xf32>
    %732 = vector.extract_strided_slice %730 {offsets = [0, 0], sizes = [8, 32], strides = [1, 1]} : vector<8x96xf32> to vector<8x32xf32>
    %733 = arith.addf %731, %732 : vector<8x32xf32>
    %734 = arith.negf %733 : vector<8x32xf32>
    %735 = math.exp %734 : vector<8x32xf32>
    %cst_190 = arith.constant 1.000000e+00 : f32
    %736 = vector.broadcast %cst_190 : f32 to vector<8x32xf32>
    %737 = arith.addf %736, %735 : vector<8x32xf32>
    %738 = arith.divf %736, %737 : vector<8x32xf32>
    %739 = vector.extract_strided_slice %700 {offsets = [0, 32], sizes = [8, 32], strides = [1, 1]} : vector<8x96xf32> to vector<8x32xf32>
    %740 = vector.extract_strided_slice %730 {offsets = [0, 32], sizes = [8, 32], strides = [1, 1]} : vector<8x96xf32> to vector<8x32xf32>
    %741 = arith.addf %739, %740 : vector<8x32xf32>
    %742 = arith.negf %741 : vector<8x32xf32>
    %743 = math.exp %742 : vector<8x32xf32>
    %cst_191 = arith.constant 1.000000e+00 : f32
    %744 = vector.broadcast %cst_191 : f32 to vector<8x32xf32>
    %745 = arith.addf %744, %743 : vector<8x32xf32>
    %746 = arith.divf %744, %745 : vector<8x32xf32>
    %747 = vector.extract_strided_slice %700 {offsets = [0, 64], sizes = [8, 32], strides = [1, 1]} : vector<8x96xf32> to vector<8x32xf32>
    %748 = vector.extract_strided_slice %730 {offsets = [0, 64], sizes = [8, 32], strides = [1, 1]} : vector<8x96xf32> to vector<8x32xf32>
    %749 = vector.broadcast %14 : vector<1x32xf32> to vector<8x32xf32>
    %750 = arith.addf %748, %749 : vector<8x32xf32>
    %751 = arith.mulf %738, %750 : vector<8x32xf32>
    %752 = arith.addf %747, %751 : vector<8x32xf32>
    %753 = math.tanh %752 : vector<8x32xf32>
    %cst_192 = arith.constant 1.000000e+00 : f32
    %754 = vector.broadcast %cst_192 : f32 to vector<8x32xf32>
    %755 = arith.subf %754, %746 : vector<8x32xf32>
    %756 = arith.mulf %755, %753 : vector<8x32xf32>
    %757 = arith.mulf %746, %696 : vector<8x32xf32>
    %758 = arith.addf %756, %757 : vector<8x32xf32>
    %c88_193 = arith.constant 88 : index
    %c0_194 = arith.constant 0 : index
    %759 = vector.load %arg14[%c88_193, %c0_194] : memref<128x64xf32, #tpu.memory_space<vmem>>, vector<8x32xf32>
    tpu.vector_store %arg14[%c88_193, %c0_194], %729 {strides = array<i32>} : memref<128x64xf32, #tpu.memory_space<vmem>>, vector<8x32xf32>,
    %c32_195 = arith.constant 32 : index
    %c32_196 = arith.constant 32 : index
    %760 = vector.load %arg14[%c32_195, %c32_196] : memref<128x64xf32, #tpu.memory_space<vmem>>, vector<8x32xf32>
    tpu.vector_store %arg14[%c32_195, %c32_196], %758 {strides = array<i32>} : memref<128x64xf32, #tpu.memory_space<vmem>>, vector<8x32xf32>,
    %c96_197 = arith.constant 96 : index
    %c0_198 = arith.constant 0 : index
    %761 = vector.load %arg15[%c96_197, %c0_198] : memref<128x192xf32, #tpu.memory_space<vmem>>, vector<8x96xf32>
    %c24_199 = arith.constant 24 : index
    %c96_200 = arith.constant 96 : index
    %762 = vector.load %arg15[%c24_199, %c96_200] : memref<128x192xf32, #tpu.memory_space<vmem>>, vector<8x96xf32>
    %cst_201 = arith.constant dense<0.000000e+00> : vector<8x96xf32>
    %763 = tpu.matmul %729, %8, %cst_201 {dimension_numbers = #tpu.dot_dimension_numbers<[1], [0], [0], [1], [0, 0, 1, 1], [], []>} : vector<8x32xf32>, vector<32x96xf32>, vector<8x96xf32> -> vector<8x96xf32>
    %764 = vector.extract_strided_slice %761 {offsets = [0, 0], sizes = [8, 32], strides = [1, 1]} : vector<8x96xf32> to vector<8x32xf32>
    %765 = vector.extract_strided_slice %763 {offsets = [0, 0], sizes = [8, 32], strides = [1, 1]} : vector<8x96xf32> to vector<8x32xf32>
    %766 = arith.addf %764, %765 : vector<8x32xf32>
    %767 = arith.negf %766 : vector<8x32xf32>
    %768 = math.exp %767 : vector<8x32xf32>
    %cst_202 = arith.constant 1.000000e+00 : f32
    %769 = vector.broadcast %cst_202 : f32 to vector<8x32xf32>
    %770 = arith.addf %769, %768 : vector<8x32xf32>
    %771 = arith.divf %769, %770 : vector<8x32xf32>
    %772 = vector.extract_strided_slice %761 {offsets = [0, 32], sizes = [8, 32], strides = [1, 1]} : vector<8x96xf32> to vector<8x32xf32>
    %773 = vector.extract_strided_slice %763 {offsets = [0, 32], sizes = [8, 32], strides = [1, 1]} : vector<8x96xf32> to vector<8x32xf32>
    %774 = arith.addf %772, %773 : vector<8x32xf32>
    %775 = arith.negf %774 : vector<8x32xf32>
    %776 = math.exp %775 : vector<8x32xf32>
    %cst_203 = arith.constant 1.000000e+00 : f32
    %777 = vector.broadcast %cst_203 : f32 to vector<8x32xf32>
    %778 = arith.addf %777, %776 : vector<8x32xf32>
    %779 = arith.divf %777, %778 : vector<8x32xf32>
    %780 = vector.extract_strided_slice %761 {offsets = [0, 64], sizes = [8, 32], strides = [1, 1]} : vector<8x96xf32> to vector<8x32xf32>
    %781 = vector.extract_strided_slice %763 {offsets = [0, 64], sizes = [8, 32], strides = [1, 1]} : vector<8x96xf32> to vector<8x32xf32>
    %782 = vector.broadcast %12 : vector<1x32xf32> to vector<8x32xf32>
    %783 = arith.addf %781, %782 : vector<8x32xf32>
    %784 = arith.mulf %771, %783 : vector<8x32xf32>
    %785 = arith.addf %780, %784 : vector<8x32xf32>
    %786 = math.tanh %785 : vector<8x32xf32>
    %cst_204 = arith.constant 1.000000e+00 : f32
    %787 = vector.broadcast %cst_204 : f32 to vector<8x32xf32>
    %788 = arith.subf %787, %779 : vector<8x32xf32>
    %789 = arith.mulf %788, %786 : vector<8x32xf32>
    %790 = arith.mulf %779, %729 : vector<8x32xf32>
    %791 = arith.addf %789, %790 : vector<8x32xf32>
    %cst_205 = arith.constant dense<0.000000e+00> : vector<8x96xf32>
    %792 = tpu.matmul %758, %10, %cst_205 {dimension_numbers = #tpu.dot_dimension_numbers<[1], [0], [0], [1], [0, 0, 1, 1], [], []>} : vector<8x32xf32>, vector<32x96xf32>, vector<8x96xf32> -> vector<8x96xf32>
    %793 = vector.extract_strided_slice %762 {offsets = [0, 0], sizes = [8, 32], strides = [1, 1]} : vector<8x96xf32> to vector<8x32xf32>
    %794 = vector.extract_strided_slice %792 {offsets = [0, 0], sizes = [8, 32], strides = [1, 1]} : vector<8x96xf32> to vector<8x32xf32>
    %795 = arith.addf %793, %794 : vector<8x32xf32>
    %796 = arith.negf %795 : vector<8x32xf32>
    %797 = math.exp %796 : vector<8x32xf32>
    %cst_206 = arith.constant 1.000000e+00 : f32
    %798 = vector.broadcast %cst_206 : f32 to vector<8x32xf32>
    %799 = arith.addf %798, %797 : vector<8x32xf32>
    %800 = arith.divf %798, %799 : vector<8x32xf32>
    %801 = vector.extract_strided_slice %762 {offsets = [0, 32], sizes = [8, 32], strides = [1, 1]} : vector<8x96xf32> to vector<8x32xf32>
    %802 = vector.extract_strided_slice %792 {offsets = [0, 32], sizes = [8, 32], strides = [1, 1]} : vector<8x96xf32> to vector<8x32xf32>
    %803 = arith.addf %801, %802 : vector<8x32xf32>
    %804 = arith.negf %803 : vector<8x32xf32>
    %805 = math.exp %804 : vector<8x32xf32>
    %cst_207 = arith.constant 1.000000e+00 : f32
    %806 = vector.broadcast %cst_207 : f32 to vector<8x32xf32>
    %807 = arith.addf %806, %805 : vector<8x32xf32>
    %808 = arith.divf %806, %807 : vector<8x32xf32>
    %809 = vector.extract_strided_slice %762 {offsets = [0, 64], sizes = [8, 32], strides = [1, 1]} : vector<8x96xf32> to vector<8x32xf32>
    %810 = vector.extract_strided_slice %792 {offsets = [0, 64], sizes = [8, 32], strides = [1, 1]} : vector<8x96xf32> to vector<8x32xf32>
    %811 = vector.broadcast %14 : vector<1x32xf32> to vector<8x32xf32>
    %812 = arith.addf %810, %811 : vector<8x32xf32>
    %813 = arith.mulf %800, %812 : vector<8x32xf32>
    %814 = arith.addf %809, %813 : vector<8x32xf32>
    %815 = math.tanh %814 : vector<8x32xf32>
    %cst_208 = arith.constant 1.000000e+00 : f32
    %816 = vector.broadcast %cst_208 : f32 to vector<8x32xf32>
    %817 = arith.subf %816, %808 : vector<8x32xf32>
    %818 = arith.mulf %817, %815 : vector<8x32xf32>
    %819 = arith.mulf %808, %758 : vector<8x32xf32>
    %820 = arith.addf %818, %819 : vector<8x32xf32>
    %c96_209 = arith.constant 96 : index
    %c0_210 = arith.constant 0 : index
    %821 = vector.load %arg14[%c96_209, %c0_210] : memref<128x64xf32, #tpu.memory_space<vmem>>, vector<8x32xf32>
    tpu.vector_store %arg14[%c96_209, %c0_210], %791 {strides = array<i32>} : memref<128x64xf32, #tpu.memory_space<vmem>>, vector<8x32xf32>,
    %c24_211 = arith.constant 24 : index
    %c32_212 = arith.constant 32 : index
    %822 = vector.load %arg14[%c24_211, %c32_212] : memref<128x64xf32, #tpu.memory_space<vmem>>, vector<8x32xf32>
    tpu.vector_store %arg14[%c24_211, %c32_212], %820 {strides = array<i32>} : memref<128x64xf32, #tpu.memory_space<vmem>>, vector<8x32xf32>,
    %c104_213 = arith.constant 104 : index
    %c0_214 = arith.constant 0 : index
    %823 = vector.load %arg15[%c104_213, %c0_214] : memref<128x192xf32, #tpu.memory_space<vmem>>, vector<8x96xf32>
    %c16_215 = arith.constant 16 : index
    %c96_216 = arith.constant 96 : index
    %824 = vector.load %arg15[%c16_215, %c96_216] : memref<128x192xf32, #tpu.memory_space<vmem>>, vector<8x96xf32>
    %cst_217 = arith.constant dense<0.000000e+00> : vector<8x96xf32>
    %825 = tpu.matmul %791, %8, %cst_217 {dimension_numbers = #tpu.dot_dimension_numbers<[1], [0], [0], [1], [0, 0, 1, 1], [], []>} : vector<8x32xf32>, vector<32x96xf32>, vector<8x96xf32> -> vector<8x96xf32>
    %826 = vector.extract_strided_slice %823 {offsets = [0, 0], sizes = [8, 32], strides = [1, 1]} : vector<8x96xf32> to vector<8x32xf32>
    %827 = vector.extract_strided_slice %825 {offsets = [0, 0], sizes = [8, 32], strides = [1, 1]} : vector<8x96xf32> to vector<8x32xf32>
    %828 = arith.addf %826, %827 : vector<8x32xf32>
    %829 = arith.negf %828 : vector<8x32xf32>
    %830 = math.exp %829 : vector<8x32xf32>
    %cst_218 = arith.constant 1.000000e+00 : f32
    %831 = vector.broadcast %cst_218 : f32 to vector<8x32xf32>
    %832 = arith.addf %831, %830 : vector<8x32xf32>
    %833 = arith.divf %831, %832 : vector<8x32xf32>
    %834 = vector.extract_strided_slice %823 {offsets = [0, 32], sizes = [8, 32], strides = [1, 1]} : vector<8x96xf32> to vector<8x32xf32>
    %835 = vector.extract_strided_slice %825 {offsets = [0, 32], sizes = [8, 32], strides = [1, 1]} : vector<8x96xf32> to vector<8x32xf32>
    %836 = arith.addf %834, %835 : vector<8x32xf32>
    %837 = arith.negf %836 : vector<8x32xf32>
    %838 = math.exp %837 : vector<8x32xf32>
    %cst_219 = arith.constant 1.000000e+00 : f32
    %839 = vector.broadcast %cst_219 : f32 to vector<8x32xf32>
    %840 = arith.addf %839, %838 : vector<8x32xf32>
    %841 = arith.divf %839, %840 : vector<8x32xf32>
    %842 = vector.extract_strided_slice %823 {offsets = [0, 64], sizes = [8, 32], strides = [1, 1]} : vector<8x96xf32> to vector<8x32xf32>
    %843 = vector.extract_strided_slice %825 {offsets = [0, 64], sizes = [8, 32], strides = [1, 1]} : vector<8x96xf32> to vector<8x32xf32>
    %844 = vector.broadcast %12 : vector<1x32xf32> to vector<8x32xf32>
    %845 = arith.addf %843, %844 : vector<8x32xf32>
    %846 = arith.mulf %833, %845 : vector<8x32xf32>
    %847 = arith.addf %842, %846 : vector<8x32xf32>
    %848 = math.tanh %847 : vector<8x32xf32>
    %cst_220 = arith.constant 1.000000e+00 : f32
    %849 = vector.broadcast %cst_220 : f32 to vector<8x32xf32>
    %850 = arith.subf %849, %841 : vector<8x32xf32>
    %851 = arith.mulf %850, %848 : vector<8x32xf32>
    %852 = arith.mulf %841, %791 : vector<8x32xf32>
    %853 = arith.addf %851, %852 : vector<8x32xf32>
    %cst_221 = arith.constant dense<0.000000e+00> : vector<8x96xf32>
    %854 = tpu.matmul %820, %10, %cst_221 {dimension_numbers = #tpu.dot_dimension_numbers<[1], [0], [0], [1], [0, 0, 1, 1], [], []>} : vector<8x32xf32>, vector<32x96xf32>, vector<8x96xf32> -> vector<8x96xf32>
    %855 = vector.extract_strided_slice %824 {offsets = [0, 0], sizes = [8, 32], strides = [1, 1]} : vector<8x96xf32> to vector<8x32xf32>
    %856 = vector.extract_strided_slice %854 {offsets = [0, 0], sizes = [8, 32], strides = [1, 1]} : vector<8x96xf32> to vector<8x32xf32>
    %857 = arith.addf %855, %856 : vector<8x32xf32>
    %858 = arith.negf %857 : vector<8x32xf32>
    %859 = math.exp %858 : vector<8x32xf32>
    %cst_222 = arith.constant 1.000000e+00 : f32
    %860 = vector.broadcast %cst_222 : f32 to vector<8x32xf32>
    %861 = arith.addf %860, %859 : vector<8x32xf32>
    %862 = arith.divf %860, %861 : vector<8x32xf32>
    %863 = vector.extract_strided_slice %824 {offsets = [0, 32], sizes = [8, 32], strides = [1, 1]} : vector<8x96xf32> to vector<8x32xf32>
    %864 = vector.extract_strided_slice %854 {offsets = [0, 32], sizes = [8, 32], strides = [1, 1]} : vector<8x96xf32> to vector<8x32xf32>
    %865 = arith.addf %863, %864 : vector<8x32xf32>
    %866 = arith.negf %865 : vector<8x32xf32>
    %867 = math.exp %866 : vector<8x32xf32>
    %cst_223 = arith.constant 1.000000e+00 : f32
    %868 = vector.broadcast %cst_223 : f32 to vector<8x32xf32>
    %869 = arith.addf %868, %867 : vector<8x32xf32>
    %870 = arith.divf %868, %869 : vector<8x32xf32>
    %871 = vector.extract_strided_slice %824 {offsets = [0, 64], sizes = [8, 32], strides = [1, 1]} : vector<8x96xf32> to vector<8x32xf32>
    %872 = vector.extract_strided_slice %854 {offsets = [0, 64], sizes = [8, 32], strides = [1, 1]} : vector<8x96xf32> to vector<8x32xf32>
    %873 = vector.broadcast %14 : vector<1x32xf32> to vector<8x32xf32>
    %874 = arith.addf %872, %873 : vector<8x32xf32>
    %875 = arith.mulf %862, %874 : vector<8x32xf32>
    %876 = arith.addf %871, %875 : vector<8x32xf32>
    %877 = math.tanh %876 : vector<8x32xf32>
    %cst_224 = arith.constant 1.000000e+00 : f32
    %878 = vector.broadcast %cst_224 : f32 to vector<8x32xf32>
    %879 = arith.subf %878, %870 : vector<8x32xf32>
    %880 = arith.mulf %879, %877 : vector<8x32xf32>
    %881 = arith.mulf %870, %820 : vector<8x32xf32>
    %882 = arith.addf %880, %881 : vector<8x32xf32>
    %c104_225 = arith.constant 104 : index
    %c0_226 = arith.constant 0 : index
    %883 = vector.load %arg14[%c104_225, %c0_226] : memref<128x64xf32, #tpu.memory_space<vmem>>, vector<8x32xf32>
    tpu.vector_store %arg14[%c104_225, %c0_226], %853 {strides = array<i32>} : memref<128x64xf32, #tpu.memory_space<vmem>>, vector<8x32xf32>,
    %c16_227 = arith.constant 16 : index
    %c32_228 = arith.constant 32 : index
    %884 = vector.load %arg14[%c16_227, %c32_228] : memref<128x64xf32, #tpu.memory_space<vmem>>, vector<8x32xf32>
    tpu.vector_store %arg14[%c16_227, %c32_228], %882 {strides = array<i32>} : memref<128x64xf32, #tpu.memory_space<vmem>>, vector<8x32xf32>,
    %c112_229 = arith.constant 112 : index
    %c0_230 = arith.constant 0 : index
    %885 = vector.load %arg15[%c112_229, %c0_230] : memref<128x192xf32, #tpu.memory_space<vmem>>, vector<8x96xf32>
    %c8_231 = arith.constant 8 : index
    %c96_232 = arith.constant 96 : index
    %886 = vector.load %arg15[%c8_231, %c96_232] : memref<128x192xf32, #tpu.memory_space<vmem>>, vector<8x96xf32>
    %cst_233 = arith.constant dense<0.000000e+00> : vector<8x96xf32>
    %887 = tpu.matmul %853, %8, %cst_233 {dimension_numbers = #tpu.dot_dimension_numbers<[1], [0], [0], [1], [0, 0, 1, 1], [], []>} : vector<8x32xf32>, vector<32x96xf32>, vector<8x96xf32> -> vector<8x96xf32>
    %888 = vector.extract_strided_slice %885 {offsets = [0, 0], sizes = [8, 32], strides = [1, 1]} : vector<8x96xf32> to vector<8x32xf32>
    %889 = vector.extract_strided_slice %887 {offsets = [0, 0], sizes = [8, 32], strides = [1, 1]} : vector<8x96xf32> to vector<8x32xf32>
    %890 = arith.addf %888, %889 : vector<8x32xf32>
    %891 = arith.negf %890 : vector<8x32xf32>
    %892 = math.exp %891 : vector<8x32xf32>
    %cst_234 = arith.constant 1.000000e+00 : f32
    %893 = vector.broadcast %cst_234 : f32 to vector<8x32xf32>
    %894 = arith.addf %893, %892 : vector<8x32xf32>
    %895 = arith.divf %893, %894 : vector<8x32xf32>
    %896 = vector.extract_strided_slice %885 {offsets = [0, 32], sizes = [8, 32], strides = [1, 1]} : vector<8x96xf32> to vector<8x32xf32>
    %897 = vector.extract_strided_slice %887 {offsets = [0, 32], sizes = [8, 32], strides = [1, 1]} : vector<8x96xf32> to vector<8x32xf32>
    %898 = arith.addf %896, %897 : vector<8x32xf32>
    %899 = arith.negf %898 : vector<8x32xf32>
    %900 = math.exp %899 : vector<8x32xf32>
    %cst_235 = arith.constant 1.000000e+00 : f32
    %901 = vector.broadcast %cst_235 : f32 to vector<8x32xf32>
    %902 = arith.addf %901, %900 : vector<8x32xf32>
    %903 = arith.divf %901, %902 : vector<8x32xf32>
    %904 = vector.extract_strided_slice %885 {offsets = [0, 64], sizes = [8, 32], strides = [1, 1]} : vector<8x96xf32> to vector<8x32xf32>
    %905 = vector.extract_strided_slice %887 {offsets = [0, 64], sizes = [8, 32], strides = [1, 1]} : vector<8x96xf32> to vector<8x32xf32>
    %906 = vector.broadcast %12 : vector<1x32xf32> to vector<8x32xf32>
    %907 = arith.addf %905, %906 : vector<8x32xf32>
    %908 = arith.mulf %895, %907 : vector<8x32xf32>
    %909 = arith.addf %904, %908 : vector<8x32xf32>
    %910 = math.tanh %909 : vector<8x32xf32>
    %cst_236 = arith.constant 1.000000e+00 : f32
    %911 = vector.broadcast %cst_236 : f32 to vector<8x32xf32>
    %912 = arith.subf %911, %903 : vector<8x32xf32>
    %913 = arith.mulf %912, %910 : vector<8x32xf32>
    %914 = arith.mulf %903, %853 : vector<8x32xf32>
    %915 = arith.addf %913, %914 : vector<8x32xf32>
    %cst_237 = arith.constant dense<0.000000e+00> : vector<8x96xf32>
    %916 = tpu.matmul %882, %10, %cst_237 {dimension_numbers = #tpu.dot_dimension_numbers<[1], [0], [0], [1], [0, 0, 1, 1], [], []>} : vector<8x32xf32>, vector<32x96xf32>, vector<8x96xf32> -> vector<8x96xf32>
    %917 = vector.extract_strided_slice %886 {offsets = [0, 0], sizes = [8, 32], strides = [1, 1]} : vector<8x96xf32> to vector<8x32xf32>
    %918 = vector.extract_strided_slice %916 {offsets = [0, 0], sizes = [8, 32], strides = [1, 1]} : vector<8x96xf32> to vector<8x32xf32>
    %919 = arith.addf %917, %918 : vector<8x32xf32>
    %920 = arith.negf %919 : vector<8x32xf32>
    %921 = math.exp %920 : vector<8x32xf32>
    %cst_238 = arith.constant 1.000000e+00 : f32
    %922 = vector.broadcast %cst_238 : f32 to vector<8x32xf32>
    %923 = arith.addf %922, %921 : vector<8x32xf32>
    %924 = arith.divf %922, %923 : vector<8x32xf32>
    %925 = vector.extract_strided_slice %886 {offsets = [0, 32], sizes = [8, 32], strides = [1, 1]} : vector<8x96xf32> to vector<8x32xf32>
    %926 = vector.extract_strided_slice %916 {offsets = [0, 32], sizes = [8, 32], strides = [1, 1]} : vector<8x96xf32> to vector<8x32xf32>
    %927 = arith.addf %925, %926 : vector<8x32xf32>
    %928 = arith.negf %927 : vector<8x32xf32>
    %929 = math.exp %928 : vector<8x32xf32>
    %cst_239 = arith.constant 1.000000e+00 : f32
    %930 = vector.broadcast %cst_239 : f32 to vector<8x32xf32>
    %931 = arith.addf %930, %929 : vector<8x32xf32>
    %932 = arith.divf %930, %931 : vector<8x32xf32>
    %933 = vector.extract_strided_slice %886 {offsets = [0, 64], sizes = [8, 32], strides = [1, 1]} : vector<8x96xf32> to vector<8x32xf32>
    %934 = vector.extract_strided_slice %916 {offsets = [0, 64], sizes = [8, 32], strides = [1, 1]} : vector<8x96xf32> to vector<8x32xf32>
    %935 = vector.broadcast %14 : vector<1x32xf32> to vector<8x32xf32>
    %936 = arith.addf %934, %935 : vector<8x32xf32>
    %937 = arith.mulf %924, %936 : vector<8x32xf32>
    %938 = arith.addf %933, %937 : vector<8x32xf32>
    %939 = math.tanh %938 : vector<8x32xf32>
    %cst_240 = arith.constant 1.000000e+00 : f32
    %940 = vector.broadcast %cst_240 : f32 to vector<8x32xf32>
    %941 = arith.subf %940, %932 : vector<8x32xf32>
    %942 = arith.mulf %941, %939 : vector<8x32xf32>
    %943 = arith.mulf %932, %882 : vector<8x32xf32>
    %944 = arith.addf %942, %943 : vector<8x32xf32>
    %c112_241 = arith.constant 112 : index
    %c0_242 = arith.constant 0 : index
    %945 = vector.load %arg14[%c112_241, %c0_242] : memref<128x64xf32, #tpu.memory_space<vmem>>, vector<8x32xf32>
    tpu.vector_store %arg14[%c112_241, %c0_242], %915 {strides = array<i32>} : memref<128x64xf32, #tpu.memory_space<vmem>>, vector<8x32xf32>,
    %c8_243 = arith.constant 8 : index
    %c32_244 = arith.constant 32 : index
    %946 = vector.load %arg14[%c8_243, %c32_244] : memref<128x64xf32, #tpu.memory_space<vmem>>, vector<8x32xf32>
    tpu.vector_store %arg14[%c8_243, %c32_244], %944 {strides = array<i32>} : memref<128x64xf32, #tpu.memory_space<vmem>>, vector<8x32xf32>,
    %c120_245 = arith.constant 120 : index
    %c0_246 = arith.constant 0 : index
    %947 = vector.load %arg15[%c120_245, %c0_246] : memref<128x192xf32, #tpu.memory_space<vmem>>, vector<8x96xf32>
    %c0_247 = arith.constant 0 : index
    %c96_248 = arith.constant 96 : index
    %948 = vector.load %arg15[%c0_247, %c96_248] : memref<128x192xf32, #tpu.memory_space<vmem>>, vector<8x96xf32>
    %cst_249 = arith.constant dense<0.000000e+00> : vector<8x96xf32>
    %949 = tpu.matmul %915, %8, %cst_249 {dimension_numbers = #tpu.dot_dimension_numbers<[1], [0], [0], [1], [0, 0, 1, 1], [], []>} : vector<8x32xf32>, vector<32x96xf32>, vector<8x96xf32> -> vector<8x96xf32>
    %950 = vector.extract_strided_slice %947 {offsets = [0, 0], sizes = [8, 32], strides = [1, 1]} : vector<8x96xf32> to vector<8x32xf32>
    %951 = vector.extract_strided_slice %949 {offsets = [0, 0], sizes = [8, 32], strides = [1, 1]} : vector<8x96xf32> to vector<8x32xf32>
    %952 = arith.addf %950, %951 : vector<8x32xf32>
    %953 = arith.negf %952 : vector<8x32xf32>
    %954 = math.exp %953 : vector<8x32xf32>
    %cst_250 = arith.constant 1.000000e+00 : f32
    %955 = vector.broadcast %cst_250 : f32 to vector<8x32xf32>
    %956 = arith.addf %955, %954 : vector<8x32xf32>
    %957 = arith.divf %955, %956 : vector<8x32xf32>
    %958 = vector.extract_strided_slice %947 {offsets = [0, 32], sizes = [8, 32], strides = [1, 1]} : vector<8x96xf32> to vector<8x32xf32>
    %959 = vector.extract_strided_slice %949 {offsets = [0, 32], sizes = [8, 32], strides = [1, 1]} : vector<8x96xf32> to vector<8x32xf32>
    %960 = arith.addf %958, %959 : vector<8x32xf32>
    %961 = arith.negf %960 : vector<8x32xf32>
    %962 = math.exp %961 : vector<8x32xf32>
    %cst_251 = arith.constant 1.000000e+00 : f32
    %963 = vector.broadcast %cst_251 : f32 to vector<8x32xf32>
    %964 = arith.addf %963, %962 : vector<8x32xf32>
    %965 = arith.divf %963, %964 : vector<8x32xf32>
    %966 = vector.extract_strided_slice %947 {offsets = [0, 64], sizes = [8, 32], strides = [1, 1]} : vector<8x96xf32> to vector<8x32xf32>
    %967 = vector.extract_strided_slice %949 {offsets = [0, 64], sizes = [8, 32], strides = [1, 1]} : vector<8x96xf32> to vector<8x32xf32>
    %968 = vector.broadcast %12 : vector<1x32xf32> to vector<8x32xf32>
    %969 = arith.addf %967, %968 : vector<8x32xf32>
    %970 = arith.mulf %957, %969 : vector<8x32xf32>
    %971 = arith.addf %966, %970 : vector<8x32xf32>
    %972 = math.tanh %971 : vector<8x32xf32>
    %cst_252 = arith.constant 1.000000e+00 : f32
    %973 = vector.broadcast %cst_252 : f32 to vector<8x32xf32>
    %974 = arith.subf %973, %965 : vector<8x32xf32>
    %975 = arith.mulf %974, %972 : vector<8x32xf32>
    %976 = arith.mulf %965, %915 : vector<8x32xf32>
    %977 = arith.addf %975, %976 : vector<8x32xf32>
    %cst_253 = arith.constant dense<0.000000e+00> : vector<8x96xf32>
    %978 = tpu.matmul %944, %10, %cst_253 {dimension_numbers = #tpu.dot_dimension_numbers<[1], [0], [0], [1], [0, 0, 1, 1], [], []>} : vector<8x32xf32>, vector<32x96xf32>, vector<8x96xf32> -> vector<8x96xf32>
    %979 = vector.extract_strided_slice %948 {offsets = [0, 0], sizes = [8, 32], strides = [1, 1]} : vector<8x96xf32> to vector<8x32xf32>
    %980 = vector.extract_strided_slice %978 {offsets = [0, 0], sizes = [8, 32], strides = [1, 1]} : vector<8x96xf32> to vector<8x32xf32>
    %981 = arith.addf %979, %980 : vector<8x32xf32>
    %982 = arith.negf %981 : vector<8x32xf32>
    %983 = math.exp %982 : vector<8x32xf32>
    %cst_254 = arith.constant 1.000000e+00 : f32
    %984 = vector.broadcast %cst_254 : f32 to vector<8x32xf32>
    %985 = arith.addf %984, %983 : vector<8x32xf32>
    %986 = arith.divf %984, %985 : vector<8x32xf32>
    %987 = vector.extract_strided_slice %948 {offsets = [0, 32], sizes = [8, 32], strides = [1, 1]} : vector<8x96xf32> to vector<8x32xf32>
    %988 = vector.extract_strided_slice %978 {offsets = [0, 32], sizes = [8, 32], strides = [1, 1]} : vector<8x96xf32> to vector<8x32xf32>
    %989 = arith.addf %987, %988 : vector<8x32xf32>
    %990 = arith.negf %989 : vector<8x32xf32>
    %991 = math.exp %990 : vector<8x32xf32>
    %cst_255 = arith.constant 1.000000e+00 : f32
    %992 = vector.broadcast %cst_255 : f32 to vector<8x32xf32>
    %993 = arith.addf %992, %991 : vector<8x32xf32>
    %994 = arith.divf %992, %993 : vector<8x32xf32>
    %995 = vector.extract_strided_slice %948 {offsets = [0, 64], sizes = [8, 32], strides = [1, 1]} : vector<8x96xf32> to vector<8x32xf32>
    %996 = vector.extract_strided_slice %978 {offsets = [0, 64], sizes = [8, 32], strides = [1, 1]} : vector<8x96xf32> to vector<8x32xf32>
    %997 = vector.broadcast %14 : vector<1x32xf32> to vector<8x32xf32>
    %998 = arith.addf %996, %997 : vector<8x32xf32>
    %999 = arith.mulf %986, %998 : vector<8x32xf32>
    %1000 = arith.addf %995, %999 : vector<8x32xf32>
    %1001 = math.tanh %1000 : vector<8x32xf32>
    %cst_256 = arith.constant 1.000000e+00 : f32
    %1002 = vector.broadcast %cst_256 : f32 to vector<8x32xf32>
    %1003 = arith.subf %1002, %994 : vector<8x32xf32>
    %1004 = arith.mulf %1003, %1001 : vector<8x32xf32>
    %1005 = arith.mulf %994, %944 : vector<8x32xf32>
    %1006 = arith.addf %1004, %1005 : vector<8x32xf32>
    %c120_257 = arith.constant 120 : index
    %c0_258 = arith.constant 0 : index
    %1007 = vector.load %arg14[%c120_257, %c0_258] : memref<128x64xf32, #tpu.memory_space<vmem>>, vector<8x32xf32>
    tpu.vector_store %arg14[%c120_257, %c0_258], %977 {strides = array<i32>} : memref<128x64xf32, #tpu.memory_space<vmem>>, vector<8x32xf32>,
    %c0_259 = arith.constant 0 : index
    %c32_260 = arith.constant 32 : index
    %1008 = vector.load %arg14[%c0_259, %c32_260] : memref<128x64xf32, #tpu.memory_space<vmem>>, vector<8x32xf32>
    tpu.vector_store %arg14[%c0_259, %c32_260], %1006 {strides = array<i32>} : memref<128x64xf32, #tpu.memory_space<vmem>>, vector<8x32xf32>,
    %c0_261 = arith.constant 0 : index
    %c0_262 = arith.constant 0 : index
    %1009 = vector.load %arg14[%c0_261, %c0_262] : memref<128x64xf32, #tpu.memory_space<vmem>>, vector<128x64xf32>
    %c0_263 = arith.constant 0 : index
    %c0_264 = arith.constant 0 : index
    %1010 = vector.load %arg5[%c0_263, %c0_264] : memref<64x192xf32, #tpu.memory_space<vmem>>, vector<64x192xf32>
    %cst_265 = arith.constant dense<0.000000e+00> : vector<128x192xf32>
    %1011 = tpu.matmul %1009, %1010, %cst_265 {dimension_numbers = #tpu.dot_dimension_numbers<[1], [0], [0], [1], [0, 0, 1, 1], [], []>} : vector<128x64xf32>, vector<64x192xf32>, vector<128x192xf32> -> vector<128x192xf32>
    %c0_266 = arith.constant 0 : index
    %c0_267 = arith.constant 0 : index
    %1012 = vector.load %arg6[%c0_266, %c0_267] : memref<1x192xf32, #tpu.memory_space<vmem>>, vector<1x192xf32>
    %1013 = vector.broadcast %1012 : vector<1x192xf32> to vector<128x192xf32>
    %1014 = arith.addf %1011, %1013 : vector<128x192xf32>
    %c0_268 = arith.constant 0 : index
    %c0_269 = arith.constant 0 : index
    %1015 = vector.load %arg15[%c0_268, %c0_269] : memref<128x192xf32, #tpu.memory_space<vmem>>, vector<128x192xf32>
    tpu.vector_store %arg15[%c0_268, %c0_269], %1014 {strides = array<i32>} : memref<128x192xf32, #tpu.memory_space<vmem>>, vector<128x192xf32>,
    %c0_270 = arith.constant 0 : index
    %c0_271 = arith.constant 0 : index
    %c0_272 = arith.constant 0 : index
    %1016 = vector.load %arg7[%c0_270, %c0_271, %c0_272] : memref<2x32x96xf32, #tpu.memory_space<vmem>>, vector<1x32x96xf32>
    %1017 = vector.shape_cast %1016 : vector<1x32x96xf32> to vector<32x96xf32>
    %c1_273 = arith.constant 1 : index
    %c0_274 = arith.constant 0 : index
    %c0_275 = arith.constant 0 : index
    %1018 = vector.load %arg7[%c1_273, %c0_274, %c0_275] : memref<2x32x96xf32, #tpu.memory_space<vmem>>, vector<1x32x96xf32>
    %1019 = vector.shape_cast %1018 : vector<1x32x96xf32> to vector<32x96xf32>
    %c0_276 = arith.constant 0 : index
    %c0_277 = arith.constant 0 : index
    %c0_278 = arith.constant 0 : index
    %1020 = vector.load %arg8[%c0_276, %c0_277, %c0_278] : memref<2x1x32xf32, #tpu.memory_space<vmem>>, vector<1x1x32xf32>
    %1021 = vector.shape_cast %1020 : vector<1x1x32xf32> to vector<1x32xf32>
    %c1_279 = arith.constant 1 : index
    %c0_280 = arith.constant 0 : index
    %c0_281 = arith.constant 0 : index
    %1022 = vector.load %arg8[%c1_279, %c0_280, %c0_281] : memref<2x1x32xf32, #tpu.memory_space<vmem>>, vector<1x1x32xf32>
    %1023 = vector.shape_cast %1022 : vector<1x1x32xf32> to vector<1x32xf32>
    %cst_282 = arith.constant 0.000000e+00 : f32
    %1024 = vector.broadcast %cst_282 : f32 to vector<8x32xf32>
    %cst_283 = arith.constant 0.000000e+00 : f32
    %1025 = vector.broadcast %cst_283 : f32 to vector<8x32xf32>
    %c0_284 = arith.constant 0 : index
    %c0_285 = arith.constant 0 : index
    %1026 = vector.load %arg15[%c0_284, %c0_285] : memref<128x192xf32, #tpu.memory_space<vmem>>, vector<8x96xf32>
    %c120_286 = arith.constant 120 : index
    %c96_287 = arith.constant 96 : index
    %1027 = vector.load %arg15[%c120_286, %c96_287] : memref<128x192xf32, #tpu.memory_space<vmem>>, vector<8x96xf32>
    %cst_288 = arith.constant dense<0.000000e+00> : vector<8x96xf32>
    %1028 = tpu.matmul %1024, %1017, %cst_288 {dimension_numbers = #tpu.dot_dimension_numbers<[1], [0], [0], [1], [0, 0, 1, 1], [], []>} : vector<8x32xf32>, vector<32x96xf32>, vector<8x96xf32> -> vector<8x96xf32>
    %1029 = vector.extract_strided_slice %1026 {offsets = [0, 0], sizes = [8, 32], strides = [1, 1]} : vector<8x96xf32> to vector<8x32xf32>
    %1030 = vector.extract_strided_slice %1028 {offsets = [0, 0], sizes = [8, 32], strides = [1, 1]} : vector<8x96xf32> to vector<8x32xf32>
    %1031 = arith.addf %1029, %1030 : vector<8x32xf32>
    %1032 = arith.negf %1031 : vector<8x32xf32>
    %1033 = math.exp %1032 : vector<8x32xf32>
    %cst_289 = arith.constant 1.000000e+00 : f32
    %1034 = vector.broadcast %cst_289 : f32 to vector<8x32xf32>
    %1035 = arith.addf %1034, %1033 : vector<8x32xf32>
    %1036 = arith.divf %1034, %1035 : vector<8x32xf32>
    %1037 = vector.extract_strided_slice %1026 {offsets = [0, 32], sizes = [8, 32], strides = [1, 1]} : vector<8x96xf32> to vector<8x32xf32>
    %1038 = vector.extract_strided_slice %1028 {offsets = [0, 32], sizes = [8, 32], strides = [1, 1]} : vector<8x96xf32> to vector<8x32xf32>
    %1039 = arith.addf %1037, %1038 : vector<8x32xf32>
    %1040 = arith.negf %1039 : vector<8x32xf32>
    %1041 = math.exp %1040 : vector<8x32xf32>
    %cst_290 = arith.constant 1.000000e+00 : f32
    %1042 = vector.broadcast %cst_290 : f32 to vector<8x32xf32>
    %1043 = arith.addf %1042, %1041 : vector<8x32xf32>
    %1044 = arith.divf %1042, %1043 : vector<8x32xf32>
    %1045 = vector.extract_strided_slice %1026 {offsets = [0, 64], sizes = [8, 32], strides = [1, 1]} : vector<8x96xf32> to vector<8x32xf32>
    %1046 = vector.extract_strided_slice %1028 {offsets = [0, 64], sizes = [8, 32], strides = [1, 1]} : vector<8x96xf32> to vector<8x32xf32>
    %1047 = vector.broadcast %1021 : vector<1x32xf32> to vector<8x32xf32>
    %1048 = arith.addf %1046, %1047 : vector<8x32xf32>
    %1049 = arith.mulf %1036, %1048 : vector<8x32xf32>
    %1050 = arith.addf %1045, %1049 : vector<8x32xf32>
    %1051 = math.tanh %1050 : vector<8x32xf32>
    %cst_291 = arith.constant 1.000000e+00 : f32
    %1052 = vector.broadcast %cst_291 : f32 to vector<8x32xf32>
    %1053 = arith.subf %1052, %1044 : vector<8x32xf32>
    %1054 = arith.mulf %1053, %1051 : vector<8x32xf32>
    %1055 = arith.mulf %1044, %1024 : vector<8x32xf32>
    %1056 = arith.addf %1054, %1055 : vector<8x32xf32>
    %cst_292 = arith.constant dense<0.000000e+00> : vector<8x96xf32>
    %1057 = tpu.matmul %1025, %1019, %cst_292 {dimension_numbers = #tpu.dot_dimension_numbers<[1], [0], [0], [1], [0, 0, 1, 1], [], []>} : vector<8x32xf32>, vector<32x96xf32>, vector<8x96xf32> -> vector<8x96xf32>
    %1058 = vector.extract_strided_slice %1027 {offsets = [0, 0], sizes = [8, 32], strides = [1, 1]} : vector<8x96xf32> to vector<8x32xf32>
    %1059 = vector.extract_strided_slice %1057 {offsets = [0, 0], sizes = [8, 32], strides = [1, 1]} : vector<8x96xf32> to vector<8x32xf32>
    %1060 = arith.addf %1058, %1059 : vector<8x32xf32>
    %1061 = arith.negf %1060 : vector<8x32xf32>
    %1062 = math.exp %1061 : vector<8x32xf32>
    %cst_293 = arith.constant 1.000000e+00 : f32
    %1063 = vector.broadcast %cst_293 : f32 to vector<8x32xf32>
    %1064 = arith.addf %1063, %1062 : vector<8x32xf32>
    %1065 = arith.divf %1063, %1064 : vector<8x32xf32>
    %1066 = vector.extract_strided_slice %1027 {offsets = [0, 32], sizes = [8, 32], strides = [1, 1]} : vector<8x96xf32> to vector<8x32xf32>
    %1067 = vector.extract_strided_slice %1057 {offsets = [0, 32], sizes = [8, 32], strides = [1, 1]} : vector<8x96xf32> to vector<8x32xf32>
    %1068 = arith.addf %1066, %1067 : vector<8x32xf32>
    %1069 = arith.negf %1068 : vector<8x32xf32>
    %1070 = math.exp %1069 : vector<8x32xf32>
    %cst_294 = arith.constant 1.000000e+00 : f32
    %1071 = vector.broadcast %cst_294 : f32 to vector<8x32xf32>
    %1072 = arith.addf %1071, %1070 : vector<8x32xf32>
    %1073 = arith.divf %1071, %1072 : vector<8x32xf32>
    %1074 = vector.extract_strided_slice %1027 {offsets = [0, 64], sizes = [8, 32], strides = [1, 1]} : vector<8x96xf32> to vector<8x32xf32>
    %1075 = vector.extract_strided_slice %1057 {offsets = [0, 64], sizes = [8, 32], strides = [1, 1]} : vector<8x96xf32> to vector<8x32xf32>
    %1076 = vector.broadcast %1023 : vector<1x32xf32> to vector<8x32xf32>
    %1077 = arith.addf %1075, %1076 : vector<8x32xf32>
    %1078 = arith.mulf %1065, %1077 : vector<8x32xf32>
    %1079 = arith.addf %1074, %1078 : vector<8x32xf32>
    %1080 = math.tanh %1079 : vector<8x32xf32>
    %cst_295 = arith.constant 1.000000e+00 : f32
    %1081 = vector.broadcast %cst_295 : f32 to vector<8x32xf32>
    %1082 = arith.subf %1081, %1073 : vector<8x32xf32>
    %1083 = arith.mulf %1082, %1080 : vector<8x32xf32>
    %1084 = arith.mulf %1073, %1025 : vector<8x32xf32>
    %1085 = arith.addf %1083, %1084 : vector<8x32xf32>
    %cst_296 = arith.constant 0.000000e+00 : f32
    %1086 = vector.broadcast %cst_296 : f32 to vector<8x32xf32>
    %1087 = arith.maximumf %1056, %1086 : vector<8x32xf32>
    %cst_297 = arith.constant 0.000000e+00 : f32
    %1088 = vector.broadcast %cst_297 : f32 to vector<8x32xf32>
    %1089 = arith.maximumf %1085, %1088 : vector<8x32xf32>
    %c0_298 = arith.constant 0 : index
    %c0_299 = arith.constant 0 : index
    %1090 = vector.load %arg14[%c0_298, %c0_299] : memref<128x64xf32, #tpu.memory_space<vmem>>, vector<8x32xf32>
    tpu.vector_store %arg14[%c0_298, %c0_299], %1087 {strides = array<i32>} : memref<128x64xf32, #tpu.memory_space<vmem>>, vector<8x32xf32>,
    %c120_300 = arith.constant 120 : index
    %c32_301 = arith.constant 32 : index
    %1091 = vector.load %arg14[%c120_300, %c32_301] : memref<128x64xf32, #tpu.memory_space<vmem>>, vector<8x32xf32>
    tpu.vector_store %arg14[%c120_300, %c32_301], %1089 {strides = array<i32>} : memref<128x64xf32, #tpu.memory_space<vmem>>, vector<8x32xf32>,
    %c8_302 = arith.constant 8 : index
    %c0_303 = arith.constant 0 : index
    %1092 = vector.load %arg15[%c8_302, %c0_303] : memref<128x192xf32, #tpu.memory_space<vmem>>, vector<8x96xf32>
    %c112_304 = arith.constant 112 : index
    %c96_305 = arith.constant 96 : index
    %1093 = vector.load %arg15[%c112_304, %c96_305] : memref<128x192xf32, #tpu.memory_space<vmem>>, vector<8x96xf32>
    %cst_306 = arith.constant dense<0.000000e+00> : vector<8x96xf32>
    %1094 = tpu.matmul %1056, %1017, %cst_306 {dimension_numbers = #tpu.dot_dimension_numbers<[1], [0], [0], [1], [0, 0, 1, 1], [], []>} : vector<8x32xf32>, vector<32x96xf32>, vector<8x96xf32> -> vector<8x96xf32>
    %1095 = vector.extract_strided_slice %1092 {offsets = [0, 0], sizes = [8, 32], strides = [1, 1]} : vector<8x96xf32> to vector<8x32xf32>
    %1096 = vector.extract_strided_slice %1094 {offsets = [0, 0], sizes = [8, 32], strides = [1, 1]} : vector<8x96xf32> to vector<8x32xf32>
    %1097 = arith.addf %1095, %1096 : vector<8x32xf32>
    %1098 = arith.negf %1097 : vector<8x32xf32>
    %1099 = math.exp %1098 : vector<8x32xf32>
    %cst_307 = arith.constant 1.000000e+00 : f32
    %1100 = vector.broadcast %cst_307 : f32 to vector<8x32xf32>
    %1101 = arith.addf %1100, %1099 : vector<8x32xf32>
    %1102 = arith.divf %1100, %1101 : vector<8x32xf32>
    %1103 = vector.extract_strided_slice %1092 {offsets = [0, 32], sizes = [8, 32], strides = [1, 1]} : vector<8x96xf32> to vector<8x32xf32>
    %1104 = vector.extract_strided_slice %1094 {offsets = [0, 32], sizes = [8, 32], strides = [1, 1]} : vector<8x96xf32> to vector<8x32xf32>
    %1105 = arith.addf %1103, %1104 : vector<8x32xf32>
    %1106 = arith.negf %1105 : vector<8x32xf32>
    %1107 = math.exp %1106 : vector<8x32xf32>
    %cst_308 = arith.constant 1.000000e+00 : f32
    %1108 = vector.broadcast %cst_308 : f32 to vector<8x32xf32>
    %1109 = arith.addf %1108, %1107 : vector<8x32xf32>
    %1110 = arith.divf %1108, %1109 : vector<8x32xf32>
    %1111 = vector.extract_strided_slice %1092 {offsets = [0, 64], sizes = [8, 32], strides = [1, 1]} : vector<8x96xf32> to vector<8x32xf32>
    %1112 = vector.extract_strided_slice %1094 {offsets = [0, 64], sizes = [8, 32], strides = [1, 1]} : vector<8x96xf32> to vector<8x32xf32>
    %1113 = vector.broadcast %1021 : vector<1x32xf32> to vector<8x32xf32>
    %1114 = arith.addf %1112, %1113 : vector<8x32xf32>
    %1115 = arith.mulf %1102, %1114 : vector<8x32xf32>
    %1116 = arith.addf %1111, %1115 : vector<8x32xf32>
    %1117 = math.tanh %1116 : vector<8x32xf32>
    %cst_309 = arith.constant 1.000000e+00 : f32
    %1118 = vector.broadcast %cst_309 : f32 to vector<8x32xf32>
    %1119 = arith.subf %1118, %1110 : vector<8x32xf32>
    %1120 = arith.mulf %1119, %1117 : vector<8x32xf32>
    %1121 = arith.mulf %1110, %1056 : vector<8x32xf32>
    %1122 = arith.addf %1120, %1121 : vector<8x32xf32>
    %cst_310 = arith.constant dense<0.000000e+00> : vector<8x96xf32>
    %1123 = tpu.matmul %1085, %1019, %cst_310 {dimension_numbers = #tpu.dot_dimension_numbers<[1], [0], [0], [1], [0, 0, 1, 1], [], []>} : vector<8x32xf32>, vector<32x96xf32>, vector<8x96xf32> -> vector<8x96xf32>
    %1124 = vector.extract_strided_slice %1093 {offsets = [0, 0], sizes = [8, 32], strides = [1, 1]} : vector<8x96xf32> to vector<8x32xf32>
    %1125 = vector.extract_strided_slice %1123 {offsets = [0, 0], sizes = [8, 32], strides = [1, 1]} : vector<8x96xf32> to vector<8x32xf32>
    %1126 = arith.addf %1124, %1125 : vector<8x32xf32>
    %1127 = arith.negf %1126 : vector<8x32xf32>
    %1128 = math.exp %1127 : vector<8x32xf32>
    %cst_311 = arith.constant 1.000000e+00 : f32
    %1129 = vector.broadcast %cst_311 : f32 to vector<8x32xf32>
    %1130 = arith.addf %1129, %1128 : vector<8x32xf32>
    %1131 = arith.divf %1129, %1130 : vector<8x32xf32>
    %1132 = vector.extract_strided_slice %1093 {offsets = [0, 32], sizes = [8, 32], strides = [1, 1]} : vector<8x96xf32> to vector<8x32xf32>
    %1133 = vector.extract_strided_slice %1123 {offsets = [0, 32], sizes = [8, 32], strides = [1, 1]} : vector<8x96xf32> to vector<8x32xf32>
    %1134 = arith.addf %1132, %1133 : vector<8x32xf32>
    %1135 = arith.negf %1134 : vector<8x32xf32>
    %1136 = math.exp %1135 : vector<8x32xf32>
    %cst_312 = arith.constant 1.000000e+00 : f32
    %1137 = vector.broadcast %cst_312 : f32 to vector<8x32xf32>
    %1138 = arith.addf %1137, %1136 : vector<8x32xf32>
    %1139 = arith.divf %1137, %1138 : vector<8x32xf32>
    %1140 = vector.extract_strided_slice %1093 {offsets = [0, 64], sizes = [8, 32], strides = [1, 1]} : vector<8x96xf32> to vector<8x32xf32>
    %1141 = vector.extract_strided_slice %1123 {offsets = [0, 64], sizes = [8, 32], strides = [1, 1]} : vector<8x96xf32> to vector<8x32xf32>
    %1142 = vector.broadcast %1023 : vector<1x32xf32> to vector<8x32xf32>
    %1143 = arith.addf %1141, %1142 : vector<8x32xf32>
    %1144 = arith.mulf %1131, %1143 : vector<8x32xf32>
    %1145 = arith.addf %1140, %1144 : vector<8x32xf32>
    %1146 = math.tanh %1145 : vector<8x32xf32>
    %cst_313 = arith.constant 1.000000e+00 : f32
    %1147 = vector.broadcast %cst_313 : f32 to vector<8x32xf32>
    %1148 = arith.subf %1147, %1139 : vector<8x32xf32>
    %1149 = arith.mulf %1148, %1146 : vector<8x32xf32>
    %1150 = arith.mulf %1139, %1085 : vector<8x32xf32>
    %1151 = arith.addf %1149, %1150 : vector<8x32xf32>
    %cst_314 = arith.constant 0.000000e+00 : f32
    %1152 = vector.broadcast %cst_314 : f32 to vector<8x32xf32>
    %1153 = arith.maximumf %1122, %1152 : vector<8x32xf32>
    %cst_315 = arith.constant 0.000000e+00 : f32
    %1154 = vector.broadcast %cst_315 : f32 to vector<8x32xf32>
    %1155 = arith.maximumf %1151, %1154 : vector<8x32xf32>
    %c8_316 = arith.constant 8 : index
    %c0_317 = arith.constant 0 : index
    %1156 = vector.load %arg14[%c8_316, %c0_317] : memref<128x64xf32, #tpu.memory_space<vmem>>, vector<8x32xf32>
    tpu.vector_store %arg14[%c8_316, %c0_317], %1153 {strides = array<i32>} : memref<128x64xf32, #tpu.memory_space<vmem>>, vector<8x32xf32>,
    %c112_318 = arith.constant 112 : index
    %c32_319 = arith.constant 32 : index
    %1157 = vector.load %arg14[%c112_318, %c32_319] : memref<128x64xf32, #tpu.memory_space<vmem>>, vector<8x32xf32>
    tpu.vector_store %arg14[%c112_318, %c32_319], %1155 {strides = array<i32>} : memref<128x64xf32, #tpu.memory_space<vmem>>, vector<8x32xf32>,
    %c16_320 = arith.constant 16 : index
    %c0_321 = arith.constant 0 : index
    %1158 = vector.load %arg15[%c16_320, %c0_321] : memref<128x192xf32, #tpu.memory_space<vmem>>, vector<8x96xf32>
    %c104_322 = arith.constant 104 : index
    %c96_323 = arith.constant 96 : index
    %1159 = vector.load %arg15[%c104_322, %c96_323] : memref<128x192xf32, #tpu.memory_space<vmem>>, vector<8x96xf32>
    %cst_324 = arith.constant dense<0.000000e+00> : vector<8x96xf32>
    %1160 = tpu.matmul %1122, %1017, %cst_324 {dimension_numbers = #tpu.dot_dimension_numbers<[1], [0], [0], [1], [0, 0, 1, 1], [], []>} : vector<8x32xf32>, vector<32x96xf32>, vector<8x96xf32> -> vector<8x96xf32>
    %1161 = vector.extract_strided_slice %1158 {offsets = [0, 0], sizes = [8, 32], strides = [1, 1]} : vector<8x96xf32> to vector<8x32xf32>
    %1162 = vector.extract_strided_slice %1160 {offsets = [0, 0], sizes = [8, 32], strides = [1, 1]} : vector<8x96xf32> to vector<8x32xf32>
    %1163 = arith.addf %1161, %1162 : vector<8x32xf32>
    %1164 = arith.negf %1163 : vector<8x32xf32>
    %1165 = math.exp %1164 : vector<8x32xf32>
    %cst_325 = arith.constant 1.000000e+00 : f32
    %1166 = vector.broadcast %cst_325 : f32 to vector<8x32xf32>
    %1167 = arith.addf %1166, %1165 : vector<8x32xf32>
    %1168 = arith.divf %1166, %1167 : vector<8x32xf32>
    %1169 = vector.extract_strided_slice %1158 {offsets = [0, 32], sizes = [8, 32], strides = [1, 1]} : vector<8x96xf32> to vector<8x32xf32>
    %1170 = vector.extract_strided_slice %1160 {offsets = [0, 32], sizes = [8, 32], strides = [1, 1]} : vector<8x96xf32> to vector<8x32xf32>
    %1171 = arith.addf %1169, %1170 : vector<8x32xf32>
    %1172 = arith.negf %1171 : vector<8x32xf32>
    %1173 = math.exp %1172 : vector<8x32xf32>
    %cst_326 = arith.constant 1.000000e+00 : f32
    %1174 = vector.broadcast %cst_326 : f32 to vector<8x32xf32>
    %1175 = arith.addf %1174, %1173 : vector<8x32xf32>
    %1176 = arith.divf %1174, %1175 : vector<8x32xf32>
    %1177 = vector.extract_strided_slice %1158 {offsets = [0, 64], sizes = [8, 32], strides = [1, 1]} : vector<8x96xf32> to vector<8x32xf32>
    %1178 = vector.extract_strided_slice %1160 {offsets = [0, 64], sizes = [8, 32], strides = [1, 1]} : vector<8x96xf32> to vector<8x32xf32>
    %1179 = vector.broadcast %1021 : vector<1x32xf32> to vector<8x32xf32>
    %1180 = arith.addf %1178, %1179 : vector<8x32xf32>
    %1181 = arith.mulf %1168, %1180 : vector<8x32xf32>
    %1182 = arith.addf %1177, %1181 : vector<8x32xf32>
    %1183 = math.tanh %1182 : vector<8x32xf32>
    %cst_327 = arith.constant 1.000000e+00 : f32
    %1184 = vector.broadcast %cst_327 : f32 to vector<8x32xf32>
    %1185 = arith.subf %1184, %1176 : vector<8x32xf32>
    %1186 = arith.mulf %1185, %1183 : vector<8x32xf32>
    %1187 = arith.mulf %1176, %1122 : vector<8x32xf32>
    %1188 = arith.addf %1186, %1187 : vector<8x32xf32>
    %cst_328 = arith.constant dense<0.000000e+00> : vector<8x96xf32>
    %1189 = tpu.matmul %1151, %1019, %cst_328 {dimension_numbers = #tpu.dot_dimension_numbers<[1], [0], [0], [1], [0, 0, 1, 1], [], []>} : vector<8x32xf32>, vector<32x96xf32>, vector<8x96xf32> -> vector<8x96xf32>
    %1190 = vector.extract_strided_slice %1159 {offsets = [0, 0], sizes = [8, 32], strides = [1, 1]} : vector<8x96xf32> to vector<8x32xf32>
    %1191 = vector.extract_strided_slice %1189 {offsets = [0, 0], sizes = [8, 32], strides = [1, 1]} : vector<8x96xf32> to vector<8x32xf32>
    %1192 = arith.addf %1190, %1191 : vector<8x32xf32>
    %1193 = arith.negf %1192 : vector<8x32xf32>
    %1194 = math.exp %1193 : vector<8x32xf32>
    %cst_329 = arith.constant 1.000000e+00 : f32
    %1195 = vector.broadcast %cst_329 : f32 to vector<8x32xf32>
    %1196 = arith.addf %1195, %1194 : vector<8x32xf32>
    %1197 = arith.divf %1195, %1196 : vector<8x32xf32>
    %1198 = vector.extract_strided_slice %1159 {offsets = [0, 32], sizes = [8, 32], strides = [1, 1]} : vector<8x96xf32> to vector<8x32xf32>
    %1199 = vector.extract_strided_slice %1189 {offsets = [0, 32], sizes = [8, 32], strides = [1, 1]} : vector<8x96xf32> to vector<8x32xf32>
    %1200 = arith.addf %1198, %1199 : vector<8x32xf32>
    %1201 = arith.negf %1200 : vector<8x32xf32>
    %1202 = math.exp %1201 : vector<8x32xf32>
    %cst_330 = arith.constant 1.000000e+00 : f32
    %1203 = vector.broadcast %cst_330 : f32 to vector<8x32xf32>
    %1204 = arith.addf %1203, %1202 : vector<8x32xf32>
    %1205 = arith.divf %1203, %1204 : vector<8x32xf32>
    %1206 = vector.extract_strided_slice %1159 {offsets = [0, 64], sizes = [8, 32], strides = [1, 1]} : vector<8x96xf32> to vector<8x32xf32>
    %1207 = vector.extract_strided_slice %1189 {offsets = [0, 64], sizes = [8, 32], strides = [1, 1]} : vector<8x96xf32> to vector<8x32xf32>
    %1208 = vector.broadcast %1023 : vector<1x32xf32> to vector<8x32xf32>
    %1209 = arith.addf %1207, %1208 : vector<8x32xf32>
    %1210 = arith.mulf %1197, %1209 : vector<8x32xf32>
    %1211 = arith.addf %1206, %1210 : vector<8x32xf32>
    %1212 = math.tanh %1211 : vector<8x32xf32>
    %cst_331 = arith.constant 1.000000e+00 : f32
    %1213 = vector.broadcast %cst_331 : f32 to vector<8x32xf32>
    %1214 = arith.subf %1213, %1205 : vector<8x32xf32>
    %1215 = arith.mulf %1214, %1212 : vector<8x32xf32>
    %1216 = arith.mulf %1205, %1151 : vector<8x32xf32>
    %1217 = arith.addf %1215, %1216 : vector<8x32xf32>
    %cst_332 = arith.constant 0.000000e+00 : f32
    %1218 = vector.broadcast %cst_332 : f32 to vector<8x32xf32>
    %1219 = arith.maximumf %1188, %1218 : vector<8x32xf32>
    %cst_333 = arith.constant 0.000000e+00 : f32
    %1220 = vector.broadcast %cst_333 : f32 to vector<8x32xf32>
    %1221 = arith.maximumf %1217, %1220 : vector<8x32xf32>
    %c16_334 = arith.constant 16 : index
    %c0_335 = arith.constant 0 : index
    %1222 = vector.load %arg14[%c16_334, %c0_335] : memref<128x64xf32, #tpu.memory_space<vmem>>, vector<8x32xf32>
    tpu.vector_store %arg14[%c16_334, %c0_335], %1219 {strides = array<i32>} : memref<128x64xf32, #tpu.memory_space<vmem>>, vector<8x32xf32>,
    %c104_336 = arith.constant 104 : index
    %c32_337 = arith.constant 32 : index
    %1223 = vector.load %arg14[%c104_336, %c32_337] : memref<128x64xf32, #tpu.memory_space<vmem>>, vector<8x32xf32>
    tpu.vector_store %arg14[%c104_336, %c32_337], %1221 {strides = array<i32>} : memref<128x64xf32, #tpu.memory_space<vmem>>, vector<8x32xf32>,
    %c24_338 = arith.constant 24 : index
    %c0_339 = arith.constant 0 : index
    %1224 = vector.load %arg15[%c24_338, %c0_339] : memref<128x192xf32, #tpu.memory_space<vmem>>, vector<8x96xf32>
    %c96_340 = arith.constant 96 : index
    %c96_341 = arith.constant 96 : index
    %1225 = vector.load %arg15[%c96_340, %c96_341] : memref<128x192xf32, #tpu.memory_space<vmem>>, vector<8x96xf32>
    %cst_342 = arith.constant dense<0.000000e+00> : vector<8x96xf32>
    %1226 = tpu.matmul %1188, %1017, %cst_342 {dimension_numbers = #tpu.dot_dimension_numbers<[1], [0], [0], [1], [0, 0, 1, 1], [], []>} : vector<8x32xf32>, vector<32x96xf32>, vector<8x96xf32> -> vector<8x96xf32>
    %1227 = vector.extract_strided_slice %1224 {offsets = [0, 0], sizes = [8, 32], strides = [1, 1]} : vector<8x96xf32> to vector<8x32xf32>
    %1228 = vector.extract_strided_slice %1226 {offsets = [0, 0], sizes = [8, 32], strides = [1, 1]} : vector<8x96xf32> to vector<8x32xf32>
    %1229 = arith.addf %1227, %1228 : vector<8x32xf32>
    %1230 = arith.negf %1229 : vector<8x32xf32>
    %1231 = math.exp %1230 : vector<8x32xf32>
    %cst_343 = arith.constant 1.000000e+00 : f32
    %1232 = vector.broadcast %cst_343 : f32 to vector<8x32xf32>
    %1233 = arith.addf %1232, %1231 : vector<8x32xf32>
    %1234 = arith.divf %1232, %1233 : vector<8x32xf32>
    %1235 = vector.extract_strided_slice %1224 {offsets = [0, 32], sizes = [8, 32], strides = [1, 1]} : vector<8x96xf32> to vector<8x32xf32>
    %1236 = vector.extract_strided_slice %1226 {offsets = [0, 32], sizes = [8, 32], strides = [1, 1]} : vector<8x96xf32> to vector<8x32xf32>
    %1237 = arith.addf %1235, %1236 : vector<8x32xf32>
    %1238 = arith.negf %1237 : vector<8x32xf32>
    %1239 = math.exp %1238 : vector<8x32xf32>
    %cst_344 = arith.constant 1.000000e+00 : f32
    %1240 = vector.broadcast %cst_344 : f32 to vector<8x32xf32>
    %1241 = arith.addf %1240, %1239 : vector<8x32xf32>
    %1242 = arith.divf %1240, %1241 : vector<8x32xf32>
    %1243 = vector.extract_strided_slice %1224 {offsets = [0, 64], sizes = [8, 32], strides = [1, 1]} : vector<8x96xf32> to vector<8x32xf32>
    %1244 = vector.extract_strided_slice %1226 {offsets = [0, 64], sizes = [8, 32], strides = [1, 1]} : vector<8x96xf32> to vector<8x32xf32>
    %1245 = vector.broadcast %1021 : vector<1x32xf32> to vector<8x32xf32>
    %1246 = arith.addf %1244, %1245 : vector<8x32xf32>
    %1247 = arith.mulf %1234, %1246 : vector<8x32xf32>
    %1248 = arith.addf %1243, %1247 : vector<8x32xf32>
    %1249 = math.tanh %1248 : vector<8x32xf32>
    %cst_345 = arith.constant 1.000000e+00 : f32
    %1250 = vector.broadcast %cst_345 : f32 to vector<8x32xf32>
    %1251 = arith.subf %1250, %1242 : vector<8x32xf32>
    %1252 = arith.mulf %1251, %1249 : vector<8x32xf32>
    %1253 = arith.mulf %1242, %1188 : vector<8x32xf32>
    %1254 = arith.addf %1252, %1253 : vector<8x32xf32>
    %cst_346 = arith.constant dense<0.000000e+00> : vector<8x96xf32>
    %1255 = tpu.matmul %1217, %1019, %cst_346 {dimension_numbers = #tpu.dot_dimension_numbers<[1], [0], [0], [1], [0, 0, 1, 1], [], []>} : vector<8x32xf32>, vector<32x96xf32>, vector<8x96xf32> -> vector<8x96xf32>
    %1256 = vector.extract_strided_slice %1225 {offsets = [0, 0], sizes = [8, 32], strides = [1, 1]} : vector<8x96xf32> to vector<8x32xf32>
    %1257 = vector.extract_strided_slice %1255 {offsets = [0, 0], sizes = [8, 32], strides = [1, 1]} : vector<8x96xf32> to vector<8x32xf32>
    %1258 = arith.addf %1256, %1257 : vector<8x32xf32>
    %1259 = arith.negf %1258 : vector<8x32xf32>
    %1260 = math.exp %1259 : vector<8x32xf32>
    %cst_347 = arith.constant 1.000000e+00 : f32
    %1261 = vector.broadcast %cst_347 : f32 to vector<8x32xf32>
    %1262 = arith.addf %1261, %1260 : vector<8x32xf32>
    %1263 = arith.divf %1261, %1262 : vector<8x32xf32>
    %1264 = vector.extract_strided_slice %1225 {offsets = [0, 32], sizes = [8, 32], strides = [1, 1]} : vector<8x96xf32> to vector<8x32xf32>
    %1265 = vector.extract_strided_slice %1255 {offsets = [0, 32], sizes = [8, 32], strides = [1, 1]} : vector<8x96xf32> to vector<8x32xf32>
    %1266 = arith.addf %1264, %1265 : vector<8x32xf32>
    %1267 = arith.negf %1266 : vector<8x32xf32>
    %1268 = math.exp %1267 : vector<8x32xf32>
    %cst_348 = arith.constant 1.000000e+00 : f32
    %1269 = vector.broadcast %cst_348 : f32 to vector<8x32xf32>
    %1270 = arith.addf %1269, %1268 : vector<8x32xf32>
    %1271 = arith.divf %1269, %1270 : vector<8x32xf32>
    %1272 = vector.extract_strided_slice %1225 {offsets = [0, 64], sizes = [8, 32], strides = [1, 1]} : vector<8x96xf32> to vector<8x32xf32>
    %1273 = vector.extract_strided_slice %1255 {offsets = [0, 64], sizes = [8, 32], strides = [1, 1]} : vector<8x96xf32> to vector<8x32xf32>
    %1274 = vector.broadcast %1023 : vector<1x32xf32> to vector<8x32xf32>
    %1275 = arith.addf %1273, %1274 : vector<8x32xf32>
    %1276 = arith.mulf %1263, %1275 : vector<8x32xf32>
    %1277 = arith.addf %1272, %1276 : vector<8x32xf32>
    %1278 = math.tanh %1277 : vector<8x32xf32>
    %cst_349 = arith.constant 1.000000e+00 : f32
    %1279 = vector.broadcast %cst_349 : f32 to vector<8x32xf32>
    %1280 = arith.subf %1279, %1271 : vector<8x32xf32>
    %1281 = arith.mulf %1280, %1278 : vector<8x32xf32>
    %1282 = arith.mulf %1271, %1217 : vector<8x32xf32>
    %1283 = arith.addf %1281, %1282 : vector<8x32xf32>
    %cst_350 = arith.constant 0.000000e+00 : f32
    %1284 = vector.broadcast %cst_350 : f32 to vector<8x32xf32>
    %1285 = arith.maximumf %1254, %1284 : vector<8x32xf32>
    %cst_351 = arith.constant 0.000000e+00 : f32
    %1286 = vector.broadcast %cst_351 : f32 to vector<8x32xf32>
    %1287 = arith.maximumf %1283, %1286 : vector<8x32xf32>
    %c24_352 = arith.constant 24 : index
    %c0_353 = arith.constant 0 : index
    %1288 = vector.load %arg14[%c24_352, %c0_353] : memref<128x64xf32, #tpu.memory_space<vmem>>, vector<8x32xf32>
    tpu.vector_store %arg14[%c24_352, %c0_353], %1285 {strides = array<i32>} : memref<128x64xf32, #tpu.memory_space<vmem>>, vector<8x32xf32>,
    %c96_354 = arith.constant 96 : index
    %c32_355 = arith.constant 32 : index
    %1289 = vector.load %arg14[%c96_354, %c32_355] : memref<128x64xf32, #tpu.memory_space<vmem>>, vector<8x32xf32>
    tpu.vector_store %arg14[%c96_354, %c32_355], %1287 {strides = array<i32>} : memref<128x64xf32, #tpu.memory_space<vmem>>, vector<8x32xf32>,
    %c32_356 = arith.constant 32 : index
    %c0_357 = arith.constant 0 : index
    %1290 = vector.load %arg15[%c32_356, %c0_357] : memref<128x192xf32, #tpu.memory_space<vmem>>, vector<8x96xf32>
    %c88_358 = arith.constant 88 : index
    %c96_359 = arith.constant 96 : index
    %1291 = vector.load %arg15[%c88_358, %c96_359] : memref<128x192xf32, #tpu.memory_space<vmem>>, vector<8x96xf32>
    %cst_360 = arith.constant dense<0.000000e+00> : vector<8x96xf32>
    %1292 = tpu.matmul %1254, %1017, %cst_360 {dimension_numbers = #tpu.dot_dimension_numbers<[1], [0], [0], [1], [0, 0, 1, 1], [], []>} : vector<8x32xf32>, vector<32x96xf32>, vector<8x96xf32> -> vector<8x96xf32>
    %1293 = vector.extract_strided_slice %1290 {offsets = [0, 0], sizes = [8, 32], strides = [1, 1]} : vector<8x96xf32> to vector<8x32xf32>
    %1294 = vector.extract_strided_slice %1292 {offsets = [0, 0], sizes = [8, 32], strides = [1, 1]} : vector<8x96xf32> to vector<8x32xf32>
    %1295 = arith.addf %1293, %1294 : vector<8x32xf32>
    %1296 = arith.negf %1295 : vector<8x32xf32>
    %1297 = math.exp %1296 : vector<8x32xf32>
    %cst_361 = arith.constant 1.000000e+00 : f32
    %1298 = vector.broadcast %cst_361 : f32 to vector<8x32xf32>
    %1299 = arith.addf %1298, %1297 : vector<8x32xf32>
    %1300 = arith.divf %1298, %1299 : vector<8x32xf32>
    %1301 = vector.extract_strided_slice %1290 {offsets = [0, 32], sizes = [8, 32], strides = [1, 1]} : vector<8x96xf32> to vector<8x32xf32>
    %1302 = vector.extract_strided_slice %1292 {offsets = [0, 32], sizes = [8, 32], strides = [1, 1]} : vector<8x96xf32> to vector<8x32xf32>
    %1303 = arith.addf %1301, %1302 : vector<8x32xf32>
    %1304 = arith.negf %1303 : vector<8x32xf32>
    %1305 = math.exp %1304 : vector<8x32xf32>
    %cst_362 = arith.constant 1.000000e+00 : f32
    %1306 = vector.broadcast %cst_362 : f32 to vector<8x32xf32>
    %1307 = arith.addf %1306, %1305 : vector<8x32xf32>
    %1308 = arith.divf %1306, %1307 : vector<8x32xf32>
    %1309 = vector.extract_strided_slice %1290 {offsets = [0, 64], sizes = [8, 32], strides = [1, 1]} : vector<8x96xf32> to vector<8x32xf32>
    %1310 = vector.extract_strided_slice %1292 {offsets = [0, 64], sizes = [8, 32], strides = [1, 1]} : vector<8x96xf32> to vector<8x32xf32>
    %1311 = vector.broadcast %1021 : vector<1x32xf32> to vector<8x32xf32>
    %1312 = arith.addf %1310, %1311 : vector<8x32xf32>
    %1313 = arith.mulf %1300, %1312 : vector<8x32xf32>
    %1314 = arith.addf %1309, %1313 : vector<8x32xf32>
    %1315 = math.tanh %1314 : vector<8x32xf32>
    %cst_363 = arith.constant 1.000000e+00 : f32
    %1316 = vector.broadcast %cst_363 : f32 to vector<8x32xf32>
    %1317 = arith.subf %1316, %1308 : vector<8x32xf32>
    %1318 = arith.mulf %1317, %1315 : vector<8x32xf32>
    %1319 = arith.mulf %1308, %1254 : vector<8x32xf32>
    %1320 = arith.addf %1318, %1319 : vector<8x32xf32>
    %cst_364 = arith.constant dense<0.000000e+00> : vector<8x96xf32>
    %1321 = tpu.matmul %1283, %1019, %cst_364 {dimension_numbers = #tpu.dot_dimension_numbers<[1], [0], [0], [1], [0, 0, 1, 1], [], []>} : vector<8x32xf32>, vector<32x96xf32>, vector<8x96xf32> -> vector<8x96xf32>
    %1322 = vector.extract_strided_slice %1291 {offsets = [0, 0], sizes = [8, 32], strides = [1, 1]} : vector<8x96xf32> to vector<8x32xf32>
    %1323 = vector.extract_strided_slice %1321 {offsets = [0, 0], sizes = [8, 32], strides = [1, 1]} : vector<8x96xf32> to vector<8x32xf32>
    %1324 = arith.addf %1322, %1323 : vector<8x32xf32>
    %1325 = arith.negf %1324 : vector<8x32xf32>
    %1326 = math.exp %1325 : vector<8x32xf32>
    %cst_365 = arith.constant 1.000000e+00 : f32
    %1327 = vector.broadcast %cst_365 : f32 to vector<8x32xf32>
    %1328 = arith.addf %1327, %1326 : vector<8x32xf32>
    %1329 = arith.divf %1327, %1328 : vector<8x32xf32>
    %1330 = vector.extract_strided_slice %1291 {offsets = [0, 32], sizes = [8, 32], strides = [1, 1]} : vector<8x96xf32> to vector<8x32xf32>
    %1331 = vector.extract_strided_slice %1321 {offsets = [0, 32], sizes = [8, 32], strides = [1, 1]} : vector<8x96xf32> to vector<8x32xf32>
    %1332 = arith.addf %1330, %1331 : vector<8x32xf32>
    %1333 = arith.negf %1332 : vector<8x32xf32>
    %1334 = math.exp %1333 : vector<8x32xf32>
    %cst_366 = arith.constant 1.000000e+00 : f32
    %1335 = vector.broadcast %cst_366 : f32 to vector<8x32xf32>
    %1336 = arith.addf %1335, %1334 : vector<8x32xf32>
    %1337 = arith.divf %1335, %1336 : vector<8x32xf32>
    %1338 = vector.extract_strided_slice %1291 {offsets = [0, 64], sizes = [8, 32], strides = [1, 1]} : vector<8x96xf32> to vector<8x32xf32>
    %1339 = vector.extract_strided_slice %1321 {offsets = [0, 64], sizes = [8, 32], strides = [1, 1]} : vector<8x96xf32> to vector<8x32xf32>
    %1340 = vector.broadcast %1023 : vector<1x32xf32> to vector<8x32xf32>
    %1341 = arith.addf %1339, %1340 : vector<8x32xf32>
    %1342 = arith.mulf %1329, %1341 : vector<8x32xf32>
    %1343 = arith.addf %1338, %1342 : vector<8x32xf32>
    %1344 = math.tanh %1343 : vector<8x32xf32>
    %cst_367 = arith.constant 1.000000e+00 : f32
    %1345 = vector.broadcast %cst_367 : f32 to vector<8x32xf32>
    %1346 = arith.subf %1345, %1337 : vector<8x32xf32>
    %1347 = arith.mulf %1346, %1344 : vector<8x32xf32>
    %1348 = arith.mulf %1337, %1283 : vector<8x32xf32>
    %1349 = arith.addf %1347, %1348 : vector<8x32xf32>
    %cst_368 = arith.constant 0.000000e+00 : f32
    %1350 = vector.broadcast %cst_368 : f32 to vector<8x32xf32>
    %1351 = arith.maximumf %1320, %1350 : vector<8x32xf32>
    %cst_369 = arith.constant 0.000000e+00 : f32
    %1352 = vector.broadcast %cst_369 : f32 to vector<8x32xf32>
    %1353 = arith.maximumf %1349, %1352 : vector<8x32xf32>
    %c32_370 = arith.constant 32 : index
    %c0_371 = arith.constant 0 : index
    %1354 = vector.load %arg14[%c32_370, %c0_371] : memref<128x64xf32, #tpu.memory_space<vmem>>, vector<8x32xf32>
    tpu.vector_store %arg14[%c32_370, %c0_371], %1351 {strides = array<i32>} : memref<128x64xf32, #tpu.memory_space<vmem>>, vector<8x32xf32>,
    %c88_372 = arith.constant 88 : index
    %c32_373 = arith.constant 32 : index
    %1355 = vector.load %arg14[%c88_372, %c32_373] : memref<128x64xf32, #tpu.memory_space<vmem>>, vector<8x32xf32>
    tpu.vector_store %arg14[%c88_372, %c32_373], %1353 {strides = array<i32>} : memref<128x64xf32, #tpu.memory_space<vmem>>, vector<8x32xf32>,
    %c40_374 = arith.constant 40 : index
    %c0_375 = arith.constant 0 : index
    %1356 = vector.load %arg15[%c40_374, %c0_375] : memref<128x192xf32, #tpu.memory_space<vmem>>, vector<8x96xf32>
    %c80_376 = arith.constant 80 : index
    %c96_377 = arith.constant 96 : index
    %1357 = vector.load %arg15[%c80_376, %c96_377] : memref<128x192xf32, #tpu.memory_space<vmem>>, vector<8x96xf32>
    %cst_378 = arith.constant dense<0.000000e+00> : vector<8x96xf32>
    %1358 = tpu.matmul %1320, %1017, %cst_378 {dimension_numbers = #tpu.dot_dimension_numbers<[1], [0], [0], [1], [0, 0, 1, 1], [], []>} : vector<8x32xf32>, vector<32x96xf32>, vector<8x96xf32> -> vector<8x96xf32>
    %1359 = vector.extract_strided_slice %1356 {offsets = [0, 0], sizes = [8, 32], strides = [1, 1]} : vector<8x96xf32> to vector<8x32xf32>
    %1360 = vector.extract_strided_slice %1358 {offsets = [0, 0], sizes = [8, 32], strides = [1, 1]} : vector<8x96xf32> to vector<8x32xf32>
    %1361 = arith.addf %1359, %1360 : vector<8x32xf32>
    %1362 = arith.negf %1361 : vector<8x32xf32>
    %1363 = math.exp %1362 : vector<8x32xf32>
    %cst_379 = arith.constant 1.000000e+00 : f32
    %1364 = vector.broadcast %cst_379 : f32 to vector<8x32xf32>
    %1365 = arith.addf %1364, %1363 : vector<8x32xf32>
    %1366 = arith.divf %1364, %1365 : vector<8x32xf32>
    %1367 = vector.extract_strided_slice %1356 {offsets = [0, 32], sizes = [8, 32], strides = [1, 1]} : vector<8x96xf32> to vector<8x32xf32>
    %1368 = vector.extract_strided_slice %1358 {offsets = [0, 32], sizes = [8, 32], strides = [1, 1]} : vector<8x96xf32> to vector<8x32xf32>
    %1369 = arith.addf %1367, %1368 : vector<8x32xf32>
    %1370 = arith.negf %1369 : vector<8x32xf32>
    %1371 = math.exp %1370 : vector<8x32xf32>
    %cst_380 = arith.constant 1.000000e+00 : f32
    %1372 = vector.broadcast %cst_380 : f32 to vector<8x32xf32>
    %1373 = arith.addf %1372, %1371 : vector<8x32xf32>
    %1374 = arith.divf %1372, %1373 : vector<8x32xf32>
    %1375 = vector.extract_strided_slice %1356 {offsets = [0, 64], sizes = [8, 32], strides = [1, 1]} : vector<8x96xf32> to vector<8x32xf32>
    %1376 = vector.extract_strided_slice %1358 {offsets = [0, 64], sizes = [8, 32], strides = [1, 1]} : vector<8x96xf32> to vector<8x32xf32>
    %1377 = vector.broadcast %1021 : vector<1x32xf32> to vector<8x32xf32>
    %1378 = arith.addf %1376, %1377 : vector<8x32xf32>
    %1379 = arith.mulf %1366, %1378 : vector<8x32xf32>
    %1380 = arith.addf %1375, %1379 : vector<8x32xf32>
    %1381 = math.tanh %1380 : vector<8x32xf32>
    %cst_381 = arith.constant 1.000000e+00 : f32
    %1382 = vector.broadcast %cst_381 : f32 to vector<8x32xf32>
    %1383 = arith.subf %1382, %1374 : vector<8x32xf32>
    %1384 = arith.mulf %1383, %1381 : vector<8x32xf32>
    %1385 = arith.mulf %1374, %1320 : vector<8x32xf32>
    %1386 = arith.addf %1384, %1385 : vector<8x32xf32>
    %cst_382 = arith.constant dense<0.000000e+00> : vector<8x96xf32>
    %1387 = tpu.matmul %1349, %1019, %cst_382 {dimension_numbers = #tpu.dot_dimension_numbers<[1], [0], [0], [1], [0, 0, 1, 1], [], []>} : vector<8x32xf32>, vector<32x96xf32>, vector<8x96xf32> -> vector<8x96xf32>
    %1388 = vector.extract_strided_slice %1357 {offsets = [0, 0], sizes = [8, 32], strides = [1, 1]} : vector<8x96xf32> to vector<8x32xf32>
    %1389 = vector.extract_strided_slice %1387 {offsets = [0, 0], sizes = [8, 32], strides = [1, 1]} : vector<8x96xf32> to vector<8x32xf32>
    %1390 = arith.addf %1388, %1389 : vector<8x32xf32>
    %1391 = arith.negf %1390 : vector<8x32xf32>
    %1392 = math.exp %1391 : vector<8x32xf32>
    %cst_383 = arith.constant 1.000000e+00 : f32
    %1393 = vector.broadcast %cst_383 : f32 to vector<8x32xf32>
    %1394 = arith.addf %1393, %1392 : vector<8x32xf32>
    %1395 = arith.divf %1393, %1394 : vector<8x32xf32>
    %1396 = vector.extract_strided_slice %1357 {offsets = [0, 32], sizes = [8, 32], strides = [1, 1]} : vector<8x96xf32> to vector<8x32xf32>
    %1397 = vector.extract_strided_slice %1387 {offsets = [0, 32], sizes = [8, 32], strides = [1, 1]} : vector<8x96xf32> to vector<8x32xf32>
    %1398 = arith.addf %1396, %1397 : vector<8x32xf32>
    %1399 = arith.negf %1398 : vector<8x32xf32>
    %1400 = math.exp %1399 : vector<8x32xf32>
    %cst_384 = arith.constant 1.000000e+00 : f32
    %1401 = vector.broadcast %cst_384 : f32 to vector<8x32xf32>
    %1402 = arith.addf %1401, %1400 : vector<8x32xf32>
    %1403 = arith.divf %1401, %1402 : vector<8x32xf32>
    %1404 = vector.extract_strided_slice %1357 {offsets = [0, 64], sizes = [8, 32], strides = [1, 1]} : vector<8x96xf32> to vector<8x32xf32>
    %1405 = vector.extract_strided_slice %1387 {offsets = [0, 64], sizes = [8, 32], strides = [1, 1]} : vector<8x96xf32> to vector<8x32xf32>
    %1406 = vector.broadcast %1023 : vector<1x32xf32> to vector<8x32xf32>
    %1407 = arith.addf %1405, %1406 : vector<8x32xf32>
    %1408 = arith.mulf %1395, %1407 : vector<8x32xf32>
    %1409 = arith.addf %1404, %1408 : vector<8x32xf32>
    %1410 = math.tanh %1409 : vector<8x32xf32>
    %cst_385 = arith.constant 1.000000e+00 : f32
    %1411 = vector.broadcast %cst_385 : f32 to vector<8x32xf32>
    %1412 = arith.subf %1411, %1403 : vector<8x32xf32>
    %1413 = arith.mulf %1412, %1410 : vector<8x32xf32>
    %1414 = arith.mulf %1403, %1349 : vector<8x32xf32>
    %1415 = arith.addf %1413, %1414 : vector<8x32xf32>
    %cst_386 = arith.constant 0.000000e+00 : f32
    %1416 = vector.broadcast %cst_386 : f32 to vector<8x32xf32>
    %1417 = arith.maximumf %1386, %1416 : vector<8x32xf32>
    %cst_387 = arith.constant 0.000000e+00 : f32
    %1418 = vector.broadcast %cst_387 : f32 to vector<8x32xf32>
    %1419 = arith.maximumf %1415, %1418 : vector<8x32xf32>
    %c40_388 = arith.constant 40 : index
    %c0_389 = arith.constant 0 : index
    %1420 = vector.load %arg14[%c40_388, %c0_389] : memref<128x64xf32, #tpu.memory_space<vmem>>, vector<8x32xf32>
    tpu.vector_store %arg14[%c40_388, %c0_389], %1417 {strides = array<i32>} : memref<128x64xf32, #tpu.memory_space<vmem>>, vector<8x32xf32>,
    %c80_390 = arith.constant 80 : index
    %c32_391 = arith.constant 32 : index
    %1421 = vector.load %arg14[%c80_390, %c32_391] : memref<128x64xf32, #tpu.memory_space<vmem>>, vector<8x32xf32>
    tpu.vector_store %arg14[%c80_390, %c32_391], %1419 {strides = array<i32>} : memref<128x64xf32, #tpu.memory_space<vmem>>, vector<8x32xf32>,
    %c48_392 = arith.constant 48 : index
    %c0_393 = arith.constant 0 : index
    %1422 = vector.load %arg15[%c48_392, %c0_393] : memref<128x192xf32, #tpu.memory_space<vmem>>, vector<8x96xf32>
    %c72_394 = arith.constant 72 : index
    %c96_395 = arith.constant 96 : index
    %1423 = vector.load %arg15[%c72_394, %c96_395] : memref<128x192xf32, #tpu.memory_space<vmem>>, vector<8x96xf32>
    %cst_396 = arith.constant dense<0.000000e+00> : vector<8x96xf32>
    %1424 = tpu.matmul %1386, %1017, %cst_396 {dimension_numbers = #tpu.dot_dimension_numbers<[1], [0], [0], [1], [0, 0, 1, 1], [], []>} : vector<8x32xf32>, vector<32x96xf32>, vector<8x96xf32> -> vector<8x96xf32>
    %1425 = vector.extract_strided_slice %1422 {offsets = [0, 0], sizes = [8, 32], strides = [1, 1]} : vector<8x96xf32> to vector<8x32xf32>
    %1426 = vector.extract_strided_slice %1424 {offsets = [0, 0], sizes = [8, 32], strides = [1, 1]} : vector<8x96xf32> to vector<8x32xf32>
    %1427 = arith.addf %1425, %1426 : vector<8x32xf32>
    %1428 = arith.negf %1427 : vector<8x32xf32>
    %1429 = math.exp %1428 : vector<8x32xf32>
    %cst_397 = arith.constant 1.000000e+00 : f32
    %1430 = vector.broadcast %cst_397 : f32 to vector<8x32xf32>
    %1431 = arith.addf %1430, %1429 : vector<8x32xf32>
    %1432 = arith.divf %1430, %1431 : vector<8x32xf32>
    %1433 = vector.extract_strided_slice %1422 {offsets = [0, 32], sizes = [8, 32], strides = [1, 1]} : vector<8x96xf32> to vector<8x32xf32>
    %1434 = vector.extract_strided_slice %1424 {offsets = [0, 32], sizes = [8, 32], strides = [1, 1]} : vector<8x96xf32> to vector<8x32xf32>
    %1435 = arith.addf %1433, %1434 : vector<8x32xf32>
    %1436 = arith.negf %1435 : vector<8x32xf32>
    %1437 = math.exp %1436 : vector<8x32xf32>
    %cst_398 = arith.constant 1.000000e+00 : f32
    %1438 = vector.broadcast %cst_398 : f32 to vector<8x32xf32>
    %1439 = arith.addf %1438, %1437 : vector<8x32xf32>
    %1440 = arith.divf %1438, %1439 : vector<8x32xf32>
    %1441 = vector.extract_strided_slice %1422 {offsets = [0, 64], sizes = [8, 32], strides = [1, 1]} : vector<8x96xf32> to vector<8x32xf32>
    %1442 = vector.extract_strided_slice %1424 {offsets = [0, 64], sizes = [8, 32], strides = [1, 1]} : vector<8x96xf32> to vector<8x32xf32>
    %1443 = vector.broadcast %1021 : vector<1x32xf32> to vector<8x32xf32>
    %1444 = arith.addf %1442, %1443 : vector<8x32xf32>
    %1445 = arith.mulf %1432, %1444 : vector<8x32xf32>
    %1446 = arith.addf %1441, %1445 : vector<8x32xf32>
    %1447 = math.tanh %1446 : vector<8x32xf32>
    %cst_399 = arith.constant 1.000000e+00 : f32
    %1448 = vector.broadcast %cst_399 : f32 to vector<8x32xf32>
    %1449 = arith.subf %1448, %1440 : vector<8x32xf32>
    %1450 = arith.mulf %1449, %1447 : vector<8x32xf32>
    %1451 = arith.mulf %1440, %1386 : vector<8x32xf32>
    %1452 = arith.addf %1450, %1451 : vector<8x32xf32>
    %cst_400 = arith.constant dense<0.000000e+00> : vector<8x96xf32>
    %1453 = tpu.matmul %1415, %1019, %cst_400 {dimension_numbers = #tpu.dot_dimension_numbers<[1], [0], [0], [1], [0, 0, 1, 1], [], []>} : vector<8x32xf32>, vector<32x96xf32>, vector<8x96xf32> -> vector<8x96xf32>
    %1454 = vector.extract_strided_slice %1423 {offsets = [0, 0], sizes = [8, 32], strides = [1, 1]} : vector<8x96xf32> to vector<8x32xf32>
    %1455 = vector.extract_strided_slice %1453 {offsets = [0, 0], sizes = [8, 32], strides = [1, 1]} : vector<8x96xf32> to vector<8x32xf32>
    %1456 = arith.addf %1454, %1455 : vector<8x32xf32>
    %1457 = arith.negf %1456 : vector<8x32xf32>
    %1458 = math.exp %1457 : vector<8x32xf32>
    %cst_401 = arith.constant 1.000000e+00 : f32
    %1459 = vector.broadcast %cst_401 : f32 to vector<8x32xf32>
    %1460 = arith.addf %1459, %1458 : vector<8x32xf32>
    %1461 = arith.divf %1459, %1460 : vector<8x32xf32>
    %1462 = vector.extract_strided_slice %1423 {offsets = [0, 32], sizes = [8, 32], strides = [1, 1]} : vector<8x96xf32> to vector<8x32xf32>
    %1463 = vector.extract_strided_slice %1453 {offsets = [0, 32], sizes = [8, 32], strides = [1, 1]} : vector<8x96xf32> to vector<8x32xf32>
    %1464 = arith.addf %1462, %1463 : vector<8x32xf32>
    %1465 = arith.negf %1464 : vector<8x32xf32>
    %1466 = math.exp %1465 : vector<8x32xf32>
    %cst_402 = arith.constant 1.000000e+00 : f32
    %1467 = vector.broadcast %cst_402 : f32 to vector<8x32xf32>
    %1468 = arith.addf %1467, %1466 : vector<8x32xf32>
    %1469 = arith.divf %1467, %1468 : vector<8x32xf32>
    %1470 = vector.extract_strided_slice %1423 {offsets = [0, 64], sizes = [8, 32], strides = [1, 1]} : vector<8x96xf32> to vector<8x32xf32>
    %1471 = vector.extract_strided_slice %1453 {offsets = [0, 64], sizes = [8, 32], strides = [1, 1]} : vector<8x96xf32> to vector<8x32xf32>
    %1472 = vector.broadcast %1023 : vector<1x32xf32> to vector<8x32xf32>
    %1473 = arith.addf %1471, %1472 : vector<8x32xf32>
    %1474 = arith.mulf %1461, %1473 : vector<8x32xf32>
    %1475 = arith.addf %1470, %1474 : vector<8x32xf32>
    %1476 = math.tanh %1475 : vector<8x32xf32>
    %cst_403 = arith.constant 1.000000e+00 : f32
    %1477 = vector.broadcast %cst_403 : f32 to vector<8x32xf32>
    %1478 = arith.subf %1477, %1469 : vector<8x32xf32>
    %1479 = arith.mulf %1478, %1476 : vector<8x32xf32>
    %1480 = arith.mulf %1469, %1415 : vector<8x32xf32>
    %1481 = arith.addf %1479, %1480 : vector<8x32xf32>
    %cst_404 = arith.constant 0.000000e+00 : f32
    %1482 = vector.broadcast %cst_404 : f32 to vector<8x32xf32>
    %1483 = arith.maximumf %1452, %1482 : vector<8x32xf32>
    %cst_405 = arith.constant 0.000000e+00 : f32
    %1484 = vector.broadcast %cst_405 : f32 to vector<8x32xf32>
    %1485 = arith.maximumf %1481, %1484 : vector<8x32xf32>
    %c48_406 = arith.constant 48 : index
    %c0_407 = arith.constant 0 : index
    %1486 = vector.load %arg14[%c48_406, %c0_407] : memref<128x64xf32, #tpu.memory_space<vmem>>, vector<8x32xf32>
    tpu.vector_store %arg14[%c48_406, %c0_407], %1483 {strides = array<i32>} : memref<128x64xf32, #tpu.memory_space<vmem>>, vector<8x32xf32>,
    %c72_408 = arith.constant 72 : index
    %c32_409 = arith.constant 32 : index
    %1487 = vector.load %arg14[%c72_408, %c32_409] : memref<128x64xf32, #tpu.memory_space<vmem>>, vector<8x32xf32>
    tpu.vector_store %arg14[%c72_408, %c32_409], %1485 {strides = array<i32>} : memref<128x64xf32, #tpu.memory_space<vmem>>, vector<8x32xf32>,
    %c56_410 = arith.constant 56 : index
    %c0_411 = arith.constant 0 : index
    %1488 = vector.load %arg15[%c56_410, %c0_411] : memref<128x192xf32, #tpu.memory_space<vmem>>, vector<8x96xf32>
    %c64_412 = arith.constant 64 : index
    %c96_413 = arith.constant 96 : index
    %1489 = vector.load %arg15[%c64_412, %c96_413] : memref<128x192xf32, #tpu.memory_space<vmem>>, vector<8x96xf32>
    %cst_414 = arith.constant dense<0.000000e+00> : vector<8x96xf32>
    %1490 = tpu.matmul %1452, %1017, %cst_414 {dimension_numbers = #tpu.dot_dimension_numbers<[1], [0], [0], [1], [0, 0, 1, 1], [], []>} : vector<8x32xf32>, vector<32x96xf32>, vector<8x96xf32> -> vector<8x96xf32>
    %1491 = vector.extract_strided_slice %1488 {offsets = [0, 0], sizes = [8, 32], strides = [1, 1]} : vector<8x96xf32> to vector<8x32xf32>
    %1492 = vector.extract_strided_slice %1490 {offsets = [0, 0], sizes = [8, 32], strides = [1, 1]} : vector<8x96xf32> to vector<8x32xf32>
    %1493 = arith.addf %1491, %1492 : vector<8x32xf32>
    %1494 = arith.negf %1493 : vector<8x32xf32>
    %1495 = math.exp %1494 : vector<8x32xf32>
    %cst_415 = arith.constant 1.000000e+00 : f32
    %1496 = vector.broadcast %cst_415 : f32 to vector<8x32xf32>
    %1497 = arith.addf %1496, %1495 : vector<8x32xf32>
    %1498 = arith.divf %1496, %1497 : vector<8x32xf32>
    %1499 = vector.extract_strided_slice %1488 {offsets = [0, 32], sizes = [8, 32], strides = [1, 1]} : vector<8x96xf32> to vector<8x32xf32>
    %1500 = vector.extract_strided_slice %1490 {offsets = [0, 32], sizes = [8, 32], strides = [1, 1]} : vector<8x96xf32> to vector<8x32xf32>
    %1501 = arith.addf %1499, %1500 : vector<8x32xf32>
    %1502 = arith.negf %1501 : vector<8x32xf32>
    %1503 = math.exp %1502 : vector<8x32xf32>
    %cst_416 = arith.constant 1.000000e+00 : f32
    %1504 = vector.broadcast %cst_416 : f32 to vector<8x32xf32>
    %1505 = arith.addf %1504, %1503 : vector<8x32xf32>
    %1506 = arith.divf %1504, %1505 : vector<8x32xf32>
    %1507 = vector.extract_strided_slice %1488 {offsets = [0, 64], sizes = [8, 32], strides = [1, 1]} : vector<8x96xf32> to vector<8x32xf32>
    %1508 = vector.extract_strided_slice %1490 {offsets = [0, 64], sizes = [8, 32], strides = [1, 1]} : vector<8x96xf32> to vector<8x32xf32>
    %1509 = vector.broadcast %1021 : vector<1x32xf32> to vector<8x32xf32>
    %1510 = arith.addf %1508, %1509 : vector<8x32xf32>
    %1511 = arith.mulf %1498, %1510 : vector<8x32xf32>
    %1512 = arith.addf %1507, %1511 : vector<8x32xf32>
    %1513 = math.tanh %1512 : vector<8x32xf32>
    %cst_417 = arith.constant 1.000000e+00 : f32
    %1514 = vector.broadcast %cst_417 : f32 to vector<8x32xf32>
    %1515 = arith.subf %1514, %1506 : vector<8x32xf32>
    %1516 = arith.mulf %1515, %1513 : vector<8x32xf32>
    %1517 = arith.mulf %1506, %1452 : vector<8x32xf32>
    %1518 = arith.addf %1516, %1517 : vector<8x32xf32>
    %cst_418 = arith.constant dense<0.000000e+00> : vector<8x96xf32>
    %1519 = tpu.matmul %1481, %1019, %cst_418 {dimension_numbers = #tpu.dot_dimension_numbers<[1], [0], [0], [1], [0, 0, 1, 1], [], []>} : vector<8x32xf32>, vector<32x96xf32>, vector<8x96xf32> -> vector<8x96xf32>
    %1520 = vector.extract_strided_slice %1489 {offsets = [0, 0], sizes = [8, 32], strides = [1, 1]} : vector<8x96xf32> to vector<8x32xf32>
    %1521 = vector.extract_strided_slice %1519 {offsets = [0, 0], sizes = [8, 32], strides = [1, 1]} : vector<8x96xf32> to vector<8x32xf32>
    %1522 = arith.addf %1520, %1521 : vector<8x32xf32>
    %1523 = arith.negf %1522 : vector<8x32xf32>
    %1524 = math.exp %1523 : vector<8x32xf32>
    %cst_419 = arith.constant 1.000000e+00 : f32
    %1525 = vector.broadcast %cst_419 : f32 to vector<8x32xf32>
    %1526 = arith.addf %1525, %1524 : vector<8x32xf32>
    %1527 = arith.divf %1525, %1526 : vector<8x32xf32>
    %1528 = vector.extract_strided_slice %1489 {offsets = [0, 32], sizes = [8, 32], strides = [1, 1]} : vector<8x96xf32> to vector<8x32xf32>
    %1529 = vector.extract_strided_slice %1519 {offsets = [0, 32], sizes = [8, 32], strides = [1, 1]} : vector<8x96xf32> to vector<8x32xf32>
    %1530 = arith.addf %1528, %1529 : vector<8x32xf32>
    %1531 = arith.negf %1530 : vector<8x32xf32>
    %1532 = math.exp %1531 : vector<8x32xf32>
    %cst_420 = arith.constant 1.000000e+00 : f32
    %1533 = vector.broadcast %cst_420 : f32 to vector<8x32xf32>
    %1534 = arith.addf %1533, %1532 : vector<8x32xf32>
    %1535 = arith.divf %1533, %1534 : vector<8x32xf32>
    %1536 = vector.extract_strided_slice %1489 {offsets = [0, 64], sizes = [8, 32], strides = [1, 1]} : vector<8x96xf32> to vector<8x32xf32>
    %1537 = vector.extract_strided_slice %1519 {offsets = [0, 64], sizes = [8, 32], strides = [1, 1]} : vector<8x96xf32> to vector<8x32xf32>
    %1538 = vector.broadcast %1023 : vector<1x32xf32> to vector<8x32xf32>
    %1539 = arith.addf %1537, %1538 : vector<8x32xf32>
    %1540 = arith.mulf %1527, %1539 : vector<8x32xf32>
    %1541 = arith.addf %1536, %1540 : vector<8x32xf32>
    %1542 = math.tanh %1541 : vector<8x32xf32>
    %cst_421 = arith.constant 1.000000e+00 : f32
    %1543 = vector.broadcast %cst_421 : f32 to vector<8x32xf32>
    %1544 = arith.subf %1543, %1535 : vector<8x32xf32>
    %1545 = arith.mulf %1544, %1542 : vector<8x32xf32>
    %1546 = arith.mulf %1535, %1481 : vector<8x32xf32>
    %1547 = arith.addf %1545, %1546 : vector<8x32xf32>
    %cst_422 = arith.constant 0.000000e+00 : f32
    %1548 = vector.broadcast %cst_422 : f32 to vector<8x32xf32>
    %1549 = arith.maximumf %1518, %1548 : vector<8x32xf32>
    %cst_423 = arith.constant 0.000000e+00 : f32
    %1550 = vector.broadcast %cst_423 : f32 to vector<8x32xf32>
    %1551 = arith.maximumf %1547, %1550 : vector<8x32xf32>
    %c56_424 = arith.constant 56 : index
    %c0_425 = arith.constant 0 : index
    %1552 = vector.load %arg14[%c56_424, %c0_425] : memref<128x64xf32, #tpu.memory_space<vmem>>, vector<8x32xf32>
    tpu.vector_store %arg14[%c56_424, %c0_425], %1549 {strides = array<i32>} : memref<128x64xf32, #tpu.memory_space<vmem>>, vector<8x32xf32>,
    %c64_426 = arith.constant 64 : index
    %c32_427 = arith.constant 32 : index
    %1553 = vector.load %arg14[%c64_426, %c32_427] : memref<128x64xf32, #tpu.memory_space<vmem>>, vector<8x32xf32>
    tpu.vector_store %arg14[%c64_426, %c32_427], %1551 {strides = array<i32>} : memref<128x64xf32, #tpu.memory_space<vmem>>, vector<8x32xf32>,
    %c64_428 = arith.constant 64 : index
    %c0_429 = arith.constant 0 : index
    %1554 = vector.load %arg15[%c64_428, %c0_429] : memref<128x192xf32, #tpu.memory_space<vmem>>, vector<8x96xf32>
    %c56_430 = arith.constant 56 : index
    %c96_431 = arith.constant 96 : index
    %1555 = vector.load %arg15[%c56_430, %c96_431] : memref<128x192xf32, #tpu.memory_space<vmem>>, vector<8x96xf32>
    %cst_432 = arith.constant dense<0.000000e+00> : vector<8x96xf32>
    %1556 = tpu.matmul %1518, %1017, %cst_432 {dimension_numbers = #tpu.dot_dimension_numbers<[1], [0], [0], [1], [0, 0, 1, 1], [], []>} : vector<8x32xf32>, vector<32x96xf32>, vector<8x96xf32> -> vector<8x96xf32>
    %1557 = vector.extract_strided_slice %1554 {offsets = [0, 0], sizes = [8, 32], strides = [1, 1]} : vector<8x96xf32> to vector<8x32xf32>
    %1558 = vector.extract_strided_slice %1556 {offsets = [0, 0], sizes = [8, 32], strides = [1, 1]} : vector<8x96xf32> to vector<8x32xf32>
    %1559 = arith.addf %1557, %1558 : vector<8x32xf32>
    %1560 = arith.negf %1559 : vector<8x32xf32>
    %1561 = math.exp %1560 : vector<8x32xf32>
    %cst_433 = arith.constant 1.000000e+00 : f32
    %1562 = vector.broadcast %cst_433 : f32 to vector<8x32xf32>
    %1563 = arith.addf %1562, %1561 : vector<8x32xf32>
    %1564 = arith.divf %1562, %1563 : vector<8x32xf32>
    %1565 = vector.extract_strided_slice %1554 {offsets = [0, 32], sizes = [8, 32], strides = [1, 1]} : vector<8x96xf32> to vector<8x32xf32>
    %1566 = vector.extract_strided_slice %1556 {offsets = [0, 32], sizes = [8, 32], strides = [1, 1]} : vector<8x96xf32> to vector<8x32xf32>
    %1567 = arith.addf %1565, %1566 : vector<8x32xf32>
    %1568 = arith.negf %1567 : vector<8x32xf32>
    %1569 = math.exp %1568 : vector<8x32xf32>
    %cst_434 = arith.constant 1.000000e+00 : f32
    %1570 = vector.broadcast %cst_434 : f32 to vector<8x32xf32>
    %1571 = arith.addf %1570, %1569 : vector<8x32xf32>
    %1572 = arith.divf %1570, %1571 : vector<8x32xf32>
    %1573 = vector.extract_strided_slice %1554 {offsets = [0, 64], sizes = [8, 32], strides = [1, 1]} : vector<8x96xf32> to vector<8x32xf32>
    %1574 = vector.extract_strided_slice %1556 {offsets = [0, 64], sizes = [8, 32], strides = [1, 1]} : vector<8x96xf32> to vector<8x32xf32>
    %1575 = vector.broadcast %1021 : vector<1x32xf32> to vector<8x32xf32>
    %1576 = arith.addf %1574, %1575 : vector<8x32xf32>
    %1577 = arith.mulf %1564, %1576 : vector<8x32xf32>
    %1578 = arith.addf %1573, %1577 : vector<8x32xf32>
    %1579 = math.tanh %1578 : vector<8x32xf32>
    %cst_435 = arith.constant 1.000000e+00 : f32
    %1580 = vector.broadcast %cst_435 : f32 to vector<8x32xf32>
    %1581 = arith.subf %1580, %1572 : vector<8x32xf32>
    %1582 = arith.mulf %1581, %1579 : vector<8x32xf32>
    %1583 = arith.mulf %1572, %1518 : vector<8x32xf32>
    %1584 = arith.addf %1582, %1583 : vector<8x32xf32>
    %cst_436 = arith.constant dense<0.000000e+00> : vector<8x96xf32>
    %1585 = tpu.matmul %1547, %1019, %cst_436 {dimension_numbers = #tpu.dot_dimension_numbers<[1], [0], [0], [1], [0, 0, 1, 1], [], []>} : vector<8x32xf32>, vector<32x96xf32>, vector<8x96xf32> -> vector<8x96xf32>
    %1586 = vector.extract_strided_slice %1555 {offsets = [0, 0], sizes = [8, 32], strides = [1, 1]} : vector<8x96xf32> to vector<8x32xf32>
    %1587 = vector.extract_strided_slice %1585 {offsets = [0, 0], sizes = [8, 32], strides = [1, 1]} : vector<8x96xf32> to vector<8x32xf32>
    %1588 = arith.addf %1586, %1587 : vector<8x32xf32>
    %1589 = arith.negf %1588 : vector<8x32xf32>
    %1590 = math.exp %1589 : vector<8x32xf32>
    %cst_437 = arith.constant 1.000000e+00 : f32
    %1591 = vector.broadcast %cst_437 : f32 to vector<8x32xf32>
    %1592 = arith.addf %1591, %1590 : vector<8x32xf32>
    %1593 = arith.divf %1591, %1592 : vector<8x32xf32>
    %1594 = vector.extract_strided_slice %1555 {offsets = [0, 32], sizes = [8, 32], strides = [1, 1]} : vector<8x96xf32> to vector<8x32xf32>
    %1595 = vector.extract_strided_slice %1585 {offsets = [0, 32], sizes = [8, 32], strides = [1, 1]} : vector<8x96xf32> to vector<8x32xf32>
    %1596 = arith.addf %1594, %1595 : vector<8x32xf32>
    %1597 = arith.negf %1596 : vector<8x32xf32>
    %1598 = math.exp %1597 : vector<8x32xf32>
    %cst_438 = arith.constant 1.000000e+00 : f32
    %1599 = vector.broadcast %cst_438 : f32 to vector<8x32xf32>
    %1600 = arith.addf %1599, %1598 : vector<8x32xf32>
    %1601 = arith.divf %1599, %1600 : vector<8x32xf32>
    %1602 = vector.extract_strided_slice %1555 {offsets = [0, 64], sizes = [8, 32], strides = [1, 1]} : vector<8x96xf32> to vector<8x32xf32>
    %1603 = vector.extract_strided_slice %1585 {offsets = [0, 64], sizes = [8, 32], strides = [1, 1]} : vector<8x96xf32> to vector<8x32xf32>
    %1604 = vector.broadcast %1023 : vector<1x32xf32> to vector<8x32xf32>
    %1605 = arith.addf %1603, %1604 : vector<8x32xf32>
    %1606 = arith.mulf %1593, %1605 : vector<8x32xf32>
    %1607 = arith.addf %1602, %1606 : vector<8x32xf32>
    %1608 = math.tanh %1607 : vector<8x32xf32>
    %cst_439 = arith.constant 1.000000e+00 : f32
    %1609 = vector.broadcast %cst_439 : f32 to vector<8x32xf32>
    %1610 = arith.subf %1609, %1601 : vector<8x32xf32>
    %1611 = arith.mulf %1610, %1608 : vector<8x32xf32>
    %1612 = arith.mulf %1601, %1547 : vector<8x32xf32>
    %1613 = arith.addf %1611, %1612 : vector<8x32xf32>
    %cst_440 = arith.constant 0.000000e+00 : f32
    %1614 = vector.broadcast %cst_440 : f32 to vector<8x32xf32>
    %1615 = arith.maximumf %1584, %1614 : vector<8x32xf32>
    %cst_441 = arith.constant 0.000000e+00 : f32
    %1616 = vector.broadcast %cst_441 : f32 to vector<8x32xf32>
    %1617 = arith.maximumf %1613, %1616 : vector<8x32xf32>
    %c64_442 = arith.constant 64 : index
    %c0_443 = arith.constant 0 : index
    %1618 = vector.load %arg14[%c64_442, %c0_443] : memref<128x64xf32, #tpu.memory_space<vmem>>, vector<8x32xf32>
    tpu.vector_store %arg14[%c64_442, %c0_443], %1615 {strides = array<i32>} : memref<128x64xf32, #tpu.memory_space<vmem>>, vector<8x32xf32>,
    %c56_444 = arith.constant 56 : index
    %c32_445 = arith.constant 32 : index
    %1619 = vector.load %arg14[%c56_444, %c32_445] : memref<128x64xf32, #tpu.memory_space<vmem>>, vector<8x32xf32>
    tpu.vector_store %arg14[%c56_444, %c32_445], %1617 {strides = array<i32>} : memref<128x64xf32, #tpu.memory_space<vmem>>, vector<8x32xf32>,
    %c72_446 = arith.constant 72 : index
    %c0_447 = arith.constant 0 : index
    %1620 = vector.load %arg15[%c72_446, %c0_447] : memref<128x192xf32, #tpu.memory_space<vmem>>, vector<8x96xf32>
    %c48_448 = arith.constant 48 : index
    %c96_449 = arith.constant 96 : index
    %1621 = vector.load %arg15[%c48_448, %c96_449] : memref<128x192xf32, #tpu.memory_space<vmem>>, vector<8x96xf32>
    %cst_450 = arith.constant dense<0.000000e+00> : vector<8x96xf32>
    %1622 = tpu.matmul %1584, %1017, %cst_450 {dimension_numbers = #tpu.dot_dimension_numbers<[1], [0], [0], [1], [0, 0, 1, 1], [], []>} : vector<8x32xf32>, vector<32x96xf32>, vector<8x96xf32> -> vector<8x96xf32>
    %1623 = vector.extract_strided_slice %1620 {offsets = [0, 0], sizes = [8, 32], strides = [1, 1]} : vector<8x96xf32> to vector<8x32xf32>
    %1624 = vector.extract_strided_slice %1622 {offsets = [0, 0], sizes = [8, 32], strides = [1, 1]} : vector<8x96xf32> to vector<8x32xf32>
    %1625 = arith.addf %1623, %1624 : vector<8x32xf32>
    %1626 = arith.negf %1625 : vector<8x32xf32>
    %1627 = math.exp %1626 : vector<8x32xf32>
    %cst_451 = arith.constant 1.000000e+00 : f32
    %1628 = vector.broadcast %cst_451 : f32 to vector<8x32xf32>
    %1629 = arith.addf %1628, %1627 : vector<8x32xf32>
    %1630 = arith.divf %1628, %1629 : vector<8x32xf32>
    %1631 = vector.extract_strided_slice %1620 {offsets = [0, 32], sizes = [8, 32], strides = [1, 1]} : vector<8x96xf32> to vector<8x32xf32>
    %1632 = vector.extract_strided_slice %1622 {offsets = [0, 32], sizes = [8, 32], strides = [1, 1]} : vector<8x96xf32> to vector<8x32xf32>
    %1633 = arith.addf %1631, %1632 : vector<8x32xf32>
    %1634 = arith.negf %1633 : vector<8x32xf32>
    %1635 = math.exp %1634 : vector<8x32xf32>
    %cst_452 = arith.constant 1.000000e+00 : f32
    %1636 = vector.broadcast %cst_452 : f32 to vector<8x32xf32>
    %1637 = arith.addf %1636, %1635 : vector<8x32xf32>
    %1638 = arith.divf %1636, %1637 : vector<8x32xf32>
    %1639 = vector.extract_strided_slice %1620 {offsets = [0, 64], sizes = [8, 32], strides = [1, 1]} : vector<8x96xf32> to vector<8x32xf32>
    %1640 = vector.extract_strided_slice %1622 {offsets = [0, 64], sizes = [8, 32], strides = [1, 1]} : vector<8x96xf32> to vector<8x32xf32>
    %1641 = vector.broadcast %1021 : vector<1x32xf32> to vector<8x32xf32>
    %1642 = arith.addf %1640, %1641 : vector<8x32xf32>
    %1643 = arith.mulf %1630, %1642 : vector<8x32xf32>
    %1644 = arith.addf %1639, %1643 : vector<8x32xf32>
    %1645 = math.tanh %1644 : vector<8x32xf32>
    %cst_453 = arith.constant 1.000000e+00 : f32
    %1646 = vector.broadcast %cst_453 : f32 to vector<8x32xf32>
    %1647 = arith.subf %1646, %1638 : vector<8x32xf32>
    %1648 = arith.mulf %1647, %1645 : vector<8x32xf32>
    %1649 = arith.mulf %1638, %1584 : vector<8x32xf32>
    %1650 = arith.addf %1648, %1649 : vector<8x32xf32>
    %cst_454 = arith.constant dense<0.000000e+00> : vector<8x96xf32>
    %1651 = tpu.matmul %1613, %1019, %cst_454 {dimension_numbers = #tpu.dot_dimension_numbers<[1], [0], [0], [1], [0, 0, 1, 1], [], []>} : vector<8x32xf32>, vector<32x96xf32>, vector<8x96xf32> -> vector<8x96xf32>
    %1652 = vector.extract_strided_slice %1621 {offsets = [0, 0], sizes = [8, 32], strides = [1, 1]} : vector<8x96xf32> to vector<8x32xf32>
    %1653 = vector.extract_strided_slice %1651 {offsets = [0, 0], sizes = [8, 32], strides = [1, 1]} : vector<8x96xf32> to vector<8x32xf32>
    %1654 = arith.addf %1652, %1653 : vector<8x32xf32>
    %1655 = arith.negf %1654 : vector<8x32xf32>
    %1656 = math.exp %1655 : vector<8x32xf32>
    %cst_455 = arith.constant 1.000000e+00 : f32
    %1657 = vector.broadcast %cst_455 : f32 to vector<8x32xf32>
    %1658 = arith.addf %1657, %1656 : vector<8x32xf32>
    %1659 = arith.divf %1657, %1658 : vector<8x32xf32>
    %1660 = vector.extract_strided_slice %1621 {offsets = [0, 32], sizes = [8, 32], strides = [1, 1]} : vector<8x96xf32> to vector<8x32xf32>
    %1661 = vector.extract_strided_slice %1651 {offsets = [0, 32], sizes = [8, 32], strides = [1, 1]} : vector<8x96xf32> to vector<8x32xf32>
    %1662 = arith.addf %1660, %1661 : vector<8x32xf32>
    %1663 = arith.negf %1662 : vector<8x32xf32>
    %1664 = math.exp %1663 : vector<8x32xf32>
    %cst_456 = arith.constant 1.000000e+00 : f32
    %1665 = vector.broadcast %cst_456 : f32 to vector<8x32xf32>
    %1666 = arith.addf %1665, %1664 : vector<8x32xf32>
    %1667 = arith.divf %1665, %1666 : vector<8x32xf32>
    %1668 = vector.extract_strided_slice %1621 {offsets = [0, 64], sizes = [8, 32], strides = [1, 1]} : vector<8x96xf32> to vector<8x32xf32>
    %1669 = vector.extract_strided_slice %1651 {offsets = [0, 64], sizes = [8, 32], strides = [1, 1]} : vector<8x96xf32> to vector<8x32xf32>
    %1670 = vector.broadcast %1023 : vector<1x32xf32> to vector<8x32xf32>
    %1671 = arith.addf %1669, %1670 : vector<8x32xf32>
    %1672 = arith.mulf %1659, %1671 : vector<8x32xf32>
    %1673 = arith.addf %1668, %1672 : vector<8x32xf32>
    %1674 = math.tanh %1673 : vector<8x32xf32>
    %cst_457 = arith.constant 1.000000e+00 : f32
    %1675 = vector.broadcast %cst_457 : f32 to vector<8x32xf32>
    %1676 = arith.subf %1675, %1667 : vector<8x32xf32>
    %1677 = arith.mulf %1676, %1674 : vector<8x32xf32>
    %1678 = arith.mulf %1667, %1613 : vector<8x32xf32>
    %1679 = arith.addf %1677, %1678 : vector<8x32xf32>
    %cst_458 = arith.constant 0.000000e+00 : f32
    %1680 = vector.broadcast %cst_458 : f32 to vector<8x32xf32>
    %1681 = arith.maximumf %1650, %1680 : vector<8x32xf32>
    %cst_459 = arith.constant 0.000000e+00 : f32
    %1682 = vector.broadcast %cst_459 : f32 to vector<8x32xf32>
    %1683 = arith.maximumf %1679, %1682 : vector<8x32xf32>
    %c72_460 = arith.constant 72 : index
    %c0_461 = arith.constant 0 : index
    %1684 = vector.load %arg14[%c72_460, %c0_461] : memref<128x64xf32, #tpu.memory_space<vmem>>, vector<8x32xf32>
    tpu.vector_store %arg14[%c72_460, %c0_461], %1681 {strides = array<i32>} : memref<128x64xf32, #tpu.memory_space<vmem>>, vector<8x32xf32>,
    %c48_462 = arith.constant 48 : index
    %c32_463 = arith.constant 32 : index
    %1685 = vector.load %arg14[%c48_462, %c32_463] : memref<128x64xf32, #tpu.memory_space<vmem>>, vector<8x32xf32>
    tpu.vector_store %arg14[%c48_462, %c32_463], %1683 {strides = array<i32>} : memref<128x64xf32, #tpu.memory_space<vmem>>, vector<8x32xf32>,
    %c80_464 = arith.constant 80 : index
    %c0_465 = arith.constant 0 : index
    %1686 = vector.load %arg15[%c80_464, %c0_465] : memref<128x192xf32, #tpu.memory_space<vmem>>, vector<8x96xf32>
    %c40_466 = arith.constant 40 : index
    %c96_467 = arith.constant 96 : index
    %1687 = vector.load %arg15[%c40_466, %c96_467] : memref<128x192xf32, #tpu.memory_space<vmem>>, vector<8x96xf32>
    %cst_468 = arith.constant dense<0.000000e+00> : vector<8x96xf32>
    %1688 = tpu.matmul %1650, %1017, %cst_468 {dimension_numbers = #tpu.dot_dimension_numbers<[1], [0], [0], [1], [0, 0, 1, 1], [], []>} : vector<8x32xf32>, vector<32x96xf32>, vector<8x96xf32> -> vector<8x96xf32>
    %1689 = vector.extract_strided_slice %1686 {offsets = [0, 0], sizes = [8, 32], strides = [1, 1]} : vector<8x96xf32> to vector<8x32xf32>
    %1690 = vector.extract_strided_slice %1688 {offsets = [0, 0], sizes = [8, 32], strides = [1, 1]} : vector<8x96xf32> to vector<8x32xf32>
    %1691 = arith.addf %1689, %1690 : vector<8x32xf32>
    %1692 = arith.negf %1691 : vector<8x32xf32>
    %1693 = math.exp %1692 : vector<8x32xf32>
    %cst_469 = arith.constant 1.000000e+00 : f32
    %1694 = vector.broadcast %cst_469 : f32 to vector<8x32xf32>
    %1695 = arith.addf %1694, %1693 : vector<8x32xf32>
    %1696 = arith.divf %1694, %1695 : vector<8x32xf32>
    %1697 = vector.extract_strided_slice %1686 {offsets = [0, 32], sizes = [8, 32], strides = [1, 1]} : vector<8x96xf32> to vector<8x32xf32>
    %1698 = vector.extract_strided_slice %1688 {offsets = [0, 32], sizes = [8, 32], strides = [1, 1]} : vector<8x96xf32> to vector<8x32xf32>
    %1699 = arith.addf %1697, %1698 : vector<8x32xf32>
    %1700 = arith.negf %1699 : vector<8x32xf32>
    %1701 = math.exp %1700 : vector<8x32xf32>
    %cst_470 = arith.constant 1.000000e+00 : f32
    %1702 = vector.broadcast %cst_470 : f32 to vector<8x32xf32>
    %1703 = arith.addf %1702, %1701 : vector<8x32xf32>
    %1704 = arith.divf %1702, %1703 : vector<8x32xf32>
    %1705 = vector.extract_strided_slice %1686 {offsets = [0, 64], sizes = [8, 32], strides = [1, 1]} : vector<8x96xf32> to vector<8x32xf32>
    %1706 = vector.extract_strided_slice %1688 {offsets = [0, 64], sizes = [8, 32], strides = [1, 1]} : vector<8x96xf32> to vector<8x32xf32>
    %1707 = vector.broadcast %1021 : vector<1x32xf32> to vector<8x32xf32>
    %1708 = arith.addf %1706, %1707 : vector<8x32xf32>
    %1709 = arith.mulf %1696, %1708 : vector<8x32xf32>
    %1710 = arith.addf %1705, %1709 : vector<8x32xf32>
    %1711 = math.tanh %1710 : vector<8x32xf32>
    %cst_471 = arith.constant 1.000000e+00 : f32
    %1712 = vector.broadcast %cst_471 : f32 to vector<8x32xf32>
    %1713 = arith.subf %1712, %1704 : vector<8x32xf32>
    %1714 = arith.mulf %1713, %1711 : vector<8x32xf32>
    %1715 = arith.mulf %1704, %1650 : vector<8x32xf32>
    %1716 = arith.addf %1714, %1715 : vector<8x32xf32>
    %cst_472 = arith.constant dense<0.000000e+00> : vector<8x96xf32>
    %1717 = tpu.matmul %1679, %1019, %cst_472 {dimension_numbers = #tpu.dot_dimension_numbers<[1], [0], [0], [1], [0, 0, 1, 1], [], []>} : vector<8x32xf32>, vector<32x96xf32>, vector<8x96xf32> -> vector<8x96xf32>
    %1718 = vector.extract_strided_slice %1687 {offsets = [0, 0], sizes = [8, 32], strides = [1, 1]} : vector<8x96xf32> to vector<8x32xf32>
    %1719 = vector.extract_strided_slice %1717 {offsets = [0, 0], sizes = [8, 32], strides = [1, 1]} : vector<8x96xf32> to vector<8x32xf32>
    %1720 = arith.addf %1718, %1719 : vector<8x32xf32>
    %1721 = arith.negf %1720 : vector<8x32xf32>
    %1722 = math.exp %1721 : vector<8x32xf32>
    %cst_473 = arith.constant 1.000000e+00 : f32
    %1723 = vector.broadcast %cst_473 : f32 to vector<8x32xf32>
    %1724 = arith.addf %1723, %1722 : vector<8x32xf32>
    %1725 = arith.divf %1723, %1724 : vector<8x32xf32>
    %1726 = vector.extract_strided_slice %1687 {offsets = [0, 32], sizes = [8, 32], strides = [1, 1]} : vector<8x96xf32> to vector<8x32xf32>
    %1727 = vector.extract_strided_slice %1717 {offsets = [0, 32], sizes = [8, 32], strides = [1, 1]} : vector<8x96xf32> to vector<8x32xf32>
    %1728 = arith.addf %1726, %1727 : vector<8x32xf32>
    %1729 = arith.negf %1728 : vector<8x32xf32>
    %1730 = math.exp %1729 : vector<8x32xf32>
    %cst_474 = arith.constant 1.000000e+00 : f32
    %1731 = vector.broadcast %cst_474 : f32 to vector<8x32xf32>
    %1732 = arith.addf %1731, %1730 : vector<8x32xf32>
    %1733 = arith.divf %1731, %1732 : vector<8x32xf32>
    %1734 = vector.extract_strided_slice %1687 {offsets = [0, 64], sizes = [8, 32], strides = [1, 1]} : vector<8x96xf32> to vector<8x32xf32>
    %1735 = vector.extract_strided_slice %1717 {offsets = [0, 64], sizes = [8, 32], strides = [1, 1]} : vector<8x96xf32> to vector<8x32xf32>
    %1736 = vector.broadcast %1023 : vector<1x32xf32> to vector<8x32xf32>
    %1737 = arith.addf %1735, %1736 : vector<8x32xf32>
    %1738 = arith.mulf %1725, %1737 : vector<8x32xf32>
    %1739 = arith.addf %1734, %1738 : vector<8x32xf32>
    %1740 = math.tanh %1739 : vector<8x32xf32>
    %cst_475 = arith.constant 1.000000e+00 : f32
    %1741 = vector.broadcast %cst_475 : f32 to vector<8x32xf32>
    %1742 = arith.subf %1741, %1733 : vector<8x32xf32>
    %1743 = arith.mulf %1742, %1740 : vector<8x32xf32>
    %1744 = arith.mulf %1733, %1679 : vector<8x32xf32>
    %1745 = arith.addf %1743, %1744 : vector<8x32xf32>
    %cst_476 = arith.constant 0.000000e+00 : f32
    %1746 = vector.broadcast %cst_476 : f32 to vector<8x32xf32>
    %1747 = arith.maximumf %1716, %1746 : vector<8x32xf32>
    %cst_477 = arith.constant 0.000000e+00 : f32
    %1748 = vector.broadcast %cst_477 : f32 to vector<8x32xf32>
    %1749 = arith.maximumf %1745, %1748 : vector<8x32xf32>
    %c80_478 = arith.constant 80 : index
    %c0_479 = arith.constant 0 : index
    %1750 = vector.load %arg14[%c80_478, %c0_479] : memref<128x64xf32, #tpu.memory_space<vmem>>, vector<8x32xf32>
    tpu.vector_store %arg14[%c80_478, %c0_479], %1747 {strides = array<i32>} : memref<128x64xf32, #tpu.memory_space<vmem>>, vector<8x32xf32>,
    %c40_480 = arith.constant 40 : index
    %c32_481 = arith.constant 32 : index
    %1751 = vector.load %arg14[%c40_480, %c32_481] : memref<128x64xf32, #tpu.memory_space<vmem>>, vector<8x32xf32>
    tpu.vector_store %arg14[%c40_480, %c32_481], %1749 {strides = array<i32>} : memref<128x64xf32, #tpu.memory_space<vmem>>, vector<8x32xf32>,
    %c88_482 = arith.constant 88 : index
    %c0_483 = arith.constant 0 : index
    %1752 = vector.load %arg15[%c88_482, %c0_483] : memref<128x192xf32, #tpu.memory_space<vmem>>, vector<8x96xf32>
    %c32_484 = arith.constant 32 : index
    %c96_485 = arith.constant 96 : index
    %1753 = vector.load %arg15[%c32_484, %c96_485] : memref<128x192xf32, #tpu.memory_space<vmem>>, vector<8x96xf32>
    %cst_486 = arith.constant dense<0.000000e+00> : vector<8x96xf32>
    %1754 = tpu.matmul %1716, %1017, %cst_486 {dimension_numbers = #tpu.dot_dimension_numbers<[1], [0], [0], [1], [0, 0, 1, 1], [], []>} : vector<8x32xf32>, vector<32x96xf32>, vector<8x96xf32> -> vector<8x96xf32>
    %1755 = vector.extract_strided_slice %1752 {offsets = [0, 0], sizes = [8, 32], strides = [1, 1]} : vector<8x96xf32> to vector<8x32xf32>
    %1756 = vector.extract_strided_slice %1754 {offsets = [0, 0], sizes = [8, 32], strides = [1, 1]} : vector<8x96xf32> to vector<8x32xf32>
    %1757 = arith.addf %1755, %1756 : vector<8x32xf32>
    %1758 = arith.negf %1757 : vector<8x32xf32>
    %1759 = math.exp %1758 : vector<8x32xf32>
    %cst_487 = arith.constant 1.000000e+00 : f32
    %1760 = vector.broadcast %cst_487 : f32 to vector<8x32xf32>
    %1761 = arith.addf %1760, %1759 : vector<8x32xf32>
    %1762 = arith.divf %1760, %1761 : vector<8x32xf32>
    %1763 = vector.extract_strided_slice %1752 {offsets = [0, 32], sizes = [8, 32], strides = [1, 1]} : vector<8x96xf32> to vector<8x32xf32>
    %1764 = vector.extract_strided_slice %1754 {offsets = [0, 32], sizes = [8, 32], strides = [1, 1]} : vector<8x96xf32> to vector<8x32xf32>
    %1765 = arith.addf %1763, %1764 : vector<8x32xf32>
    %1766 = arith.negf %1765 : vector<8x32xf32>
    %1767 = math.exp %1766 : vector<8x32xf32>
    %cst_488 = arith.constant 1.000000e+00 : f32
    %1768 = vector.broadcast %cst_488 : f32 to vector<8x32xf32>
    %1769 = arith.addf %1768, %1767 : vector<8x32xf32>
    %1770 = arith.divf %1768, %1769 : vector<8x32xf32>
    %1771 = vector.extract_strided_slice %1752 {offsets = [0, 64], sizes = [8, 32], strides = [1, 1]} : vector<8x96xf32> to vector<8x32xf32>
    %1772 = vector.extract_strided_slice %1754 {offsets = [0, 64], sizes = [8, 32], strides = [1, 1]} : vector<8x96xf32> to vector<8x32xf32>
    %1773 = vector.broadcast %1021 : vector<1x32xf32> to vector<8x32xf32>
    %1774 = arith.addf %1772, %1773 : vector<8x32xf32>
    %1775 = arith.mulf %1762, %1774 : vector<8x32xf32>
    %1776 = arith.addf %1771, %1775 : vector<8x32xf32>
    %1777 = math.tanh %1776 : vector<8x32xf32>
    %cst_489 = arith.constant 1.000000e+00 : f32
    %1778 = vector.broadcast %cst_489 : f32 to vector<8x32xf32>
    %1779 = arith.subf %1778, %1770 : vector<8x32xf32>
    %1780 = arith.mulf %1779, %1777 : vector<8x32xf32>
    %1781 = arith.mulf %1770, %1716 : vector<8x32xf32>
    %1782 = arith.addf %1780, %1781 : vector<8x32xf32>
    %cst_490 = arith.constant dense<0.000000e+00> : vector<8x96xf32>
    %1783 = tpu.matmul %1745, %1019, %cst_490 {dimension_numbers = #tpu.dot_dimension_numbers<[1], [0], [0], [1], [0, 0, 1, 1], [], []>} : vector<8x32xf32>, vector<32x96xf32>, vector<8x96xf32> -> vector<8x96xf32>
    %1784 = vector.extract_strided_slice %1753 {offsets = [0, 0], sizes = [8, 32], strides = [1, 1]} : vector<8x96xf32> to vector<8x32xf32>
    %1785 = vector.extract_strided_slice %1783 {offsets = [0, 0], sizes = [8, 32], strides = [1, 1]} : vector<8x96xf32> to vector<8x32xf32>
    %1786 = arith.addf %1784, %1785 : vector<8x32xf32>
    %1787 = arith.negf %1786 : vector<8x32xf32>
    %1788 = math.exp %1787 : vector<8x32xf32>
    %cst_491 = arith.constant 1.000000e+00 : f32
    %1789 = vector.broadcast %cst_491 : f32 to vector<8x32xf32>
    %1790 = arith.addf %1789, %1788 : vector<8x32xf32>
    %1791 = arith.divf %1789, %1790 : vector<8x32xf32>
    %1792 = vector.extract_strided_slice %1753 {offsets = [0, 32], sizes = [8, 32], strides = [1, 1]} : vector<8x96xf32> to vector<8x32xf32>
    %1793 = vector.extract_strided_slice %1783 {offsets = [0, 32], sizes = [8, 32], strides = [1, 1]} : vector<8x96xf32> to vector<8x32xf32>
    %1794 = arith.addf %1792, %1793 : vector<8x32xf32>
    %1795 = arith.negf %1794 : vector<8x32xf32>
    %1796 = math.exp %1795 : vector<8x32xf32>
    %cst_492 = arith.constant 1.000000e+00 : f32
    %1797 = vector.broadcast %cst_492 : f32 to vector<8x32xf32>
    %1798 = arith.addf %1797, %1796 : vector<8x32xf32>
    %1799 = arith.divf %1797, %1798 : vector<8x32xf32>
    %1800 = vector.extract_strided_slice %1753 {offsets = [0, 64], sizes = [8, 32], strides = [1, 1]} : vector<8x96xf32> to vector<8x32xf32>
    %1801 = vector.extract_strided_slice %1783 {offsets = [0, 64], sizes = [8, 32], strides = [1, 1]} : vector<8x96xf32> to vector<8x32xf32>
    %1802 = vector.broadcast %1023 : vector<1x32xf32> to vector<8x32xf32>
    %1803 = arith.addf %1801, %1802 : vector<8x32xf32>
    %1804 = arith.mulf %1791, %1803 : vector<8x32xf32>
    %1805 = arith.addf %1800, %1804 : vector<8x32xf32>
    %1806 = math.tanh %1805 : vector<8x32xf32>
    %cst_493 = arith.constant 1.000000e+00 : f32
    %1807 = vector.broadcast %cst_493 : f32 to vector<8x32xf32>
    %1808 = arith.subf %1807, %1799 : vector<8x32xf32>
    %1809 = arith.mulf %1808, %1806 : vector<8x32xf32>
    %1810 = arith.mulf %1799, %1745 : vector<8x32xf32>
    %1811 = arith.addf %1809, %1810 : vector<8x32xf32>
    %cst_494 = arith.constant 0.000000e+00 : f32
    %1812 = vector.broadcast %cst_494 : f32 to vector<8x32xf32>
    %1813 = arith.maximumf %1782, %1812 : vector<8x32xf32>
    %cst_495 = arith.constant 0.000000e+00 : f32
    %1814 = vector.broadcast %cst_495 : f32 to vector<8x32xf32>
    %1815 = arith.maximumf %1811, %1814 : vector<8x32xf32>
    %c88_496 = arith.constant 88 : index
    %c0_497 = arith.constant 0 : index
    %1816 = vector.load %arg14[%c88_496, %c0_497] : memref<128x64xf32, #tpu.memory_space<vmem>>, vector<8x32xf32>
    tpu.vector_store %arg14[%c88_496, %c0_497], %1813 {strides = array<i32>} : memref<128x64xf32, #tpu.memory_space<vmem>>, vector<8x32xf32>,
    %c32_498 = arith.constant 32 : index
    %c32_499 = arith.constant 32 : index
    %1817 = vector.load %arg14[%c32_498, %c32_499] : memref<128x64xf32, #tpu.memory_space<vmem>>, vector<8x32xf32>
    tpu.vector_store %arg14[%c32_498, %c32_499], %1815 {strides = array<i32>} : memref<128x64xf32, #tpu.memory_space<vmem>>, vector<8x32xf32>,
    %c96_500 = arith.constant 96 : index
    %c0_501 = arith.constant 0 : index
    %1818 = vector.load %arg15[%c96_500, %c0_501] : memref<128x192xf32, #tpu.memory_space<vmem>>, vector<8x96xf32>
    %c24_502 = arith.constant 24 : index
    %c96_503 = arith.constant 96 : index
    %1819 = vector.load %arg15[%c24_502, %c96_503] : memref<128x192xf32, #tpu.memory_space<vmem>>, vector<8x96xf32>
    %cst_504 = arith.constant dense<0.000000e+00> : vector<8x96xf32>
    %1820 = tpu.matmul %1782, %1017, %cst_504 {dimension_numbers = #tpu.dot_dimension_numbers<[1], [0], [0], [1], [0, 0, 1, 1], [], []>} : vector<8x32xf32>, vector<32x96xf32>, vector<8x96xf32> -> vector<8x96xf32>
    %1821 = vector.extract_strided_slice %1818 {offsets = [0, 0], sizes = [8, 32], strides = [1, 1]} : vector<8x96xf32> to vector<8x32xf32>
    %1822 = vector.extract_strided_slice %1820 {offsets = [0, 0], sizes = [8, 32], strides = [1, 1]} : vector<8x96xf32> to vector<8x32xf32>
    %1823 = arith.addf %1821, %1822 : vector<8x32xf32>
    %1824 = arith.negf %1823 : vector<8x32xf32>
    %1825 = math.exp %1824 : vector<8x32xf32>
    %cst_505 = arith.constant 1.000000e+00 : f32
    %1826 = vector.broadcast %cst_505 : f32 to vector<8x32xf32>
    %1827 = arith.addf %1826, %1825 : vector<8x32xf32>
    %1828 = arith.divf %1826, %1827 : vector<8x32xf32>
    %1829 = vector.extract_strided_slice %1818 {offsets = [0, 32], sizes = [8, 32], strides = [1, 1]} : vector<8x96xf32> to vector<8x32xf32>
    %1830 = vector.extract_strided_slice %1820 {offsets = [0, 32], sizes = [8, 32], strides = [1, 1]} : vector<8x96xf32> to vector<8x32xf32>
    %1831 = arith.addf %1829, %1830 : vector<8x32xf32>
    %1832 = arith.negf %1831 : vector<8x32xf32>
    %1833 = math.exp %1832 : vector<8x32xf32>
    %cst_506 = arith.constant 1.000000e+00 : f32
    %1834 = vector.broadcast %cst_506 : f32 to vector<8x32xf32>
    %1835 = arith.addf %1834, %1833 : vector<8x32xf32>
    %1836 = arith.divf %1834, %1835 : vector<8x32xf32>
    %1837 = vector.extract_strided_slice %1818 {offsets = [0, 64], sizes = [8, 32], strides = [1, 1]} : vector<8x96xf32> to vector<8x32xf32>
    %1838 = vector.extract_strided_slice %1820 {offsets = [0, 64], sizes = [8, 32], strides = [1, 1]} : vector<8x96xf32> to vector<8x32xf32>
    %1839 = vector.broadcast %1021 : vector<1x32xf32> to vector<8x32xf32>
    %1840 = arith.addf %1838, %1839 : vector<8x32xf32>
    %1841 = arith.mulf %1828, %1840 : vector<8x32xf32>
    %1842 = arith.addf %1837, %1841 : vector<8x32xf32>
    %1843 = math.tanh %1842 : vector<8x32xf32>
    %cst_507 = arith.constant 1.000000e+00 : f32
    %1844 = vector.broadcast %cst_507 : f32 to vector<8x32xf32>
    %1845 = arith.subf %1844, %1836 : vector<8x32xf32>
    %1846 = arith.mulf %1845, %1843 : vector<8x32xf32>
    %1847 = arith.mulf %1836, %1782 : vector<8x32xf32>
    %1848 = arith.addf %1846, %1847 : vector<8x32xf32>
    %cst_508 = arith.constant dense<0.000000e+00> : vector<8x96xf32>
    %1849 = tpu.matmul %1811, %1019, %cst_508 {dimension_numbers = #tpu.dot_dimension_numbers<[1], [0], [0], [1], [0, 0, 1, 1], [], []>} : vector<8x32xf32>, vector<32x96xf32>, vector<8x96xf32> -> vector<8x96xf32>
    %1850 = vector.extract_strided_slice %1819 {offsets = [0, 0], sizes = [8, 32], strides = [1, 1]} : vector<8x96xf32> to vector<8x32xf32>
    %1851 = vector.extract_strided_slice %1849 {offsets = [0, 0], sizes = [8, 32], strides = [1, 1]} : vector<8x96xf32> to vector<8x32xf32>
    %1852 = arith.addf %1850, %1851 : vector<8x32xf32>
    %1853 = arith.negf %1852 : vector<8x32xf32>
    %1854 = math.exp %1853 : vector<8x32xf32>
    %cst_509 = arith.constant 1.000000e+00 : f32
    %1855 = vector.broadcast %cst_509 : f32 to vector<8x32xf32>
    %1856 = arith.addf %1855, %1854 : vector<8x32xf32>
    %1857 = arith.divf %1855, %1856 : vector<8x32xf32>
    %1858 = vector.extract_strided_slice %1819 {offsets = [0, 32], sizes = [8, 32], strides = [1, 1]} : vector<8x96xf32> to vector<8x32xf32>
    %1859 = vector.extract_strided_slice %1849 {offsets = [0, 32], sizes = [8, 32], strides = [1, 1]} : vector<8x96xf32> to vector<8x32xf32>
    %1860 = arith.addf %1858, %1859 : vector<8x32xf32>
    %1861 = arith.negf %1860 : vector<8x32xf32>
    %1862 = math.exp %1861 : vector<8x32xf32>
    %cst_510 = arith.constant 1.000000e+00 : f32
    %1863 = vector.broadcast %cst_510 : f32 to vector<8x32xf32>
    %1864 = arith.addf %1863, %1862 : vector<8x32xf32>
    %1865 = arith.divf %1863, %1864 : vector<8x32xf32>
    %1866 = vector.extract_strided_slice %1819 {offsets = [0, 64], sizes = [8, 32], strides = [1, 1]} : vector<8x96xf32> to vector<8x32xf32>
    %1867 = vector.extract_strided_slice %1849 {offsets = [0, 64], sizes = [8, 32], strides = [1, 1]} : vector<8x96xf32> to vector<8x32xf32>
    %1868 = vector.broadcast %1023 : vector<1x32xf32> to vector<8x32xf32>
    %1869 = arith.addf %1867, %1868 : vector<8x32xf32>
    %1870 = arith.mulf %1857, %1869 : vector<8x32xf32>
    %1871 = arith.addf %1866, %1870 : vector<8x32xf32>
    %1872 = math.tanh %1871 : vector<8x32xf32>
    %cst_511 = arith.constant 1.000000e+00 : f32
    %1873 = vector.broadcast %cst_511 : f32 to vector<8x32xf32>
    %1874 = arith.subf %1873, %1865 : vector<8x32xf32>
    %1875 = arith.mulf %1874, %1872 : vector<8x32xf32>
    %1876 = arith.mulf %1865, %1811 : vector<8x32xf32>
    %1877 = arith.addf %1875, %1876 : vector<8x32xf32>
    %cst_512 = arith.constant 0.000000e+00 : f32
    %1878 = vector.broadcast %cst_512 : f32 to vector<8x32xf32>
    %1879 = arith.maximumf %1848, %1878 : vector<8x32xf32>
    %cst_513 = arith.constant 0.000000e+00 : f32
    %1880 = vector.broadcast %cst_513 : f32 to vector<8x32xf32>
    %1881 = arith.maximumf %1877, %1880 : vector<8x32xf32>
    %c96_514 = arith.constant 96 : index
    %c0_515 = arith.constant 0 : index
    %1882 = vector.load %arg14[%c96_514, %c0_515] : memref<128x64xf32, #tpu.memory_space<vmem>>, vector<8x32xf32>
    tpu.vector_store %arg14[%c96_514, %c0_515], %1879 {strides = array<i32>} : memref<128x64xf32, #tpu.memory_space<vmem>>, vector<8x32xf32>,
    %c24_516 = arith.constant 24 : index
    %c32_517 = arith.constant 32 : index
    %1883 = vector.load %arg14[%c24_516, %c32_517] : memref<128x64xf32, #tpu.memory_space<vmem>>, vector<8x32xf32>
    tpu.vector_store %arg14[%c24_516, %c32_517], %1881 {strides = array<i32>} : memref<128x64xf32, #tpu.memory_space<vmem>>, vector<8x32xf32>,
    %c104_518 = arith.constant 104 : index
    %c0_519 = arith.constant 0 : index
    %1884 = vector.load %arg15[%c104_518, %c0_519] : memref<128x192xf32, #tpu.memory_space<vmem>>, vector<8x96xf32>
    %c16_520 = arith.constant 16 : index
    %c96_521 = arith.constant 96 : index
    %1885 = vector.load %arg15[%c16_520, %c96_521] : memref<128x192xf32, #tpu.memory_space<vmem>>, vector<8x96xf32>
    %cst_522 = arith.constant dense<0.000000e+00> : vector<8x96xf32>
    %1886 = tpu.matmul %1848, %1017, %cst_522 {dimension_numbers = #tpu.dot_dimension_numbers<[1], [0], [0], [1], [0, 0, 1, 1], [], []>} : vector<8x32xf32>, vector<32x96xf32>, vector<8x96xf32> -> vector<8x96xf32>
    %1887 = vector.extract_strided_slice %1884 {offsets = [0, 0], sizes = [8, 32], strides = [1, 1]} : vector<8x96xf32> to vector<8x32xf32>
    %1888 = vector.extract_strided_slice %1886 {offsets = [0, 0], sizes = [8, 32], strides = [1, 1]} : vector<8x96xf32> to vector<8x32xf32>
    %1889 = arith.addf %1887, %1888 : vector<8x32xf32>
    %1890 = arith.negf %1889 : vector<8x32xf32>
    %1891 = math.exp %1890 : vector<8x32xf32>
    %cst_523 = arith.constant 1.000000e+00 : f32
    %1892 = vector.broadcast %cst_523 : f32 to vector<8x32xf32>
    %1893 = arith.addf %1892, %1891 : vector<8x32xf32>
    %1894 = arith.divf %1892, %1893 : vector<8x32xf32>
    %1895 = vector.extract_strided_slice %1884 {offsets = [0, 32], sizes = [8, 32], strides = [1, 1]} : vector<8x96xf32> to vector<8x32xf32>
    %1896 = vector.extract_strided_slice %1886 {offsets = [0, 32], sizes = [8, 32], strides = [1, 1]} : vector<8x96xf32> to vector<8x32xf32>
    %1897 = arith.addf %1895, %1896 : vector<8x32xf32>
    %1898 = arith.negf %1897 : vector<8x32xf32>
    %1899 = math.exp %1898 : vector<8x32xf32>
    %cst_524 = arith.constant 1.000000e+00 : f32
    %1900 = vector.broadcast %cst_524 : f32 to vector<8x32xf32>
    %1901 = arith.addf %1900, %1899 : vector<8x32xf32>
    %1902 = arith.divf %1900, %1901 : vector<8x32xf32>
    %1903 = vector.extract_strided_slice %1884 {offsets = [0, 64], sizes = [8, 32], strides = [1, 1]} : vector<8x96xf32> to vector<8x32xf32>
    %1904 = vector.extract_strided_slice %1886 {offsets = [0, 64], sizes = [8, 32], strides = [1, 1]} : vector<8x96xf32> to vector<8x32xf32>
    %1905 = vector.broadcast %1021 : vector<1x32xf32> to vector<8x32xf32>
    %1906 = arith.addf %1904, %1905 : vector<8x32xf32>
    %1907 = arith.mulf %1894, %1906 : vector<8x32xf32>
    %1908 = arith.addf %1903, %1907 : vector<8x32xf32>
    %1909 = math.tanh %1908 : vector<8x32xf32>
    %cst_525 = arith.constant 1.000000e+00 : f32
    %1910 = vector.broadcast %cst_525 : f32 to vector<8x32xf32>
    %1911 = arith.subf %1910, %1902 : vector<8x32xf32>
    %1912 = arith.mulf %1911, %1909 : vector<8x32xf32>
    %1913 = arith.mulf %1902, %1848 : vector<8x32xf32>
    %1914 = arith.addf %1912, %1913 : vector<8x32xf32>
    %cst_526 = arith.constant dense<0.000000e+00> : vector<8x96xf32>
    %1915 = tpu.matmul %1877, %1019, %cst_526 {dimension_numbers = #tpu.dot_dimension_numbers<[1], [0], [0], [1], [0, 0, 1, 1], [], []>} : vector<8x32xf32>, vector<32x96xf32>, vector<8x96xf32> -> vector<8x96xf32>
    %1916 = vector.extract_strided_slice %1885 {offsets = [0, 0], sizes = [8, 32], strides = [1, 1]} : vector<8x96xf32> to vector<8x32xf32>
    %1917 = vector.extract_strided_slice %1915 {offsets = [0, 0], sizes = [8, 32], strides = [1, 1]} : vector<8x96xf32> to vector<8x32xf32>
    %1918 = arith.addf %1916, %1917 : vector<8x32xf32>
    %1919 = arith.negf %1918 : vector<8x32xf32>
    %1920 = math.exp %1919 : vector<8x32xf32>
    %cst_527 = arith.constant 1.000000e+00 : f32
    %1921 = vector.broadcast %cst_527 : f32 to vector<8x32xf32>
    %1922 = arith.addf %1921, %1920 : vector<8x32xf32>
    %1923 = arith.divf %1921, %1922 : vector<8x32xf32>
    %1924 = vector.extract_strided_slice %1885 {offsets = [0, 32], sizes = [8, 32], strides = [1, 1]} : vector<8x96xf32> to vector<8x32xf32>
    %1925 = vector.extract_strided_slice %1915 {offsets = [0, 32], sizes = [8, 32], strides = [1, 1]} : vector<8x96xf32> to vector<8x32xf32>
    %1926 = arith.addf %1924, %1925 : vector<8x32xf32>
    %1927 = arith.negf %1926 : vector<8x32xf32>
    %1928 = math.exp %1927 : vector<8x32xf32>
    %cst_528 = arith.constant 1.000000e+00 : f32
    %1929 = vector.broadcast %cst_528 : f32 to vector<8x32xf32>
    %1930 = arith.addf %1929, %1928 : vector<8x32xf32>
    %1931 = arith.divf %1929, %1930 : vector<8x32xf32>
    %1932 = vector.extract_strided_slice %1885 {offsets = [0, 64], sizes = [8, 32], strides = [1, 1]} : vector<8x96xf32> to vector<8x32xf32>
    %1933 = vector.extract_strided_slice %1915 {offsets = [0, 64], sizes = [8, 32], strides = [1, 1]} : vector<8x96xf32> to vector<8x32xf32>
    %1934 = vector.broadcast %1023 : vector<1x32xf32> to vector<8x32xf32>
    %1935 = arith.addf %1933, %1934 : vector<8x32xf32>
    %1936 = arith.mulf %1923, %1935 : vector<8x32xf32>
    %1937 = arith.addf %1932, %1936 : vector<8x32xf32>
    %1938 = math.tanh %1937 : vector<8x32xf32>
    %cst_529 = arith.constant 1.000000e+00 : f32
    %1939 = vector.broadcast %cst_529 : f32 to vector<8x32xf32>
    %1940 = arith.subf %1939, %1931 : vector<8x32xf32>
    %1941 = arith.mulf %1940, %1938 : vector<8x32xf32>
    %1942 = arith.mulf %1931, %1877 : vector<8x32xf32>
    %1943 = arith.addf %1941, %1942 : vector<8x32xf32>
    %cst_530 = arith.constant 0.000000e+00 : f32
    %1944 = vector.broadcast %cst_530 : f32 to vector<8x32xf32>
    %1945 = arith.maximumf %1914, %1944 : vector<8x32xf32>
    %cst_531 = arith.constant 0.000000e+00 : f32
    %1946 = vector.broadcast %cst_531 : f32 to vector<8x32xf32>
    %1947 = arith.maximumf %1943, %1946 : vector<8x32xf32>
    %c104_532 = arith.constant 104 : index
    %c0_533 = arith.constant 0 : index
    %1948 = vector.load %arg14[%c104_532, %c0_533] : memref<128x64xf32, #tpu.memory_space<vmem>>, vector<8x32xf32>
    tpu.vector_store %arg14[%c104_532, %c0_533], %1945 {strides = array<i32>} : memref<128x64xf32, #tpu.memory_space<vmem>>, vector<8x32xf32>,
    %c16_534 = arith.constant 16 : index
    %c32_535 = arith.constant 32 : index
    %1949 = vector.load %arg14[%c16_534, %c32_535] : memref<128x64xf32, #tpu.memory_space<vmem>>, vector<8x32xf32>
    tpu.vector_store %arg14[%c16_534, %c32_535], %1947 {strides = array<i32>} : memref<128x64xf32, #tpu.memory_space<vmem>>, vector<8x32xf32>,
    %c112_536 = arith.constant 112 : index
    %c0_537 = arith.constant 0 : index
    %1950 = vector.load %arg15[%c112_536, %c0_537] : memref<128x192xf32, #tpu.memory_space<vmem>>, vector<8x96xf32>
    %c8_538 = arith.constant 8 : index
    %c96_539 = arith.constant 96 : index
    %1951 = vector.load %arg15[%c8_538, %c96_539] : memref<128x192xf32, #tpu.memory_space<vmem>>, vector<8x96xf32>
    %cst_540 = arith.constant dense<0.000000e+00> : vector<8x96xf32>
    %1952 = tpu.matmul %1914, %1017, %cst_540 {dimension_numbers = #tpu.dot_dimension_numbers<[1], [0], [0], [1], [0, 0, 1, 1], [], []>} : vector<8x32xf32>, vector<32x96xf32>, vector<8x96xf32> -> vector<8x96xf32>
    %1953 = vector.extract_strided_slice %1950 {offsets = [0, 0], sizes = [8, 32], strides = [1, 1]} : vector<8x96xf32> to vector<8x32xf32>
    %1954 = vector.extract_strided_slice %1952 {offsets = [0, 0], sizes = [8, 32], strides = [1, 1]} : vector<8x96xf32> to vector<8x32xf32>
    %1955 = arith.addf %1953, %1954 : vector<8x32xf32>
    %1956 = arith.negf %1955 : vector<8x32xf32>
    %1957 = math.exp %1956 : vector<8x32xf32>
    %cst_541 = arith.constant 1.000000e+00 : f32
    %1958 = vector.broadcast %cst_541 : f32 to vector<8x32xf32>
    %1959 = arith.addf %1958, %1957 : vector<8x32xf32>
    %1960 = arith.divf %1958, %1959 : vector<8x32xf32>
    %1961 = vector.extract_strided_slice %1950 {offsets = [0, 32], sizes = [8, 32], strides = [1, 1]} : vector<8x96xf32> to vector<8x32xf32>
    %1962 = vector.extract_strided_slice %1952 {offsets = [0, 32], sizes = [8, 32], strides = [1, 1]} : vector<8x96xf32> to vector<8x32xf32>
    %1963 = arith.addf %1961, %1962 : vector<8x32xf32>
    %1964 = arith.negf %1963 : vector<8x32xf32>
    %1965 = math.exp %1964 : vector<8x32xf32>
    %cst_542 = arith.constant 1.000000e+00 : f32
    %1966 = vector.broadcast %cst_542 : f32 to vector<8x32xf32>
    %1967 = arith.addf %1966, %1965 : vector<8x32xf32>
    %1968 = arith.divf %1966, %1967 : vector<8x32xf32>
    %1969 = vector.extract_strided_slice %1950 {offsets = [0, 64], sizes = [8, 32], strides = [1, 1]} : vector<8x96xf32> to vector<8x32xf32>
    %1970 = vector.extract_strided_slice %1952 {offsets = [0, 64], sizes = [8, 32], strides = [1, 1]} : vector<8x96xf32> to vector<8x32xf32>
    %1971 = vector.broadcast %1021 : vector<1x32xf32> to vector<8x32xf32>
    %1972 = arith.addf %1970, %1971 : vector<8x32xf32>
    %1973 = arith.mulf %1960, %1972 : vector<8x32xf32>
    %1974 = arith.addf %1969, %1973 : vector<8x32xf32>
    %1975 = math.tanh %1974 : vector<8x32xf32>
    %cst_543 = arith.constant 1.000000e+00 : f32
    %1976 = vector.broadcast %cst_543 : f32 to vector<8x32xf32>
    %1977 = arith.subf %1976, %1968 : vector<8x32xf32>
    %1978 = arith.mulf %1977, %1975 : vector<8x32xf32>
    %1979 = arith.mulf %1968, %1914 : vector<8x32xf32>
    %1980 = arith.addf %1978, %1979 : vector<8x32xf32>
    %cst_544 = arith.constant dense<0.000000e+00> : vector<8x96xf32>
    %1981 = tpu.matmul %1943, %1019, %cst_544 {dimension_numbers = #tpu.dot_dimension_numbers<[1], [0], [0], [1], [0, 0, 1, 1], [], []>} : vector<8x32xf32>, vector<32x96xf32>, vector<8x96xf32> -> vector<8x96xf32>
    %1982 = vector.extract_strided_slice %1951 {offsets = [0, 0], sizes = [8, 32], strides = [1, 1]} : vector<8x96xf32> to vector<8x32xf32>
    %1983 = vector.extract_strided_slice %1981 {offsets = [0, 0], sizes = [8, 32], strides = [1, 1]} : vector<8x96xf32> to vector<8x32xf32>
    %1984 = arith.addf %1982, %1983 : vector<8x32xf32>
    %1985 = arith.negf %1984 : vector<8x32xf32>
    %1986 = math.exp %1985 : vector<8x32xf32>
    %cst_545 = arith.constant 1.000000e+00 : f32
    %1987 = vector.broadcast %cst_545 : f32 to vector<8x32xf32>
    %1988 = arith.addf %1987, %1986 : vector<8x32xf32>
    %1989 = arith.divf %1987, %1988 : vector<8x32xf32>
    %1990 = vector.extract_strided_slice %1951 {offsets = [0, 32], sizes = [8, 32], strides = [1, 1]} : vector<8x96xf32> to vector<8x32xf32>
    %1991 = vector.extract_strided_slice %1981 {offsets = [0, 32], sizes = [8, 32], strides = [1, 1]} : vector<8x96xf32> to vector<8x32xf32>
    %1992 = arith.addf %1990, %1991 : vector<8x32xf32>
    %1993 = arith.negf %1992 : vector<8x32xf32>
    %1994 = math.exp %1993 : vector<8x32xf32>
    %cst_546 = arith.constant 1.000000e+00 : f32
    %1995 = vector.broadcast %cst_546 : f32 to vector<8x32xf32>
    %1996 = arith.addf %1995, %1994 : vector<8x32xf32>
    %1997 = arith.divf %1995, %1996 : vector<8x32xf32>
    %1998 = vector.extract_strided_slice %1951 {offsets = [0, 64], sizes = [8, 32], strides = [1, 1]} : vector<8x96xf32> to vector<8x32xf32>
    %1999 = vector.extract_strided_slice %1981 {offsets = [0, 64], sizes = [8, 32], strides = [1, 1]} : vector<8x96xf32> to vector<8x32xf32>
    %2000 = vector.broadcast %1023 : vector<1x32xf32> to vector<8x32xf32>
    %2001 = arith.addf %1999, %2000 : vector<8x32xf32>
    %2002 = arith.mulf %1989, %2001 : vector<8x32xf32>
    %2003 = arith.addf %1998, %2002 : vector<8x32xf32>
    %2004 = math.tanh %2003 : vector<8x32xf32>
    %cst_547 = arith.constant 1.000000e+00 : f32
    %2005 = vector.broadcast %cst_547 : f32 to vector<8x32xf32>
    %2006 = arith.subf %2005, %1997 : vector<8x32xf32>
    %2007 = arith.mulf %2006, %2004 : vector<8x32xf32>
    %2008 = arith.mulf %1997, %1943 : vector<8x32xf32>
    %2009 = arith.addf %2007, %2008 : vector<8x32xf32>
    %cst_548 = arith.constant 0.000000e+00 : f32
    %2010 = vector.broadcast %cst_548 : f32 to vector<8x32xf32>
    %2011 = arith.maximumf %1980, %2010 : vector<8x32xf32>
    %cst_549 = arith.constant 0.000000e+00 : f32
    %2012 = vector.broadcast %cst_549 : f32 to vector<8x32xf32>
    %2013 = arith.maximumf %2009, %2012 : vector<8x32xf32>
    %c112_550 = arith.constant 112 : index
    %c0_551 = arith.constant 0 : index
    %2014 = vector.load %arg14[%c112_550, %c0_551] : memref<128x64xf32, #tpu.memory_space<vmem>>, vector<8x32xf32>
    tpu.vector_store %arg14[%c112_550, %c0_551], %2011 {strides = array<i32>} : memref<128x64xf32, #tpu.memory_space<vmem>>, vector<8x32xf32>,
    %c8_552 = arith.constant 8 : index
    %c32_553 = arith.constant 32 : index
    %2015 = vector.load %arg14[%c8_552, %c32_553] : memref<128x64xf32, #tpu.memory_space<vmem>>, vector<8x32xf32>
    tpu.vector_store %arg14[%c8_552, %c32_553], %2013 {strides = array<i32>} : memref<128x64xf32, #tpu.memory_space<vmem>>, vector<8x32xf32>,
    %c120_554 = arith.constant 120 : index
    %c0_555 = arith.constant 0 : index
    %2016 = vector.load %arg15[%c120_554, %c0_555] : memref<128x192xf32, #tpu.memory_space<vmem>>, vector<8x96xf32>
    %c0_556 = arith.constant 0 : index
    %c96_557 = arith.constant 96 : index
    %2017 = vector.load %arg15[%c0_556, %c96_557] : memref<128x192xf32, #tpu.memory_space<vmem>>, vector<8x96xf32>
    %cst_558 = arith.constant dense<0.000000e+00> : vector<8x96xf32>
    %2018 = tpu.matmul %1980, %1017, %cst_558 {dimension_numbers = #tpu.dot_dimension_numbers<[1], [0], [0], [1], [0, 0, 1, 1], [], []>} : vector<8x32xf32>, vector<32x96xf32>, vector<8x96xf32> -> vector<8x96xf32>
    %2019 = vector.extract_strided_slice %2016 {offsets = [0, 0], sizes = [8, 32], strides = [1, 1]} : vector<8x96xf32> to vector<8x32xf32>
    %2020 = vector.extract_strided_slice %2018 {offsets = [0, 0], sizes = [8, 32], strides = [1, 1]} : vector<8x96xf32> to vector<8x32xf32>
    %2021 = arith.addf %2019, %2020 : vector<8x32xf32>
    %2022 = arith.negf %2021 : vector<8x32xf32>
    %2023 = math.exp %2022 : vector<8x32xf32>
    %cst_559 = arith.constant 1.000000e+00 : f32
    %2024 = vector.broadcast %cst_559 : f32 to vector<8x32xf32>
    %2025 = arith.addf %2024, %2023 : vector<8x32xf32>
    %2026 = arith.divf %2024, %2025 : vector<8x32xf32>
    %2027 = vector.extract_strided_slice %2016 {offsets = [0, 32], sizes = [8, 32], strides = [1, 1]} : vector<8x96xf32> to vector<8x32xf32>
    %2028 = vector.extract_strided_slice %2018 {offsets = [0, 32], sizes = [8, 32], strides = [1, 1]} : vector<8x96xf32> to vector<8x32xf32>
    %2029 = arith.addf %2027, %2028 : vector<8x32xf32>
    %2030 = arith.negf %2029 : vector<8x32xf32>
    %2031 = math.exp %2030 : vector<8x32xf32>
    %cst_560 = arith.constant 1.000000e+00 : f32
    %2032 = vector.broadcast %cst_560 : f32 to vector<8x32xf32>
    %2033 = arith.addf %2032, %2031 : vector<8x32xf32>
    %2034 = arith.divf %2032, %2033 : vector<8x32xf32>
    %2035 = vector.extract_strided_slice %2016 {offsets = [0, 64], sizes = [8, 32], strides = [1, 1]} : vector<8x96xf32> to vector<8x32xf32>
    %2036 = vector.extract_strided_slice %2018 {offsets = [0, 64], sizes = [8, 32], strides = [1, 1]} : vector<8x96xf32> to vector<8x32xf32>
    %2037 = vector.broadcast %1021 : vector<1x32xf32> to vector<8x32xf32>
    %2038 = arith.addf %2036, %2037 : vector<8x32xf32>
    %2039 = arith.mulf %2026, %2038 : vector<8x32xf32>
    %2040 = arith.addf %2035, %2039 : vector<8x32xf32>
    %2041 = math.tanh %2040 : vector<8x32xf32>
    %cst_561 = arith.constant 1.000000e+00 : f32
    %2042 = vector.broadcast %cst_561 : f32 to vector<8x32xf32>
    %2043 = arith.subf %2042, %2034 : vector<8x32xf32>
    %2044 = arith.mulf %2043, %2041 : vector<8x32xf32>
    %2045 = arith.mulf %2034, %1980 : vector<8x32xf32>
    %2046 = arith.addf %2044, %2045 : vector<8x32xf32>
    %cst_562 = arith.constant dense<0.000000e+00> : vector<8x96xf32>
    %2047 = tpu.matmul %2009, %1019, %cst_562 {dimension_numbers = #tpu.dot_dimension_numbers<[1], [0], [0], [1], [0, 0, 1, 1], [], []>} : vector<8x32xf32>, vector<32x96xf32>, vector<8x96xf32> -> vector<8x96xf32>
    %2048 = vector.extract_strided_slice %2017 {offsets = [0, 0], sizes = [8, 32], strides = [1, 1]} : vector<8x96xf32> to vector<8x32xf32>
    %2049 = vector.extract_strided_slice %2047 {offsets = [0, 0], sizes = [8, 32], strides = [1, 1]} : vector<8x96xf32> to vector<8x32xf32>
    %2050 = arith.addf %2048, %2049 : vector<8x32xf32>
    %2051 = arith.negf %2050 : vector<8x32xf32>
    %2052 = math.exp %2051 : vector<8x32xf32>
    %cst_563 = arith.constant 1.000000e+00 : f32
    %2053 = vector.broadcast %cst_563 : f32 to vector<8x32xf32>
    %2054 = arith.addf %2053, %2052 : vector<8x32xf32>
    %2055 = arith.divf %2053, %2054 : vector<8x32xf32>
    %2056 = vector.extract_strided_slice %2017 {offsets = [0, 32], sizes = [8, 32], strides = [1, 1]} : vector<8x96xf32> to vector<8x32xf32>
    %2057 = vector.extract_strided_slice %2047 {offsets = [0, 32], sizes = [8, 32], strides = [1, 1]} : vector<8x96xf32> to vector<8x32xf32>
    %2058 = arith.addf %2056, %2057 : vector<8x32xf32>
    %2059 = arith.negf %2058 : vector<8x32xf32>
    %2060 = math.exp %2059 : vector<8x32xf32>
    %cst_564 = arith.constant 1.000000e+00 : f32
    %2061 = vector.broadcast %cst_564 : f32 to vector<8x32xf32>
    %2062 = arith.addf %2061, %2060 : vector<8x32xf32>
    %2063 = arith.divf %2061, %2062 : vector<8x32xf32>
    %2064 = vector.extract_strided_slice %2017 {offsets = [0, 64], sizes = [8, 32], strides = [1, 1]} : vector<8x96xf32> to vector<8x32xf32>
    %2065 = vector.extract_strided_slice %2047 {offsets = [0, 64], sizes = [8, 32], strides = [1, 1]} : vector<8x96xf32> to vector<8x32xf32>
    %2066 = vector.broadcast %1023 : vector<1x32xf32> to vector<8x32xf32>
    %2067 = arith.addf %2065, %2066 : vector<8x32xf32>
    %2068 = arith.mulf %2055, %2067 : vector<8x32xf32>
    %2069 = arith.addf %2064, %2068 : vector<8x32xf32>
    %2070 = math.tanh %2069 : vector<8x32xf32>
    %cst_565 = arith.constant 1.000000e+00 : f32
    %2071 = vector.broadcast %cst_565 : f32 to vector<8x32xf32>
    %2072 = arith.subf %2071, %2063 : vector<8x32xf32>
    %2073 = arith.mulf %2072, %2070 : vector<8x32xf32>
    %2074 = arith.mulf %2063, %2009 : vector<8x32xf32>
    %2075 = arith.addf %2073, %2074 : vector<8x32xf32>
    %cst_566 = arith.constant 0.000000e+00 : f32
    %2076 = vector.broadcast %cst_566 : f32 to vector<8x32xf32>
    %2077 = arith.maximumf %2046, %2076 : vector<8x32xf32>
    %cst_567 = arith.constant 0.000000e+00 : f32
    %2078 = vector.broadcast %cst_567 : f32 to vector<8x32xf32>
    %2079 = arith.maximumf %2075, %2078 : vector<8x32xf32>
    %c120_568 = arith.constant 120 : index
    %c0_569 = arith.constant 0 : index
    %2080 = vector.load %arg14[%c120_568, %c0_569] : memref<128x64xf32, #tpu.memory_space<vmem>>, vector<8x32xf32>
    tpu.vector_store %arg14[%c120_568, %c0_569], %2077 {strides = array<i32>} : memref<128x64xf32, #tpu.memory_space<vmem>>, vector<8x32xf32>,
    %c0_570 = arith.constant 0 : index
    %c32_571 = arith.constant 32 : index
    %2081 = vector.load %arg14[%c0_570, %c32_571] : memref<128x64xf32, #tpu.memory_space<vmem>>, vector<8x32xf32>
    tpu.vector_store %arg14[%c0_570, %c32_571], %2079 {strides = array<i32>} : memref<128x64xf32, #tpu.memory_space<vmem>>, vector<8x32xf32>,
    %c0_572 = arith.constant 0 : index
    %c0_573 = arith.constant 0 : index
    %2082 = vector.load %arg9[%c0_572, %c0_573] : memref<1x64xf32, #tpu.memory_space<vmem>>, vector<1x64xf32>
    %c0_574 = arith.constant 0 : index
    %c0_575 = arith.constant 0 : index
    %2083 = vector.load %arg10[%c0_574, %c0_575] : memref<1x1xf32, #tpu.memory_space<vmem>>, vector<1x1xf32>
    %c0_576 = arith.constant 0 : index
    %c0_577 = arith.constant 0 : index
    %2084 = vector.load %arg11[%c0_576, %c0_577] : memref<16x16xf32, #tpu.memory_space<vmem>>, vector<16x16xf32>
    %cst_578 = arith.constant 0.000000e+00 : f32
    %2085 = vector.broadcast %cst_578 : f32 to vector<8x16xf32>
    %c0_579 = arith.constant 0 : index
    %c0_580 = arith.constant 0 : index
    %2086 = vector.load %arg14[%c0_579, %c0_580] : memref<128x64xf32, #tpu.memory_space<vmem>>, vector<8x64xf32>
    %2087 = vector.broadcast %2082 : vector<1x64xf32> to vector<8x64xf32>
    %2088 = arith.mulf %2086, %2087 : vector<8x64xf32>
    %cst_581 = arith.constant dense<0.000000e+00> : vector<8xf32>
    %2089 = vector.multi_reduction <add>, %2088, %cst_581 [1] : vector<8x64xf32> to vector<8xf32>
    %2090 = vector.shape_cast %2089 : vector<8xf32> to vector<8x1xf32>
    %2091 = vector.broadcast %2083 : vector<1x1xf32> to vector<8x1xf32>
    %2092 = arith.addf %2090, %2091 : vector<8x1xf32>
    %cst_582 = arith.constant 0.000000e+00 : f32
    %2093 = vector.broadcast %cst_582 : f32 to vector<8x1xf32>
    %2094 = arith.maximumf %2092, %2093 : vector<8x1xf32>
    %2095 = vector.extract_strided_slice %2084 {offsets = [0, 0], sizes = [1, 16], strides = [1, 1]} : vector<16x16xf32> to vector<1x16xf32>
    %2096 = vector.broadcast %2094 : vector<8x1xf32> to vector<8x16xf32>
    %2097 = vector.broadcast %2095 : vector<1x16xf32> to vector<8x16xf32>
    %2098 = arith.mulf %2096, %2097 : vector<8x16xf32>
    %2099 = arith.addf %2085, %2098 : vector<8x16xf32>
    %c8_583 = arith.constant 8 : index
    %c0_584 = arith.constant 0 : index
    %2100 = vector.load %arg14[%c8_583, %c0_584] : memref<128x64xf32, #tpu.memory_space<vmem>>, vector<8x64xf32>
    %2101 = vector.broadcast %2082 : vector<1x64xf32> to vector<8x64xf32>
    %2102 = arith.mulf %2100, %2101 : vector<8x64xf32>
    %cst_585 = arith.constant dense<0.000000e+00> : vector<8xf32>
    %2103 = vector.multi_reduction <add>, %2102, %cst_585 [1] : vector<8x64xf32> to vector<8xf32>
    %2104 = vector.shape_cast %2103 : vector<8xf32> to vector<8x1xf32>
    %2105 = vector.broadcast %2083 : vector<1x1xf32> to vector<8x1xf32>
    %2106 = arith.addf %2104, %2105 : vector<8x1xf32>
    %cst_586 = arith.constant 0.000000e+00 : f32
    %2107 = vector.broadcast %cst_586 : f32 to vector<8x1xf32>
    %2108 = arith.maximumf %2106, %2107 : vector<8x1xf32>
    %2109 = vector.extract_strided_slice %2084 {offsets = [1, 0], sizes = [1, 16], strides = [1, 1]} : vector<16x16xf32> to vector<1x16xf32>
    %2110 = vector.broadcast %2108 : vector<8x1xf32> to vector<8x16xf32>
    %2111 = vector.broadcast %2109 : vector<1x16xf32> to vector<8x16xf32>
    %2112 = arith.mulf %2110, %2111 : vector<8x16xf32>
    %2113 = arith.addf %2099, %2112 : vector<8x16xf32>
    %c16_587 = arith.constant 16 : index
    %c0_588 = arith.constant 0 : index
    %2114 = vector.load %arg14[%c16_587, %c0_588] : memref<128x64xf32, #tpu.memory_space<vmem>>, vector<8x64xf32>
    %2115 = vector.broadcast %2082 : vector<1x64xf32> to vector<8x64xf32>
    %2116 = arith.mulf %2114, %2115 : vector<8x64xf32>
    %cst_589 = arith.constant dense<0.000000e+00> : vector<8xf32>
    %2117 = vector.multi_reduction <add>, %2116, %cst_589 [1] : vector<8x64xf32> to vector<8xf32>
    %2118 = vector.shape_cast %2117 : vector<8xf32> to vector<8x1xf32>
    %2119 = vector.broadcast %2083 : vector<1x1xf32> to vector<8x1xf32>
    %2120 = arith.addf %2118, %2119 : vector<8x1xf32>
    %cst_590 = arith.constant 0.000000e+00 : f32
    %2121 = vector.broadcast %cst_590 : f32 to vector<8x1xf32>
    %2122 = arith.maximumf %2120, %2121 : vector<8x1xf32>
    %2123 = vector.extract_strided_slice %2084 {offsets = [2, 0], sizes = [1, 16], strides = [1, 1]} : vector<16x16xf32> to vector<1x16xf32>
    %2124 = vector.broadcast %2122 : vector<8x1xf32> to vector<8x16xf32>
    %2125 = vector.broadcast %2123 : vector<1x16xf32> to vector<8x16xf32>
    %2126 = arith.mulf %2124, %2125 : vector<8x16xf32>
    %2127 = arith.addf %2113, %2126 : vector<8x16xf32>
    %c24_591 = arith.constant 24 : index
    %c0_592 = arith.constant 0 : index
    %2128 = vector.load %arg14[%c24_591, %c0_592] : memref<128x64xf32, #tpu.memory_space<vmem>>, vector<8x64xf32>
    %2129 = vector.broadcast %2082 : vector<1x64xf32> to vector<8x64xf32>
    %2130 = arith.mulf %2128, %2129 : vector<8x64xf32>
    %cst_593 = arith.constant dense<0.000000e+00> : vector<8xf32>
    %2131 = vector.multi_reduction <add>, %2130, %cst_593 [1] : vector<8x64xf32> to vector<8xf32>
    %2132 = vector.shape_cast %2131 : vector<8xf32> to vector<8x1xf32>
    %2133 = vector.broadcast %2083 : vector<1x1xf32> to vector<8x1xf32>
    %2134 = arith.addf %2132, %2133 : vector<8x1xf32>
    %cst_594 = arith.constant 0.000000e+00 : f32
    %2135 = vector.broadcast %cst_594 : f32 to vector<8x1xf32>
    %2136 = arith.maximumf %2134, %2135 : vector<8x1xf32>
    %2137 = vector.extract_strided_slice %2084 {offsets = [3, 0], sizes = [1, 16], strides = [1, 1]} : vector<16x16xf32> to vector<1x16xf32>
    %2138 = vector.broadcast %2136 : vector<8x1xf32> to vector<8x16xf32>
    %2139 = vector.broadcast %2137 : vector<1x16xf32> to vector<8x16xf32>
    %2140 = arith.mulf %2138, %2139 : vector<8x16xf32>
    %2141 = arith.addf %2127, %2140 : vector<8x16xf32>
    %c32_595 = arith.constant 32 : index
    %c0_596 = arith.constant 0 : index
    %2142 = vector.load %arg14[%c32_595, %c0_596] : memref<128x64xf32, #tpu.memory_space<vmem>>, vector<8x64xf32>
    %2143 = vector.broadcast %2082 : vector<1x64xf32> to vector<8x64xf32>
    %2144 = arith.mulf %2142, %2143 : vector<8x64xf32>
    %cst_597 = arith.constant dense<0.000000e+00> : vector<8xf32>
    %2145 = vector.multi_reduction <add>, %2144, %cst_597 [1] : vector<8x64xf32> to vector<8xf32>
    %2146 = vector.shape_cast %2145 : vector<8xf32> to vector<8x1xf32>
    %2147 = vector.broadcast %2083 : vector<1x1xf32> to vector<8x1xf32>
    %2148 = arith.addf %2146, %2147 : vector<8x1xf32>
    %cst_598 = arith.constant 0.000000e+00 : f32
    %2149 = vector.broadcast %cst_598 : f32 to vector<8x1xf32>
    %2150 = arith.maximumf %2148, %2149 : vector<8x1xf32>
    %2151 = vector.extract_strided_slice %2084 {offsets = [4, 0], sizes = [1, 16], strides = [1, 1]} : vector<16x16xf32> to vector<1x16xf32>
    %2152 = vector.broadcast %2150 : vector<8x1xf32> to vector<8x16xf32>
    %2153 = vector.broadcast %2151 : vector<1x16xf32> to vector<8x16xf32>
    %2154 = arith.mulf %2152, %2153 : vector<8x16xf32>
    %2155 = arith.addf %2141, %2154 : vector<8x16xf32>
    %c40_599 = arith.constant 40 : index
    %c0_600 = arith.constant 0 : index
    %2156 = vector.load %arg14[%c40_599, %c0_600] : memref<128x64xf32, #tpu.memory_space<vmem>>, vector<8x64xf32>
    %2157 = vector.broadcast %2082 : vector<1x64xf32> to vector<8x64xf32>
    %2158 = arith.mulf %2156, %2157 : vector<8x64xf32>
    %cst_601 = arith.constant dense<0.000000e+00> : vector<8xf32>
    %2159 = vector.multi_reduction <add>, %2158, %cst_601 [1] : vector<8x64xf32> to vector<8xf32>
    %2160 = vector.shape_cast %2159 : vector<8xf32> to vector<8x1xf32>
    %2161 = vector.broadcast %2083 : vector<1x1xf32> to vector<8x1xf32>
    %2162 = arith.addf %2160, %2161 : vector<8x1xf32>
    %cst_602 = arith.constant 0.000000e+00 : f32
    %2163 = vector.broadcast %cst_602 : f32 to vector<8x1xf32>
    %2164 = arith.maximumf %2162, %2163 : vector<8x1xf32>
    %2165 = vector.extract_strided_slice %2084 {offsets = [5, 0], sizes = [1, 16], strides = [1, 1]} : vector<16x16xf32> to vector<1x16xf32>
    %2166 = vector.broadcast %2164 : vector<8x1xf32> to vector<8x16xf32>
    %2167 = vector.broadcast %2165 : vector<1x16xf32> to vector<8x16xf32>
    %2168 = arith.mulf %2166, %2167 : vector<8x16xf32>
    %2169 = arith.addf %2155, %2168 : vector<8x16xf32>
    %c48_603 = arith.constant 48 : index
    %c0_604 = arith.constant 0 : index
    %2170 = vector.load %arg14[%c48_603, %c0_604] : memref<128x64xf32, #tpu.memory_space<vmem>>, vector<8x64xf32>
    %2171 = vector.broadcast %2082 : vector<1x64xf32> to vector<8x64xf32>
    %2172 = arith.mulf %2170, %2171 : vector<8x64xf32>
    %cst_605 = arith.constant dense<0.000000e+00> : vector<8xf32>
    %2173 = vector.multi_reduction <add>, %2172, %cst_605 [1] : vector<8x64xf32> to vector<8xf32>
    %2174 = vector.shape_cast %2173 : vector<8xf32> to vector<8x1xf32>
    %2175 = vector.broadcast %2083 : vector<1x1xf32> to vector<8x1xf32>
    %2176 = arith.addf %2174, %2175 : vector<8x1xf32>
    %cst_606 = arith.constant 0.000000e+00 : f32
    %2177 = vector.broadcast %cst_606 : f32 to vector<8x1xf32>
    %2178 = arith.maximumf %2176, %2177 : vector<8x1xf32>
    %2179 = vector.extract_strided_slice %2084 {offsets = [6, 0], sizes = [1, 16], strides = [1, 1]} : vector<16x16xf32> to vector<1x16xf32>
    %2180 = vector.broadcast %2178 : vector<8x1xf32> to vector<8x16xf32>
    %2181 = vector.broadcast %2179 : vector<1x16xf32> to vector<8x16xf32>
    %2182 = arith.mulf %2180, %2181 : vector<8x16xf32>
    %2183 = arith.addf %2169, %2182 : vector<8x16xf32>
    %c56_607 = arith.constant 56 : index
    %c0_608 = arith.constant 0 : index
    %2184 = vector.load %arg14[%c56_607, %c0_608] : memref<128x64xf32, #tpu.memory_space<vmem>>, vector<8x64xf32>
    %2185 = vector.broadcast %2082 : vector<1x64xf32> to vector<8x64xf32>
    %2186 = arith.mulf %2184, %2185 : vector<8x64xf32>
    %cst_609 = arith.constant dense<0.000000e+00> : vector<8xf32>
    %2187 = vector.multi_reduction <add>, %2186, %cst_609 [1] : vector<8x64xf32> to vector<8xf32>
    %2188 = vector.shape_cast %2187 : vector<8xf32> to vector<8x1xf32>
    %2189 = vector.broadcast %2083 : vector<1x1xf32> to vector<8x1xf32>
    %2190 = arith.addf %2188, %2189 : vector<8x1xf32>
    %cst_610 = arith.constant 0.000000e+00 : f32
    %2191 = vector.broadcast %cst_610 : f32 to vector<8x1xf32>
    %2192 = arith.maximumf %2190, %2191 : vector<8x1xf32>
    %2193 = vector.extract_strided_slice %2084 {offsets = [7, 0], sizes = [1, 16], strides = [1, 1]} : vector<16x16xf32> to vector<1x16xf32>
    %2194 = vector.broadcast %2192 : vector<8x1xf32> to vector<8x16xf32>
    %2195 = vector.broadcast %2193 : vector<1x16xf32> to vector<8x16xf32>
    %2196 = arith.mulf %2194, %2195 : vector<8x16xf32>
    %2197 = arith.addf %2183, %2196 : vector<8x16xf32>
    %c64_611 = arith.constant 64 : index
    %c0_612 = arith.constant 0 : index
    %2198 = vector.load %arg14[%c64_611, %c0_612] : memref<128x64xf32, #tpu.memory_space<vmem>>, vector<8x64xf32>
    %2199 = vector.broadcast %2082 : vector<1x64xf32> to vector<8x64xf32>
    %2200 = arith.mulf %2198, %2199 : vector<8x64xf32>
    %cst_613 = arith.constant dense<0.000000e+00> : vector<8xf32>
    %2201 = vector.multi_reduction <add>, %2200, %cst_613 [1] : vector<8x64xf32> to vector<8xf32>
    %2202 = vector.shape_cast %2201 : vector<8xf32> to vector<8x1xf32>
    %2203 = vector.broadcast %2083 : vector<1x1xf32> to vector<8x1xf32>
    %2204 = arith.addf %2202, %2203 : vector<8x1xf32>
    %cst_614 = arith.constant 0.000000e+00 : f32
    %2205 = vector.broadcast %cst_614 : f32 to vector<8x1xf32>
    %2206 = arith.maximumf %2204, %2205 : vector<8x1xf32>
    %2207 = vector.extract_strided_slice %2084 {offsets = [8, 0], sizes = [1, 16], strides = [1, 1]} : vector<16x16xf32> to vector<1x16xf32>
    %2208 = vector.broadcast %2206 : vector<8x1xf32> to vector<8x16xf32>
    %2209 = vector.broadcast %2207 : vector<1x16xf32> to vector<8x16xf32>
    %2210 = arith.mulf %2208, %2209 : vector<8x16xf32>
    %2211 = arith.addf %2197, %2210 : vector<8x16xf32>
    %c72_615 = arith.constant 72 : index
    %c0_616 = arith.constant 0 : index
    %2212 = vector.load %arg14[%c72_615, %c0_616] : memref<128x64xf32, #tpu.memory_space<vmem>>, vector<8x64xf32>
    %2213 = vector.broadcast %2082 : vector<1x64xf32> to vector<8x64xf32>
    %2214 = arith.mulf %2212, %2213 : vector<8x64xf32>
    %cst_617 = arith.constant dense<0.000000e+00> : vector<8xf32>
    %2215 = vector.multi_reduction <add>, %2214, %cst_617 [1] : vector<8x64xf32> to vector<8xf32>
    %2216 = vector.shape_cast %2215 : vector<8xf32> to vector<8x1xf32>
    %2217 = vector.broadcast %2083 : vector<1x1xf32> to vector<8x1xf32>
    %2218 = arith.addf %2216, %2217 : vector<8x1xf32>
    %cst_618 = arith.constant 0.000000e+00 : f32
    %2219 = vector.broadcast %cst_618 : f32 to vector<8x1xf32>
    %2220 = arith.maximumf %2218, %2219 : vector<8x1xf32>
    %2221 = vector.extract_strided_slice %2084 {offsets = [9, 0], sizes = [1, 16], strides = [1, 1]} : vector<16x16xf32> to vector<1x16xf32>
    %2222 = vector.broadcast %2220 : vector<8x1xf32> to vector<8x16xf32>
    %2223 = vector.broadcast %2221 : vector<1x16xf32> to vector<8x16xf32>
    %2224 = arith.mulf %2222, %2223 : vector<8x16xf32>
    %2225 = arith.addf %2211, %2224 : vector<8x16xf32>
    %c80_619 = arith.constant 80 : index
    %c0_620 = arith.constant 0 : index
    %2226 = vector.load %arg14[%c80_619, %c0_620] : memref<128x64xf32, #tpu.memory_space<vmem>>, vector<8x64xf32>
    %2227 = vector.broadcast %2082 : vector<1x64xf32> to vector<8x64xf32>
    %2228 = arith.mulf %2226, %2227 : vector<8x64xf32>
    %cst_621 = arith.constant dense<0.000000e+00> : vector<8xf32>
    %2229 = vector.multi_reduction <add>, %2228, %cst_621 [1] : vector<8x64xf32> to vector<8xf32>
    %2230 = vector.shape_cast %2229 : vector<8xf32> to vector<8x1xf32>
    %2231 = vector.broadcast %2083 : vector<1x1xf32> to vector<8x1xf32>
    %2232 = arith.addf %2230, %2231 : vector<8x1xf32>
    %cst_622 = arith.constant 0.000000e+00 : f32
    %2233 = vector.broadcast %cst_622 : f32 to vector<8x1xf32>
    %2234 = arith.maximumf %2232, %2233 : vector<8x1xf32>
    %2235 = vector.extract_strided_slice %2084 {offsets = [10, 0], sizes = [1, 16], strides = [1, 1]} : vector<16x16xf32> to vector<1x16xf32>
    %2236 = vector.broadcast %2234 : vector<8x1xf32> to vector<8x16xf32>
    %2237 = vector.broadcast %2235 : vector<1x16xf32> to vector<8x16xf32>
    %2238 = arith.mulf %2236, %2237 : vector<8x16xf32>
    %2239 = arith.addf %2225, %2238 : vector<8x16xf32>
    %c88_623 = arith.constant 88 : index
    %c0_624 = arith.constant 0 : index
    %2240 = vector.load %arg14[%c88_623, %c0_624] : memref<128x64xf32, #tpu.memory_space<vmem>>, vector<8x64xf32>
    %2241 = vector.broadcast %2082 : vector<1x64xf32> to vector<8x64xf32>
    %2242 = arith.mulf %2240, %2241 : vector<8x64xf32>
    %cst_625 = arith.constant dense<0.000000e+00> : vector<8xf32>
    %2243 = vector.multi_reduction <add>, %2242, %cst_625 [1] : vector<8x64xf32> to vector<8xf32>
    %2244 = vector.shape_cast %2243 : vector<8xf32> to vector<8x1xf32>
    %2245 = vector.broadcast %2083 : vector<1x1xf32> to vector<8x1xf32>
    %2246 = arith.addf %2244, %2245 : vector<8x1xf32>
    %cst_626 = arith.constant 0.000000e+00 : f32
    %2247 = vector.broadcast %cst_626 : f32 to vector<8x1xf32>
    %2248 = arith.maximumf %2246, %2247 : vector<8x1xf32>
    %2249 = vector.extract_strided_slice %2084 {offsets = [11, 0], sizes = [1, 16], strides = [1, 1]} : vector<16x16xf32> to vector<1x16xf32>
    %2250 = vector.broadcast %2248 : vector<8x1xf32> to vector<8x16xf32>
    %2251 = vector.broadcast %2249 : vector<1x16xf32> to vector<8x16xf32>
    %2252 = arith.mulf %2250, %2251 : vector<8x16xf32>
    %2253 = arith.addf %2239, %2252 : vector<8x16xf32>
    %c96_627 = arith.constant 96 : index
    %c0_628 = arith.constant 0 : index
    %2254 = vector.load %arg14[%c96_627, %c0_628] : memref<128x64xf32, #tpu.memory_space<vmem>>, vector<8x64xf32>
    %2255 = vector.broadcast %2082 : vector<1x64xf32> to vector<8x64xf32>
    %2256 = arith.mulf %2254, %2255 : vector<8x64xf32>
    %cst_629 = arith.constant dense<0.000000e+00> : vector<8xf32>
    %2257 = vector.multi_reduction <add>, %2256, %cst_629 [1] : vector<8x64xf32> to vector<8xf32>
    %2258 = vector.shape_cast %2257 : vector<8xf32> to vector<8x1xf32>
    %2259 = vector.broadcast %2083 : vector<1x1xf32> to vector<8x1xf32>
    %2260 = arith.addf %2258, %2259 : vector<8x1xf32>
    %cst_630 = arith.constant 0.000000e+00 : f32
    %2261 = vector.broadcast %cst_630 : f32 to vector<8x1xf32>
    %2262 = arith.maximumf %2260, %2261 : vector<8x1xf32>
    %2263 = vector.extract_strided_slice %2084 {offsets = [12, 0], sizes = [1, 16], strides = [1, 1]} : vector<16x16xf32> to vector<1x16xf32>
    %2264 = vector.broadcast %2262 : vector<8x1xf32> to vector<8x16xf32>
    %2265 = vector.broadcast %2263 : vector<1x16xf32> to vector<8x16xf32>
    %2266 = arith.mulf %2264, %2265 : vector<8x16xf32>
    %2267 = arith.addf %2253, %2266 : vector<8x16xf32>
    %c104_631 = arith.constant 104 : index
    %c0_632 = arith.constant 0 : index
    %2268 = vector.load %arg14[%c104_631, %c0_632] : memref<128x64xf32, #tpu.memory_space<vmem>>, vector<8x64xf32>
    %2269 = vector.broadcast %2082 : vector<1x64xf32> to vector<8x64xf32>
    %2270 = arith.mulf %2268, %2269 : vector<8x64xf32>
    %cst_633 = arith.constant dense<0.000000e+00> : vector<8xf32>
    %2271 = vector.multi_reduction <add>, %2270, %cst_633 [1] : vector<8x64xf32> to vector<8xf32>
    %2272 = vector.shape_cast %2271 : vector<8xf32> to vector<8x1xf32>
    %2273 = vector.broadcast %2083 : vector<1x1xf32> to vector<8x1xf32>
    %2274 = arith.addf %2272, %2273 : vector<8x1xf32>
    %cst_634 = arith.constant 0.000000e+00 : f32
    %2275 = vector.broadcast %cst_634 : f32 to vector<8x1xf32>
    %2276 = arith.maximumf %2274, %2275 : vector<8x1xf32>
    %2277 = vector.extract_strided_slice %2084 {offsets = [13, 0], sizes = [1, 16], strides = [1, 1]} : vector<16x16xf32> to vector<1x16xf32>
    %2278 = vector.broadcast %2276 : vector<8x1xf32> to vector<8x16xf32>
    %2279 = vector.broadcast %2277 : vector<1x16xf32> to vector<8x16xf32>
    %2280 = arith.mulf %2278, %2279 : vector<8x16xf32>
    %2281 = arith.addf %2267, %2280 : vector<8x16xf32>
    %c112_635 = arith.constant 112 : index
    %c0_636 = arith.constant 0 : index
    %2282 = vector.load %arg14[%c112_635, %c0_636] : memref<128x64xf32, #tpu.memory_space<vmem>>, vector<8x64xf32>
    %2283 = vector.broadcast %2082 : vector<1x64xf32> to vector<8x64xf32>
    %2284 = arith.mulf %2282, %2283 : vector<8x64xf32>
    %cst_637 = arith.constant dense<0.000000e+00> : vector<8xf32>
    %2285 = vector.multi_reduction <add>, %2284, %cst_637 [1] : vector<8x64xf32> to vector<8xf32>
    %2286 = vector.shape_cast %2285 : vector<8xf32> to vector<8x1xf32>
    %2287 = vector.broadcast %2083 : vector<1x1xf32> to vector<8x1xf32>
    %2288 = arith.addf %2286, %2287 : vector<8x1xf32>
    %cst_638 = arith.constant 0.000000e+00 : f32
    %2289 = vector.broadcast %cst_638 : f32 to vector<8x1xf32>
    %2290 = arith.maximumf %2288, %2289 : vector<8x1xf32>
    %2291 = vector.extract_strided_slice %2084 {offsets = [14, 0], sizes = [1, 16], strides = [1, 1]} : vector<16x16xf32> to vector<1x16xf32>
    %2292 = vector.broadcast %2290 : vector<8x1xf32> to vector<8x16xf32>
    %2293 = vector.broadcast %2291 : vector<1x16xf32> to vector<8x16xf32>
    %2294 = arith.mulf %2292, %2293 : vector<8x16xf32>
    %2295 = arith.addf %2281, %2294 : vector<8x16xf32>
    %c120_639 = arith.constant 120 : index
    %c0_640 = arith.constant 0 : index
    %2296 = vector.load %arg14[%c120_639, %c0_640] : memref<128x64xf32, #tpu.memory_space<vmem>>, vector<8x64xf32>
    %2297 = vector.broadcast %2082 : vector<1x64xf32> to vector<8x64xf32>
    %2298 = arith.mulf %2296, %2297 : vector<8x64xf32>
    %cst_641 = arith.constant dense<0.000000e+00> : vector<8xf32>
    %2299 = vector.multi_reduction <add>, %2298, %cst_641 [1] : vector<8x64xf32> to vector<8xf32>
    %2300 = vector.shape_cast %2299 : vector<8xf32> to vector<8x1xf32>
    %2301 = vector.broadcast %2083 : vector<1x1xf32> to vector<8x1xf32>
    %2302 = arith.addf %2300, %2301 : vector<8x1xf32>
    %cst_642 = arith.constant 0.000000e+00 : f32
    %2303 = vector.broadcast %cst_642 : f32 to vector<8x1xf32>
    %2304 = arith.maximumf %2302, %2303 : vector<8x1xf32>
    %2305 = vector.extract_strided_slice %2084 {offsets = [15, 0], sizes = [1, 16], strides = [1, 1]} : vector<16x16xf32> to vector<1x16xf32>
    %2306 = vector.broadcast %2304 : vector<8x1xf32> to vector<8x16xf32>
    %2307 = vector.broadcast %2305 : vector<1x16xf32> to vector<8x16xf32>
    %2308 = arith.mulf %2306, %2307 : vector<8x16xf32>
    %2309 = arith.addf %2295, %2308 : vector<8x16xf32>
    %c0_643 = arith.constant 0 : index
    %c0_644 = arith.constant 0 : index
    %2310 = vector.load %arg12[%c0_643, %c0_644] : memref<1x16xf32, #tpu.memory_space<vmem>>, vector<1x16xf32>
    %2311 = vector.broadcast %2310 : vector<1x16xf32> to vector<8x16xf32>
    %2312 = arith.addf %2309, %2311 : vector<8x16xf32>
    %cst_645 = arith.constant 0.000000e+00 : f32
    %2313 = vector.broadcast %cst_645 : f32 to vector<8x16xf32>
    %2314 = arith.maximumf %2312, %2313 : vector<8x16xf32>
    %c0_646 = arith.constant 0 : index
    %c0_647 = arith.constant 0 : index
    %2315 = vector.load %arg13[%c0_646, %c0_647] : memref<8x16xf32, #tpu.memory_space<vmem>>, vector<8x16xf32>
    tpu.vector_store %arg13[%c0_646, %c0_647], %2314 {strides = array<i32>} : memref<8x16xf32, #tpu.memory_space<vmem>>, vector<8x16xf32>,
    return
  }
}

</mosaic_0001>

<bundles_post_ra>
// kernel: timbre_encoder_forward.1
= control target key start
LH: loop header
LB: loop body
LE: loop exit
PB: predicated region body
PF: predicated region fallthrough
CT: control target
= control target key end

     0   :  { %s12314_s0 = inlined_call_operand.vmem [shape: f32[128,64], index: 0, kind: input, shape index: {}]   ;;  %s12315_s1 = inlined_call_operand.vmem [shape: f32[64,192], index: 1, kind: input, shape index: {}]   ;;  %s12316_s2 = inlined_call_operand.vmem [shape: f32[1,192], index: 2, kind: input, shape index: {}]   ;;  %s12317_s3 = inlined_call_operand.vmem [shape: f32[2,32,96], index: 3, kind: input, shape index: {}]   ;;  %s12318_s4 = inlined_call_operand.vmem [shape: f32[2,1,32], index: 4, kind: input, shape index: {}]   ;;  %s12319_s5 = inlined_call_operand.hbm [shape: f32[64,192], index: 5, kind: input, shape index: {}]   ;;  %s12320_s6 = inlined_call_operand.vmem [shape: f32[1,192], index: 6, kind: input, shape index: {}]   ;;  %s12321_s7 = inlined_call_operand.hbm [shape: f32[2,32,96], index: 7, kind: input, shape index: {}]   ;;  %s12322_s8 = inlined_call_operand.vmem [shape: f32[2,1,32], index: 8, kind: input, shape index: {}]   ;;  %s12323_s9 = inlined_call_operand.vmem [shape: f32[1,64], index: 9, kind: input, shape index: {}]   ;;  %s12324_s10 = inlined_call_operand.<no memory space> [shape: f32[1,1], index: 10, kind: input, shape index: {}]   ;;  %s12325_s11 = inlined_call_operand.vmem [shape: f32[16,16], index: 11, kind: input, shape index: {}]   ;;  %s12326_s12 = inlined_call_operand.vmem [shape: f32[1,16], index: 12, kind: input, shape index: {}]   ;;  %s12327_s13 = inlined_call_operand.vmem [shape: f32[8,16], index: 13, kind: output, shape index: {}]  }
   0x1   :  { %v18_v0 = vstv %s12324_s10 }
   0x2   :  { %19 = vst [vmem:[#allocation4] sm:$0x1] %v18_v0 }
   0x3   :  { %20 = vsyncpa [#allocation6], 0 }
   0x4   :  { %21 = vsyncpa [#allocation8], 0  ;;  %s10435_s27 = smov [#allocation5]   ;;  %s10387_s14 = scalar_lea.hbm %s12319_s5, 2048 }
   0x5   :  { %s37_s28 = sshll.u32 %s10435_s27, 4  ;;  %p10388_p0 = scmp.ne.s32.totalorder %s12319_s5, %s10387_s14  ;;  %s38_s28 = int_to_ptr.vmem [resolvable:$true] %s37_s28 }
   0x6   :  { %p10391_p1 = scmp.lt.u32.totalorder %s10387_s14, %s12319_s5 }
   0x8   :  { %p10393_p2 = pnand %p10391_p1, %p10388_p0 }
   0xa   :  { %10396 = shalt.err (!%p10393_p2)
}
   0xb   :  { %s10397_s10 = scalar_lea.vmem %s38_s28, 2048  ;;  %p10402_p4 = scmp.lt.s32.totalorder %s38_s28, %s38_s28 }
   0xc   :  { %p10398_p3 = scmp.ne.s32.totalorder %s38_s28, %s10397_s10  ;;  %p10403_p5 = scmp.lt.s32.totalorder %s10397_s10, %s10397_s10 }
   0xe   :  { %p10404_p6 = por %p10403_p5, %p10402_p4 }
  0x10   :  { %p10405_p7 = pnand %p10404_p6, %p10398_p3 }
  0x12   :  { %10408 = shalt.err (!%p10405_p7)
}
  0x13   :  { %s10436_s19 = smov 256   ;;  %s10437_s20 = smov 16  }
  0x14   :  { %43 = dma.hbm_to_vmem [thread:$0]  %s12319_s5, 2048, %s38_s28, [#allocation6], %s10436_s19, %s10436_s19, %s10437_s20  }
  0x15   :  { %s10438_s23 = smov [#allocation7]   ;;  %s10409_s27 = scalar_lea.hbm %s12321_s7, 1024 }
  0x16   :  { %s51_s24 = sshll.u32 %s10438_s23, 4  ;;  %p10410_p8 = scmp.ne.s32.totalorder %s12321_s7, %s10409_s27  ;;  %s52_s24 = int_to_ptr.vmem [resolvable:$true] %s51_s24 }
  0x17   :  { %p10413_p9 = scmp.lt.u32.totalorder %s10409_s27, %s12321_s7 }
  0x19   :  { %p10415_p10 = pnand %p10413_p9, %p10410_p8 }
  0x1b   :  { %10418 = shalt.err (!%p10415_p10)
}
  0x1c   :  { %s10419_s16 = scalar_lea.vmem %s52_s24, 1024  ;;  %p10424_p12 = scmp.lt.s32.totalorder %s52_s24, %s52_s24 }
  0x1d   :  { %p10420_p11 = scmp.ne.s32.totalorder %s52_s24, %s10419_s16  ;;  %p10425_p13 = scmp.lt.s32.totalorder %s10419_s16, %s10419_s16 }
  0x1f   :  { %p10426_p0 = por %p10425_p13, %p10424_p12 }
  0x21   :  { %p10427_p1 = pnand %p10426_p0, %p10420_p11 }
  0x23   :  { %10430 = shalt.err (!%p10427_p1)
}
  0x24   :  { %s10439_s5 = smov 128   ;;  %s10440_s28 = smov 8  }
  0x25   :  { %57 = dma.hbm_to_vmem [thread:$0]  %s12321_s7, 1024, %s52_s24, [#allocation8], %s10439_s5, %s10439_s5, %s10440_s28  }
  0x26   :  { %10431 = dma.done.wait [#allocation6], 2048  }
  0x27   :  { %10432 = vsyncadd [#allocation6], 4294965248 }
  0x28   :  { %10433 = dma.done.wait [#allocation8], 1024  }
  0x29   :  { %10434 = vsyncadd [#allocation8], 4294966272  ;;  %v10441_v1 = vmov 0.0|0.0   ;;  %vm10442_vm0 = vmmov 0   ;;  %v10443_v2 = vmov 0.0   ;;  %v91_v3 = vld [vmem:[%s12315_s1 + $0x8] sm:$0xff]  ;;  %v108_v56 = vlaneseq }
  0x2a   :  { %9456 = vmatprep.subr.bf16.mxu1 %v10441_v1  ;;  %8744 = vmatprep.mubr.msk.f32.mxu1 %vm10442_vm0, %v10443_v2  ;;  %v93_v4 = vld [vmem:[%s12315_s1 + $0x18] sm:$0xff]  ;;  %v360_v5 = vld [vmem:[%s12317_s3] sm:$0xff]  ;;  %v361_v7 = vld [vmem:[%s12317_s3 + $0x8] sm:$0xff]  ;;  %s10444_s23 = smov 64   ;;  %vm118_vm1 = vcmask 523264   ;;  %vm375_vm2 = vcmask 261120  }
  0x2b   :  { %231 = vmatprep.mubr.f32.mxu0 %v10443_v2  ;;  %v9440_v6 = vpack.c.bf16 %v93_v4, %v91_v3  ;;  %v90_v8 = vld [vmem:[%s12315_s1] sm:$0xff]  ;;  %v92_v9 = vld [vmem:[%s12315_s1 + $0x10] sm:$0xff]  ;;  %v10567_v10 = vpack.c.bf16 %v361_v7, %v360_v5  ;;  %v95_v12 = vld [vmem:[%s12315_s1 + $0x28] sm:$0xff]  ;;  %v10737_v57 = vshrl.u32 %v108_v56, 7  ;;  %vm609_vm3 = vcmask 523520  }
  0x2c   :  { %v9442_v11 = vpack.c.bf16 %v92_v9, %v90_v8  ;;  %v97_v13 = vld [vmem:[%s12315_s1 + $0x38] sm:$0xff]  ;;  %v362_v14 = vld [vmem:[%s12317_s3 + $0x10] sm:$0xff]  ;;  %v94_v17 = vld [vmem:[%s12315_s1 + $0x20] sm:$0xff]  ;;  %vm8207_vm4 = vcmask 130048  }
  0x2d   :  { %9441 = vmatprep.subr.bf16.mxu0 %v9440_v6  ;;  %v9444_v15 = vpack.c.bf16 %v97_v13, %v95_v12  ;;  %v363_v16 = vld [vmem:[%s12317_s3 + $0x18] sm:$0xff]  ;;  %v96_v18 = vld [vmem:[%s12315_s1 + $0x30] sm:$0xff]  ;;  %9458 = vmatpush3.bf16.msra.mxu1 %v10567_v10  ;;  %v99_v21 = vld [vmem:[%s12315_s1 + $0x48] sm:$0xff]  ;;  %v10743_v62 = vsub.s32 0, %v10737_v57  ;;  %v10749_v0 = vsub.s32 1, %v10737_v57 }
  0x2e   :  { %9443 = vmatpush1.bf16.msra.mxu0 %v9442_v11  ;;  %v10588_v19 = vpack.c.bf16 %v363_v16, %v362_v14  ;;  %v9446_v20 = vpack.c.bf16 %v96_v18, %v94_v17  ;;  %v101_v22 = vld [vmem:[%s12315_s1 + $0x58] sm:$0xff]  ;;  %9459 = vmatprep.subr.bf16.mxu1 %v10441_v1  ;;  %v98_v24 = vld [vmem:[%s12315_s1 + $0x40] sm:$0xff]  ;;  %v100_v25 = vld [vmem:[%s12315_s1 + $0x50] sm:$0xff] }
  0x2f   :  { %9445 = vmatprep.subr.bf16.mxu0 %v9444_v15  ;;  %v9448_v23 = vpack.c.bf16 %v101_v22, %v99_v21  ;;  %v103_v26 = vld [vmem:[%s12315_s1 + $0x68] sm:$0xff]  ;;  %v105_v27 = vld [vmem:[%s12315_s1 + $0x78] sm:$0xff]  ;;  %v8237_v28 = vld [vmem:[%s12318_s4] ss:$0 sm:$0xff]  ;;  %v9450_v31 = vpack.c.bf16 %v100_v25, %v98_v24 }
  0x30   :  { %v8231_v29 = vld [vmem:[%s12317_s3 + $0x20] sm:$0xff]  ;;  %v8232_v30 = vld [vmem:[%s12317_s3 + $0x28] sm:$0xff]  ;;  %v9452_v34 = vpack.c.bf16 %v105_v27, %v103_v26  ;;  %v104_v35 = vld [vmem:[%s12315_s1 + $0x70] sm:$0xff]  ;;  %461 = vrot.lane.b32.xlu0 %v8237_v28, %s10444_s23 }
  0x31   :  { %9461 = vmatpush3.bf16.msra.mxu1 %v10588_v19  ;;  %v102_v32 = vld [vmem:[%s12315_s1 + $0x60] sm:$0xff]  ;;  %v10622_v33 = vpack.c.bf16 %v8232_v30, %v8231_v29  ;;  %v8233_v36 = vld [vmem:[%s12317_s3 + $0x30] sm:$0xff]  ;;  %v8234_v37 = vld [vmem:[%s12317_s3 + $0x38] sm:$0xff] }
  0x32   :  { %9447 = vmatpush1.bf16.msra.mxu0 %v9446_v20  ;;  %9462 = vmatprep.subr.bf16.mxu1 %v10441_v1  ;;  %v9454_v38 = vpack.c.bf16 %v104_v35, %v102_v32  ;;  %v10637_v39 = vpack.c.bf16 %v8234_v37, %v8233_v36  ;;  %v74_v40 = vld [vmem:[%s12314_s0] sm:$0xff]  ;;  %v75_v41 = vld [vmem:[%s12314_s0 + $0x8] sm:$0xff]  ;;  %v76_v42 = vld [vmem:[%s12314_s0 + $0x10] sm:$0xff] }
  0x33   :  { %9449 = vmatprep.subr.bf16.mxu0 %v9448_v23  ;;  %v77_v43 = vld [vmem:[%s12314_s0 + $0x18] sm:$0xff]  ;;  %v78_v44 = vld [vmem:[%s12314_s0 + $0x20] sm:$0xff]  ;;  %v79_v45 = vld [vmem:[%s12314_s0 + $0x28] sm:$0xff] }
  0x34   :  { %8745 = vmatmul.mubr.f32.vlgmr.msra.gmra.mrb[0].mxu1 %v10443_v2  ;;  %v80_v46 = vld [vmem:[%s12314_s0 + $0x30] sm:$0xff]  ;;  %v81_v47 = vld [vmem:[%s12314_s0 + $0x38] sm:$0xff]  ;;  %v82_v48 = vld [vmem:[%s12314_s0 + $0x40] sm:$0xff] }
  0x35   :  { %9464 = vmatpush3.bf16.msra.mxu1 %v10622_v33  ;;  %8755 = vmatprep.mubr.msk.f32.mxu1 %vm10442_vm0, %v10443_v2  ;;  %v83_v49 = vld [vmem:[%s12314_s0 + $0x48] sm:$0xff]  ;;  %v84_v50 = vld [vmem:[%s12314_s0 + $0x50] sm:$0xff]  ;;  %v85_v51 = vld [vmem:[%s12314_s0 + $0x58] sm:$0xff] }
  0x36   :  { %9451 = vmatpush1.bf16.msra.mxu0 %v9450_v31  ;;  %9465 = vmatprep.subr.bf16.mxu1 %v10441_v1  ;;  %v86_v52 = vld [vmem:[%s12314_s0 + $0x60] sm:$0xff]  ;;  %v87_v53 = vld [vmem:[%s12314_s0 + $0x68] sm:$0xff]  ;;  %v88_v54 = vld [vmem:[%s12314_s0 + $0x70] sm:$0xff] }
  0x37   :  { %9453 = vmatprep.subr.bf16.mxu0 %v9452_v34  ;;  %v89_v55 = vld [vmem:[%s12314_s0 + $0x78] sm:$0xff]  ;;  %v106_v63 = vld [vmem:[%s12316_s2] sm:$0x3]  ;;  %s10445_s0 = smov 96  }
  0x38   :  { %v10753_v3 = vrot.slane %v106_v63, %v10743_v62  ;;  %v10756_v4 = vrot.slane %v106_v63, %v10749_v0  ;;  %v8240_v21 = vld [vmem:[%s12318_s4 + $0x1] ss:$0 sm:$0xff]  ;;  %s10446_s4 = smov 32  }
  0x39   :  { %9467 = vmatpush3.bf16.msra.mxu1 %v10637_v39 }
  0x3a   :  { %9455 = vmatpush1.bf16.msra.mxu0 %v9454_v38  ;;  %9468 = vmatprep.subr.bf16.mxu1 %v10441_v1 }
  0x3b   :  { %9510 = vmatprep.subr.bf16.mxu0 %v10441_v1 }
  0x3c   :  { %8756 = vmatmul.mubr.f32.vlgmr.msra.gmra.mrb[2].mxu1 %v10443_v2 }
  0x3d   :  { %8215 = vmatmul.mubr.msk.f32.vlgmr.msra.gmra.mrb[0].mxu0 %vm118_vm1, %v74_v40  ;;  %9470 = vmatpush3.bf16.msra.mxu1 %v10567_v10 }
  0x3e   :  { %237 = vmatprep.mubr.f32.mxu0 %v10443_v2  ;;  %9471 = vmatprep.subr.bf16.mxu1 %v10441_v1 }
  0x3f   :  { %8766 = vmatprep.mubr.msk.f32.mxu1 %vm10442_vm0, %v10443_v2  ;;  %9512 = vmatpush3.bf16.msra.mxu0 %v10622_v33 }
  0x40   :  { %9513 = vmatprep.subr.bf16.mxu0 %v10441_v1 }
  0x41   :  { %9473 = vmatpush3.bf16.msra.mxu1 %v10588_v19  ;;  %8216 = vmatmul.mubr.msk.f32.gmra.mrb[2].mxu0 %vm118_vm1, %v75_v41 }
  0x42   :  { %9474 = vmatprep.subr.bf16.mxu1 %v10441_v1  ;;  %243 = vmatprep.mubr.f32.mxu0 %v10443_v2 }
  0x43   :  { %9515 = vmatpush3.bf16.msra.mxu0 %v10637_v39 }
  0x44   :  { %9522 = vmatprep.subr.bf16.mxu0 %v10441_v1 }
  0x45   :  { %8217 = vmatmul.mubr.msk.f32.gmra.mrb[4].mxu0 %vm118_vm1, %v76_v42 }
  0x46   :  { %249 = vmatprep.mubr.f32.mxu0 %v10443_v2 }
  0x49   :  { %8218 = vmatmul.mubr.msk.f32.gmra.mrb[6].mxu0 %vm118_vm1, %v77_v43 }
  0x4a   :  { %255 = vmatprep.mubr.f32.mxu0 %v10443_v2 }
  0x4d   :  { %8219 = vmatmul.mubr.msk.f32.gmra.mrb[8].mxu0 %vm118_vm1, %v78_v44 }
  0x4e   :  { %261 = vmatprep.mubr.f32.mxu0 %v10443_v2 }
  0x51   :  { %8220 = vmatmul.mubr.msk.f32.gmra.mrb[10].mxu0 %vm118_vm1, %v79_v45 }
  0x52   :  { %267 = vmatprep.mubr.f32.mxu0 %v10443_v2 }
  0x55   :  { %8221 = vmatmul.mubr.msk.f32.gmra.mrb[12].mxu0 %vm118_vm1, %v80_v46 }
  0x56   :  { %273 = vmatprep.mubr.f32.mxu0 %v10443_v2 }
  0x59   :  { %8222 = vmatmul.mubr.msk.f32.gmra.mrb[14].mxu0 %vm118_vm1, %v81_v47 }
  0x5a   :  { %279 = vmatprep.mubr.f32.mxu0 %v10443_v2 }
  0x5d   :  { %8223 = vmatmul.mubr.msk.f32.gmra.mrb[16].mxu0 %vm118_vm1, %v82_v48 }
  0x5e   :  { %285 = vmatprep.mubr.f32.mxu0 %v10443_v2 }
  0x61   :  { %8224 = vmatmul.mubr.msk.f32.gmra.mrb[18].mxu0 %vm118_vm1, %v83_v49 }
  0x62   :  { %291 = vmatprep.mubr.f32.mxu0 %v10443_v2 }
  0x65   :  { %8225 = vmatmul.mubr.msk.f32.gmra.mrb[20].mxu0 %vm118_vm1, %v84_v50 }
  0x66   :  { %297 = vmatprep.mubr.f32.mxu0 %v10443_v2 }
  0x69   :  { %8226 = vmatmul.mubr.msk.f32.gmra.mrb[22].mxu0 %vm118_vm1, %v85_v51 }
  0x6a   :  { %303 = vmatprep.mubr.f32.mxu0 %v10443_v2 }
  0x6d   :  { %8227 = vmatmul.mubr.msk.f32.gmra.mrb[24].mxu0 %vm118_vm1, %v86_v52 }
  0x6e   :  { %309 = vmatprep.mubr.f32.mxu0 %v10443_v2 }
  0x71   :  { %8228 = vmatmul.mubr.msk.f32.gmra.mrb[26].mxu0 %vm118_vm1, %v87_v53 }
  0x72   :  { %315 = vmatprep.mubr.f32.mxu0 %v10443_v2 }
  0x75   :  { %8229 = vmatmul.mubr.msk.f32.gmra.mrb[28].mxu0 %vm118_vm1, %v88_v54 }
  0x76   :  { %321 = vmatprep.mubr.f32.mxu0 %v10443_v2 }
  0x79   :  { %8230 = vmatmul.mubr.msk.f32.gmra.mrb[30].mxu0 %vm118_vm1, %v89_v55 }
  0x7a   :  { %8843 = vmatprep.mubr.msk.f32.mxu0 %vm10442_vm0, %v10443_v2 }
  0xa2   :  { %v10739_v58 = vpop.permute.xlu0 %461 }
 0x107   :  { %v445_v59 = vpop.f32.mrb[0].mxu1 }
 0x108   :  { %v464_v60 = vadd.f32 %v10739_v58, %v445_v59  ;;  %v8746_v61 = vpop.f32.mrb[1].mxu1 }
 0x10a   :  { %466 = vrot.lane.b32.xlu0 %v464_v60, %s10444_s23 }
 0x10f   :  { %v10758_v6 = vpop.f32.mrb[2].mxu1 }
 0x110   :  { %v233_v5 = vpop.f32.mrb[0].mxu0  ;;  %555 = vrot.lane.b32.xlu0 %v10758_v6, %s10445_s0  ;;  %v8757_v9 = vpop.f32.mrb[3].mxu1 }
 0x111   :  { %v10761_v7 = vadd.f32 %v233_v5, %v10753_v3  ;;  %v235_v8 = vpop.f32.mrb[1].mxu0 }
 0x112   :  { %v236_v11 = vadd.f32 %v235_v8, %v10756_v4 }
 0x113   :  { %328 = vst [vmem:[#allocation3] sm:$0xff] %v10761_v7  ;;  %v449_v12 = vadd.f32 %v445_v59, %v10761_v7 }
 0x114   :  { %329 = vst.msk [vmem:[#allocation3 + $0x8] sm:$0xff] %vm118_vm1, %v236_v11  ;;  %v239_v20 = vpop.f32.mrb[2].mxu0 }
 0x115   :  { %v8236_v13 = vmul.f32 -1.442695, %v449_v12  ;;  %v10777_v22 = vadd.f32 %v239_v20, %v10753_v3  ;;  %v241_v23 = vpop.f32.mrb[3].mxu0 }
 0x116   :  { %v242_v24 = vadd.f32 %v241_v23, %v10756_v4 }
 0x117   :  { %9871 = vpow2.f32 %v8236_v13  ;;  %330 = vst [vmem:[#allocation3 + $0x10] sm:$0xff] %v10777_v22 }
 0x118   :  { %v245_v25 = vpop.f32.mrb[4].mxu0  ;;  %331 = vst.msk [vmem:[#allocation3 + $0x18] sm:$0xff] %vm118_vm1, %v242_v24 }
 0x119   :  { %v10782_v26 = vadd.f32 %v245_v25, %v10753_v3  ;;  %v247_v27 = vpop.f32.mrb[5].mxu0 }
 0x11a   :  { %v248_v28 = vadd.f32 %v247_v27, %v10756_v4 }
 0x11b   :  { %332 = vst [vmem:[#allocation3 + $0x20] sm:$0xff] %v10782_v26 }
 0x11c   :  { %v251_v29 = vpop.f32.mrb[6].mxu0  ;;  %333 = vst.msk [vmem:[#allocation3 + $0x28] sm:$0xff] %vm118_vm1, %v248_v28 }
 0x11d   :  { %v10789_v30 = vadd.f32 %v251_v29, %v10753_v3  ;;  %v253_v31 = vpop.f32.mrb[7].mxu0 }
 0x11e   :  { %v254_v32 = vadd.f32 %v253_v31, %v10756_v4 }
 0x11f   :  { %334 = vst [vmem:[#allocation3 + $0x30] sm:$0xff] %v10789_v30 }
 0x120   :  { %v257_v34 = vpop.f32.mrb[8].mxu0  ;;  %335 = vst.msk [vmem:[#allocation3 + $0x38] sm:$0xff] %vm118_vm1, %v254_v32 }
 0x121   :  { %v9872_v14 = vpop.eup %9871  ;;  %v10795_v35 = vadd.f32 %v257_v34, %v10753_v3  ;;  %v259_v36 = vpop.f32.mrb[9].mxu0 }
 0x122   :  { %v453_v15 = vadd.f32 1.0, %v9872_v14  ;;  %v260_v37 = vadd.f32 %v259_v36, %v10756_v4 }
 0x123   :  { %336 = vst [vmem:[#allocation3 + $0x40] sm:$0xff] %v10795_v35 }
 0x124   :  { %9873 = vrcp.f32 %v453_v15  ;;  %v263_v38 = vpop.f32.mrb[10].mxu0  ;;  %337 = vst.msk [vmem:[#allocation3 + $0x48] sm:$0xff] %vm118_vm1, %v260_v37 }
 0x125   :  { %v10801_v40 = vadd.f32 %v263_v38, %v10753_v3  ;;  %v265_v41 = vpop.f32.mrb[11].mxu0 }
 0x126   :  { %v266_v42 = vadd.f32 %v265_v41, %v10756_v4 }
 0x127   :  { %338 = vst [vmem:[#allocation3 + $0x50] sm:$0xff] %v10801_v40 }
 0x128   :  { %v269_v43 = vpop.f32.mrb[12].mxu0  ;;  %339 = vst.msk [vmem:[#allocation3 + $0x58] sm:$0xff] %vm118_vm1, %v266_v42 }
 0x129   :  { %v10807_v44 = vadd.f32 %v269_v43, %v10753_v3  ;;  %v271_v45 = vpop.f32.mrb[13].mxu0 }
 0x12a   :  { %v272_v46 = vadd.f32 %v271_v45, %v10756_v4 }
 0x12b   :  { %340 = vst [vmem:[#allocation3 + $0x60] sm:$0xff] %v10807_v44 }
 0x12c   :  { %v275_v47 = vpop.f32.mrb[14].mxu0  ;;  %341 = vst.msk [vmem:[#allocation3 + $0x68] sm:$0xff] %vm118_vm1, %v272_v46 }
 0x12d   :  { %v276_v48 = vadd.f32 %v275_v47, %v10753_v3  ;;  %v277_v49 = vpop.f32.mrb[15].mxu0 }
 0x12e   :  { %v10769_v16 = vpop.eup %9873  ;;  %v278_v50 = vadd.f32 %v277_v49, %v10756_v4 }
 0x12f   :  { %342 = vst [vmem:[#allocation3 + $0x70] sm:$0xff] %v276_v48 }
 0x130   :  { %v281_v51 = vpop.f32.mrb[16].mxu0  ;;  %343 = vst.msk [vmem:[#allocation3 + $0x78] sm:$0xff] %vm118_vm1, %v278_v50 }
 0x131   :  { %v282_v52 = vadd.f32 %v281_v51, %v10753_v3  ;;  %v283_v53 = vpop.f32.mrb[17].mxu0  ;;  %v482_v51 = vmul.f32 0.0, %v10769_v16 }
 0x132   :  { %v284_v54 = vadd.f32 %v283_v53, %v10756_v4 }
 0x133   :  { %344 = vst [vmem:[#allocation3 + $0x80] sm:$0xff] %v282_v52 }
 0x134   :  { %v287_v55 = vpop.f32.mrb[18].mxu0  ;;  %345 = vst.msk [vmem:[#allocation3 + $0x88] sm:$0xff] %vm118_vm1, %v284_v54 }
 0x135   :  { %v10819_v56 = vadd.f32 %v287_v55, %v10753_v3  ;;  %v289_v59 = vpop.f32.mrb[19].mxu0 }
 0x136   :  { %v290_v60 = vadd.f32 %v289_v59, %v10756_v4 }
 0x137   :  { %346 = vst [vmem:[#allocation3 + $0x90] sm:$0xff] %v10819_v56 }
 0x138   :  { %v293_v61 = vpop.f32.mrb[20].mxu0  ;;  %347 = vst.msk [vmem:[#allocation3 + $0x98] sm:$0xff] %vm118_vm1, %v290_v60 }
 0x139   :  { %v10825_v63 = vadd.f32 %v293_v61, %v10753_v3  ;;  %v295_v5 = vpop.f32.mrb[21].mxu0 }
 0x13a   :  { %v296_v8 = vadd.f32 %v295_v5, %v10756_v4 }
 0x13b   :  { %348 = vst [vmem:[#allocation3 + $0xa0] sm:$0xff] %v10825_v63 }
 0x13c   :  { %v299_v9 = vpop.f32.mrb[22].mxu0  ;;  %349 = vst.msk [vmem:[#allocation3 + $0xa8] sm:$0xff] %vm118_vm1, %v296_v8 }
 0x13d   :  { %v10831_v11 = vadd.f32 %v299_v9, %v10753_v3  ;;  %v301_v12 = vpop.f32.mrb[23].mxu0 }
 0x13e   :  { %v302_v13 = vadd.f32 %v301_v12, %v10756_v4 }
 0x13f   :  { %350 = vst [vmem:[#allocation3 + $0xb0] sm:$0xff] %v10831_v11 }
 0x140   :  { %v305_v14 = vpop.f32.mrb[24].mxu0  ;;  %351 = vst.msk [vmem:[#allocation3 + $0xb8] sm:$0xff] %vm118_vm1, %v302_v13 }
 0x141   :  { %v10837_v15 = vadd.f32 %v305_v14, %v10753_v3 }
 0x143   :  { %352 = vst [vmem:[#allocation3 + $0xc0] sm:$0xff] %v10837_v15 }
 0x17c   :  { %v467_v17 = vpop.permute.xlu0 %466 }
 0x17d   :  { %v469_v18 = vmul.f32 %v10769_v16, %v467_v17  ;;  %v307_v17 = vpop.f32.mrb[25].mxu0 }
 0x17e   :  { %v311_v20 = vpop.f32.mrb[26].mxu0 }
 0x17f   :  { %471 = vrot.lane.b32.xlu1 %v469_v18, %s10444_s23  ;;  %v308_v18 = vadd.f32 %v307_v17, %v10756_v4  ;;  %v313_v23 = vpop.f32.mrb[27].mxu0 }
 0x180   :  { %v314_v24 = vadd.f32 %v313_v23, %v10756_v4  ;;  %v317_v25 = vpop.f32.mrb[28].mxu0 }
 0x181   :  { %353 = vst.msk [vmem:[#allocation3 + $0xc8] sm:$0xff] %vm118_vm1, %v308_v18  ;;  %v10850_v27 = vadd.f32 %v317_v25, %v10753_v3  ;;  %v319_v28 = vpop.f32.mrb[29].mxu0 }
 0x182   :  { %355 = vst.msk [vmem:[#allocation3 + $0xd8] sm:$0xff] %vm118_vm1, %v314_v24  ;;  %v320_v29 = vadd.f32 %v319_v28, %v10756_v4  ;;  %v323_v31 = vpop.f32.mrb[30].mxu0 }
 0x183   :  { %577 = vrot.lane.b32.xlu1 %v8240_v21, %s10444_s23  ;;  %v10843_v21 = vadd.f32 %v311_v20, %v10753_v3  ;;  %356 = vst [vmem:[#allocation3 + $0xe0] sm:$0xff] %v10850_v27  ;;  %v324_v32 = vadd.f32 %v323_v31, %v10753_v3  ;;  %v325_v34 = vpop.f32.mrb[31].mxu0  ;;  %v556_v3 = vpop.permute.xlu0 %555 }
 0x184   :  { %357 = vst.msk [vmem:[#allocation3 + $0xe8] sm:$0xff] %vm118_vm1, %v320_v29  ;;  %v326_v36 = vadd.f32 %v325_v34, %v10756_v4 }
 0x185   :  { %354 = vst [vmem:[#allocation3 + $0xd0] sm:$0xff] %v10843_v21  ;;  %358 = vst [vmem:[#allocation3 + $0xf0] sm:$0xff] %v324_v32  ;;  %v558_v4 = vadd.f32 %v556_v3, %v324_v32 }
 0x186   :  { %359 = vst.msk [vmem:[#allocation3 + $0xf8] sm:$0xff] %vm118_vm1, %v326_v36 }
 0x187   :  { %v8238_v45 = vmul.f32 -1.442695, %v558_v4 }
 0x18d   :  { %v374_v54 = vld [vmem:[#allocation3 + $0xf8] sm:$0xff] }
 0x18e   :  { %v565_v61 = vadd.f32 %v556_v3, %v374_v54 }
 0x190   :  { %v8239_v5 = vmul.f32 -1.442695, %v565_v61 }
 0x1f1   :  { %v472_v37 = vpop.permute.xlu1 %471 }
 0x1f2   :  { %v474_v38 = vadd.f32 %v472_v37, %v10761_v7 }
 0x1f4   :  { %9875 = vtanh.f32 %v474_v38 }
 0x1f5   :  { %v10859_v41 = vpop.permute.xlu1 %577  ;;  %9877 = vpow2.f32 %v8238_v45 }
 0x1f6   :  { %v580_v42 = vadd.f32 %v10859_v41, %v10758_v6  ;;  %v476_v6 = vsub.f32 1.0, %v10769_v16 }
 0x1f8   :  { %582 = vrot.lane.b32.xlu1 %v580_v42, %s10446_s4 }
 0x1fe   :  { %v9876_v43 = vpop.eup %9875 }
 0x1ff   :  { %478 = vrot.lane.b32.xlu0 %v9876_v43, %s10445_s0  ;;  %v9878_v46 = vpop.eup %9877 }
 0x200   :  { %v562_v47 = vadd.f32 1.0, %v9878_v46 }
 0x202   :  { %9879 = vrcp.f32 %v562_v47 }
 0x20c   :  { %v9880_v7 = vpop.eup %9879 }
 0x26a   :  { %v583_v48 = vpop.permute.xlu1 %582 }
 0x26b   :  { %v585_v49 = vmul.f32 %v9880_v7, %v583_v48 }
 0x26d   :  { %587 = vrot.lane.b32.xlu1 %v585_v49, %s10444_s23 }
 0x271   :  { %v479_v50 = vpop.permute.xlu0 %478 }
 0x272   :  { %v481_v52 = vmul.f32 %v479_v50, %v476_v6 }
 0x274   :  { %v10868_v53 = vadd.f32 %v482_v51, %v481_v52 }
 0x276   :  { %601 = vrot.lane.b32.xlu0 %v10868_v53, %s10445_s0 }
 0x2df   :  { %v588_v55 = vpop.permute.xlu1 %587 }
 0x2e0   :  { %v590_v59 = vadd.f32 %v588_v55, %v374_v54 }
 0x2e2   :  { %9881 = vtanh.f32 %v590_v59 }
 0x2e3   :  { %9883 = vpow2.f32 %v8239_v5 }
 0x2e8   :  { %v602_v60 = vpop.permute.xlu0 %601 }
 0x2e9   :  { %604 = vst.msk [vmem:[#allocation2] sm:$0xff] %vm375_vm2, %v602_v60  ;;  %8767 = vmatmul.mubr.msk.f32.vlgmr.msra.gmra.mrb[4].mxu1 %vm375_vm2, %v602_v60 }
 0x2ea   :  { %9476 = vmatpush3.bf16.msra.mxu1 %v10622_v33  ;;  %8777 = vmatprep.mubr.msk.f32.mxu1 %vm10442_vm0, %v10443_v2 }
 0x2eb   :  { %9477 = vmatprep.subr.bf16.mxu1 %v10441_v1 }
 0x2ec   :  { %v9882_v16 = vpop.eup %9881 }
 0x2ed   :  { %594 = vrot.lane.b32.xlu1 %v9882_v16, %s10445_s0  ;;  %v9884_v8 = vpop.eup %9883 }
 0x2ee   :  { %9479 = vmatpush3.bf16.msra.mxu1 %v10637_v39  ;;  %v569_v9 = vadd.f32 1.0, %v9884_v8 }
 0x2ef   :  { %9480 = vmatprep.subr.bf16.mxu1 %v10441_v1 }
 0x2f0   :  { %9885 = vrcp.f32 %v569_v9 }
 0x2fa   :  { %v9886_v12 = vpop.eup %9885 }
 0x2fb   :  { %v592_v13 = vsub.f32 1.0, %v9886_v12  ;;  %v598_v17 = vmul.f32 0.0, %v9886_v12 }
 0x35f   :  { %v595_v14 = vpop.permute.xlu1 %594 }
 0x360   :  { %v597_v18 = vmul.f32 %v595_v14, %v592_v13 }
 0x362   :  { %v10881_v20 = vadd.f32 %v598_v17, %v597_v18 }
 0x364   :  { %8778 = vmatmul.mubr.msk.f32.vlgmr.msra.gmra.mrb[6].mxu1 %vm375_vm2, %v10881_v20 }
 0x365   :  { %9482 = vmatpush3.bf16.msra.mxu1 %v10567_v10  ;;  %8788 = vmatprep.mubr.msk.f32.mxu1 %vm10442_vm0, %v10443_v2 }
 0x366   :  { %9483 = vmatprep.subr.bf16.mxu1 %v10441_v1 }
 0x369   :  { %9485 = vmatpush3.bf16.msra.mxu1 %v10588_v19 }
 0x36a   :  { %9486 = vmatprep.subr.bf16.mxu1 %v10441_v1 }
 0x3bc   :  { %v682_v23 = vpop.f32.mrb[4].mxu1 }
 0x3bd   :  { %v693_v24 = vadd.f32 %v682_v23, %v10739_v58  ;;  %v8768_v25 = vpop.f32.mrb[5].mxu1  ;;  %v686_v28 = vadd.f32 %v682_v23, %v10777_v22 }
 0x3bf   :  { %695 = vrot.lane.b32.xlu0 %v693_v24, %s10444_s23  ;;  %v8242_v29 = vmul.f32 -1.442695, %v686_v28 }
 0x3c1   :  { %9887 = vpow2.f32 %v8242_v29 }
 0x3cb   :  { %v9888_v31 = vpop.eup %9887 }
 0x3cc   :  { %v690_v32 = vadd.f32 1.0, %v9888_v31 }
 0x3ce   :  { %9889 = vrcp.f32 %v690_v32 }
 0x3d8   :  { %v9890_v34 = vpop.eup %9889 }
 0x3d9   :  { %v705_v52 = vsub.f32 1.0, %v9890_v34 }
 0x431   :  { %v696_v36 = vpop.permute.xlu0 %695 }
 0x432   :  { %v698_v37 = vmul.f32 %v9890_v34, %v696_v36 }
 0x434   :  { %700 = vrot.lane.b32.xlu1 %v698_v37, %s10444_s23 }
 0x437   :  { %v781_v38 = vpop.f32.mrb[6].mxu1 }
 0x438   :  { %v803_v42 = vadd.f32 %v781_v38, %v10859_v41  ;;  %786 = vrot.lane.b32.xlu0 %v781_v38, %s10445_s0  ;;  %v8779_v43 = vpop.f32.mrb[7].mxu1 }
 0x43a   :  { %805 = vrot.lane.b32.xlu1 %v803_v42, %s10446_s4 }
 0x4a6   :  { %v701_v3 = vpop.permute.xlu1 %700 }
 0x4a7   :  { %v703_v4 = vadd.f32 %v701_v3, %v10777_v22  ;;  %v711_v22 = vmul.f32 %v9890_v34, %v10868_v53 }
 0x4a9   :  { %9891 = vtanh.f32 %v703_v4 }
 0x4aa   :  { %v787_v45 = vpop.permute.xlu0 %786 }
 0x4ab   :  { %v789_v46 = vadd.f32 %v787_v45, %v10850_v27  ;;  %v613_v27 = vld [vmem:[#allocation3 + $0xe8] sm:$0xff] }
 0x4ac   :  { %v806_v50 = vpop.permute.xlu1 %805  ;;  %v796_v5 = vadd.f32 %v787_v45, %v613_v27 }
 0x4ad   :  { %v8244_v47 = vmul.f32 -1.442695, %v789_v46 }
 0x4ae   :  { %v8245_v8 = vmul.f32 -1.442695, %v796_v5 }
 0x4af   :  { %9893 = vpow2.f32 %v8244_v47 }
 0x4b3   :  { %v9892_v7 = vpop.eup %9891 }
 0x4b4   :  { %707 = vrot.lane.b32.xlu0 %v9892_v7, %s10445_s0 }
 0x4b9   :  { %v9894_v48 = vpop.eup %9893 }
 0x4ba   :  { %v793_v49 = vadd.f32 1.0, %v9894_v48 }
 0x4bc   :  { %9895 = vrcp.f32 %v793_v49 }
 0x4c6   :  { %v9896_v6 = vpop.eup %9895 }
 0x4c7   :  { %v808_v51 = vmul.f32 %v9896_v6, %v806_v50 }
 0x4c9   :  { %810 = vrot.lane.b32.xlu1 %v808_v51, %s10444_s23 }
 0x526   :  { %v708_v54 = vpop.permute.xlu0 %707 }
 0x527   :  { %v710_v55 = vmul.f32 %v708_v54, %v705_v52 }
 0x529   :  { %v10903_v59 = vadd.f32 %v711_v22, %v710_v55  ;;  %v835_v22 = vld [vmem:[#allocation3 + $0xd8] sm:$0xff] }
 0x52b   :  { %824 = vrot.lane.b32.xlu0 %v10903_v59, %s10445_s0 }
 0x53b   :  { %v811_v60 = vpop.permute.xlu1 %810 }
 0x53c   :  { %v813_v16 = vadd.f32 %v811_v60, %v613_v27 }
 0x53e   :  { %9897 = vtanh.f32 %v813_v16 }
 0x53f   :  { %9899 = vpow2.f32 %v8245_v8 }
 0x548   :  { %v9898_v61 = vpop.eup %9897 }
 0x549   :  { %817 = vrot.lane.b32.xlu1 %v9898_v61, %s10445_s0  ;;  %v9900_v53 = vpop.eup %9899 }
 0x54a   :  { %v800_v12 = vadd.f32 1.0, %v9900_v53 }
 0x54c   :  { %9901 = vrcp.f32 %v800_v12 }
 0x556   :  { %v9902_v13 = vpop.eup %9901 }
 0x557   :  { %v815_v14 = vsub.f32 1.0, %v9902_v13  ;;  %v821_v18 = vmul.f32 %v9902_v13, %v10881_v20 }
 0x59d   :  { %v825_v9 = vpop.permute.xlu0 %824 }
 0x59e   :  { %827 = vst.msk [vmem:[#allocation2 + $0x8] sm:$0xff] %vm375_vm2, %v825_v9  ;;  %8789 = vmatmul.mubr.msk.f32.vlgmr.msra.gmra.mrb[8].mxu1 %vm375_vm2, %v825_v9 }
 0x59f   :  { %9488 = vmatpush3.bf16.msra.mxu1 %v10622_v33  ;;  %8799 = vmatprep.mubr.msk.f32.mxu1 %vm10442_vm0, %v10443_v2 }
 0x5a0   :  { %9489 = vmatprep.subr.bf16.mxu1 %v10441_v1 }
 0x5a3   :  { %9491 = vmatpush3.bf16.msra.mxu1 %v10637_v39 }
 0x5a4   :  { %9492 = vmatprep.subr.bf16.mxu1 %v10441_v1 }
 0x5bb   :  { %v818_v17 = vpop.permute.xlu1 %817 }
 0x5bc   :  { %v820_v23 = vmul.f32 %v818_v17, %v815_v14 }
 0x5be   :  { %v10917_v24 = vadd.f32 %v821_v18, %v820_v23 }
 0x5c0   :  { %8800 = vmatmul.mubr.msk.f32.vlgmr.msra.gmra.mrb[10].mxu1 %vm375_vm2, %v10917_v24 }
 0x5c1   :  { %9494 = vmatpush3.bf16.msra.mxu1 %v10567_v10  ;;  %8810 = vmatprep.mubr.msk.f32.mxu1 %vm10442_vm0, %v10443_v2 }
 0x5c2   :  { %9495 = vmatprep.subr.bf16.mxu1 %v10441_v1 }
 0x5c5   :  { %9497 = vmatpush3.bf16.msra.mxu1 %v10588_v19 }
 0x5c6   :  { %9498 = vmatprep.subr.bf16.mxu1 %v10441_v1 }
 0x671   :  { %v904_v25 = vpop.f32.mrb[8].mxu1 }
 0x672   :  { %v915_v28 = vadd.f32 %v904_v25, %v10739_v58  ;;  %v8790_v29 = vpop.f32.mrb[9].mxu1  ;;  %v908_v36 = vadd.f32 %v904_v25, %v10782_v26 }
 0x674   :  { %917 = vrot.lane.b32.xlu0 %v915_v28, %s10444_s23  ;;  %v8247_v37 = vmul.f32 -1.442695, %v908_v36 }
 0x676   :  { %9903 = vpow2.f32 %v8247_v37 }
 0x680   :  { %v9904_v38 = vpop.eup %9903 }
 0x681   :  { %v912_v42 = vadd.f32 1.0, %v9904_v38 }
 0x683   :  { %9905 = vrcp.f32 %v912_v42 }
 0x68d   :  { %v9906_v43 = vpop.eup %9905 }
 0x68e   :  { %v927_v60 = vsub.f32 1.0, %v9906_v43  ;;  %v933_v61 = vmul.f32 %v9906_v43, %v10903_v59 }
 0x693   :  { %v1003_v31 = vpop.f32.mrb[10].mxu1 }
 0x694   :  { %1008 = vrot.lane.b32.xlu1 %v1003_v31, %s10445_s0  ;;  %v8801_v32 = vpop.f32.mrb[11].mxu1  ;;  %v1025_v34 = vadd.f32 %v1003_v31, %v10859_v41 }
 0x698   :  { %1027 = vrot.lane.b32.xlu1 %v1025_v34, %s10446_s4 }
 0x6e6   :  { %v918_v3 = vpop.permute.xlu0 %917 }
 0x6e7   :  { %v920_v4 = vmul.f32 %v9906_v43, %v918_v3 }
 0x6e9   :  { %922 = vrot.lane.b32.xlu0 %v920_v4, %s10444_s23 }
 0x706   :  { %v1009_v45 = vpop.permute.xlu1 %1008 }
 0x707   :  { %v1011_v46 = vadd.f32 %v1009_v45, %v10843_v21 }
 0x709   :  { %v8249_v47 = vmul.f32 -1.442695, %v1011_v46 }
 0x70a   :  { %v1028_v6 = vpop.permute.xlu1 %1027 }
 0x70b   :  { %9907 = vpow2.f32 %v8249_v47 }
 0x715   :  { %v9908_v7 = vpop.eup %9907 }
 0x716   :  { %v1015_v48 = vadd.f32 1.0, %v9908_v7 }
 0x718   :  { %9909 = vrcp.f32 %v1015_v48 }
 0x722   :  { %v9910_v49 = vpop.eup %9909 }
 0x723   :  { %v1030_v50 = vmul.f32 %v9910_v49, %v1028_v6 }
 0x725   :  { %1032 = vrot.lane.b32.xlu0 %v1030_v50, %s10444_s23 }
 0x75b   :  { %v923_v51 = vpop.permute.xlu0 %922 }
 0x75c   :  { %v925_v52 = vadd.f32 %v923_v51, %v10782_v26  ;;  %v1018_v26 = vadd.f32 %v1009_v45, %v835_v22 }
 0x75e   :  { %9911 = vtanh.f32 %v925_v52  ;;  %v8250_v9 = vmul.f32 -1.442695, %v1018_v26 }
 0x768   :  { %v9912_v54 = vpop.eup %9911 }
 0x769   :  { %929 = vrot.lane.b32.xlu1 %v9912_v54, %s10445_s0 }
 0x797   :  { %v1033_v55 = vpop.permute.xlu0 %1032 }
 0x798   :  { %v1035_v21 = vadd.f32 %v1033_v55, %v835_v22 }
 0x79a   :  { %9913 = vtanh.f32 %v1035_v21 }
 0x79b   :  { %9915 = vpow2.f32 %v8250_v9 }
 0x7a4   :  { %v9914_v27 = vpop.eup %9913 }
 0x7a5   :  { %1039 = vrot.lane.b32.xlu1 %v9914_v27, %s10445_s0  ;;  %v9916_v53 = vpop.eup %9915 }
 0x7a6   :  { %v1022_v12 = vadd.f32 1.0, %v9916_v53 }
 0x7a8   :  { %9917 = vrcp.f32 %v1022_v12 }
 0x7b2   :  { %v9918_v13 = vpop.eup %9917 }
 0x7b3   :  { %v1037_v18 = vsub.f32 1.0, %v9918_v13  ;;  %v1043_v23 = vmul.f32 %v9918_v13, %v10917_v24 }
 0x7db   :  { %v930_v16 = vpop.permute.xlu1 %929 }
 0x7dc   :  { %v932_v5 = vmul.f32 %v930_v16, %v927_v60 }
 0x7de   :  { %v10940_v8 = vadd.f32 %v933_v61, %v932_v5 }
 0x7e0   :  { %1046 = vrot.lane.b32.xlu0 %v10940_v8, %s10445_s0 }
 0x817   :  { %v1040_v14 = vpop.permute.xlu1 %1039 }
 0x818   :  { %v1042_v59 = vmul.f32 %v1040_v14, %v1037_v18 }
 0x81a   :  { %v10952_v25 = vadd.f32 %v1043_v23, %v1042_v59 }
 0x852   :  { %v1047_v17 = vpop.permute.xlu0 %1046 }
 0x853   :  { %1049 = vst.msk [vmem:[#allocation2 + $0x10] sm:$0xff] %vm375_vm2, %v1047_v17  ;;  %8811 = vmatmul.mubr.msk.f32.vlgmr.msra.gmra.mrb[12].mxu1 %vm375_vm2, %v1047_v17 }
 0x854   :  { %9500 = vmatpush3.bf16.msra.mxu1 %v10622_v33  ;;  %8821 = vmatprep.mubr.msk.f32.mxu1 %vm10442_vm0, %v10443_v2 }
 0x855   :  { %9501 = vmatprep.subr.bf16.mxu1 %v10441_v1 }
 0x858   :  { %9503 = vmatpush3.bf16.msra.mxu1 %v10637_v39 }
 0x859   :  { %9504 = vmatprep.subr.bf16.mxu1 %v10441_v1 }
 0x85b   :  { %8822 = vmatmul.mubr.msk.f32.vlgmr.msra.gmra.mrb[14].mxu1 %vm375_vm2, %v10952_v25 }
 0x85c   :  { %9506 = vmatpush3.bf16.msra.mxu1 %v10567_v10  ;;  %8832 = vmatprep.mubr.msk.f32.mxu1 %vm10442_vm0, %v10443_v2 }
 0x85d   :  { %9507 = vmatprep.subr.bf16.mxu1 %v10441_v1 }
 0x860   :  { %9509 = vmatpush3.bf16.msra.mxu1 %v10588_v19 }
 0x861   :  { %9516 = vmatprep.subr.bf16.mxu1 %v10441_v1 }
 0x926   :  { %v1126_v28 = vpop.f32.mrb[12].mxu1 }
 0x927   :  { %v8812_v29 = vpop.f32.mrb[13].mxu1  ;;  %v1137_v36 = vadd.f32 %v1126_v28, %v10739_v58  ;;  %v1130_v37 = vadd.f32 %v1126_v28, %v10789_v30 }
 0x929   :  { %v8252_v38 = vmul.f32 -1.442695, %v1130_v37 }
 0x92b   :  { %9919 = vpow2.f32 %v8252_v38 }
 0x92e   :  { %v1225_v31 = vpop.f32.mrb[14].mxu1 }
 0x92f   :  { %v1247_v32 = vadd.f32 %v1225_v31, %v10859_v41  ;;  %1230 = vrot.lane.b32.xlu0 %v1225_v31, %s10445_s0  ;;  %v8823_v34 = vpop.f32.mrb[15].mxu1 }
 0x931   :  { %1249 = vrot.lane.b32.xlu1 %v1247_v32, %s10446_s4 }
 0x935   :  { %1139 = vrot.lane.b32.xlu1 %v1137_v36, %s10444_s23  ;;  %v9920_v4 = vpop.eup %9919 }
 0x936   :  { %v1134_v47 = vadd.f32 1.0, %v9920_v4 }
 0x9a1   :  { %v1231_v42 = vpop.permute.xlu0 %1230 }
 0x9a2   :  { %v1233_v43 = vadd.f32 %v1231_v42, %v10837_v15  ;;  %v1057_v15 = vld [vmem:[#allocation3 + $0xc8] sm:$0xff] }
 0x9a3   :  { %v1250_v7 = vpop.permute.xlu1 %1249  ;;  %v1240_v60 = vadd.f32 %v1231_v42, %v1057_v15 }
 0x9a4   :  { %v8254_v3 = vmul.f32 -1.442695, %v1233_v43 }
 0x9a5   :  { %v8255_v16 = vmul.f32 -1.442695, %v1240_v60 }
 0x9a6   :  { %9921 = vpow2.f32 %v8254_v3 }
 0x9a7   :  { %v1140_v6 = vpop.permute.xlu1 %1139 }
 0x9b0   :  { %v9922_v45 = vpop.eup %9921 }
 0x9b1   :  { %v1237_v46 = vadd.f32 1.0, %v9922_v45 }
 0x9b3   :  { %9923 = vrcp.f32 %v1237_v46 }
 0x9b4   :  { %9925 = vrcp.f32 %v1134_v47 }
 0x9bd   :  { %v9924_v48 = vpop.eup %9923 }
 0x9be   :  { %v1252_v49 = vmul.f32 %v9924_v48, %v1250_v7  ;;  %v9926_v50 = vpop.eup %9925 }
 0x9bf   :  { %v1142_v51 = vmul.f32 %v9926_v50, %v1140_v6  ;;  %v1149_v14 = vsub.f32 1.0, %v9926_v50  ;;  %v1155_v18 = vmul.f32 %v9926_v50, %v10940_v8 }
 0x9c0   :  { %1254 = vrot.lane.b32.xlu0 %v1252_v49, %s10444_s23 }
 0x9c4   :  { %1144 = vrot.lane.b32.xlu0 %v1142_v51, %s10444_s23  ;;  %v1279_v51 = vld [vmem:[#allocation3 + $0xb8] sm:$0xff] }
 0xa32   :  { %v1255_v52 = vpop.permute.xlu0 %1254 }
 0xa33   :  { %v1257_v54 = vadd.f32 %v1255_v52, %v1057_v15 }
 0xa35   :  { %9927 = vtanh.f32 %v1257_v54 }
 0xa36   :  { %v1145_v22 = vpop.permute.xlu0 %1144 }
 0xa37   :  { %v1147_v55 = vadd.f32 %v1145_v22, %v10789_v30 }
 0xa39   :  { %9929 = vtanh.f32 %v1147_v55 }
 0xa3a   :  { %9931 = vpow2.f32 %v8255_v16 }
 0xa3f   :  { %v9928_v21 = vpop.eup %9927 }
 0xa40   :  { %1261 = vrot.lane.b32.xlu1 %v9928_v21, %s10445_s0 }
 0xa43   :  { %v9930_v27 = vpop.eup %9929 }
 0xa44   :  { %1151 = vrot.lane.b32.xlu0 %v9930_v27, %s10445_s0  ;;  %v9932_v61 = vpop.eup %9931 }
 0xa45   :  { %v1244_v5 = vadd.f32 1.0, %v9932_v61 }
 0xa47   :  { %9933 = vrcp.f32 %v1244_v5 }
 0xa51   :  { %v9934_v26 = vpop.eup %9933 }
 0xa52   :  { %v1259_v9 = vsub.f32 1.0, %v9934_v26  ;;  %v1265_v12 = vmul.f32 %v9934_v26, %v10952_v25 }
 0xab2   :  { %v1262_v53 = vpop.permute.xlu1 %1261 }
 0xab3   :  { %v1264_v13 = vmul.f32 %v1262_v53, %v1259_v9 }
 0xab5   :  { %v10976_v30 = vadd.f32 %v1265_v12, %v1264_v13 }
 0xab6   :  { %v1152_v17 = vpop.permute.xlu0 %1151 }
 0xab7   :  { %v1154_v59 = vmul.f32 %v1152_v17, %v1149_v14  ;;  %8844 = vmatmul.mubr.msk.f32.vlgmr.msra.gmra.mrb[32].mxu0 %vm375_vm2, %v10976_v30 }
 0xab8   :  { %9524 = vmatpush3.bf16.msra.mxu0 %v10622_v33  ;;  %8865 = vmatprep.mubr.msk.f32.mxu0 %vm10442_vm0, %v10443_v2 }
 0xab9   :  { %v10984_v23 = vadd.f32 %v1155_v18, %v1154_v59  ;;  %9525 = vmatprep.subr.bf16.mxu0 %v10441_v1 }
 0xabb   :  { %1268 = vrot.lane.b32.xlu1 %v10984_v23, %s10445_s0 }
 0xabc   :  { %9527 = vmatpush3.bf16.msra.mxu0 %v10637_v39 }
 0xabd   :  { %9534 = vmatprep.subr.bf16.mxu0 %v10441_v1 }
 0xb2d   :  { %v1269_v8 = vpop.permute.xlu1 %1268 }
 0xb2e   :  { %1271 = vst.msk [vmem:[#allocation2 + $0x18] sm:$0xff] %vm375_vm2, %v1269_v8  ;;  %8833 = vmatmul.mubr.msk.f32.vlgmr.msra.gmra.mrb[16].mxu1 %vm375_vm2, %v1269_v8 }
 0xb2f   :  { %9518 = vmatpush3.bf16.msra.mxu1 %v10567_v10  ;;  %8854 = vmatprep.mubr.msk.f32.mxu1 %vm10442_vm0, %v10443_v2 }
 0xb30   :  { %9519 = vmatprep.subr.bf16.mxu1 %v10441_v1 }
 0xb33   :  { %9521 = vmatpush3.bf16.msra.mxu1 %v10588_v19 }
 0xb34   :  { %9528 = vmatprep.subr.bf16.mxu1 %v10441_v1 }
 0xb8a   :  { %v1447_v28 = vpop.f32.mrb[32].mxu0 }
 0xb8b   :  { %v1469_v29 = vadd.f32 %v1447_v28, %v10859_v41  ;;  %1452 = vrot.lane.b32.xlu0 %v1447_v28, %s10445_s0  ;;  %v8845_v31 = vpop.f32.mrb[33].mxu0 }
 0xb8d   :  { %1471 = vrot.lane.b32.xlu1 %v1469_v29, %s10446_s4 }
 0xbfd   :  { %v1453_v32 = vpop.permute.xlu0 %1452 }
 0xbfe   :  { %v1455_v34 = vadd.f32 %v1453_v32, %v10831_v11  ;;  %v1462_v22 = vadd.f32 %v1453_v32, %v1279_v51 }
 0xbff   :  { %v1472_v45 = vpop.permute.xlu1 %1471 }
 0xc00   :  { %v8259_v36 = vmul.f32 -1.442695, %v1455_v34  ;;  %v8260_v55 = vmul.f32 -1.442695, %v1462_v22 }
 0xc01   :  { %v1348_v37 = vpop.f32.mrb[16].mxu1 }
 0xc02   :  { %9935 = vpow2.f32 %v8259_v36  ;;  %v1359_v38 = vadd.f32 %v1348_v37, %v10739_v58  ;;  %v8834_v42 = vpop.f32.mrb[17].mxu1  ;;  %v1352_v47 = vadd.f32 %v1348_v37, %v10795_v35 }
 0xc04   :  { %1361 = vrot.lane.b32.xlu1 %v1359_v38, %s10444_s23  ;;  %v8257_v7 = vmul.f32 -1.442695, %v1352_v47 }
 0xc0c   :  { %v9936_v43 = vpop.eup %9935 }
 0xc0d   :  { %v1459_v3 = vadd.f32 1.0, %v9936_v43 }
 0xc0f   :  { %9937 = vrcp.f32 %v1459_v3 }
 0xc10   :  { %9939 = vpow2.f32 %v8257_v7 }
 0xc19   :  { %v9938_v4 = vpop.eup %9937 }
 0xc1a   :  { %v1474_v46 = vmul.f32 %v9938_v4, %v1472_v45  ;;  %v9940_v11 = vpop.eup %9939 }
 0xc1b   :  { %v1356_v48 = vadd.f32 1.0, %v9940_v11 }
 0xc1c   :  { %1476 = vrot.lane.b32.xlu0 %v1474_v46, %s10444_s23  ;;  %v1501_v46 = vld [vmem:[#allocation3 + $0xa8] sm:$0xff] }
 0xc1d   :  { %9941 = vrcp.f32 %v1356_v48 }
 0xc27   :  { %v9942_v49 = vpop.eup %9941 }
 0xc28   :  { %v1377_v17 = vmul.f32 %v9942_v49, %v10984_v23 }
 0xc76   :  { %v1362_v6 = vpop.permute.xlu1 %1361 }
 0xc77   :  { %v1364_v50 = vmul.f32 %v9942_v49, %v1362_v6 }
 0xc79   :  { %1366 = vrot.lane.b32.xlu1 %v1364_v50, %s10444_s23 }
 0xc8e   :  { %v1477_v15 = vpop.permute.xlu0 %1476 }
 0xc8f   :  { %v1479_v52 = vadd.f32 %v1477_v15, %v1279_v51 }
 0xc91   :  { %9943 = vtanh.f32 %v1479_v52 }
 0xc9b   :  { %v9944_v54 = vpop.eup %9943 }
 0xc9c   :  { %1483 = vrot.lane.b32.xlu0 %v9944_v54, %s10445_s0 }
 0xceb   :  { %v1367_v21 = vpop.permute.xlu1 %1366 }
 0xcec   :  { %v1369_v27 = vadd.f32 %v1367_v21, %v10795_v35  ;;  %v1371_v35 = vsub.f32 1.0, %v9942_v49 }
 0xcee   :  { %9945 = vtanh.f32 %v1369_v27 }
 0xcef   :  { %9947 = vpow2.f32 %v8260_v55 }
 0xcf8   :  { %v9946_v60 = vpop.eup %9945 }
 0xcf9   :  { %v9948_v16 = vpop.eup %9947  ;;  %1373 = vrot.lane.b32.xlu0 %v9946_v60, %s10445_s0 }
 0xcfa   :  { %v1466_v61 = vadd.f32 1.0, %v9948_v16 }
 0xcfc   :  { %9949 = vrcp.f32 %v1466_v61 }
 0xd06   :  { %v9950_v5 = vpop.eup %9949 }
 0xd07   :  { %v1481_v26 = vsub.f32 1.0, %v9950_v5  ;;  %v1487_v53 = vmul.f32 %v9950_v5, %v10976_v30 }
 0xd0e   :  { %v1484_v9 = vpop.permute.xlu0 %1483 }
 0xd0f   :  { %v1486_v12 = vmul.f32 %v1484_v9, %v1481_v26 }
 0xd11   :  { %v11012_v13 = vadd.f32 %v1487_v53, %v1486_v12 }
 0xd13   :  { %8866 = vmatmul.mubr.msk.f32.vlgmr.msra.gmra.mrb[34].mxu0 %vm375_vm2, %v11012_v13 }
 0xd14   :  { %9536 = vmatpush3.bf16.msra.mxu0 %v10622_v33  ;;  %8887 = vmatprep.mubr.msk.f32.mxu0 %vm10442_vm0, %v10443_v2 }
 0xd15   :  { %9537 = vmatprep.subr.bf16.mxu0 %v10441_v1 }
 0xd18   :  { %9539 = vmatpush3.bf16.msra.mxu0 %v10637_v39 }
 0xd19   :  { %9546 = vmatprep.subr.bf16.mxu0 %v10441_v1 }
 0xd6b   :  { %v1374_v14 = vpop.permute.xlu0 %1373 }
 0xd6c   :  { %v1376_v18 = vmul.f32 %v1374_v14, %v1371_v35 }
 0xd6e   :  { %v11023_v59 = vadd.f32 %v1377_v17, %v1376_v18 }
 0xd70   :  { %1490 = vrot.lane.b32.xlu1 %v11023_v59, %s10445_s0 }
 0xde2   :  { %v1491_v8 = vpop.permute.xlu1 %1490 }
 0xde3   :  { %1493 = vst.msk [vmem:[#allocation2 + $0x20] sm:$0xff] %vm375_vm2, %v1491_v8  ;;  %8855 = vmatmul.mubr.msk.f32.vlgmr.msra.gmra.mrb[18].mxu1 %vm375_vm2, %v1491_v8 }
 0xde4   :  { %9530 = vmatpush3.bf16.msra.mxu1 %v10567_v10  ;;  %8876 = vmatprep.mubr.msk.f32.mxu1 %vm10442_vm0, %v10443_v2 }
 0xde5   :  { %9531 = vmatprep.subr.bf16.mxu1 %v10441_v1 }
 0xde6   :  { %v1669_v28 = vpop.f32.mrb[34].mxu0 }
 0xde7   :  { %v1691_v23 = vadd.f32 %v1669_v28, %v10859_v41  ;;  %v8867_v29 = vpop.f32.mrb[35].mxu0  ;;  %1674 = vrot.lane.b32.xlu0 %v1669_v28, %s10445_s0 }
 0xde8   :  { %9533 = vmatpush3.bf16.msra.mxu1 %v10588_v19 }
 0xde9   :  { %1693 = vrot.lane.b32.xlu1 %v1691_v23, %s10446_s4  ;;  %9540 = vmatprep.subr.bf16.mxu1 %v10441_v1 }
 0xe59   :  { %v1675_v31 = vpop.permute.xlu0 %1674 }
 0xe5a   :  { %v1677_v32 = vadd.f32 %v1675_v31, %v10825_v63  ;;  %v1684_v52 = vadd.f32 %v1675_v31, %v1501_v46 }
 0xe5b   :  { %v1694_v42 = vpop.permute.xlu1 %1693 }
 0xe5c   :  { %v8264_v34 = vmul.f32 -1.442695, %v1677_v32  ;;  %v8265_v54 = vmul.f32 -1.442695, %v1684_v52 }
 0xe5e   :  { %9951 = vpow2.f32 %v8264_v34 }
 0xe68   :  { %v9952_v36 = vpop.eup %9951 }
 0xe69   :  { %v1681_v37 = vadd.f32 1.0, %v9952_v36 }
 0xe6b   :  { %9953 = vrcp.f32 %v1681_v37 }
 0xe75   :  { %v9954_v38 = vpop.eup %9953 }
 0xe76   :  { %v1696_v43 = vmul.f32 %v9954_v38, %v1694_v42  ;;  %v1723_v42 = vld [vmem:[#allocation3 + $0x98] sm:$0xff] }
 0xe78   :  { %1698 = vrot.lane.b32.xlu0 %v1696_v43, %s10444_s23 }
 0xeb6   :  { %v1570_v3 = vpop.f32.mrb[18].mxu1 }
 0xeb7   :  { %v1581_v4 = vadd.f32 %v1570_v3, %v10739_v58  ;;  %v8856_v45 = vpop.f32.mrb[19].mxu1  ;;  %v1574_v11 = vadd.f32 %v1570_v3, %v10801_v40 }
 0xeb9   :  { %1583 = vrot.lane.b32.xlu0 %v1581_v4, %s10444_s23  ;;  %v8262_v48 = vmul.f32 -1.442695, %v1574_v11 }
 0xeea   :  { %v1699_v47 = vpop.permute.xlu0 %1698 }
 0xeeb   :  { %v1701_v7 = vadd.f32 %v1699_v47, %v1501_v46 }
 0xeed   :  { %9955 = vtanh.f32 %v1701_v7 }
 0xeee   :  { %9957 = vpow2.f32 %v8262_v48 }
 0xef7   :  { %v9956_v63 = vpop.eup %9955 }
 0xef8   :  { %1705 = vrot.lane.b32.xlu1 %v9956_v63, %s10445_s0  ;;  %v9958_v49 = vpop.eup %9957 }
 0xef9   :  { %v1578_v6 = vadd.f32 1.0, %v9958_v49 }
 0xefb   :  { %9959 = vrcp.f32 %v1578_v6 }
 0xefc   :  { %9961 = vpow2.f32 %v8265_v54 }
 0xf05   :  { %v9960_v50 = vpop.eup %9959 }
 0xf06   :  { %v9962_v22 = vpop.eup %9961  ;;  %v1593_v12 = vsub.f32 1.0, %v9960_v50  ;;  %v1599_v14 = vmul.f32 %v9960_v50, %v11023_v59 }
 0xf07   :  { %v1688_v55 = vadd.f32 1.0, %v9962_v22 }
 0xf09   :  { %9963 = vrcp.f32 %v1688_v55 }
 0xf13   :  { %v9964_v21 = vpop.eup %9963 }
 0xf14   :  { %v1703_v27 = vsub.f32 1.0, %v9964_v21  ;;  %v1709_v16 = vmul.f32 %v9964_v21, %v11012_v13 }
 0xf2b   :  { %v1584_v51 = vpop.permute.xlu0 %1583 }
 0xf2c   :  { %v1586_v15 = vmul.f32 %v9960_v50, %v1584_v51 }
 0xf2e   :  { %1588 = vrot.lane.b32.xlu1 %v1586_v15, %s10444_s23 }
 0xf6a   :  { %v1706_v60 = vpop.permute.xlu1 %1705 }
 0xf6b   :  { %v1708_v61 = vmul.f32 %v1706_v60, %v1703_v27 }
 0xf6d   :  { %v11046_v5 = vadd.f32 %v1709_v16, %v1708_v61  ;;  %v10383_v16 = vld [vmem:[#allocation3 + $0x60] sm:$0xff] }
 0xf6f   :  { %8888 = vmatmul.mubr.msk.f32.vlgmr.msra.gmra.mrb[36].mxu0 %vm375_vm2, %v11046_v5 }
 0xf70   :  { %9548 = vmatpush3.bf16.msra.mxu0 %v10622_v33  ;;  %8909 = vmatprep.mubr.msk.f32.mxu0 %vm10442_vm0, %v10443_v2 }
 0xf71   :  { %9549 = vmatprep.subr.bf16.mxu0 %v10441_v1 }
 0xf74   :  { %9551 = vmatpush3.bf16.msra.mxu0 %v10637_v39 }
 0xf75   :  { %9558 = vmatprep.subr.bf16.mxu0 %v10441_v1 }
 0xfa0   :  { %v1589_v26 = vpop.permute.xlu1 %1588 }
 0xfa1   :  { %v1591_v9 = vadd.f32 %v1589_v26, %v10801_v40 }
 0xfa3   :  { %9965 = vtanh.f32 %v1591_v9 }
 0xfad   :  { %v9966_v53 = vpop.eup %9965 }
 0xfae   :  { %1595 = vrot.lane.b32.xlu0 %v9966_v53, %s10445_s0 }
0x1020   :  { %v1596_v35 = vpop.permute.xlu0 %1595 }
0x1021   :  { %v1598_v17 = vmul.f32 %v1596_v35, %v1593_v12 }
0x1023   :  { %v11059_v18 = vadd.f32 %v1599_v14, %v1598_v17 }
0x1025   :  { %1712 = vrot.lane.b32.xlu1 %v11059_v18, %s10445_s0 }
0x1042   :  { %v1891_v8 = vpop.f32.mrb[36].mxu0 }
0x1043   :  { %v1913_v28 = vadd.f32 %v1891_v8, %v10859_v41  ;;  %v8889_v23 = vpop.f32.mrb[37].mxu0  ;;  %1896 = vrot.lane.b32.xlu0 %v1891_v8, %s10445_s0 }
0x1045   :  { %1915 = vrot.lane.b32.xlu1 %v1913_v28, %s10446_s4 }
0x1097   :  { %v1713_v40 = vpop.permute.xlu1 %1712 }
0x1098   :  { %1715 = vst.msk [vmem:[#allocation2 + $0x28] sm:$0xff] %vm375_vm2, %v1713_v40  ;;  %8877 = vmatmul.mubr.msk.f32.vlgmr.msra.gmra.mrb[20].mxu1 %vm375_vm2, %v1713_v40  ;;  %v10384_v40 = vld [vmem:[#allocation3 + $0x80] sm:$0xff] }
0x1099   :  { %9542 = vmatpush3.bf16.msra.mxu1 %v10567_v10  ;;  %8898 = vmatprep.mubr.msk.f32.mxu1 %vm10442_vm0, %v10443_v2 }
0x109a   :  { %9543 = vmatprep.subr.bf16.mxu1 %v10441_v1 }
0x109d   :  { %9545 = vmatpush3.bf16.msra.mxu1 %v10588_v19 }
0x109e   :  { %9552 = vmatprep.subr.bf16.mxu1 %v10441_v1 }
0x10b5   :  { %v1897_v59 = vpop.permute.xlu0 %1896 }
0x10b6   :  { %v1899_v29 = vadd.f32 %v1897_v59, %v10819_v56  ;;  %v1906_v47 = vadd.f32 %v1897_v59, %v1723_v42 }
0x10b7   :  { %v1916_v37 = vpop.permute.xlu1 %1915 }
0x10b8   :  { %v8269_v31 = vmul.f32 -1.442695, %v1899_v29  ;;  %v8270_v7 = vmul.f32 -1.442695, %v1906_v47 }
0x10ba   :  { %9967 = vpow2.f32 %v8269_v31 }
0x10c4   :  { %v9968_v32 = vpop.eup %9967 }
0x10c5   :  { %v1903_v34 = vadd.f32 1.0, %v9968_v32 }
0x10c7   :  { %9969 = vrcp.f32 %v1903_v34 }
0x10d1   :  { %v9970_v36 = vpop.eup %9969 }
0x10d2   :  { %v1918_v38 = vmul.f32 %v9970_v36, %v1916_v37 }
0x10d4   :  { %1920 = vrot.lane.b32.xlu0 %v1918_v38, %s10444_s23  ;;  %v1945_v38 = vld [vmem:[#allocation3 + $0x88] sm:$0xff] }
0x1146   :  { %v1921_v43 = vpop.permute.xlu0 %1920 }
0x1147   :  { %v1923_v3 = vadd.f32 %v1921_v43, %v1723_v42 }
0x1149   :  { %9971 = vtanh.f32 %v1923_v3 }
0x114a   :  { %9973 = vpow2.f32 %v8270_v7 }
0x1153   :  { %v9972_v4 = vpop.eup %9971 }
0x1154   :  { %1927 = vrot.lane.b32.xlu1 %v9972_v4, %s10445_s0  ;;  %v9974_v63 = vpop.eup %9973 }
0x1155   :  { %v1910_v11 = vadd.f32 1.0, %v9974_v63 }
0x1157   :  { %9975 = vrcp.f32 %v1910_v11 }
0x1161   :  { %v9976_v6 = vpop.eup %9975 }
0x1162   :  { %v1925_v50 = vsub.f32 1.0, %v9976_v6  ;;  %v1931_v15 = vmul.f32 %v9976_v6, %v11046_v5 }
0x116b   :  { %v1792_v45 = vpop.f32.mrb[20].mxu1 }
0x116c   :  { %v1803_v56 = vadd.f32 %v1792_v45, %v10739_v58  ;;  %v8878_v46 = vpop.f32.mrb[21].mxu1  ;;  %v1796_v48 = vadd.f32 %v1792_v45, %v10807_v44 }
0x116e   :  { %1805 = vrot.lane.b32.xlu0 %v1803_v56, %s10444_s23  ;;  %v8267_v49 = vmul.f32 -1.442695, %v1796_v48 }
0x1170   :  { %9977 = vpow2.f32 %v8267_v49 }
0x117a   :  { %v9978_v44 = vpop.eup %9977 }
0x117b   :  { %v1800_v22 = vadd.f32 1.0, %v9978_v44 }
0x117d   :  { %9979 = vrcp.f32 %v1800_v22 }
0x1187   :  { %v9980_v55 = vpop.eup %9979 }
0x1188   :  { %v1815_v12 = vsub.f32 1.0, %v9980_v55  ;;  %v1821_v14 = vmul.f32 %v9980_v55, %v11059_v18 }
0x11c6   :  { %v1928_v51 = vpop.permute.xlu1 %1927 }
0x11c7   :  { %v1930_v52 = vmul.f32 %v1928_v51, %v1925_v50 }
0x11c9   :  { %v11081_v54 = vadd.f32 %v1931_v15, %v1930_v52  ;;  %v1943_v15 = vld [vmem:[#allocation3 + $0x70] sm:$0xff] }
0x11cb   :  { %8910 = vmatmul.mubr.msk.f32.vlgmr.msra.gmra.mrb[38].mxu0 %vm375_vm2, %v11081_v54 }
0x11cc   :  { %9560 = vmatpush3.bf16.msra.mxu0 %v10622_v33  ;;  %8931 = vmatprep.mubr.msk.f32.mxu0 %vm10442_vm0, %v10443_v2 }
0x11cd   :  { %9561 = vmatprep.subr.bf16.mxu0 %v10441_v1 }
0x11d0   :  { %9563 = vmatpush3.bf16.msra.mxu0 %v10637_v39 }
0x11d1   :  { %9570 = vmatprep.subr.bf16.mxu0 %v10441_v1 }
0x11e0   :  { %v1806_v21 = vpop.permute.xlu0 %1805 }
0x11e1   :  { %v1808_v27 = vmul.f32 %v9980_v55, %v1806_v21 }
0x11e3   :  { %1810 = vrot.lane.b32.xlu1 %v1808_v27, %s10444_s23 }
0x1255   :  { %v1811_v60 = vpop.permute.xlu1 %1810 }
0x1256   :  { %v1813_v61 = vadd.f32 %v10383_v16, %v1811_v60 }
0x1258   :  { %9981 = vtanh.f32 %v1813_v61 }
0x1262   :  { %v9982_v26 = vpop.eup %9981 }
0x1263   :  { %1817 = vrot.lane.b32.xlu0 %v9982_v26, %s10445_s0 }
0x129e   :  { %v2113_v9 = vpop.f32.mrb[38].mxu0 }
0x129f   :  { %v8911_v53 = vpop.f32.mrb[39].mxu0  ;;  %2118 = vrot.lane.b32.xlu0 %v2113_v9, %s10445_s0  ;;  %v2135_v28 = vadd.f32 %v2113_v9, %v10859_v41 }
0x12d5   :  { %v1818_v35 = vpop.permute.xlu0 %1817 }
0x12d6   :  { %v1820_v17 = vmul.f32 %v1818_v35, %v1815_v12 }
0x12d8   :  { %v11095_v8 = vadd.f32 %v1821_v14, %v1820_v17 }
0x12da   :  { %1934 = vrot.lane.b32.xlu1 %v11095_v8, %s10445_s0 }
0x12de   :  { %2137 = vrot.lane.b32.xlu1 %v2135_v28, %s10446_s4 }
0x1311   :  { %v2119_v23 = vpop.permute.xlu0 %2118 }
0x1312   :  { %v2121_v59 = vadd.f32 %v10384_v40, %v2119_v23  ;;  %v2128_v4 = vadd.f32 %v2119_v23, %v1945_v38 }
0x1314   :  { %v8274_v29 = vmul.f32 -1.442695, %v2121_v59  ;;  %v8275_v47 = vmul.f32 -1.442695, %v2128_v4 }
0x1316   :  { %9983 = vpow2.f32 %v8274_v29 }
0x1320   :  { %v9984_v31 = vpop.eup %9983 }
0x1321   :  { %v2125_v32 = vadd.f32 1.0, %v9984_v31 }
0x1323   :  { %9985 = vrcp.f32 %v2125_v32 }
0x132d   :  { %v9986_v18 = vpop.eup %9985 }
0x134c   :  { %v1935_v34 = vpop.permute.xlu1 %1934 }
0x134d   :  { %1937 = vst.msk [vmem:[#allocation2 + $0x30] sm:$0xff] %vm375_vm2, %v1935_v34  ;;  %8899 = vmatmul.mubr.msk.f32.vlgmr.msra.gmra.mrb[22].mxu1 %vm375_vm2, %v1935_v34 }
0x134e   :  { %9554 = vmatpush3.bf16.msra.mxu1 %v10567_v10  ;;  %8920 = vmatprep.mubr.msk.f32.mxu1 %vm10442_vm0, %v10443_v2 }
0x134f   :  { %9555 = vmatprep.subr.bf16.mxu1 %v10441_v1 }
0x1350   :  { %v2138_v36 = vpop.permute.xlu1 %2137 }
0x1351   :  { %v2140_v37 = vmul.f32 %v9986_v18, %v2138_v36 }
0x1352   :  { %9557 = vmatpush3.bf16.msra.mxu1 %v10588_v19 }
0x1353   :  { %2142 = vrot.lane.b32.xlu0 %v2140_v37, %s10444_s23  ;;  %9564 = vmatprep.subr.bf16.mxu1 %v10441_v1  ;;  %v2167_v37 = vld [vmem:[#allocation3 + $0x78] sm:$0xff] }
0x13c5   :  { %v2143_v42 = vpop.permute.xlu0 %2142 }
0x13c6   :  { %v2145_v43 = vadd.f32 %v2143_v42, %v1945_v38 }
0x13c8   :  { %9987 = vtanh.f32 %v2145_v43 }
0x13c9   :  { %9989 = vpow2.f32 %v8275_v47 }
0x13d2   :  { %v9988_v3 = vpop.eup %9987 }
0x13d3   :  { %2149 = vrot.lane.b32.xlu1 %v9988_v3, %s10445_s0  ;;  %v9990_v7 = vpop.eup %9989 }
0x13d4   :  { %v2132_v63 = vadd.f32 1.0, %v9990_v7 }
0x13d6   :  { %9991 = vrcp.f32 %v2132_v63 }
0x13e0   :  { %v9992_v11 = vpop.eup %9991 }
0x13e1   :  { %v2147_v48 = vsub.f32 1.0, %v9992_v11  ;;  %v2153_v6 = vmul.f32 %v9992_v11, %v11081_v54 }
0x1420   :  { %v2014_v45 = vpop.f32.mrb[22].mxu1 }
0x1421   :  { %v2025_v56 = vadd.f32 %v2014_v45, %v10739_v58  ;;  %v8900_v46 = vpop.f32.mrb[23].mxu1  ;;  %v2018_v52 = vadd.f32 %v2014_v45, %v1943_v15 }
0x1423   :  { %2027 = vrot.lane.b32.xlu0 %v2025_v56, %s10444_s23  ;;  %v8272_v44 = vmul.f32 -1.442695, %v2018_v52 }
0x1425   :  { %9993 = vpow2.f32 %v8272_v44 }
0x142f   :  { %v9994_v22 = vpop.eup %9993 }
0x1430   :  { %v2022_v55 = vadd.f32 1.0, %v9994_v22 }
0x1432   :  { %9995 = vrcp.f32 %v2022_v55 }
0x143c   :  { %v9996_v21 = vpop.eup %9995 }
0x143d   :  { %v2037_v12 = vsub.f32 1.0, %v9996_v21  ;;  %v2043_v14 = vmul.f32 %v9996_v21, %v11095_v8 }
0x1445   :  { %v2150_v49 = vpop.permute.xlu1 %2149 }
0x1446   :  { %v2152_v50 = vmul.f32 %v2150_v49, %v2147_v48 }
0x1448   :  { %v11114_v51 = vadd.f32 %v2153_v6, %v2152_v50 }
0x144a   :  { %8932 = vmatmul.mubr.msk.f32.vlgmr.msra.gmra.mrb[40].mxu0 %vm375_vm2, %v11114_v51 }
0x144b   :  { %9572 = vmatpush3.bf16.msra.mxu0 %v10622_v33  ;;  %8953 = vmatprep.mubr.msk.f32.mxu0 %vm10442_vm0, %v10443_v2 }
0x144c   :  { %9573 = vmatprep.subr.bf16.mxu0 %v10441_v1 }
0x144f   :  { %9575 = vmatpush3.bf16.msra.mxu0 %v10637_v39 }
0x1450   :  { %9582 = vmatprep.subr.bf16.mxu0 %v10441_v1 }
0x1495   :  { %v2028_v27 = vpop.permute.xlu0 %2027 }
0x1496   :  { %v2030_v60 = vmul.f32 %v9996_v21, %v2028_v27 }
0x1498   :  { %2032 = vrot.lane.b32.xlu1 %v2030_v60, %s10444_s23 }
0x150a   :  { %v2033_v16 = vpop.permute.xlu1 %2032 }
0x150b   :  { %v2035_v61 = vadd.f32 %v2033_v16, %v1943_v15 }
0x150d   :  { %9997 = vtanh.f32 %v2035_v61 }
0x1517   :  { %v9998_v26 = vpop.eup %9997 }
0x1518   :  { %2039 = vrot.lane.b32.xlu0 %v9998_v26, %s10445_s0 }
0x151d   :  { %v2335_v9 = vpop.f32.mrb[40].mxu0 }
0x151e   :  { %v8933_v53 = vpop.f32.mrb[41].mxu0  ;;  %2340 = vrot.lane.b32.xlu0 %v2335_v9, %s10445_s0  ;;  %v2357_v23 = vadd.f32 %v2335_v9, %v10859_v41 }
0x158a   :  { %v2040_v35 = vpop.permute.xlu0 %2039 }
0x158b   :  { %v2042_v17 = vmul.f32 %v2040_v35, %v2037_v12 }
0x158d   :  { %v11128_v28 = vadd.f32 %v2043_v14, %v2042_v17 }
0x158f   :  { %2156 = vrot.lane.b32.xlu1 %v11128_v28, %s10445_s0 }
0x1590   :  { %v2341_v40 = vpop.permute.xlu0 %2340 }
0x1591   :  { %v2343_v59 = vadd.f32 %v2341_v40, %v1943_v15  ;;  %v2350_v3 = vadd.f32 %v2341_v40, %v2167_v37  ;;  %v2165_v15 = vld [vmem:[#allocation3 + $0x80] sm:$0xff] }
0x1593   :  { %2359 = vrot.lane.b32.xlu1 %v2357_v23, %s10446_s4  ;;  %v8279_v29 = vmul.f32 -1.442695, %v2343_v59  ;;  %v8280_v46 = vmul.f32 -1.442695, %v2350_v3  ;;  %v2388_v59 = vld [vmem:[#allocation3 + $0x60] sm:$0xff] }
0x1595   :  { %9999 = vpow2.f32 %v8279_v29 }
0x159f   :  { %v10000_v31 = vpop.eup %9999 }
0x15a0   :  { %v2347_v32 = vadd.f32 1.0, %v10000_v31 }
0x15a2   :  { %10001 = vrcp.f32 %v2347_v32 }
0x15ac   :  { %v10002_v8 = vpop.eup %10001 }
0x1601   :  { %v2157_v34 = vpop.permute.xlu1 %2156 }
0x1602   :  { %2159 = vst.msk [vmem:[#allocation2 + $0x38] sm:$0xff] %vm375_vm2, %v2157_v34  ;;  %8921 = vmatmul.mubr.msk.f32.vlgmr.msra.gmra.mrb[24].mxu1 %vm375_vm2, %v2157_v34 }
0x1603   :  { %9566 = vmatpush3.bf16.msra.mxu1 %v10567_v10  ;;  %8942 = vmatprep.mubr.msk.f32.mxu1 %vm10442_vm0, %v10443_v2 }
0x1604   :  { %9567 = vmatprep.subr.bf16.mxu1 %v10441_v1 }
0x1605   :  { %v2360_v18 = vpop.permute.xlu1 %2359 }
0x1606   :  { %v2362_v36 = vmul.f32 %v10002_v8, %v2360_v18 }
0x1607   :  { %9569 = vmatpush3.bf16.msra.mxu1 %v10588_v19 }
0x1608   :  { %2364 = vrot.lane.b32.xlu0 %v2362_v36, %s10444_s23  ;;  %9576 = vmatprep.subr.bf16.mxu1 %v10441_v1 }
0x167a   :  { %v2365_v38 = vpop.permute.xlu0 %2364 }
0x167b   :  { %v2367_v42 = vadd.f32 %v2365_v38, %v2167_v37  ;;  %v2389_v38 = vld [vmem:[#allocation3 + $0x68] sm:$0xff] }
0x167d   :  { %10003 = vtanh.f32 %v2367_v42 }
0x167e   :  { %10005 = vpow2.f32 %v8280_v46 }
0x1687   :  { %v10004_v43 = vpop.eup %10003 }
0x1688   :  { %2371 = vrot.lane.b32.xlu1 %v10004_v43, %s10445_s0  ;;  %v10006_v47 = vpop.eup %10005 }
0x1689   :  { %v2354_v7 = vadd.f32 1.0, %v10006_v47 }
0x168b   :  { %10007 = vrcp.f32 %v2354_v7 }
0x1695   :  { %v10008_v63 = vpop.eup %10007 }
0x1696   :  { %v2369_v11 = vsub.f32 1.0, %v10008_v63  ;;  %v2375_v49 = vmul.f32 %v10008_v63, %v11114_v51 }
0x16d5   :  { %v2236_v4 = vpop.f32.mrb[24].mxu1 }
0x16d6   :  { %v2247_v45 = vadd.f32 %v2236_v4, %v10739_v58  ;;  %v8922_v56 = vpop.f32.mrb[25].mxu1  ;;  %v2240_v52 = vadd.f32 %v2236_v4, %v2165_v15 }
0x16d8   :  { %2249 = vrot.lane.b32.xlu0 %v2247_v45, %s10444_s23  ;;  %v8277_v44 = vmul.f32 -1.442695, %v2240_v52 }
0x16da   :  { %10009 = vpow2.f32 %v8277_v44  ;;  %v2387_v44 = vld [vmem:[#allocation3 + $0x90] sm:$0xff] }
0x16e4   :  { %v10010_v22 = vpop.eup %10009 }
0x16e5   :  { %v2244_v55 = vadd.f32 1.0, %v10010_v22 }
0x16e7   :  { %10011 = vrcp.f32 %v2244_v55 }
0x16f1   :  { %v10012_v21 = vpop.eup %10011 }
0x16f2   :  { %v2259_v35 = vsub.f32 1.0, %v10012_v21  ;;  %v2265_v17 = vmul.f32 %v10012_v21, %v11128_v28 }
0x16fa   :  { %v2372_v48 = vpop.permute.xlu1 %2371 }
0x16fb   :  { %v2374_v6 = vmul.f32 %v2372_v48, %v2369_v11 }
0x16fd   :  { %v11147_v50 = vadd.f32 %v2375_v49, %v2374_v6 }
0x16ff   :  { %8954 = vmatmul.mubr.msk.f32.vlgmr.msra.gmra.mrb[42].mxu0 %vm375_vm2, %v11147_v50 }
0x1700   :  { %9584 = vmatpush3.bf16.msra.mxu0 %v10622_v33  ;;  %8975 = vmatprep.mubr.msk.f32.mxu0 %vm10442_vm0, %v10443_v2 }
0x1701   :  { %9585 = vmatprep.subr.bf16.mxu0 %v10441_v1 }
0x1704   :  { %9587 = vmatpush3.bf16.msra.mxu0 %v10637_v39 }
0x1705   :  { %9594 = vmatprep.subr.bf16.mxu0 %v10441_v1 }
0x174a   :  { %v2250_v27 = vpop.permute.xlu0 %2249 }
0x174b   :  { %v2252_v60 = vmul.f32 %v10012_v21, %v2250_v27 }
0x174d   :  { %2254 = vrot.lane.b32.xlu1 %v2252_v60, %s10444_s23 }
0x17bf   :  { %v2255_v16 = vpop.permute.xlu1 %2254 }
0x17c0   :  { %v2257_v61 = vadd.f32 %v2255_v16, %v2165_v15 }
0x17c2   :  { %10013 = vtanh.f32 %v2257_v61 }
0x17cc   :  { %v10014_v26 = vpop.eup %10013 }
0x17cd   :  { %2261 = vrot.lane.b32.xlu0 %v10014_v26, %s10445_s0 }
0x17d2   :  { %v2557_v9 = vpop.f32.mrb[42].mxu0 }
0x17d3   :  { %v8955_v53 = vpop.f32.mrb[43].mxu0  ;;  %2562 = vrot.lane.b32.xlu1 %v2557_v9, %s10445_s0  ;;  %v2579_v12 = vadd.f32 %v2557_v9, %v10859_v41 }
0x17d7   :  { %2581 = vrot.lane.b32.xlu1 %v2579_v12, %s10446_s4 }
0x183f   :  { %v2262_v14 = vpop.permute.xlu0 %2261 }
0x1840   :  { %v2264_v23 = vmul.f32 %v2262_v14, %v2259_v35 }
0x1842   :  { %v11163_v40 = vadd.f32 %v2265_v17, %v2264_v23  ;;  %v2610_v23 = vld [vmem:[#allocation3 + $0x50] sm:$0xff] }
0x1844   :  { %2378 = vrot.lane.b32.xlu0 %v11163_v40, %s10445_s0 }
0x1845   :  { %v2563_v29 = vpop.permute.xlu1 %2562 }
0x1846   :  { %v2565_v31 = vadd.f32 %v2563_v29, %v2388_v59  ;;  %v2572_v4 = vadd.f32 %v2563_v29, %v2389_v38 }
0x1848   :  { %v8284_v32 = vmul.f32 -1.442695, %v2565_v31  ;;  %v8285_v45 = vmul.f32 -1.442695, %v2572_v4  ;;  %v2611_v4 = vld [vmem:[#allocation3 + $0x58] sm:$0xff] }
0x1849   :  { %v2582_v36 = vpop.permute.xlu1 %2581 }
0x184a   :  { %10015 = vpow2.f32 %v8284_v32 }
0x1854   :  { %v10016_v34 = vpop.eup %10015 }
0x1855   :  { %v2569_v8 = vadd.f32 1.0, %v10016_v34 }
0x1857   :  { %10017 = vrcp.f32 %v2569_v8 }
0x1861   :  { %v10018_v18 = vpop.eup %10017 }
0x1862   :  { %v2584_v37 = vmul.f32 %v10018_v18, %v2582_v36 }
0x1864   :  { %2586 = vrot.lane.b32.xlu0 %v2584_v37, %s10444_s23 }
0x18b6   :  { %v11168_v28 = vpop.permute.xlu0 %2378 }
0x18b7   :  { %8943 = vmatmul.mubr.msk.f32.vlgmr.msra.gmra.mrb[26].mxu1 %vm375_vm2, %v11168_v28 }
0x18b8   :  { %9578 = vmatpush3.bf16.msra.mxu1 %v10567_v10  ;;  %8964 = vmatprep.mubr.msk.f32.mxu1 %vm10442_vm0, %v10443_v2 }
0x18b9   :  { %9579 = vmatprep.subr.bf16.mxu1 %v10441_v1 }
0x18bc   :  { %9581 = vmatpush3.bf16.msra.mxu1 %v10588_v19 }
0x18bd   :  { %9588 = vmatprep.subr.bf16.mxu1 %v10441_v1 }
0x18d6   :  { %v2587_v42 = vpop.permute.xlu0 %2586 }
0x18d7   :  { %v2589_v43 = vadd.f32 %v2587_v42, %v2389_v38 }
0x18d9   :  { %10019 = vtanh.f32 %v2589_v43 }
0x18da   :  { %10021 = vpow2.f32 %v8285_v45 }
0x18e3   :  { %v10020_v3 = vpop.eup %10019 }
0x18e4   :  { %2593 = vrot.lane.b32.xlu1 %v10020_v3, %s10445_s0  ;;  %v10022_v56 = vpop.eup %10021 }
0x18e5   :  { %v2576_v46 = vadd.f32 1.0, %v10022_v56 }
0x18e7   :  { %10023 = vrcp.f32 %v2576_v46 }
0x18f1   :  { %v10024_v47 = vpop.eup %10023 }
0x18f2   :  { %v2591_v7 = vsub.f32 1.0, %v10024_v47  ;;  %v2597_v11 = vmul.f32 %v10024_v47, %v11147_v50 }
0x1956   :  { %v2594_v63 = vpop.permute.xlu1 %2593 }
0x1957   :  { %v2596_v48 = vmul.f32 %v2594_v63, %v2591_v7 }
0x1959   :  { %v11180_v49 = vadd.f32 %v2597_v11, %v2596_v48 }
0x195b   :  { %8976 = vmatmul.mubr.msk.f32.vlgmr.msra.gmra.mrb[44].mxu0 %vm375_vm2, %v11180_v49 }
0x195c   :  { %9596 = vmatpush3.bf16.msra.mxu0 %v10622_v33  ;;  %8997 = vmatprep.mubr.msk.f32.mxu0 %vm10442_vm0, %v10443_v2 }
0x195d   :  { %9597 = vmatprep.subr.bf16.mxu0 %v10441_v1 }
0x1960   :  { %9599 = vmatpush3.bf16.msra.mxu0 %v10637_v39 }
0x1961   :  { %9606 = vmatprep.subr.bf16.mxu0 %v10441_v1 }
0x198a   :  { %v2458_v6 = vpop.f32.mrb[26].mxu1 }
0x198b   :  { %v2469_v15 = vadd.f32 %v2458_v6, %v10739_v58  ;;  %v8944_v52 = vpop.f32.mrb[27].mxu1  ;;  %v2462_v22 = vadd.f32 %v2458_v6, %v2387_v44 }
0x198d   :  { %2471 = vrot.lane.b32.xlu0 %v2469_v15, %s10444_s23  ;;  %v8282_v55 = vmul.f32 -1.442695, %v2462_v22 }
0x198f   :  { %10025 = vpow2.f32 %v8282_v55 }
0x1999   :  { %v10026_v21 = vpop.eup %10025 }
0x199a   :  { %v2466_v27 = vadd.f32 1.0, %v10026_v21 }
0x199c   :  { %10027 = vrcp.f32 %v2466_v27  ;;  %v2609_v27 = vld [vmem:[#allocation3 + $0xa0] sm:$0xff] }
0x19a6   :  { %v10028_v60 = vpop.eup %10027 }
0x19a7   :  { %v2481_v34 = vsub.f32 1.0, %v10028_v60  ;;  %v2487_v18 = vmul.f32 %v10028_v60, %v11163_v40 }
0x19ff   :  { %v2472_v16 = vpop.permute.xlu0 %2471 }
0x1a00   :  { %v2474_v61 = vmul.f32 %v10028_v60, %v2472_v16 }
0x1a02   :  { %2476 = vrot.lane.b32.xlu1 %v2474_v61, %s10444_s23 }
0x1a2e   :  { %v2779_v26 = vpop.f32.mrb[44].mxu0 }
0x1a2f   :  { %v8977_v9 = vpop.f32.mrb[45].mxu0  ;;  %2784 = vrot.lane.b32.xlu1 %v2779_v26, %s10445_s0  ;;  %v2801_v14 = vadd.f32 %v2779_v26, %v10859_v41 }
0x1a74   :  { %v2477_v53 = vpop.permute.xlu1 %2476 }
0x1a75   :  { %v2479_v12 = vadd.f32 %v2477_v53, %v2387_v44 }
0x1a77   :  { %10029 = vtanh.f32 %v2479_v12 }
0x1a81   :  { %v10030_v35 = vpop.eup %10029 }
0x1a82   :  { %2483 = vrot.lane.b32.xlu0 %v10030_v35, %s10445_s0 }
0x1a86   :  { %2803 = vrot.lane.b32.xlu0 %v2801_v14, %s10446_s4 }
0x1aa1   :  { %v2785_v17 = vpop.permute.xlu1 %2784 }
0x1aa2   :  { %v2787_v59 = vadd.f32 %v2785_v17, %v2610_v23  ;;  %v2794_v46 = vadd.f32 %v2785_v17, %v2611_v4 }
0x1aa4   :  { %v8289_v29 = vmul.f32 -1.442695, %v2787_v59  ;;  %v8290_v47 = vmul.f32 -1.442695, %v2794_v46 }
0x1aa6   :  { %10031 = vpow2.f32 %v8289_v29 }
0x1ab0   :  { %v10032_v31 = vpop.eup %10031 }
0x1ab1   :  { %v2791_v32 = vadd.f32 1.0, %v10032_v31  ;;  %v2832_v31 = vld [vmem:[#allocation3 + $0x40] sm:$0xff] }
0x1ab3   :  { %10033 = vrcp.f32 %v2791_v32 }
0x1abd   :  { %v10034_v38 = vpop.eup %10033 }
0x1af4   :  { %v2484_v8 = vpop.permute.xlu0 %2483 }
0x1af5   :  { %v2486_v36 = vmul.f32 %v2484_v8, %v2481_v34 }
0x1af7   :  { %v11198_v37 = vadd.f32 %v2487_v18, %v2486_v36 }
0x1af8   :  { %v2804_v42 = vpop.permute.xlu0 %2803 }
0x1af9   :  { %v2806_v43 = vmul.f32 %v10034_v38, %v2804_v42  ;;  %2600 = vrot.lane.b32.xlu1 %v11198_v37, %s10445_s0 }
0x1afb   :  { %2808 = vrot.lane.b32.xlu0 %v2806_v43, %s10444_s23 }
0x1b6b   :  { %v11203_v3 = vpop.permute.xlu1 %2600 }
0x1b6c   :  { %8965 = vmatmul.mubr.msk.f32.vlgmr.msra.gmra.mrb[28].mxu1 %vm375_vm2, %v11203_v3 }
0x1b6d   :  { %v2809_v45 = vpop.permute.xlu0 %2808  ;;  %9590 = vmatpush3.bf16.msra.mxu1 %v10567_v10  ;;  %8986 = vmatprep.mubr.msk.f32.mxu1 %vm10442_vm0, %v10443_v2 }
0x1b6e   :  { %v2811_v40 = vadd.f32 %v2809_v45, %v2611_v4  ;;  %9591 = vmatprep.subr.bf16.mxu1 %v10441_v1 }
0x1b70   :  { %10035 = vtanh.f32 %v2811_v40 }
0x1b71   :  { %9593 = vmatpush3.bf16.msra.mxu1 %v10588_v19  ;;  %10037 = vpow2.f32 %v8290_v47  ;;  %v2833_v47 = vld [vmem:[#allocation3 + $0x48] sm:$0xff] }
0x1b72   :  { %9600 = vmatprep.subr.bf16.mxu1 %v10441_v1 }
0x1b7a   :  { %v10036_v56 = vpop.eup %10035 }
0x1b7b   :  { %2815 = vrot.lane.b32.xlu1 %v10036_v56, %s10445_s0  ;;  %v10038_v7 = vpop.eup %10037 }
0x1b7c   :  { %v2798_v63 = vadd.f32 1.0, %v10038_v7 }
0x1b7e   :  { %10039 = vrcp.f32 %v2798_v63 }
0x1b88   :  { %v10040_v11 = vpop.eup %10039 }
0x1b89   :  { %v2813_v48 = vsub.f32 1.0, %v10040_v11  ;;  %v2819_v15 = vmul.f32 %v10040_v11, %v11180_v49 }
0x1bed   :  { %v2816_v6 = vpop.permute.xlu1 %2815 }
0x1bee   :  { %v2818_v52 = vmul.f32 %v2816_v6, %v2813_v48 }
0x1bf0   :  { %v11215_v44 = vadd.f32 %v2819_v15, %v2818_v52 }
0x1bf2   :  { %8998 = vmatmul.mubr.msk.f32.vlgmr.msra.gmra.mrb[46].mxu0 %vm375_vm2, %v11215_v44 }
0x1bf3   :  { %9608 = vmatpush3.bf16.msra.mxu0 %v10622_v33  ;;  %9019 = vmatprep.mubr.msk.f32.mxu0 %vm10442_vm0, %v10443_v2 }
0x1bf4   :  { %9609 = vmatprep.subr.bf16.mxu0 %v10441_v1 }
0x1bf7   :  { %9611 = vmatpush3.bf16.msra.mxu0 %v10637_v39 }
0x1bf8   :  { %9618 = vmatprep.subr.bf16.mxu0 %v10441_v1 }
0x1c3f   :  { %v2680_v22 = vpop.f32.mrb[28].mxu1 }
0x1c40   :  { %v2691_v55 = vadd.f32 %v2680_v22, %v10739_v58  ;;  %v8966_v21 = vpop.f32.mrb[29].mxu1  ;;  %v2684_v60 = vadd.f32 %v2680_v22, %v2609_v27 }
0x1c42   :  { %2693 = vrot.lane.b32.xlu0 %v2691_v55, %s10444_s23  ;;  %v8287_v16 = vmul.f32 -1.442695, %v2684_v60 }
0x1c44   :  { %10041 = vpow2.f32 %v8287_v16 }
0x1c4e   :  { %v10042_v61 = vpop.eup %10041 }
0x1c4f   :  { %v2688_v26 = vadd.f32 1.0, %v10042_v61 }
0x1c51   :  { %10043 = vrcp.f32 %v2688_v26 }
0x1c5b   :  { %v10044_v9 = vpop.eup %10043 }
0x1c5c   :  { %v2703_v4 = vsub.f32 1.0, %v10044_v9  ;;  %v2709_v40 = vmul.f32 %v10044_v9, %v11198_v37 }
0x1cb4   :  { %v2694_v53 = vpop.permute.xlu0 %2693 }
0x1cb5   :  { %v2696_v12 = vmul.f32 %v10044_v9, %v2694_v53 }
0x1cb7   :  { %2698 = vrot.lane.b32.xlu1 %v2696_v12, %s10444_s23 }
0x1cc5   :  { %v3001_v35 = vpop.f32.mrb[46].mxu0 }
0x1cc6   :  { %v8999_v14 = vpop.f32.mrb[47].mxu0  ;;  %3006 = vrot.lane.b32.xlu0 %v3001_v35, %s10445_s0  ;;  %v3023_v17 = vadd.f32 %v3001_v35, %v10859_v41  ;;  %v2831_v35 = vld [vmem:[#allocation3 + $0xb0] sm:$0xff] }
0x1cca   :  { %3025 = vrot.lane.b32.xlu0 %v3023_v17, %s10446_s4 }
0x1d29   :  { %v2699_v23 = vpop.permute.xlu1 %2698 }
0x1d2a   :  { %v2701_v59 = vadd.f32 %v2699_v23, %v2609_v27 }
0x1d2c   :  { %10045 = vtanh.f32 %v2701_v59 }
0x1d36   :  { %v10046_v29 = vpop.eup %10045 }
0x1d37   :  { %2705 = vrot.lane.b32.xlu1 %v10046_v29, %s10445_s0 }
0x1d38   :  { %v3007_v32 = vpop.permute.xlu0 %3006 }
0x1d39   :  { %v3009_v34 = vadd.f32 %v3007_v32, %v2832_v31  ;;  %v3016_v6 = vadd.f32 %v3007_v32, %v2833_v47 }
0x1d3b   :  { %v8294_v8 = vmul.f32 -1.442695, %v3009_v34  ;;  %v8295_v37 = vmul.f32 -1.442695, %v3016_v6 }
0x1d3c   :  { %v3026_v42 = vpop.permute.xlu0 %3025 }
0x1d3d   :  { %10047 = vpow2.f32 %v8294_v8 }
0x1d47   :  { %v10048_v18 = vpop.eup %10047 }
0x1d48   :  { %v3013_v36 = vadd.f32 1.0, %v10048_v18  ;;  %v3054_v18 = vld [vmem:[#allocation3 + $0x30] sm:$0xff] }
0x1d4a   :  { %10049 = vrcp.f32 %v3013_v36 }
0x1d54   :  { %v10050_v38 = vpop.eup %10049 }
0x1d55   :  { %v3028_v43 = vmul.f32 %v10050_v38, %v3026_v42 }
0x1d57   :  { %3030 = vrot.lane.b32.xlu0 %v3028_v43, %s10444_s23 }
0x1da9   :  { %v2706_v45 = vpop.permute.xlu1 %2705 }
0x1daa   :  { %v2708_v56 = vmul.f32 %v2706_v45, %v2703_v4 }
0x1dac   :  { %v11234_v46 = vadd.f32 %v2709_v40, %v2708_v56 }
0x1dae   :  { %2822 = vrot.lane.b32.xlu1 %v11234_v46, %s10445_s0 }
0x1dc9   :  { %v3031_v7 = vpop.permute.xlu0 %3030 }
0x1dca   :  { %v3033_v63 = vadd.f32 %v3031_v7, %v2833_v47 }
0x1dcc   :  { %10051 = vtanh.f32 %v3033_v63  ;;  %v3055_v63 = vld [vmem:[#allocation3 + $0x38] sm:$0xff] }
0x1dcd   :  { %10053 = vpow2.f32 %v8295_v37 }
0x1dd6   :  { %v10052_v11 = vpop.eup %10051 }
0x1dd7   :  { %3037 = vrot.lane.b32.xlu1 %v10052_v11, %s10445_s0  ;;  %v10054_v15 = vpop.eup %10053 }
0x1dd8   :  { %v3020_v52 = vadd.f32 1.0, %v10054_v15 }
0x1dda   :  { %10055 = vrcp.f32 %v3020_v52 }
0x1de4   :  { %v10056_v22 = vpop.eup %10055 }
0x1de5   :  { %v3035_v55 = vsub.f32 1.0, %v10056_v22  ;;  %v3041_v27 = vmul.f32 %v10056_v22, %v11215_v44 }
0x1e20   :  { %v11239_v48 = vpop.permute.xlu1 %2822 }
0x1e21   :  { %8987 = vmatmul.mubr.msk.f32.vlgmr.msra.gmra.mrb[30].mxu1 %vm375_vm2, %v11239_v48 }
0x1e22   :  { %9602 = vmatpush3.bf16.msra.mxu1 %v10567_v10  ;;  %9008 = vmatprep.mubr.msk.f32.mxu1 %vm10442_vm0, %v10443_v2 }
0x1e23   :  { %9603 = vmatprep.subr.bf16.mxu1 %v10441_v1 }
0x1e26   :  { %9605 = vmatpush3.bf16.msra.mxu1 %v10588_v19 }
0x1e27   :  { %9612 = vmatprep.subr.bf16.mxu1 %v10441_v1 }
0x1e49   :  { %v3038_v21 = vpop.permute.xlu1 %3037 }
0x1e4a   :  { %v3040_v60 = vmul.f32 %v3038_v21, %v3035_v55 }
0x1e4c   :  { %v11250_v16 = vadd.f32 %v3041_v27, %v3040_v60 }
0x1e4e   :  { %9020 = vmatmul.mubr.msk.f32.vlgmr.msra.gmra.mrb[48].mxu0 %vm375_vm2, %v11250_v16 }
0x1e4f   :  { %9620 = vmatpush3.bf16.msra.mxu0 %v10622_v33  ;;  %9041 = vmatprep.mubr.msk.f32.mxu0 %vm10442_vm0, %v10443_v2 }
0x1e50   :  { %9621 = vmatprep.subr.bf16.mxu0 %v10441_v1 }
0x1e53   :  { %9623 = vmatpush3.bf16.msra.mxu0 %v10637_v39 }
0x1e54   :  { %9630 = vmatprep.subr.bf16.mxu0 %v10441_v1 }
0x1ef4   :  { %v2902_v61 = vpop.f32.mrb[30].mxu1 }
0x1ef5   :  { %v2913_v26 = vadd.f32 %v2902_v61, %v10739_v58  ;;  %v8988_v9 = vpop.f32.mrb[31].mxu1  ;;  %v2906_v14 = vadd.f32 %v2902_v61, %v2831_v35 }
0x1ef7   :  { %2915 = vrot.lane.b32.xlu0 %v2913_v26, %s10444_s23  ;;  %v8292_v17 = vmul.f32 -1.442695, %v2906_v14 }
0x1ef9   :  { %10057 = vpow2.f32 %v8292_v17 }
0x1f03   :  { %v10058_v23 = vpop.eup %10057 }
0x1f04   :  { %v2910_v59 = vadd.f32 1.0, %v10058_v23 }
0x1f06   :  { %10059 = vrcp.f32 %v2910_v59 }
0x1f10   :  { %v10060_v29 = vpop.eup %10059 }
0x1f11   :  { %v2925_v37 = vsub.f32 1.0, %v10060_v29  ;;  %v2931_v52 = vmul.f32 %v10060_v29, %v11234_v46 }
0x1f21   :  { %v3223_v53 = vpop.f32.mrb[48].mxu0 }
0x1f22   :  { %v9021_v12 = vpop.f32.mrb[49].mxu0  ;;  %3228 = vrot.lane.b32.xlu0 %v3223_v53, %s10445_s0  ;;  %v3245_v34 = vadd.f32 %v3223_v53, %v10859_v41 }
0x1f69   :  { %v2916_v31 = vpop.permute.xlu0 %2915 }
0x1f6a   :  { %v2918_v32 = vmul.f32 %v10060_v29, %v2916_v31 }
0x1f6c   :  { %2920 = vrot.lane.b32.xlu1 %v2918_v32, %s10444_s23 }
0x1f70   :  { %3247 = vrot.lane.b32.xlu1 %v3245_v34, %s10446_s4 }
0x1f94   :  { %v3229_v8 = vpop.permute.xlu0 %3228 }
0x1f95   :  { %v3231_v36 = vadd.f32 %v3229_v8, %v3054_v18  ;;  %v3238_v27 = vadd.f32 %v3229_v8, %v3055_v63  ;;  %v3053_v8 = vld [vmem:[#allocation3 + $0xc0] sm:$0xff] }
0x1f97   :  { %v8299_v38 = vmul.f32 -1.442695, %v3231_v36  ;;  %v8300_v60 = vmul.f32 -1.442695, %v3238_v27  ;;  %v3277_v27 = vld [vmem:[#allocation3 + $0x28] sm:$0xff] }
0x1f99   :  { %10061 = vpow2.f32 %v8299_v38 }
0x1fa3   :  { %v10062_v42 = vpop.eup %10061 }
0x1fa4   :  { %v3235_v43 = vadd.f32 1.0, %v10062_v42 }
0x1fa6   :  { %10063 = vrcp.f32 %v3235_v43 }
0x1fb0   :  { %v10064_v40 = vpop.eup %10063 }
0x1fde   :  { %v2921_v4 = vpop.permute.xlu1 %2920 }
0x1fdf   :  { %v2923_v45 = vadd.f32 %v2921_v4, %v2831_v35 }
0x1fe1   :  { %10065 = vtanh.f32 %v2923_v45 }
0x1fe2   :  { %v3248_v56 = vpop.permute.xlu1 %3247 }
0x1fe3   :  { %v3250_v47 = vmul.f32 %v10064_v40, %v3248_v56  ;;  %v3276_v40 = vld [vmem:[#allocation3 + $0x20] sm:$0xff] }
0x1fe5   :  { %3252 = vrot.lane.b32.xlu1 %v3250_v47, %s10444_s23 }
0x1feb   :  { %v10066_v7 = vpop.eup %10065 }
0x1fec   :  { %2927 = vrot.lane.b32.xlu0 %v10066_v7, %s10445_s0 }
0x2057   :  { %v3253_v11 = vpop.permute.xlu1 %3252 }
0x2058   :  { %v3255_v6 = vadd.f32 %v3253_v11, %v3055_v63 }
0x205a   :  { %10067 = vtanh.f32 %v3255_v6 }
0x205b   :  { %10069 = vpow2.f32 %v8300_v60 }
0x205e   :  { %v2928_v15 = vpop.permute.xlu0 %2927 }
0x205f   :  { %v2930_v22 = vmul.f32 %v2928_v15, %v2925_v37 }
0x2061   :  { %v11269_v55 = vadd.f32 %v2931_v52, %v2930_v22 }
0x2063   :  { %3044 = vrot.lane.b32.xlu0 %v11269_v55, %s10445_s0 }
0x2064   :  { %v10068_v21 = vpop.eup %10067 }
0x2065   :  { %3259 = vrot.lane.b32.xlu1 %v10068_v21, %s10445_s0  ;;  %v10070_v61 = vpop.eup %10069 }
0x2066   :  { %v3242_v26 = vadd.f32 1.0, %v10070_v61 }
0x2068   :  { %10071 = vrcp.f32 %v3242_v26 }
0x2072   :  { %v10072_v9 = vpop.eup %10071 }
0x2073   :  { %v3257_v46 = vsub.f32 1.0, %v10072_v9  ;;  %v3263_v35 = vmul.f32 %v10072_v9, %v11250_v16 }
0x20d5   :  { %v11274_v53 = vpop.permute.xlu0 %3044 }
0x20d6   :  { %9009 = vmatmul.mubr.msk.f32.vlgmr.msra.gmra.mrb[32].mxu1 %vm375_vm2, %v11274_v53 }
0x20d7   :  { %v3260_v12 = vpop.permute.xlu1 %3259  ;;  %9614 = vmatpush3.bf16.msra.mxu1 %v10567_v10  ;;  %9030 = vmatprep.mubr.msk.f32.mxu1 %vm10442_vm0, %v10443_v2 }
0x20d8   :  { %v3262_v14 = vmul.f32 %v3260_v12, %v3257_v46  ;;  %9615 = vmatprep.subr.bf16.mxu1 %v10441_v1 }
0x20da   :  { %v11283_v17 = vadd.f32 %v3263_v35, %v3262_v14 }
0x20db   :  { %9617 = vmatpush3.bf16.msra.mxu1 %v10588_v19 }
0x20dc   :  { %9042 = vmatmul.mubr.msk.f32.vlgmr.msra.gmra.mrb[50].mxu0 %vm375_vm2, %v11283_v17  ;;  %9624 = vmatprep.subr.bf16.mxu1 %v10441_v1 }
0x20dd   :  { %9632 = vmatpush3.bf16.msra.mxu0 %v10622_v33  ;;  %9063 = vmatprep.mubr.msk.f32.mxu0 %vm10442_vm0, %v10443_v2 }
0x20de   :  { %9633 = vmatprep.subr.bf16.mxu0 %v10441_v1 }
0x20e1   :  { %9635 = vmatpush3.bf16.msra.mxu0 %v10637_v39 }
0x20e2   :  { %9642 = vmatprep.subr.bf16.mxu0 %v10441_v1 }
0x21a9   :  { %v3124_v23 = vpop.f32.mrb[32].mxu1 }
0x21aa   :  { %v3135_v59 = vadd.f32 %v3124_v23, %v10739_v58  ;;  %v9010_v29 = vpop.f32.mrb[33].mxu1  ;;  %v3128_v18 = vadd.f32 %v3124_v23, %v3053_v8 }
0x21ac   :  { %3137 = vrot.lane.b32.xlu0 %v3135_v59, %s10444_s23  ;;  %v8297_v36 = vmul.f32 -1.442695, %v3128_v18 }
0x21ae   :  { %10073 = vpow2.f32 %v8297_v36 }
0x21af   :  { %v3445_v31 = vpop.f32.mrb[50].mxu0 }
0x21b0   :  { %3450 = vrot.lane.b32.xlu1 %v3445_v31, %s10445_s0  ;;  %v9043_v32 = vpop.f32.mrb[51].mxu0  ;;  %v3467_v34 = vadd.f32 %v3445_v31, %v10859_v41 }
0x21b4   :  { %3469 = vrot.lane.b32.xlu1 %v3467_v34, %s10446_s4 }
0x21b8   :  { %v10074_v38 = vpop.eup %10073 }
0x21b9   :  { %v3132_v42 = vadd.f32 1.0, %v10074_v38 }
0x21bb   :  { %10075 = vrcp.f32 %v3132_v42 }
0x21c5   :  { %v10076_v43 = vpop.eup %10075 }
0x21c6   :  { %v3147_v12 = vsub.f32 1.0, %v10076_v43  ;;  %v3153_v14 = vmul.f32 %v10076_v43, %v11269_v55 }
0x221e   :  { %v3138_v4 = vpop.permute.xlu0 %3137 }
0x221f   :  { %v3140_v45 = vmul.f32 %v10076_v43, %v3138_v4 }
0x2221   :  { %3142 = vrot.lane.b32.xlu0 %v3140_v45, %s10444_s23 }
0x2222   :  { %v3451_v56 = vpop.permute.xlu1 %3450 }
0x2223   :  { %v3453_v47 = vadd.f32 %v3451_v56, %v3276_v40  ;;  %v3460_v9 = vadd.f32 %v3451_v56, %v3277_v27  ;;  %v3275_v40 = vld [vmem:[#allocation3 + $0xd0] sm:$0xff] }
0x2225   :  { %v8304_v7 = vmul.f32 -1.442695, %v3453_v47  ;;  %v8305_v46 = vmul.f32 -1.442695, %v3460_v9 }
0x2226   :  { %v3470_v37 = vpop.permute.xlu1 %3469 }
0x2227   :  { %10077 = vpow2.f32 %v8304_v7  ;;  %v3498_v7 = vld [vmem:[#allocation3 + $0x10] sm:$0xff] }
0x2231   :  { %v10078_v63 = vpop.eup %10077 }
0x2232   :  { %v3457_v11 = vadd.f32 1.0, %v10078_v63 }
0x2234   :  { %10079 = vrcp.f32 %v3457_v11 }
0x223e   :  { %v10080_v6 = vpop.eup %10079 }
0x223f   :  { %v3472_v15 = vmul.f32 %v10080_v6, %v3470_v37 }
0x2241   :  { %3474 = vrot.lane.b32.xlu1 %v3472_v15, %s10444_s23 }
0x2293   :  { %v3143_v52 = vpop.permute.xlu0 %3142 }
0x2294   :  { %v3145_v22 = vadd.f32 %v3143_v52, %v3053_v8 }
0x2296   :  { %10081 = vtanh.f32 %v3145_v22 }
0x22a0   :  { %v10082_v21 = vpop.eup %10081 }
0x22a1   :  { %3149 = vrot.lane.b32.xlu0 %v10082_v21, %s10445_s0 }
0x22b3   :  { %v3475_v60 = vpop.permute.xlu1 %3474 }
0x22b4   :  { %v3477_v61 = vadd.f32 %v3475_v60, %v3277_v27 }
0x22b6   :  { %10083 = vtanh.f32 %v3477_v61 }
0x22b7   :  { %10085 = vpow2.f32 %v8305_v46 }
0x22c0   :  { %v10084_v26 = vpop.eup %10083 }
0x22c1   :  { %3481 = vrot.lane.b32.xlu1 %v10084_v26, %s10445_s0  ;;  %v10086_v29 = vpop.eup %10085 }
0x22c2   :  { %v3464_v31 = vadd.f32 1.0, %v10086_v29 }
0x22c4   :  { %10087 = vrcp.f32 %v3464_v31 }
0x22ce   :  { %v10088_v32 = vpop.eup %10087 }
0x22cf   :  { %v3479_v34 = vsub.f32 1.0, %v10088_v32  ;;  %v3485_v18 = vmul.f32 %v10088_v32, %v11283_v17 }
0x2313   :  { %v3150_v35 = vpop.permute.xlu0 %3149 }
0x2314   :  { %v3152_v23 = vmul.f32 %v3150_v35, %v3147_v12  ;;  %v3499_v35 = vld [vmem:[#allocation3 + $0x18] sm:$0xff] }
0x2316   :  { %v11305_v59 = vadd.f32 %v3153_v14, %v3152_v23 }
0x2318   :  { %3266 = vrot.lane.b32.xlu0 %v11305_v59, %s10445_s0 }
0x2333   :  { %v3482_v8 = vpop.permute.xlu1 %3481 }
0x2334   :  { %v3484_v36 = vmul.f32 %v3482_v8, %v3479_v34 }
0x2336   :  { %v11310_v38 = vadd.f32 %v3485_v18, %v3484_v36 }
0x2338   :  { %9064 = vmatmul.mubr.msk.f32.vlgmr.msra.gmra.mrb[52].mxu0 %vm375_vm2, %v11310_v38 }
0x2339   :  { %9644 = vmatpush3.bf16.msra.mxu0 %v10622_v33  ;;  %9085 = vmatprep.mubr.msk.f32.mxu0 %vm10442_vm0, %v10443_v2 }
0x233a   :  { %9645 = vmatprep.subr.bf16.mxu0 %v10441_v1 }
0x233d   :  { %9647 = vmatpush3.bf16.msra.mxu0 %v10637_v39 }
0x233e   :  { %9664 = vmatprep.subr.bf16.mxu0 %v10441_v1 }
0x238a   :  { %v11320_v55 = vpop.permute.xlu0 %3266 }
0x238b   :  { %9031 = vmatmul.mubr.msk.f32.vlgmr.msra.gmra.mrb[34].mxu1 %vm375_vm2, %v11320_v55 }
0x238c   :  { %9626 = vmatpush3.bf16.msra.mxu1 %v10567_v10  ;;  %9052 = vmatprep.mubr.msk.f32.mxu1 %vm10442_vm0, %v10443_v2 }
0x238d   :  { %9627 = vmatprep.subr.bf16.mxu1 %v10441_v1 }
0x2390   :  { %9629 = vmatpush3.bf16.msra.mxu1 %v10588_v19 }
0x2391   :  { %9636 = vmatprep.subr.bf16.mxu1 %v10441_v1 }
0x240b   :  { %v3667_v33 = vpop.f32.mrb[52].mxu0 }
0x240c   :  { %3672 = vrot.lane.b32.xlu1 %v3667_v33, %s10445_s0  ;;  %v9065_v39 = vpop.f32.mrb[53].mxu0  ;;  %v3689_v45 = vadd.f32 %v3667_v33, %v10859_v41 }
0x245e   :  { %v3346_v42 = vpop.f32.mrb[34].mxu1 }
0x245f   :  { %v3357_v43 = vadd.f32 %v3346_v42, %v10739_v58  ;;  %v9032_v4 = vpop.f32.mrb[35].mxu1  ;;  %v3350_v56 = vadd.f32 %v3346_v42, %v3275_v40 }
0x2461   :  { %3359 = vrot.lane.b32.xlu0 %v3357_v43, %s10444_s23  ;;  %v8302_v63 = vmul.f32 -1.442695, %v3350_v56 }
0x2463   :  { %10089 = vpow2.f32 %v8302_v63 }
0x2465   :  { %3691 = vrot.lane.b32.xlu0 %v3689_v45, %s10446_s4 }
0x246d   :  { %v10090_v37 = vpop.eup %10089 }
0x246e   :  { %v3354_v15 = vadd.f32 1.0, %v10090_v37 }
0x247e   :  { %v3673_v47 = vpop.permute.xlu1 %3672 }
0x247f   :  { %v3675_v11 = vadd.f32 %v3673_v47, %v3498_v7  ;;  %v3682_v32 = vadd.f32 %v3673_v47, %v3499_v35 }
0x2481   :  { %v8309_v6 = vmul.f32 -1.442695, %v3675_v11  ;;  %v8310_v34 = vmul.f32 -1.442695, %v3682_v32  ;;  %v3721_v32 = vld [vmem:[#allocation3 + $0x8] sm:$0xff] }
0x2483   :  { %10091 = vpow2.f32 %v8309_v6 }
0x2484   :  { %10093 = vrcp.f32 %v3354_v15 }
0x248d   :  { %v10092_v52 = vpop.eup %10091 }
0x248e   :  { %v3679_v22 = vadd.f32 1.0, %v10092_v52  ;;  %v10094_v21 = vpop.eup %10093 }
0x248f   :  { %v3369_v36 = vsub.f32 1.0, %v10094_v21  ;;  %v3375_v42 = vmul.f32 %v10094_v21, %v11305_v59 }
0x2490   :  { %10095 = vrcp.f32 %v3679_v22 }
0x249a   :  { %v10096_v61 = vpop.eup %10095 }
0x24d3   :  { %v3360_v27 = vpop.permute.xlu0 %3359 }
0x24d4   :  { %v3362_v60 = vmul.f32 %v10094_v21, %v3360_v27 }
0x24d6   :  { %3364 = vrot.lane.b32.xlu1 %v3362_v60, %s10444_s23 }
0x24d7   :  { %v3692_v26 = vpop.permute.xlu0 %3691 }
0x24d8   :  { %v3694_v9 = vmul.f32 %v10096_v61, %v3692_v26 }
0x24da   :  { %3696 = vrot.lane.b32.xlu0 %v3694_v9, %s10444_s23 }
0x2548   :  { %v3365_v46 = vpop.permute.xlu1 %3364 }
0x2549   :  { %v3367_v12 = vadd.f32 %v3365_v46, %v3275_v40 }
0x254b   :  { %10097 = vtanh.f32 %v3367_v12 }
0x254c   :  { %v3697_v14 = vpop.permute.xlu0 %3696 }
0x254d   :  { %v3699_v23 = vadd.f32 %v3697_v14, %v3499_v35 }
0x254f   :  { %10099 = vtanh.f32 %v3699_v23 }
0x2550   :  { %10101 = vpow2.f32 %v8310_v34 }
0x2555   :  { %v10098_v29 = vpop.eup %10097 }
0x2556   :  { %3371 = vrot.lane.b32.xlu1 %v10098_v29, %s10445_s0 }
0x2559   :  { %v10100_v31 = vpop.eup %10099 }
0x255a   :  { %3703 = vrot.lane.b32.xlu0 %v10100_v31, %s10445_s0  ;;  %v10102_v8 = vpop.eup %10101 }
0x255b   :  { %v3686_v18 = vadd.f32 1.0, %v10102_v8 }
0x255d   :  { %10103 = vrcp.f32 %v3686_v18 }
0x2567   :  { %v10104_v33 = vpop.eup %10103 }
0x2568   :  { %v3701_v45 = vsub.f32 1.0, %v10104_v33  ;;  %v3707_v56 = vmul.f32 %v10104_v33, %v11310_v38 }
0x25c8   :  { %v3372_v39 = vpop.permute.xlu1 %3371 }
0x25c9   :  { %v3374_v43 = vmul.f32 %v3372_v39, %v3369_v36 }
0x25cb   :  { %v11340_v4 = vadd.f32 %v3375_v42, %v3374_v43 }
0x25cc   :  { %v3704_v40 = vpop.permute.xlu0 %3703 }
0x25cd   :  { %v3706_v7 = vmul.f32 %v3704_v40, %v3701_v45  ;;  %3488 = vrot.lane.b32.xlu1 %v11340_v4, %s10445_s0 }
0x25cf   :  { %v11345_v47 = vadd.f32 %v3707_v56, %v3706_v7  ;;  %v4226_v56 = vld [vmem:[#allocation7] sm:$0xff]  ;;  %v4227_v7 = vld [vmem:[#allocation7 + $0x8] sm:$0xff] }
0x25d1   :  { %9086 = vmatmul.mubr.msk.f32.vlgmr.msra.gmra.mrb[54].mxu0 %vm375_vm2, %v11345_v47 }
0x25d2   :  { %9096 = vmatprep.mubr.msk.f32.mxu0 %vm10442_vm0, %v10443_v2 }
0x263f   :  { %v11351_v59 = vpop.permute.xlu1 %3488 }
0x2640   :  { %9053 = vmatmul.mubr.msk.f32.vlgmr.msra.gmra.mrb[36].mxu1 %vm375_vm2, %v11351_v59 }
0x2641   :  { %9638 = vmatpush3.bf16.msra.mxu1 %v10567_v10  ;;  %9074 = vmatprep.mubr.msk.f32.mxu1 %vm10442_vm0, %v10443_v2  ;;  %v3720_v10 = vld [vmem:[#allocation3] sm:$0xff] }
0x2642   :  { %9639 = vmatprep.subr.bf16.mxu1 %v10441_v1 }
0x2645   :  { %9641 = vmatpush3.bf16.msra.mxu1 %v10588_v19 }
0x26a4   :  { %v3889_v63 = vpop.f32.mrb[54].mxu0 }
0x26a5   :  { %3894 = vrot.lane.b32.xlu0 %v3889_v63, %s10445_s0  ;;  %v9087_v11 = vpop.f32.mrb[55].mxu0  ;;  %v3911_v6 = vadd.f32 %v3889_v63, %v10859_v41  ;;  %v3497_v41 = vld [vmem:[#allocation3 + $0xe0] sm:$0xff]  ;;  %v4228_v63 = vld [vmem:[#allocation7 + $0x10] sm:$0xff] }
0x26a6   :  { %v11369_v11 = vpack.c.bf16 %v4227_v7, %v4226_v56  ;;  %v3970_v56 = vld [vmem:[#allocation5 + $0x68] sm:$0xff]  ;;  %v3972_v7 = vld [vmem:[#allocation5 + $0x78] sm:$0xff] }
0x26a8   :  { %9666 = vmatpush3.bf16.msra.mxu0 %v11369_v11 }
0x26a9   :  { %3913 = vrot.lane.b32.xlu0 %v3911_v6, %s10446_s4  ;;  %v4229_v6 = vld [vmem:[#allocation7 + $0x18] sm:$0xff]  ;;  %9667 = vmatprep.subr.bf16.mxu0 %v10441_v1 }
0x2713   :  { %v3568_v37 = vpop.f32.mrb[36].mxu1 }
0x2714   :  { %v3579_v15 = vadd.f32 %v3568_v37, %v10739_v58  ;;  %v9054_v52 = vpop.f32.mrb[37].mxu1  ;;  %v3572_v46 = vadd.f32 %v3568_v37, %v3497_v41  ;;  %v3958_v37 = vld [vmem:[#allocation5 + $0x8] sm:$0xff] }
0x2716   :  { %3581 = vrot.lane.b32.xlu1 %v3579_v15, %s10444_s23  ;;  %v8307_v12 = vmul.f32 -1.442695, %v3572_v46  ;;  %v3960_v15 = vld [vmem:[#allocation5 + $0x18] sm:$0xff] }
0x2717   :  { %v3895_v22 = vpop.permute.xlu0 %3894  ;;  %v9648_v52 = vpack.c.bf16 %v3960_v15, %v3958_v37  ;;  %v3969_v37 = vld [vmem:[#allocation5 + $0x60] sm:$0xff]  ;;  %v3971_v15 = vld [vmem:[#allocation5 + $0x70] sm:$0xff] }
0x2718   :  { %v3897_v21 = vadd.f32 %v3895_v22, %v3720_v10  ;;  %v3904_v39 = vadd.f32 %v3895_v22, %v3721_v32  ;;  %v11372_v10 = vpack.c.bf16 %v4229_v6, %v4228_v63  ;;  %v9660_v6 = vpack.c.bf16 %v3972_v7, %v3970_v56 }
0x2719   :  { %9649 = vmatprep.subr.bf16.mxu1 %v9648_v52 }
0x271a   :  { %v8314_v27 = vmul.f32 -1.442695, %v3897_v21  ;;  %v8315_v42 = vmul.f32 -1.442695, %v3904_v39  ;;  %9669 = vmatpush3.bf16.msra.mxu0 %v11372_v10  ;;  %v3968_v39 = vld [vmem:[#allocation5 + $0x58] sm:$0xff] }
0x271b   :  { %v3914_v26 = vpop.permute.xlu0 %3913  ;;  %9670 = vmatprep.subr.bf16.mxu0 %v10441_v1 }
0x271c   :  { %10105 = vpow2.f32 %v8314_v27 }
0x271d   :  { %9097 = vmatmul.mubr.f32.vlgmr.msra.gmra.mrb[56].mxu0 %v10443_v2 }
0x271e   :  { %9107 = vmatprep.mubr.msk.f32.mxu0 %vm10442_vm0, %v10443_v2 }
0x2726   :  { %v10106_v19 = vpop.eup %10105 }
0x2727   :  { %v3901_v60 = vadd.f32 1.0, %v10106_v19 }
0x2729   :  { %10107 = vrcp.f32 %v3901_v60 }
0x272a   :  { %10109 = vpow2.f32 %v8307_v12 }
0x2733   :  { %v10108_v61 = vpop.eup %10107 }
0x2734   :  { %v3916_v9 = vmul.f32 %v10108_v61, %v3914_v26  ;;  %v10110_v35 = vpop.eup %10109 }
0x2735   :  { %v3576_v14 = vadd.f32 1.0, %v10110_v35  ;;  %v8334_v35 = vld [vmem:[%s12322_s8] ss:$0 sm:$0xff] }
0x2736   :  { %3918 = vrot.lane.b32.xlu0 %v3916_v9, %s10444_s23 }
0x2737   :  { %10111 = vrcp.f32 %v3576_v14 }
0x2741   :  { %v10112_v23 = vpop.eup %10111 }
0x2742   :  { %v3591_v26 = vsub.f32 1.0, %v10112_v23 }
0x2788   :  { %v3582_v29 = vpop.permute.xlu1 %3581 }
0x2789   :  { %v3584_v31 = vmul.f32 %v10112_v23, %v3582_v29  ;;  %v3957_v29 = vld [vmem:[#allocation5] sm:$0xff] }
0x278b   :  { %3586 = vrot.lane.b32.xlu1 %v3584_v31, %s10444_s23  ;;  %v3959_v31 = vld [vmem:[#allocation5 + $0x10] sm:$0xff] }
0x27a8   :  { %v3919_v34 = vpop.permute.xlu0 %3918 }
0x27a9   :  { %v3921_v8 = vadd.f32 %v3919_v34, %v3721_v32  ;;  %v3962_v32 = vld [vmem:[#allocation5 + $0x28] sm:$0xff] }
0x27ab   :  { %10113 = vtanh.f32 %v3921_v8  ;;  %v3961_v8 = vld [vmem:[#allocation5 + $0x20] sm:$0xff] }
0x27b5   :  { %v10114_v18 = vpop.eup %10113 }
0x27b6   :  { %3925 = vrot.lane.b32.xlu0 %v10114_v18, %s10445_s0  ;;  %v3963_v18 = vld [vmem:[#allocation5 + $0x30] sm:$0xff] }
0x27fd   :  { %v3587_v36 = vpop.permute.xlu1 %3586 }
0x27fe   :  { %v3589_v33 = vadd.f32 %v3587_v36, %v3497_v41  ;;  %v3597_v41 = vmul.f32 %v10112_v23, %v11340_v4  ;;  %v3964_v4 = vld [vmem:[#allocation5 + $0x38] sm:$0xff]  ;;  %v9650_v23 = vpack.c.bf16 %v3959_v31, %v3957_v29 }
0x27ff   :  { %v9652_v34 = vpack.c.bf16 %v3964_v4, %v3962_v32 }
0x2800   :  { %10115 = vtanh.f32 %v3589_v33  ;;  %v3966_v33 = vld [vmem:[#allocation5 + $0x48] sm:$0xff] }
0x2801   :  { %10117 = vpow2.f32 %v8315_v42  ;;  %v9654_v42 = vpack.c.bf16 %v3963_v18, %v3961_v8 }
0x280a   :  { %v10116_v43 = vpop.eup %10115 }
0x280b   :  { %3593 = vrot.lane.b32.xlu1 %v10116_v43, %s10445_s0  ;;  %v10118_v45 = vpop.eup %10117  ;;  %v9656_v43 = vpack.c.bf16 %v3968_v39, %v3966_v33  ;;  %v3719_v39 = vld [vmem:[#allocation3 + $0xf0] sm:$0xff] }
0x280c   :  { %v3908_v40 = vadd.f32 1.0, %v10118_v45  ;;  %v3965_v45 = vld [vmem:[#allocation5 + $0x40] sm:$0xff] }
0x280e   :  { %10119 = vrcp.f32 %v3908_v40  ;;  %v3967_v40 = vld [vmem:[#allocation5 + $0x50] sm:$0xff] }
0x280f   :  { %v9658_v63 = vpack.c.bf16 %v3967_v40, %v3965_v45 }
0x2818   :  { %v10120_v22 = vpop.eup %10119 }
0x2819   :  { %v3923_v21 = vsub.f32 1.0, %v10120_v22  ;;  %v3929_v19 = vmul.f32 %v10120_v22, %v11345_v47  ;;  %v4307_v22 = vpop.f32.mrb[56].mxu0 }
0x2828   :  { %v3926_v27 = vpop.permute.xlu0 %3925 }
0x2829   :  { %v3928_v60 = vmul.f32 %v3926_v27, %v3923_v21  ;;  %v9662_v21 = vpack.c.bf16 %v3971_v15, %v3969_v37  ;;  %v9098_v27 = vpop.f32.mrb[57].mxu0 }
0x282b   :  { %v3930_v61 = vadd.f32 %v3929_v19, %v3928_v60 }
0x282d   :  { %3937 = vrot.lane.b32.xlu0 %v3930_v61, %s10446_s4 }
0x287d   :  { %v3594_v9 = vpop.permute.xlu1 %3593 }
0x287e   :  { %v3596_v46 = vmul.f32 %v3594_v9, %v3591_v26 }
0x2880   :  { %v11383_v12 = vadd.f32 %v3597_v41, %v3596_v46  ;;  %v3973_v41 = vld [vmem:[%s12320_s6] sm:$0x3] }
0x2881   :  { %v11410_v46 = vrot.slane %v3973_v41, %v10743_v62 }
0x2882   :  { %3710 = vrot.lane.b32.xlu1 %v11383_v12, %s10445_s0 }
0x2886   :  { %4323 = vrot.lane.b32.xlu1 %v8334_v35, %s10444_s23  ;;  %v11413_v35 = vrot.slane %v3973_v41, %v10749_v0 }
0x289f   :  { %v3938_v14 = vpop.permute.xlu0 %3937 }
0x28a0   :  { %3940 = vst.msk [vmem:[#allocation2] sm:$0xff] %vm609_vm3, %v3938_v14 }
0x28a7   :  { %v3941_v60 = vld [vmem:[#allocation2] sm:$0xff] }
0x28f4   :  { %v11392_v36 = vpop.permute.xlu1 %3710 }
0x28f5   :  { %9075 = vmatmul.mubr.msk.f32.vlgmr.msra.gmra.mrb[38].mxu1 %vm375_vm2, %v11392_v36 }
0x28f6   :  { %9651 = vmatpush1.bf16.msra.mxu1 %v9650_v23  ;;  %4097 = vmatprep.mubr.f32.mxu1 %v10443_v2 }
0x28f7   :  { %9653 = vmatprep.subr.bf16.mxu1 %v9652_v34 }
0x28f8   :  { %v11397_v52 = vpop.permute.xlu1 %4323 }
0x28f9   :  { %v4326_v19 = vadd.f32 %v11397_v52, %v4307_v22 }
0x28fa   :  { %9655 = vmatpush1.bf16.msra.mxu1 %v9654_v42 }
0x28fb   :  { %9657 = vmatprep.subr.bf16.mxu1 %v9656_v43  ;;  %4328 = vrot.lane.b32.xlu0 %v4326_v19, %s10444_s23 }
0x28fe   :  { %9659 = vmatpush1.bf16.msra.mxu1 %v9658_v63 }
0x28ff   :  { %9661 = vmatprep.subr.bf16.mxu1 %v9660_v6 }
0x2902   :  { %9663 = vmatpush1.bf16.msra.mxu1 %v9662_v21 }
0x2903   :  { %9718 = vmatprep.subr.bf16.mxu1 %v10441_v1 }
0x2905   :  { %8316 = vmatmul.mubr.msk.f32.vlgmr.msra.gmra.mrb[40].mxu1 %vm118_vm1, %v3941_v60 }
0x2906   :  { %4103 = vmatprep.mubr.f32.mxu1 %v10443_v2 }
0x296d   :  { %v4329_v8 = vpop.permute.xlu0 %4328 }
0x29c8   :  { %v3790_v61 = vpop.f32.mrb[38].mxu1 }
0x29c9   :  { %v3801_v26 = vadd.f32 %v3790_v61, %v10739_v58  ;;  %v9076_v9 = vpop.f32.mrb[39].mxu1  ;;  %v3794_v42 = vadd.f32 %v3790_v61, %v3719_v39 }
0x29cb   :  { %3803 = vrot.lane.b32.xlu1 %v3801_v26, %s10444_s23  ;;  %v8312_v43 = vmul.f32 -1.442695, %v3794_v42 }
0x29d8   :  { %v4099_v14 = vpop.f32.mrb[40].mxu1 }
0x29d9   :  { %v4100_v29 = vadd.f32 %v4099_v14, %v11410_v46  ;;  %v4101_v31 = vpop.f32.mrb[41].mxu1 }
0x29da   :  { %v4102_v32 = vadd.f32 %v4101_v31, %v11413_v35 }
0x29db   :  { %4194 = vst [vmem:[#allocation3] sm:$0xff] %v4100_v29  ;;  %v4311_v58 = vadd.f32 %v4307_v22, %v4100_v29  ;;  %v4231_v22 = vld [vmem:[#allocation7 + $0x20] sm:$0xff] }
0x29dc   :  { %4195 = vst.msk [vmem:[#allocation3 + $0x8] sm:$0xff] %vm118_vm1, %v4102_v32 }
0x29dd   :  { %v8333_v4 = vmul.f32 -1.442695, %v4311_v58 }
0x29df   :  { %10121 = vpow2.f32 %v8333_v4 }
0x29e9   :  { %v10122_v23 = vpop.eup %10121 }
0x29ea   :  { %v4315_v34 = vadd.f32 1.0, %v10122_v23 }
0x29ec   :  { %10123 = vrcp.f32 %v4315_v34 }
0x29ed   :  { %10125 = vpow2.f32 %v8312_v43 }
0x29f6   :  { %v11418_v18 = vpop.eup %10123 }
0x29f7   :  { %v4331_v33 = vmul.f32 %v11418_v18, %v4329_v8  ;;  %v10126_v45 = vpop.eup %10125 }
0x29f8   :  { %v3798_v40 = vadd.f32 1.0, %v10126_v45 }
0x29f9   :  { %4333 = vrot.lane.b32.xlu0 %v4331_v33, %s10444_s23 }
0x29fa   :  { %10127 = vrcp.f32 %v3798_v40 }
0x2a04   :  { %v11422_v56 = vpop.eup %10127 }
0x2a05   :  { %v3813_v41 = vsub.f32 1.0, %v11422_v56 }
0x2a3d   :  { %v3804_v7 = vpop.permute.xlu1 %3803 }
0x2a3e   :  { %v3806_v63 = vmul.f32 %v11422_v56, %v3804_v7 }
0x2a40   :  { %3808 = vrot.lane.b32.xlu1 %v3806_v63, %s10444_s23 }
0x2a6b   :  { %v4334_v6 = vpop.permute.xlu0 %4333 }
0x2a6c   :  { %v4336_v37 = vadd.f32 %v4334_v6, %v4100_v29  ;;  %v3819_v29 = vmul.f32 %v11422_v56, %v11383_v12 }
0x2a6e   :  { %10129 = vtanh.f32 %v4336_v37 }
0x2a78   :  { %v10130_v15 = vpop.eup %10129 }
0x2a79   :  { %4340 = vrot.lane.b32.xlu0 %v10130_v15, %s10445_s0 }
0x2a7d   :  { %3715 = vrot.lane.b32.xlu0 %v11345_v47, %s10446_s4 }
0x2a81   :  { %3271 = vrot.lane.b32.xlu0 %v11283_v17, %s10446_s4 }
0x2a85   :  { %2827 = vrot.lane.b32.xlu0 %v11215_v44, %s10446_s4  ;;  %v4232_v44 = vld [vmem:[#allocation7 + $0x28] sm:$0xff] }
0x2a86   :  { %v11443_v21 = vpack.c.bf16 %v4232_v44, %v4231_v22 }
0x2a88   :  { %9672 = vmatpush3.bf16.msra.mxu0 %v11443_v21  ;;  %9720 = vmatpush3.bf16.msra.mxu1 %v11443_v21 }
0x2a89   :  { %2383 = vrot.lane.b32.xlu0 %v11147_v50, %s10446_s4  ;;  %9673 = vmatprep.subr.bf16.mxu0 %v10441_v1  ;;  %v4338_v50 = vsub.f32 1.0, %v11418_v18 }
0x2a8a   :  { %9721 = vmatprep.subr.bf16.mxu1 %v10441_v1 }
0x2a8d   :  { %1939 = vrot.lane.b32.xlu0 %v11081_v54, %s10446_s4  ;;  %v4234_v54 = vld [vmem:[#allocation7 + $0x38] sm:$0xff] }
0x2a91   :  { %1495 = vrot.lane.b32.xlu0 %v11012_v13, %s10446_s4  ;;  %v4233_v13 = vld [vmem:[#allocation7 + $0x30] sm:$0xff] }
0x2a95   :  { %1051 = vrot.lane.b32.xlu0 %v10952_v25, %s10446_s4  ;;  %v11449_v25 = vpack.c.bf16 %v4234_v54, %v4233_v13 }
0x2a97   :  { %9675 = vmatpush3.bf16.msra.mxu0 %v11449_v25  ;;  %9723 = vmatpush3.bf16.msra.mxu1 %v11449_v25 }
0x2a98   :  { %9676 = vmatprep.subr.bf16.mxu0 %v10441_v1  ;;  %9730 = vmatprep.subr.bf16.mxu1 %v10441_v1 }
0x2a99   :  { %606 = vrot.lane.b32.xlu0 %v10881_v20, %s10446_s4 }
0x2a9a   :  { %9108 = vmatmul.mubr.f32.vlgmr.msra.gmra.mrb[58].mxu0 %v10443_v2 }
0x2a9b   :  { %9678 = vmatpush3.bf16.msra.mxu0 %v11369_v11  ;;  %9118 = vmatprep.mubr.msk.f32.mxu0 %vm10442_vm0, %v10443_v2 }
0x2a9c   :  { %9679 = vmatprep.subr.bf16.mxu0 %v10441_v1 }
0x2a9f   :  { %9681 = vmatpush3.bf16.msra.mxu0 %v11372_v10 }
0x2aa0   :  { %9682 = vmatprep.subr.bf16.mxu0 %v10441_v1 }
0x2ab2   :  { %v3809_v47 = vpop.permute.xlu1 %3808 }
0x2ab3   :  { %v3811_v17 = vadd.f32 %v3809_v47, %v3719_v39 }
0x2ab5   :  { %10131 = vtanh.f32 %v3811_v17 }
0x2abf   :  { %v10132_v20 = vpop.eup %10131 }
0x2ac0   :  { %3815 = vrot.lane.b32.xlu1 %v10132_v20, %s10445_s0 }
0x2ac4   :  { %3493 = vrot.lane.b32.xlu1 %v11310_v38, %s10446_s4  ;;  %v4344_v38 = vmul.f32 0.0, %v11418_v18 }
0x2ac8   :  { %3049 = vrot.lane.b32.xlu1 %v11250_v16, %s10446_s4 }
0x2acc   :  { %2605 = vrot.lane.b32.xlu1 %v11180_v49, %s10446_s4 }
0x2ad0   :  { %2161 = vrot.lane.b32.xlu1 %v11114_v51, %s10446_s4 }
0x2ad4   :  { %1717 = vrot.lane.b32.xlu1 %v11046_v5, %s10446_s4 }
0x2ad8   :  { %1273 = vrot.lane.b32.xlu1 %v10976_v30, %s10446_s4 }
0x2adc   :  { %829 = vrot.lane.b32.xlu1 %v10917_v24, %s10446_s4 }
0x2aeb   :  { %v4341_v16 = vpop.permute.xlu0 %4340 }
0x2aec   :  { %v4343_v27 = vmul.f32 %v4341_v16, %v4338_v50 }
0x2aee   :  { %v11479_v19 = vadd.f32 %v4344_v38, %v4343_v27 }
0x2aef   :  { %v3716_v49 = vpop.permute.xlu0 %3715 }
0x2af0   :  { %3718 = vst.msk [vmem:[#allocation2 + $0x8] sm:$0xff] %vm609_vm3, %v3716_v49  ;;  %4478 = vrot.lane.b32.xlu1 %v11479_v19, %s10445_s0 }
0x2af3   :  { %v3272_v5 = vpop.permute.xlu0 %3271 }
0x2af4   :  { %3274 = vst.msk [vmem:[#allocation2 + $0x18] sm:$0xff] %vm609_vm3, %v3272_v5 }
0x2af7   :  { %v2828_v30 = vpop.permute.xlu0 %2827  ;;  %v3942_v51 = vld [vmem:[#allocation2 + $0x8] sm:$0xff] }
0x2af8   :  { %2830 = vst.msk [vmem:[#allocation2 + $0x28] sm:$0xff] %vm609_vm3, %v2828_v30  ;;  %8317 = vmatmul.mubr.msk.f32.gmra.mrb[42].mxu1 %vm118_vm1, %v3942_v51 }
0x2af9   :  { %4109 = vmatprep.mubr.f32.mxu1 %v10443_v2 }
0x2afb   :  { %v2384_v24 = vpop.permute.xlu0 %2383  ;;  %v3944_v23 = vld [vmem:[#allocation2 + $0x18] sm:$0xff] }
0x2afc   :  { %2386 = vst.msk [vmem:[#allocation2 + $0x38] sm:$0xff] %vm609_vm3, %v2384_v24 }
0x2aff   :  { %v1940_v60 = vpop.permute.xlu0 %1939  ;;  %v3946_v33 = vld [vmem:[#allocation2 + $0x28] sm:$0xff] }
0x2b00   :  { %1942 = vst.msk [vmem:[#allocation2 + $0x48] sm:$0xff] %vm609_vm3, %v1940_v60 }
0x2b01   :  { %2603 = vst.msk [vmem:[#allocation2 + $0x48] sm:$0xff] %vm375_vm2, %v11203_v3  ;;  %v8337_v3 = vld [vmem:[%s12322_s8 + $0x1] ss:$0 sm:$0xff] }
0x2b02   :  { %4439 = vrot.lane.b32.xlu1 %v8337_v3, %s10444_s23 }
0x2b03   :  { %v1496_v61 = vpop.permute.xlu0 %1495 }
0x2b04   :  { %1498 = vst.msk [vmem:[#allocation2 + $0x58] sm:$0xff] %vm609_vm3, %v1496_v61 }
0x2b05   :  { %3047 = vst.msk [vmem:[#allocation2 + $0x58] sm:$0xff] %vm375_vm2, %v11274_v53 }
0x2b07   :  { %v1052_v26 = vpop.permute.xlu0 %1051 }
0x2b08   :  { %1054 = vst.msk [vmem:[#allocation2 + $0x68] sm:$0xff] %vm609_vm3, %v1052_v26 }
0x2b09   :  { %3491 = vst.msk [vmem:[#allocation2 + $0x68] sm:$0xff] %vm375_vm2, %v11351_v59 }
0x2b0b   :  { %v607_v9 = vpop.permute.xlu0 %606 }
0x2b0c   :  { %610 = vst.msk [vmem:[#allocation2 + $0x78] sm:$0xff] %vm609_vm3, %v607_v9 }
0x2b10   :  { %v3954_v56 = vld [vmem:[#allocation2 + $0x68] sm:$0xff] }
0x2b32   :  { %v3816_v14 = vpop.permute.xlu1 %3815 }
0x2b33   :  { %v3818_v53 = vmul.f32 %v3816_v14, %v3813_v41 }
0x2b35   :  { %v3820_v31 = vadd.f32 %v3819_v29, %v3818_v53 }
0x2b36   :  { %v3494_v32 = vpop.permute.xlu1 %3493 }
0x2b37   :  { %3496 = vst.msk [vmem:[#allocation2 + $0x10] sm:$0xff] %vm609_vm3, %v3494_v32  ;;  %3932 = vrot.lane.b32.xlu0 %v3820_v31, %s10445_s0 }
0x2b3a   :  { %v3050_v59 = vpop.permute.xlu1 %3049 }
0x2b3b   :  { %3052 = vst.msk [vmem:[#allocation2 + $0x20] sm:$0xff] %vm609_vm3, %v3050_v59 }
0x2b3e   :  { %v2606_v58 = vpop.permute.xlu1 %2605  ;;  %v3943_v4 = vld [vmem:[#allocation2 + $0x10] sm:$0xff] }
0x2b3f   :  { %2608 = vst.msk [vmem:[#allocation2 + $0x30] sm:$0xff] %vm609_vm3, %v2606_v58  ;;  %8318 = vmatmul.mubr.msk.f32.gmra.mrb[44].mxu1 %vm118_vm1, %v3943_v4 }
0x2b40   :  { %4115 = vmatprep.mubr.f32.mxu1 %v10443_v2 }
0x2b42   :  { %v2162_v12 = vpop.permute.xlu1 %2161  ;;  %v3945_v8 = vld [vmem:[#allocation2 + $0x20] sm:$0xff] }
0x2b43   :  { %2164 = vst.msk [vmem:[#allocation2 + $0x40] sm:$0xff] %vm609_vm3, %v2162_v12  ;;  %8319 = vmatmul.mubr.msk.f32.gmra.mrb[46].mxu1 %vm118_vm1, %v3944_v23 }
0x2b44   :  { %2381 = vst.msk [vmem:[#allocation2 + $0x40] sm:$0xff] %vm375_vm2, %v11168_v28  ;;  %4121 = vmatprep.mubr.f32.mxu1 %v10443_v2 }
0x2b46   :  { %v1718_v34 = vpop.permute.xlu1 %1717  ;;  %v3947_v39 = vld [vmem:[#allocation2 + $0x30] sm:$0xff] }
0x2b47   :  { %1720 = vst.msk [vmem:[#allocation2 + $0x50] sm:$0xff] %vm609_vm3, %v1718_v34  ;;  %8320 = vmatmul.mubr.msk.f32.gmra.mrb[48].mxu1 %vm118_vm1, %v3945_v8 }
0x2b48   :  { %2825 = vst.msk [vmem:[#allocation2 + $0x50] sm:$0xff] %vm375_vm2, %v11239_v48  ;;  %4127 = vmatprep.mubr.f32.mxu1 %v10443_v2  ;;  %v3948_v48 = vld [vmem:[#allocation2 + $0x38] sm:$0xff] }
0x2b4a   :  { %v1274_v18 = vpop.permute.xlu1 %1273 }
0x2b4b   :  { %1276 = vst.msk [vmem:[#allocation2 + $0x60] sm:$0xff] %vm609_vm3, %v1274_v18  ;;  %8321 = vmatmul.mubr.msk.f32.gmra.mrb[50].mxu1 %vm118_vm1, %v3946_v33  ;;  %v3949_v42 = vld [vmem:[#allocation2 + $0x40] sm:$0xff] }
0x2b4c   :  { %3269 = vst.msk [vmem:[#allocation2 + $0x60] sm:$0xff] %vm375_vm2, %v11320_v55  ;;  %4133 = vmatprep.mubr.f32.mxu1 %v10443_v2  ;;  %v3950_v55 = vld [vmem:[#allocation2 + $0x48] sm:$0xff] }
0x2b4e   :  { %v830_v28 = vpop.permute.xlu1 %829 }
0x2b4f   :  { %832 = vst.msk [vmem:[#allocation2 + $0x70] sm:$0xff] %vm609_vm3, %v830_v28  ;;  %8322 = vmatmul.mubr.msk.f32.gmra.mrb[52].mxu1 %vm118_vm1, %v3947_v39  ;;  %v3951_v43 = vld [vmem:[#allocation2 + $0x50] sm:$0xff] }
0x2b50   :  { %3713 = vst.msk [vmem:[#allocation2 + $0x70] sm:$0xff] %vm375_vm2, %v11392_v36  ;;  %4139 = vmatprep.mubr.f32.mxu1 %v10443_v2  ;;  %v3952_v36 = vld [vmem:[#allocation2 + $0x58] sm:$0xff] }
0x2b53   :  { %8323 = vmatmul.mubr.msk.f32.gmra.mrb[54].mxu1 %vm118_vm1, %v3948_v48  ;;  %v3953_v40 = vld [vmem:[#allocation2 + $0x60] sm:$0xff] }
0x2b54   :  { %4145 = vmatprep.mubr.f32.mxu1 %v10443_v2 }
0x2b57   :  { %8324 = vmatmul.mubr.msk.f32.gmra.mrb[56].mxu1 %vm118_vm1, %v3949_v42  ;;  %v3955_v7 = vld [vmem:[#allocation2 + $0x70] sm:$0xff] }
0x2b58   :  { %4151 = vmatprep.mubr.f32.mxu1 %v10443_v2 }
0x2b5b   :  { %8325 = vmatmul.mubr.msk.f32.gmra.mrb[58].mxu1 %vm118_vm1, %v3950_v55 }
0x2b5c   :  { %4157 = vmatprep.mubr.f32.mxu1 %v10443_v2 }
0x2b5f   :  { %8326 = vmatmul.mubr.msk.f32.gmra.mrb[60].mxu1 %vm118_vm1, %v3951_v43 }
0x2b60   :  { %4163 = vmatprep.mubr.f32.mxu1 %v10443_v2 }
0x2b62   :  { %v4479_v45 = vpop.permute.xlu1 %4478 }
0x2b63   :  { %8327 = vmatmul.mubr.msk.f32.gmra.mrb[62].mxu1 %vm118_vm1, %v3952_v36  ;;  %9119 = vmatmul.mubr.msk.f32.vlgmr.msra.gmra.mrb[60].mxu0 %vm375_vm2, %v4479_v45 }
0x2b64   :  { %4169 = vmatprep.mubr.f32.mxu1 %v10443_v2  ;;  %9684 = vmatpush3.bf16.msra.mxu0 %v11443_v21 }
0x2b65   :  { %9685 = vmatprep.subr.bf16.mxu0 %v10441_v1  ;;  %9129 = vmatprep.mubr.msk.f32.mxu0 %vm10442_vm0, %v10443_v2 }
0x2b67   :  { %8328 = vmatmul.mubr.msk.f32.gmra.mrb[64].mxu1 %vm118_vm1, %v3953_v40 }
0x2b68   :  { %4175 = vmatprep.mubr.f32.mxu1 %v10443_v2  ;;  %9687 = vmatpush3.bf16.msra.mxu0 %v11449_v25 }
0x2b69   :  { %9688 = vmatprep.subr.bf16.mxu0 %v10441_v1 }
0x2b6b   :  { %8329 = vmatmul.mubr.msk.f32.gmra.mrb[66].mxu1 %vm118_vm1, %v3954_v56 }
0x2b6c   :  { %4181 = vmatprep.mubr.f32.mxu1 %v10443_v2 }
0x2b6d   :  { %v4412_v63 = vpop.f32.mrb[58].mxu0 }
0x2b6e   :  { %4417 = vrot.lane.b32.xlu0 %v4412_v63, %s10445_s0  ;;  %v9109_v6 = vpop.f32.mrb[59].mxu0 }
0x2b6f   :  { %8330 = vmatmul.mubr.msk.f32.gmra.mrb[68].mxu1 %vm118_vm1, %v3955_v7 }
0x2b70   :  { %4187 = vmatprep.mubr.f32.mxu1 %v10443_v2 }
0x2b74   :  { %v11557_v15 = vpop.permute.xlu1 %4439 }
0x2b75   :  { %v4442_v47 = vadd.f32 %v11557_v15, %v4412_v63 }
0x2b77   :  { %4444 = vrot.lane.b32.xlu1 %v4442_v47, %s10446_s4 }
0x2ba9   :  { %v3933_v37 = vpop.permute.xlu0 %3932 }
0x2baa   :  { %3935 = vst.msk [vmem:[#allocation2 + $0x78] sm:$0xff] %vm375_vm2, %v3933_v37 }
0x2bb1   :  { %v3956_v17 = vld [vmem:[#allocation2 + $0x78] sm:$0xff] }
0x2bb2   :  { %8331 = vmatmul.mubr.msk.f32.gmra.mrb[70].mxu1 %vm118_vm1, %v3956_v17 }
0x2bb3   :  { %9195 = vmatprep.mubr.msk.f32.mxu1 %vm10442_vm0, %v10443_v2 }
0x2bcb   :  { %v4105_v22 = vpop.f32.mrb[42].mxu1 }
0x2bcc   :  { %v11565_v44 = vadd.f32 %v4105_v22, %v11410_v46  ;;  %v4107_v13 = vpop.f32.mrb[43].mxu1 }
0x2bcd   :  { %v4108_v54 = vadd.f32 %v4107_v13, %v11413_v35 }
0x2bce   :  { %4196 = vst [vmem:[#allocation3 + $0x10] sm:$0xff] %v11565_v44 }
0x2bcf   :  { %4197 = vst.msk [vmem:[#allocation3 + $0x18] sm:$0xff] %vm118_vm1, %v4108_v54 }
0x2c12   :  { %v4111_v20 = vpop.f32.mrb[44].mxu1 }
0x2c13   :  { %v11571_v50 = vadd.f32 %v4111_v20, %v11410_v46  ;;  %v4113_v16 = vpop.f32.mrb[45].mxu1 }
0x2c14   :  { %v4114_v38 = vadd.f32 %v4113_v16, %v11413_v35 }
0x2c15   :  { %4198 = vst [vmem:[#allocation3 + $0x20] sm:$0xff] %v11571_v50 }
0x2c16   :  { %4199 = vst.msk [vmem:[#allocation3 + $0x28] sm:$0xff] %vm118_vm1, %v4114_v38  ;;  %v4117_v27 = vpop.f32.mrb[46].mxu1 }
0x2c17   :  { %v11577_v49 = vadd.f32 %v4117_v27, %v11410_v46  ;;  %v4119_v5 = vpop.f32.mrb[47].mxu1 }
0x2c18   :  { %v4120_v30 = vadd.f32 %v4119_v5, %v11413_v35 }
0x2c19   :  { %4200 = vst [vmem:[#allocation3 + $0x30] sm:$0xff] %v11577_v49 }
0x2c1a   :  { %4201 = vst.msk [vmem:[#allocation3 + $0x38] sm:$0xff] %vm118_vm1, %v4120_v30  ;;  %v4123_v51 = vpop.f32.mrb[48].mxu1 }
0x2c1b   :  { %v11583_v24 = vadd.f32 %v4123_v51, %v11410_v46  ;;  %v4125_v60 = vpop.f32.mrb[49].mxu1 }
0x2c1c   :  { %v4126_v61 = vadd.f32 %v4125_v60, %v11413_v35  ;;  %v4418_v60 = vpop.permute.xlu0 %4417 }
0x2c1d   :  { %4202 = vst [vmem:[#allocation3 + $0x40] sm:$0xff] %v11583_v24 }
0x2c1e   :  { %4203 = vst.msk [vmem:[#allocation3 + $0x48] sm:$0xff] %vm118_vm1, %v4126_v61  ;;  %v4129_v26 = vpop.f32.mrb[50].mxu1 }
0x2c1f   :  { %v11589_v9 = vadd.f32 %v4129_v26, %v11410_v46  ;;  %v4131_v41 = vpop.f32.mrb[51].mxu1 }
0x2c20   :  { %v4132_v14 = vadd.f32 %v4131_v41, %v11413_v35 }
0x2c21   :  { %4204 = vst [vmem:[#allocation3 + $0x50] sm:$0xff] %v11589_v9 }
0x2c22   :  { %4205 = vst.msk [vmem:[#allocation3 + $0x58] sm:$0xff] %vm118_vm1, %v4132_v14  ;;  %v4135_v3 = vpop.f32.mrb[52].mxu1 }
0x2c23   :  { %v11595_v29 = vadd.f32 %v4135_v3, %v11410_v46  ;;  %v4137_v53 = vpop.f32.mrb[53].mxu1 }
0x2c24   :  { %v4138_v31 = vadd.f32 %v4137_v53, %v11413_v35 }
0x2c25   :  { %4206 = vst [vmem:[#allocation3 + $0x60] sm:$0xff] %v11595_v29 }
0x2c26   :  { %4207 = vst.msk [vmem:[#allocation3 + $0x68] sm:$0xff] %vm118_vm1, %v4138_v31  ;;  %v4141_v32 = vpop.f32.mrb[54].mxu1 }
0x2c27   :  { %v4142_v59 = vadd.f32 %v4141_v32, %v11410_v46  ;;  %v4143_v58 = vpop.f32.mrb[55].mxu1 }
0x2c28   :  { %v4144_v4 = vadd.f32 %v4143_v58, %v11413_v35 }
0x2c29   :  { %4208 = vst [vmem:[#allocation3 + $0x70] sm:$0xff] %v4142_v59 }
0x2c2a   :  { %4209 = vst.msk [vmem:[#allocation3 + $0x78] sm:$0xff] %vm118_vm1, %v4144_v4  ;;  %v4147_v12 = vpop.f32.mrb[56].mxu1 }
0x2c2b   :  { %v4148_v23 = vadd.f32 %v4147_v12, %v11410_v46  ;;  %v4149_v34 = vpop.f32.mrb[57].mxu1 }
0x2c2c   :  { %v4150_v8 = vadd.f32 %v4149_v34, %v11413_v35 }
0x2c2d   :  { %4210 = vst [vmem:[#allocation3 + $0x80] sm:$0xff] %v4148_v23 }
0x2c2e   :  { %4211 = vst.msk [vmem:[#allocation3 + $0x88] sm:$0xff] %vm118_vm1, %v4150_v8  ;;  %v4153_v18 = vpop.f32.mrb[58].mxu1 }
0x2c2f   :  { %v11607_v33 = vadd.f32 %v4153_v18, %v11410_v46  ;;  %v4155_v28 = vpop.f32.mrb[59].mxu1 }
0x2c30   :  { %v4156_v39 = vadd.f32 %v4155_v28, %v11413_v35 }
0x2c31   :  { %4212 = vst [vmem:[#allocation3 + $0x90] sm:$0xff] %v11607_v33 }
0x2c32   :  { %4213 = vst.msk [vmem:[#allocation3 + $0x98] sm:$0xff] %vm118_vm1, %v4156_v39  ;;  %v4159_v48 = vpop.f32.mrb[60].mxu1 }
0x2c33   :  { %v11613_v42 = vadd.f32 %v4159_v48, %v11410_v46  ;;  %v4161_v55 = vpop.f32.mrb[61].mxu1 }
0x2c34   :  { %v4162_v43 = vadd.f32 %v4161_v55, %v11413_v35 }
0x2c35   :  { %4214 = vst [vmem:[#allocation3 + $0xa0] sm:$0xff] %v11613_v42 }
0x2c36   :  { %4215 = vst.msk [vmem:[#allocation3 + $0xa8] sm:$0xff] %vm118_vm1, %v4162_v43  ;;  %v4165_v36 = vpop.f32.mrb[62].mxu1  ;;  %v4548_v45 = vpop.f32.mrb[60].mxu0 }
0x2c37   :  { %v11619_v40 = vadd.f32 %v4165_v36, %v11410_v46  ;;  %v4167_v56 = vpop.f32.mrb[63].mxu1  ;;  %v4559_v7 = vadd.f32 %v4548_v45, %v11397_v52  ;;  %v9120_v63 = vpop.f32.mrb[61].mxu0  ;;  %v4552_v14 = vadd.f32 %v4548_v45, %v11565_v44 }
0x2c38   :  { %v4168_v6 = vadd.f32 %v4167_v56, %v11413_v35 }
0x2c39   :  { %4216 = vst [vmem:[#allocation3 + $0xb0] sm:$0xff] %v11619_v40  ;;  %4561 = vrot.lane.b32.xlu0 %v4559_v7, %s10444_s23  ;;  %v8339_v31 = vmul.f32 -1.442695, %v4552_v14 }
0x2c3a   :  { %4217 = vst.msk [vmem:[#allocation3 + $0xb8] sm:$0xff] %vm118_vm1, %v4168_v6  ;;  %v4171_v37 = vpop.f32.mrb[64].mxu1 }
0x2c3b   :  { %v11627_v47 = vadd.f32 %v4171_v37, %v11410_v46  ;;  %v4173_v17 = vpop.f32.mrb[65].mxu1 }
0x2c3c   :  { %v4174_v22 = vadd.f32 %v4173_v17, %v11413_v35 }
0x2c3d   :  { %4218 = vst [vmem:[#allocation3 + $0xc0] sm:$0xff] %v11627_v47 }
0x2c3e   :  { %4219 = vst.msk [vmem:[#allocation3 + $0xc8] sm:$0xff] %vm118_vm1, %v4174_v22  ;;  %v4177_v13 = vpop.f32.mrb[66].mxu1 }
0x2c3f   :  { %v11633_v54 = vadd.f32 %v4177_v13, %v11410_v46  ;;  %v4179_v20 = vpop.f32.mrb[67].mxu1 }
0x2c40   :  { %v4180_v16 = vadd.f32 %v4179_v20, %v11413_v35 }
0x2c41   :  { %4220 = vst [vmem:[#allocation3 + $0xd0] sm:$0xff] %v11633_v54 }
0x2c42   :  { %4221 = vst.msk [vmem:[#allocation3 + $0xd8] sm:$0xff] %vm118_vm1, %v4180_v16  ;;  %v4183_v38 = vpop.f32.mrb[68].mxu1 }
0x2c43   :  { %v11639_v27 = vadd.f32 %v4183_v38, %v11410_v46  ;;  %v4185_v5 = vpop.f32.mrb[69].mxu1 }
0x2c44   :  { %v4186_v30 = vadd.f32 %v4185_v5, %v11413_v35 }
0x2c45   :  { %4222 = vst [vmem:[#allocation3 + $0xe0] sm:$0xff] %v11639_v27 }
0x2c46   :  { %4223 = vst.msk [vmem:[#allocation3 + $0xe8] sm:$0xff] %vm118_vm1, %v4186_v30 }
0x2c85   :  { %v4189_v51 = vpop.f32.mrb[70].mxu1 }
0x2c86   :  { %v4190_v61 = vadd.f32 %v4189_v51, %v11410_v46  ;;  %v4191_v26 = vpop.f32.mrb[71].mxu1  ;;  %v4445_v46 = vpop.permute.xlu1 %4444 }
0x2c87   :  { %v4192_v41 = vadd.f32 %v4191_v26, %v11413_v35 }
0x2c88   :  { %4224 = vst [vmem:[#allocation3 + $0xf0] sm:$0xff] %v4190_v61  ;;  %v4420_v3 = vadd.f32 %v4418_v60, %v4190_v61 }
0x2c89   :  { %4225 = vst.msk [vmem:[#allocation3 + $0xf8] sm:$0xff] %vm118_vm1, %v4192_v41 }
0x2c8a   :  { %v8335_v53 = vmul.f32 -1.442695, %v4420_v3 }
0x2c8c   :  { %10133 = vpow2.f32 %v8335_v53 }
0x2c8d   :  { %10135 = vpow2.f32 %v8339_v31 }
0x2c90   :  { %v4240_v18 = vld [vmem:[#allocation3 + $0xf8] sm:$0xff] }
0x2c91   :  { %v4427_v45 = vadd.f32 %v4418_v60, %v4240_v18 }
0x2c93   :  { %v8336_v56 = vmul.f32 -1.442695, %v4427_v45 }
0x2c96   :  { %v10134_v32 = vpop.eup %10133 }
0x2c97   :  { %v4424_v59 = vadd.f32 1.0, %v10134_v32  ;;  %v10136_v58 = vpop.eup %10135 }
0x2c98   :  { %v4556_v4 = vadd.f32 1.0, %v10136_v58 }
0x2c99   :  { %10137 = vrcp.f32 %v4424_v59 }
0x2c9a   :  { %10139 = vrcp.f32 %v4556_v4 }
0x2ca3   :  { %v10138_v12 = vpop.eup %10137 }
0x2ca4   :  { %v4447_v23 = vmul.f32 %v10138_v12, %v4445_v46  ;;  %v10140_v35 = vpop.eup %10139 }
0x2ca5   :  { %v4577_v38 = vmul.f32 %v10140_v35, %v11479_v19 }
0x2ca6   :  { %4449 = vrot.lane.b32.xlu1 %v4447_v23, %s10444_s23 }
0x2cab   :  { %v4562_v34 = vpop.permute.xlu0 %4561 }
0x2cac   :  { %v4564_v8 = vmul.f32 %v10140_v35, %v4562_v34 }
0x2cae   :  { %4566 = vrot.lane.b32.xlu0 %v4564_v8, %s10444_s23 }
0x2d18   :  { %v4450_v28 = vpop.permute.xlu1 %4449 }
0x2d19   :  { %v4452_v39 = vadd.f32 %v4450_v28, %v4240_v18 }
0x2d1b   :  { %10141 = vtanh.f32 %v4452_v39  ;;  %v4476_v39 = vld [vmem:[#allocation3 + $0xe8] sm:$0xff] }
0x2d20   :  { %v4567_v48 = vpop.permute.xlu0 %4566 }
0x2d21   :  { %v4569_v55 = vadd.f32 %v4567_v48, %v11565_v44  ;;  %v4571_v44 = vsub.f32 1.0, %v10140_v35 }
0x2d23   :  { %10143 = vtanh.f32 %v4569_v55 }
0x2d24   :  { %10145 = vpow2.f32 %v8336_v56 }
0x2d25   :  { %v10142_v43 = vpop.eup %10141 }
0x2d26   :  { %4456 = vrot.lane.b32.xlu1 %v10142_v43, %s10445_s0 }
0x2d2d   :  { %v10144_v36 = vpop.eup %10143 }
0x2d2e   :  { %4573 = vrot.lane.b32.xlu0 %v10144_v36, %s10445_s0  ;;  %v10146_v7 = vpop.eup %10145 }
0x2d2f   :  { %v4431_v63 = vadd.f32 1.0, %v10146_v7 }
0x2d31   :  { %10147 = vrcp.f32 %v4431_v63 }
0x2d3b   :  { %v10148_v6 = vpop.eup %10147 }
0x2d3c   :  { %v4454_v37 = vsub.f32 1.0, %v10148_v6  ;;  %v4460_v22 = vmul.f32 0.0, %v10148_v6 }
0x2d98   :  { %v4457_v17 = vpop.permute.xlu1 %4456 }
0x2d99   :  { %v4459_v13 = vmul.f32 %v4457_v17, %v4454_v37 }
0x2d9b   :  { %v11653_v20 = vadd.f32 %v4460_v22, %v4459_v13 }
0x2d9d   :  { %9130 = vmatmul.mubr.msk.f32.vlgmr.msra.gmra.mrb[62].mxu0 %vm375_vm2, %v11653_v20 }
0x2d9e   :  { %9690 = vmatpush3.bf16.msra.mxu0 %v11369_v11  ;;  %9140 = vmatprep.mubr.msk.f32.mxu0 %vm10442_vm0, %v10443_v2 }
0x2d9f   :  { %9691 = vmatprep.subr.bf16.mxu0 %v10441_v1 }
0x2da0   :  { %v4574_v16 = vpop.permute.xlu0 %4573 }
0x2da1   :  { %v4576_v5 = vmul.f32 %v4574_v16, %v4571_v44 }
0x2da2   :  { %9693 = vmatpush3.bf16.msra.mxu0 %v11372_v10 }
0x2da3   :  { %v11663_v30 = vadd.f32 %v4577_v38, %v4576_v5  ;;  %9694 = vmatprep.subr.bf16.mxu0 %v10441_v1 }
0x2da5   :  { %4706 = vrot.lane.b32.xlu1 %v11663_v30, %s10445_s0 }
0x2e17   :  { %v4707_v51 = vpop.permute.xlu1 %4706 }
0x2e18   :  { %9141 = vmatmul.mubr.msk.f32.vlgmr.msra.gmra.mrb[64].mxu0 %vm375_vm2, %v4707_v51 }
0x2e19   :  { %9696 = vmatpush3.bf16.msra.mxu0 %v11443_v21  ;;  %9151 = vmatprep.mubr.msk.f32.mxu0 %vm10442_vm0, %v10443_v2 }
0x2e1a   :  { %9697 = vmatprep.subr.bf16.mxu0 %v10441_v1 }
0x2e1d   :  { %9699 = vmatpush3.bf16.msra.mxu0 %v11449_v25 }
0x2e1e   :  { %9700 = vmatprep.subr.bf16.mxu0 %v10441_v1 }
0x2e70   :  { %v4648_v60 = vpop.f32.mrb[62].mxu0 }
0x2e71   :  { %v4670_v61 = vadd.f32 %v4648_v60, %v11557_v15  ;;  %v9131_v26 = vpop.f32.mrb[63].mxu0  ;;  %4653 = vrot.lane.b32.xlu0 %v4648_v60, %s10445_s0 }
0x2e73   :  { %4672 = vrot.lane.b32.xlu1 %v4670_v61, %s10446_s4 }
0x2ee3   :  { %v4654_v41 = vpop.permute.xlu0 %4653 }
0x2ee4   :  { %v4656_v14 = vadd.f32 %v4654_v41, %v11639_v27  ;;  %v4663_v36 = vadd.f32 %v4654_v41, %v4476_v39 }
0x2ee5   :  { %v4673_v46 = vpop.permute.xlu1 %4672 }
0x2ee6   :  { %v8341_v3 = vmul.f32 -1.442695, %v4656_v14  ;;  %v8342_v45 = vmul.f32 -1.442695, %v4663_v36 }
0x2ee8   :  { %10149 = vpow2.f32 %v8341_v3 }
0x2eeb   :  { %v4776_v53 = vpop.f32.mrb[64].mxu0 }
0x2eec   :  { %v4787_v31 = vadd.f32 %v4776_v53, %v11397_v52  ;;  %v9142_v32 = vpop.f32.mrb[65].mxu0  ;;  %v4780_v23 = vadd.f32 %v4776_v53, %v11571_v50 }
0x2eee   :  { %4789 = vrot.lane.b32.xlu0 %v4787_v31, %s10444_s23  ;;  %v8344_v35 = vmul.f32 -1.442695, %v4780_v23 }
0x2ef2   :  { %v10150_v59 = vpop.eup %10149 }
0x2ef3   :  { %v4660_v58 = vadd.f32 1.0, %v10150_v59 }
0x2ef5   :  { %10151 = vrcp.f32 %v4660_v58 }
0x2ef6   :  { %10153 = vpow2.f32 %v8344_v35 }
0x2eff   :  { %v10152_v4 = vpop.eup %10151 }
0x2f00   :  { %v4675_v12 = vmul.f32 %v10152_v4, %v4673_v46  ;;  %v10154_v27 = vpop.eup %10153 }
0x2f01   :  { %v4784_v34 = vadd.f32 1.0, %v10154_v27 }
0x2f02   :  { %4677 = vrot.lane.b32.xlu1 %v4675_v12, %s10444_s23 }
0x2f03   :  { %10155 = vrcp.f32 %v4784_v34  ;;  %v4704_v34 = vld [vmem:[#allocation3 + $0xd8] sm:$0xff] }
0x2f0d   :  { %v10156_v8 = vpop.eup %10155 }
0x2f0e   :  { %v4805_v51 = vmul.f32 %v10156_v8, %v11663_v30 }
0x2f60   :  { %v4790_v18 = vpop.permute.xlu0 %4789 }
0x2f61   :  { %v4792_v28 = vmul.f32 %v10156_v8, %v4790_v18 }
0x2f63   :  { %4794 = vrot.lane.b32.xlu0 %v4792_v28, %s10444_s23 }
0x2f74   :  { %v4678_v48 = vpop.permute.xlu1 %4677 }
0x2f75   :  { %v4680_v55 = vadd.f32 %v4678_v48, %v4476_v39 }
0x2f77   :  { %10157 = vtanh.f32 %v4680_v55 }
0x2f78   :  { %10159 = vpow2.f32 %v8342_v45 }
0x2f81   :  { %v10158_v43 = vpop.eup %10157 }
0x2f82   :  { %4684 = vrot.lane.b32.xlu1 %v10158_v43, %s10445_s0  ;;  %v10160_v63 = vpop.eup %10159 }
0x2f83   :  { %v4667_v37 = vadd.f32 1.0, %v10160_v63 }
0x2fd5   :  { %v4795_v56 = vpop.permute.xlu0 %4794 }
0x2fd6   :  { %v4797_v7 = vadd.f32 %v4795_v56, %v11571_v50  ;;  %v4799_v50 = vsub.f32 1.0, %v10156_v8 }
0x2fd8   :  { %10161 = vtanh.f32 %v4797_v7 }
0x2fd9   :  { %10163 = vrcp.f32 %v4667_v37 }
0x2fe2   :  { %v10162_v6 = vpop.eup %10161 }
0x2fe3   :  { %4801 = vrot.lane.b32.xlu0 %v10162_v6, %s10445_s0  ;;  %v10164_v17 = vpop.eup %10163 }
0x2fe4   :  { %v4682_v22 = vsub.f32 1.0, %v10164_v17  ;;  %v4688_v44 = vmul.f32 %v10164_v17, %v11653_v20 }
0x2ff4   :  { %v4685_v13 = vpop.permute.xlu1 %4684 }
0x2ff5   :  { %v4687_v16 = vmul.f32 %v4685_v13, %v4682_v22 }
0x2ff7   :  { %v11688_v38 = vadd.f32 %v4688_v44, %v4687_v16 }
0x2ff9   :  { %9152 = vmatmul.mubr.msk.f32.vlgmr.msra.gmra.mrb[66].mxu0 %vm375_vm2, %v11688_v38 }
0x2ffa   :  { %9702 = vmatpush3.bf16.msra.mxu0 %v11369_v11  ;;  %9162 = vmatprep.mubr.msk.f32.mxu0 %vm10442_vm0, %v10443_v2 }
0x2ffb   :  { %9703 = vmatprep.subr.bf16.mxu0 %v10441_v1 }
0x2ffe   :  { %9705 = vmatpush3.bf16.msra.mxu0 %v11372_v10 }
0x2fff   :  { %9706 = vmatprep.subr.bf16.mxu0 %v10441_v1 }
0x3055   :  { %v4802_v5 = vpop.permute.xlu0 %4801 }
0x3056   :  { %v4804_v60 = vmul.f32 %v4802_v5, %v4799_v50 }
0x3058   :  { %v11699_v61 = vadd.f32 %v4805_v51, %v4804_v60 }
0x305a   :  { %4934 = vrot.lane.b32.xlu1 %v11699_v61, %s10445_s0 }
0x30cc   :  { %v4935_v26 = vpop.permute.xlu1 %4934  ;;  %v4876_v41 = vpop.f32.mrb[66].mxu0 }
0x30cd   :  { %v4898_v14 = vadd.f32 %v4876_v41, %v11557_v15  ;;  %9163 = vmatmul.mubr.msk.f32.vlgmr.msra.gmra.mrb[68].mxu0 %vm375_vm2, %v4935_v26  ;;  %v9153_v3 = vpop.f32.mrb[67].mxu0  ;;  %4881 = vrot.lane.b32.xlu0 %v4876_v41, %s10445_s0 }
0x30ce   :  { %9708 = vmatpush3.bf16.msra.mxu0 %v11443_v21  ;;  %9173 = vmatprep.mubr.msk.f32.mxu0 %vm10442_vm0, %v10443_v2 }
0x30cf   :  { %4900 = vrot.lane.b32.xlu1 %v4898_v14, %s10446_s4  ;;  %9709 = vmatprep.subr.bf16.mxu0 %v10441_v1 }
0x30d2   :  { %9711 = vmatpush3.bf16.msra.mxu0 %v11449_v25 }
0x30d3   :  { %9712 = vmatprep.subr.bf16.mxu0 %v10441_v1 }
0x313f   :  { %v4882_v53 = vpop.permute.xlu0 %4881 }
0x3140   :  { %v4884_v31 = vadd.f32 %v4882_v53, %v11633_v54  ;;  %v4891_v56 = vadd.f32 %v4882_v53, %v4704_v34 }
0x3141   :  { %v4901_v46 = vpop.permute.xlu1 %4900 }
0x3142   :  { %v8346_v32 = vmul.f32 -1.442695, %v4884_v31  ;;  %v8347_v7 = vmul.f32 -1.442695, %v4891_v56 }
0x3144   :  { %10165 = vpow2.f32 %v8346_v32 }
0x314e   :  { %v10166_v59 = vpop.eup %10165 }
0x314f   :  { %v4888_v58 = vadd.f32 1.0, %v10166_v59 }
0x3151   :  { %10167 = vrcp.f32 %v4888_v58 }
0x315b   :  { %v10168_v4 = vpop.eup %10167 }
0x315c   :  { %v4903_v12 = vmul.f32 %v10168_v4, %v4901_v46 }
0x315e   :  { %4905 = vrot.lane.b32.xlu0 %v4903_v12, %s10444_s23 }
0x31a0   :  { %v5004_v23 = vpop.f32.mrb[68].mxu0 }
0x31a1   :  { %v5015_v35 = vadd.f32 %v5004_v23, %v11397_v52  ;;  %v9164_v27 = vpop.f32.mrb[69].mxu0  ;;  %v5008_v28 = vadd.f32 %v5004_v23, %v11577_v49 }
0x31a3   :  { %5017 = vrot.lane.b32.xlu1 %v5015_v35, %s10444_s23  ;;  %v8349_v39 = vmul.f32 -1.442695, %v5008_v28 }
0x31d0   :  { %v4906_v8 = vpop.permute.xlu0 %4905 }
0x31d1   :  { %v4908_v18 = vadd.f32 %v4906_v8, %v4704_v34  ;;  %v4932_v34 = vld [vmem:[#allocation3 + $0xc8] sm:$0xff] }
0x31d3   :  { %10169 = vtanh.f32 %v4908_v18 }
0x31d4   :  { %10171 = vpow2.f32 %v8349_v39 }
0x31dd   :  { %v10170_v54 = vpop.eup %10169 }
0x31de   :  { %4912 = vrot.lane.b32.xlu0 %v10170_v54, %s10445_s0  ;;  %v10172_v48 = vpop.eup %10171 }
0x31df   :  { %v5012_v55 = vadd.f32 1.0, %v10172_v48 }
0x31e1   :  { %10173 = vrcp.f32 %v5012_v55 }
0x31e2   :  { %10175 = vpow2.f32 %v8347_v7 }
0x31eb   :  { %v10174_v43 = vpop.eup %10173 }
0x31ec   :  { %v10176_v63 = vpop.eup %10175  ;;  %v5027_v60 = vsub.f32 1.0, %v10174_v43  ;;  %v5033_v41 = vmul.f32 %v10174_v43, %v11699_v61 }
0x31ed   :  { %v4895_v6 = vadd.f32 1.0, %v10176_v63 }
0x31ef   :  { %10177 = vrcp.f32 %v4895_v6 }
0x31f9   :  { %v10178_v37 = vpop.eup %10177 }
0x31fa   :  { %v4910_v17 = vsub.f32 1.0, %v10178_v37  ;;  %v4916_v13 = vmul.f32 %v10178_v37, %v11688_v38 }
0x3215   :  { %v5018_v36 = vpop.permute.xlu1 %5017 }
0x3216   :  { %v5020_v45 = vmul.f32 %v10174_v43, %v5018_v36 }
0x3218   :  { %5022 = vrot.lane.b32.xlu1 %v5020_v45, %s10444_s23 }
0x3250   :  { %v4913_v22 = vpop.permute.xlu0 %4912 }
0x3251   :  { %v4915_v44 = vmul.f32 %v4913_v22, %v4910_v17 }
0x3253   :  { %v11721_v16 = vadd.f32 %v4916_v13, %v4915_v44 }
0x3255   :  { %9174 = vmatmul.mubr.msk.f32.vlgmr.msra.gmra.mrb[70].mxu0 %vm375_vm2, %v11721_v16 }
0x3256   :  { %9714 = vmatpush3.bf16.msra.mxu0 %v11369_v11  ;;  %9184 = vmatprep.mubr.msk.f32.mxu0 %vm10442_vm0, %v10443_v2 }
0x3257   :  { %9715 = vmatprep.subr.bf16.mxu0 %v10441_v1 }
0x325a   :  { %9717 = vmatpush3.bf16.msra.mxu0 %v11372_v10 }
0x325b   :  { %9724 = vmatprep.subr.bf16.mxu0 %v10441_v1 }
0x328a   :  { %v5023_v50 = vpop.permute.xlu1 %5022 }
0x328b   :  { %v5025_v5 = vadd.f32 %v5023_v50, %v11577_v49 }
0x328d   :  { %10179 = vtanh.f32 %v5025_v5 }
0x3297   :  { %v10180_v51 = vpop.eup %10179 }
0x3298   :  { %5029 = vrot.lane.b32.xlu0 %v10180_v51, %s10445_s0 }
0x330a   :  { %v5030_v26 = vpop.permute.xlu0 %5029 }
0x330b   :  { %v5032_v14 = vmul.f32 %v5030_v26, %v5027_v60 }
0x330d   :  { %v11734_v3 = vadd.f32 %v5033_v41, %v5032_v14 }
0x330f   :  { %5162 = vrot.lane.b32.xlu1 %v11734_v3, %s10445_s0 }
0x3328   :  { %v5104_v53 = vpop.f32.mrb[70].mxu0 }
0x3329   :  { %v5126_v31 = vadd.f32 %v5104_v53, %v11557_v15  ;;  %5109 = vrot.lane.b32.xlu0 %v5104_v53, %s10445_s0  ;;  %v9175_v49 = vpop.f32.mrb[71].mxu0 }
0x332b   :  { %5128 = vrot.lane.b32.xlu1 %v5126_v31, %s10446_s4 }
0x3381   :  { %v5163_v32 = vpop.permute.xlu1 %5162 }
0x3382   :  { %9185 = vmatmul.mubr.msk.f32.vlgmr.msra.gmra.mrb[72].mxu0 %vm375_vm2, %v5163_v32 }
0x3383   :  { %9726 = vmatpush3.bf16.msra.mxu0 %v11369_v11  ;;  %9206 = vmatprep.mubr.msk.f32.mxu0 %vm10442_vm0, %v10443_v2 }
0x3384   :  { %9727 = vmatprep.subr.bf16.mxu0 %v10441_v1 }
0x3387   :  { %9729 = vmatpush3.bf16.msra.mxu0 %v11372_v10 }
0x3388   :  { %9736 = vmatprep.subr.bf16.mxu0 %v10441_v1 }
0x339b   :  { %v5110_v59 = vpop.permute.xlu0 %5109 }
0x339c   :  { %v5112_v58 = vadd.f32 %v5110_v59, %v11627_v47  ;;  %v5119_v48 = vadd.f32 %v5110_v59, %v4932_v34 }
0x339d   :  { %v5129_v35 = vpop.permute.xlu1 %5128 }
0x339e   :  { %v8351_v4 = vmul.f32 -1.442695, %v5112_v58  ;;  %v8352_v55 = vmul.f32 -1.442695, %v5119_v48 }
0x33a0   :  { %10181 = vpow2.f32 %v8351_v4 }
0x33aa   :  { %v10182_v46 = vpop.eup %10181 }
0x33ab   :  { %v5116_v12 = vadd.f32 1.0, %v10182_v46 }
0x33ad   :  { %10183 = vrcp.f32 %v5116_v12 }
0x33b7   :  { %v10184_v23 = vpop.eup %10183 }
0x33b8   :  { %v5131_v27 = vmul.f32 %v10184_v23, %v5129_v35 }
0x33ba   :  { %5133 = vrot.lane.b32.xlu0 %v5131_v27, %s10444_s23 }
0x342c   :  { %v5134_v8 = vpop.permute.xlu0 %5133 }
0x342d   :  { %v5136_v18 = vadd.f32 %v5134_v8, %v4932_v34 }
0x342f   :  { %10185 = vtanh.f32 %v5136_v18 }
0x3430   :  { %10187 = vpow2.f32 %v8352_v55 }
0x3439   :  { %v10186_v54 = vpop.eup %10185 }
0x343a   :  { %5140 = vrot.lane.b32.xlu0 %v10186_v54, %s10445_s0  ;;  %v10188_v43 = vpop.eup %10187 }
0x343b   :  { %v5123_v36 = vadd.f32 1.0, %v10188_v43 }
0x343d   :  { %10189 = vrcp.f32 %v5123_v36 }
0x3447   :  { %v10190_v56 = vpop.eup %10189 }
0x3448   :  { %v5138_v63 = vsub.f32 1.0, %v10190_v56  ;;  %v5144_v37 = vmul.f32 %v10190_v56, %v11721_v16 }
0x3455   :  { %v5232_v28 = vpop.f32.mrb[72].mxu0 }
0x3456   :  { %v5243_v47 = vadd.f32 %v5232_v28, %v11397_v52  ;;  %v9186_v39 = vpop.f32.mrb[73].mxu0  ;;  %v5236_v45 = vadd.f32 %v5232_v28, %v11583_v24 }
0x3458   :  { %5245 = vrot.lane.b32.xlu1 %v5243_v47, %s10444_s23  ;;  %v8354_v7 = vmul.f32 -1.442695, %v5236_v45 }
0x345a   :  { %10191 = vpow2.f32 %v8354_v7 }
0x3464   :  { %v10192_v13 = vpop.eup %10191 }
0x3465   :  { %v5240_v44 = vadd.f32 1.0, %v10192_v13 }
0x3467   :  { %10193 = vrcp.f32 %v5240_v44 }
0x3471   :  { %v10194_v50 = vpop.eup %10193 }
0x3472   :  { %v5255_v31 = vsub.f32 1.0, %v10194_v50  ;;  %v5261_v32 = vmul.f32 %v10194_v50, %v11734_v3 }
0x34ac   :  { %v5141_v6 = vpop.permute.xlu0 %5140 }
0x34ad   :  { %v5143_v17 = vmul.f32 %v5141_v6, %v5138_v63 }
0x34af   :  { %v11755_v22 = vadd.f32 %v5144_v37, %v5143_v17 }
0x34b1   :  { %9196 = vmatmul.mubr.msk.f32.vlgmr.msra.gmra.mrb[72].mxu1 %vm375_vm2, %v11755_v22 }
0x34b2   :  { %9732 = vmatpush3.bf16.msra.mxu1 %v11443_v21  ;;  %9217 = vmatprep.mubr.msk.f32.mxu1 %vm10442_vm0, %v10443_v2 }
0x34b3   :  { %9733 = vmatprep.subr.bf16.mxu1 %v10441_v1 }
0x34b6   :  { %9735 = vmatpush3.bf16.msra.mxu1 %v11449_v25 }
0x34b7   :  { %9742 = vmatprep.subr.bf16.mxu1 %v10441_v1 }
0x34ca   :  { %v5246_v5 = vpop.permute.xlu1 %5245 }
0x34cb   :  { %v5248_v51 = vmul.f32 %v10194_v50, %v5246_v5 }
0x34cd   :  { %5250 = vrot.lane.b32.xlu1 %v5248_v51, %s10444_s23 }
0x353f   :  { %v5251_v60 = vpop.permute.xlu1 %5250 }
0x3540   :  { %v5253_v26 = vadd.f32 %v5251_v60, %v11583_v24 }
0x3542   :  { %10195 = vtanh.f32 %v5253_v26 }
0x354c   :  { %v10196_v41 = vpop.eup %10195 }
0x354d   :  { %5257 = vrot.lane.b32.xlu0 %v10196_v41, %s10445_s0 }
0x3584   :  { %v5332_v14 = vpop.f32.mrb[72].mxu1 }
0x3585   :  { %5337 = vrot.lane.b32.xlu0 %v5332_v14, %s10445_s0  ;;  %v9197_v53 = vpop.f32.mrb[73].mxu1  ;;  %v5354_v24 = vadd.f32 %v5332_v14, %v11557_v15 }
0x35bf   :  { %v5258_v49 = vpop.permute.xlu0 %5257 }
0x35c0   :  { %v5260_v59 = vmul.f32 %v5258_v49, %v5255_v31 }
0x35c2   :  { %v11770_v58 = vadd.f32 %v5261_v32, %v5260_v59 }
0x35c4   :  { %5390 = vrot.lane.b32.xlu1 %v11770_v58, %s10445_s0 }
0x35c8   :  { %5356 = vrot.lane.b32.xlu1 %v5354_v24, %s10446_s4 }
0x35f7   :  { %v5338_v4 = vpop.permute.xlu0 %5337 }
0x35f8   :  { %v5340_v46 = vadd.f32 %v5338_v4, %v11619_v40  ;;  %v5160_v40 = vld [vmem:[#allocation3 + $0xb8] sm:$0xff] }
0x35f9   :  { %v5347_v39 = vadd.f32 %v5338_v4, %v5160_v40 }
0x35fa   :  { %v8356_v12 = vmul.f32 -1.442695, %v5340_v46 }
0x35fb   :  { %v8357_v36 = vmul.f32 -1.442695, %v5347_v39 }
0x35fc   :  { %10197 = vpow2.f32 %v8356_v12 }
0x3606   :  { %v10198_v23 = vpop.eup %10197 }
0x3607   :  { %v5344_v35 = vadd.f32 1.0, %v10198_v23 }
0x3609   :  { %10199 = vrcp.f32 %v5344_v35 }
0x3613   :  { %v10200_v34 = vpop.eup %10199 }
0x3636   :  { %v5391_v27 = vpop.permute.xlu1 %5390 }
0x3637   :  { %9207 = vmatmul.mubr.msk.f32.vlgmr.msra.gmra.mrb[74].mxu0 %vm375_vm2, %v5391_v27 }
0x3638   :  { %9738 = vmatpush3.bf16.msra.mxu0 %v11369_v11  ;;  %9228 = vmatprep.mubr.msk.f32.mxu0 %vm10442_vm0, %v10443_v2 }
0x3639   :  { %9739 = vmatprep.subr.bf16.mxu0 %v10441_v1 }
0x363a   :  { %v5357_v8 = vpop.permute.xlu1 %5356 }
0x363b   :  { %v5359_v18 = vmul.f32 %v10200_v34, %v5357_v8 }
0x363c   :  { %9741 = vmatpush3.bf16.msra.mxu0 %v11372_v10 }
0x363d   :  { %5361 = vrot.lane.b32.xlu0 %v5359_v18, %s10444_s23  ;;  %9748 = vmatprep.subr.bf16.mxu0 %v10441_v1 }
0x36af   :  { %v5362_v54 = vpop.permute.xlu0 %5361 }
0x36b0   :  { %v5364_v28 = vadd.f32 %v5362_v54, %v5160_v40 }
0x36b2   :  { %10201 = vtanh.f32 %v5364_v28 }
0x36b3   :  { %10203 = vpow2.f32 %v8357_v36 }
0x36bc   :  { %v10202_v47 = vpop.eup %10201 }
0x36bd   :  { %5368 = vrot.lane.b32.xlu1 %v10202_v47, %s10445_s0  ;;  %v10204_v45 = vpop.eup %10203 }
0x36be   :  { %v5351_v56 = vadd.f32 1.0, %v10204_v45 }
0x36c0   :  { %10205 = vrcp.f32 %v5351_v56 }
0x36ca   :  { %v10206_v7 = vpop.eup %10205 }
0x36cb   :  { %v5366_v63 = vsub.f32 1.0, %v10206_v7  ;;  %v5372_v37 = vmul.f32 %v10206_v7, %v11755_v22 }
0x370a   :  { %v5460_v48 = vpop.f32.mrb[74].mxu0 }
0x370b   :  { %v5471_v55 = vadd.f32 %v5460_v48, %v11397_v52  ;;  %v9208_v43 = vpop.f32.mrb[75].mxu0  ;;  %v5464_v44 = vadd.f32 %v5460_v48, %v11589_v9 }
0x370d   :  { %5473 = vrot.lane.b32.xlu0 %v5471_v55, %s10444_s23  ;;  %v8359_v50 = vmul.f32 -1.442695, %v5464_v44 }
0x370f   :  { %10207 = vpow2.f32 %v8359_v50 }
0x3719   :  { %v10208_v5 = vpop.eup %10207 }
0x371a   :  { %v5468_v51 = vadd.f32 1.0, %v10208_v5 }
0x371c   :  { %10209 = vrcp.f32 %v5468_v51 }
0x3726   :  { %v10210_v60 = vpop.eup %10209 }
0x3727   :  { %v5483_v59 = vsub.f32 1.0, %v10210_v60  ;;  %v5489_v4 = vmul.f32 %v10210_v60, %v11770_v58 }
0x372f   :  { %v5369_v6 = vpop.permute.xlu1 %5368 }
0x3730   :  { %v5371_v17 = vmul.f32 %v5369_v6, %v5366_v63 }
0x3732   :  { %v11789_v13 = vadd.f32 %v5372_v37, %v5371_v17 }
0x3734   :  { %9218 = vmatmul.mubr.msk.f32.vlgmr.msra.gmra.mrb[74].mxu1 %vm375_vm2, %v11789_v13 }
0x3735   :  { %9744 = vmatpush3.bf16.msra.mxu1 %v11443_v21  ;;  %9239 = vmatprep.mubr.msk.f32.mxu1 %vm10442_vm0, %v10443_v2 }
0x3736   :  { %9745 = vmatprep.subr.bf16.mxu1 %v10441_v1 }
0x3739   :  { %9747 = vmatpush3.bf16.msra.mxu1 %v11449_v25 }
0x373a   :  { %9754 = vmatprep.subr.bf16.mxu1 %v10441_v1 }
0x377f   :  { %v5474_v26 = vpop.permute.xlu0 %5473 }
0x3780   :  { %v5476_v41 = vmul.f32 %v10210_v60, %v5474_v26 }
0x3782   :  { %5478 = vrot.lane.b32.xlu1 %v5476_v41, %s10444_s23 }
0x37f4   :  { %v5479_v14 = vpop.permute.xlu1 %5478 }
0x37f5   :  { %v5481_v53 = vadd.f32 %v5479_v14, %v11589_v9 }
0x37f7   :  { %10211 = vtanh.f32 %v5481_v53 }
0x3801   :  { %v10212_v31 = vpop.eup %10211 }
0x3802   :  { %5485 = vrot.lane.b32.xlu0 %v10212_v31, %s10445_s0 }
0x3807   :  { %v5560_v49 = vpop.f32.mrb[74].mxu1 }
0x3808   :  { %v9219_v32 = vpop.f32.mrb[75].mxu1  ;;  %5565 = vrot.lane.b32.xlu0 %v5560_v49, %s10445_s0  ;;  %v5582_v9 = vadd.f32 %v5560_v49, %v11557_v15 }
0x3874   :  { %v5486_v24 = vpop.permute.xlu0 %5485 }
0x3875   :  { %v5488_v46 = vmul.f32 %v5486_v24, %v5483_v59 }
0x3877   :  { %v11805_v12 = vadd.f32 %v5489_v4, %v5488_v46 }
0x3879   :  { %5618 = vrot.lane.b32.xlu1 %v11805_v12, %s10445_s0 }
0x387a   :  { %v5566_v23 = vpop.permute.xlu0 %5565 }
0x387b   :  { %v5568_v35 = vadd.f32 %v5566_v23, %v11613_v42  ;;  %v5388_v42 = vld [vmem:[#allocation3 + $0xa8] sm:$0xff] }
0x387c   :  { %v5575_v55 = vadd.f32 %v5566_v23, %v5388_v42 }
0x387d   :  { %5584 = vrot.lane.b32.xlu1 %v5582_v9, %s10446_s4  ;;  %v8361_v27 = vmul.f32 -1.442695, %v5568_v35 }
0x387e   :  { %v8362_v56 = vmul.f32 -1.442695, %v5575_v55 }
0x387f   :  { %10213 = vpow2.f32 %v8361_v27 }
0x3889   :  { %v10214_v34 = vpop.eup %10213 }
0x388a   :  { %v5572_v8 = vadd.f32 1.0, %v10214_v34 }
0x388c   :  { %10215 = vrcp.f32 %v5572_v8 }
0x3896   :  { %v10216_v40 = vpop.eup %10215 }
0x38eb   :  { %v5619_v18 = vpop.permute.xlu1 %5618 }
0x38ec   :  { %9229 = vmatmul.mubr.msk.f32.vlgmr.msra.gmra.mrb[76].mxu0 %vm375_vm2, %v5619_v18 }
0x38ed   :  { %9750 = vmatpush3.bf16.msra.mxu0 %v11369_v11  ;;  %9250 = vmatprep.mubr.msk.f32.mxu0 %vm10442_vm0, %v10443_v2 }
0x38ee   :  { %9751 = vmatprep.subr.bf16.mxu0 %v10441_v1 }
0x38ef   :  { %v5585_v54 = vpop.permute.xlu1 %5584 }
0x38f0   :  { %v5587_v28 = vmul.f32 %v10216_v40, %v5585_v54 }
0x38f1   :  { %9753 = vmatpush3.bf16.msra.mxu0 %v11372_v10 }
0x38f2   :  { %5589 = vrot.lane.b32.xlu0 %v5587_v28, %s10444_s23  ;;  %9760 = vmatprep.subr.bf16.mxu0 %v10441_v1 }
0x3964   :  { %v5590_v47 = vpop.permute.xlu0 %5589 }
0x3965   :  { %v5592_v39 = vadd.f32 %v5590_v47, %v5388_v42 }
0x3967   :  { %10217 = vtanh.f32 %v5592_v39 }
0x3968   :  { %10219 = vpow2.f32 %v8362_v56 }
0x3971   :  { %v10218_v48 = vpop.eup %10217 }
0x3972   :  { %5596 = vrot.lane.b32.xlu1 %v10218_v48, %s10445_s0  ;;  %v10220_v7 = vpop.eup %10219 }
0x3973   :  { %v5579_v63 = vadd.f32 1.0, %v10220_v7 }
0x3975   :  { %10221 = vrcp.f32 %v5579_v63 }
0x397f   :  { %v10222_v6 = vpop.eup %10221 }
0x3980   :  { %v5594_v37 = vsub.f32 1.0, %v10222_v6  ;;  %v5600_v44 = vmul.f32 %v10222_v6, %v11789_v13 }
0x39bf   :  { %v5688_v43 = vpop.f32.mrb[76].mxu0 }
0x39c0   :  { %v5699_v36 = vadd.f32 %v5688_v43, %v11397_v52  ;;  %v9230_v45 = vpop.f32.mrb[77].mxu0  ;;  %v5692_v51 = vadd.f32 %v5688_v43, %v11595_v29 }
0x39c2   :  { %5701 = vrot.lane.b32.xlu0 %v5699_v36, %s10444_s23  ;;  %v8364_v60 = vmul.f32 -1.442695, %v5692_v51 }
0x39c4   :  { %10223 = vpow2.f32 %v8364_v60 }
0x39ce   :  { %v10224_v26 = vpop.eup %10223 }
0x39cf   :  { %v5696_v41 = vadd.f32 1.0, %v10224_v26 }
0x39d1   :  { %10225 = vrcp.f32 %v5696_v41  ;;  %v10385_v41 = vld [vmem:[#allocation3 + $0x70] sm:$0xff] }
0x39db   :  { %v10226_v14 = vpop.eup %10225 }
0x39dc   :  { %v5711_v46 = vsub.f32 1.0, %v10226_v14  ;;  %v5717_v23 = vmul.f32 %v10226_v14, %v11805_v12 }
0x39e4   :  { %v5597_v17 = vpop.permute.xlu1 %5596 }
0x39e5   :  { %v5599_v50 = vmul.f32 %v5597_v17, %v5594_v37 }
0x39e7   :  { %v11824_v5 = vadd.f32 %v5600_v44, %v5599_v50 }
0x39e9   :  { %9240 = vmatmul.mubr.msk.f32.vlgmr.msra.gmra.mrb[76].mxu1 %vm375_vm2, %v11824_v5 }
0x39ea   :  { %9756 = vmatpush3.bf16.msra.mxu1 %v11443_v21  ;;  %9261 = vmatprep.mubr.msk.f32.mxu1 %vm10442_vm0, %v10443_v2 }
0x39eb   :  { %9757 = vmatprep.subr.bf16.mxu1 %v10441_v1 }
0x39ee   :  { %9759 = vmatpush3.bf16.msra.mxu1 %v11449_v25 }
0x39ef   :  { %9766 = vmatprep.subr.bf16.mxu1 %v10441_v1 }
0x3a34   :  { %v5702_v53 = vpop.permute.xlu0 %5701 }
0x3a35   :  { %v5704_v31 = vmul.f32 %v10226_v14, %v5702_v53 }
0x3a37   :  { %5706 = vrot.lane.b32.xlu1 %v5704_v31, %s10444_s23 }
0x3aa9   :  { %v5707_v49 = vpop.permute.xlu1 %5706 }
0x3aaa   :  { %v5709_v32 = vadd.f32 %v5707_v49, %v11595_v29 }
0x3aac   :  { %10227 = vtanh.f32 %v5709_v32 }
0x3ab6   :  { %v10228_v59 = vpop.eup %10227 }
0x3ab7   :  { %5713 = vrot.lane.b32.xlu0 %v10228_v59, %s10445_s0 }
0x3abc   :  { %v5788_v24 = vpop.f32.mrb[76].mxu1 }
0x3abd   :  { %v9241_v4 = vpop.f32.mrb[77].mxu1  ;;  %5793 = vrot.lane.b32.xlu0 %v5788_v24, %s10445_s0  ;;  %v5810_v29 = vadd.f32 %v5788_v24, %v11557_v15 }
0x3b29   :  { %v5714_v9 = vpop.permute.xlu0 %5713 }
0x3b2a   :  { %v5716_v35 = vmul.f32 %v5714_v9, %v5711_v46 }
0x3b2c   :  { %v11840_v27 = vadd.f32 %v5717_v23, %v5716_v35 }
0x3b2e   :  { %5846 = vrot.lane.b32.xlu1 %v11840_v27, %s10445_s0 }
0x3b2f   :  { %v5794_v34 = vpop.permute.xlu0 %5793 }
0x3b30   :  { %v5796_v8 = vadd.f32 %v5794_v34, %v11607_v33  ;;  %v5616_v33 = vld [vmem:[#allocation3 + $0x98] sm:$0xff] }
0x3b31   :  { %v5803_v36 = vadd.f32 %v5794_v34, %v5616_v33 }
0x3b32   :  { %5812 = vrot.lane.b32.xlu1 %v5810_v29, %s10446_s4  ;;  %v8366_v18 = vmul.f32 -1.442695, %v5796_v8 }
0x3b33   :  { %v8367_v63 = vmul.f32 -1.442695, %v5803_v36 }
0x3b34   :  { %10229 = vpow2.f32 %v8366_v18 }
0x3b3e   :  { %v10230_v40 = vpop.eup %10229 }
0x3b3f   :  { %v5800_v54 = vadd.f32 1.0, %v10230_v40 }
0x3b41   :  { %10231 = vrcp.f32 %v5800_v54 }
0x3b4b   :  { %v10232_v42 = vpop.eup %10231 }
0x3ba0   :  { %v5847_v28 = vpop.permute.xlu1 %5846 }
0x3ba1   :  { %9251 = vmatmul.mubr.msk.f32.vlgmr.msra.gmra.mrb[78].mxu0 %vm375_vm2, %v5847_v28 }
0x3ba2   :  { %9762 = vmatpush3.bf16.msra.mxu0 %v11369_v11  ;;  %9272 = vmatprep.mubr.msk.f32.mxu0 %vm10442_vm0, %v10443_v2 }
0x3ba3   :  { %9763 = vmatprep.subr.bf16.mxu0 %v10441_v1 }
0x3ba4   :  { %v5813_v47 = vpop.permute.xlu1 %5812 }
0x3ba5   :  { %v5815_v39 = vmul.f32 %v10232_v42, %v5813_v47  ;;  %v10386_v42 = vld [vmem:[#allocation3 + $0x80] sm:$0xff] }
0x3ba6   :  { %9765 = vmatpush3.bf16.msra.mxu0 %v11372_v10 }
0x3ba7   :  { %5817 = vrot.lane.b32.xlu0 %v5815_v39, %s10444_s23  ;;  %9772 = vmatprep.subr.bf16.mxu0 %v10441_v1 }
0x3c19   :  { %v5818_v48 = vpop.permute.xlu0 %5817 }
0x3c1a   :  { %v5820_v55 = vadd.f32 %v5818_v48, %v5616_v33 }
0x3c1c   :  { %10233 = vtanh.f32 %v5820_v55 }
0x3c1d   :  { %10235 = vpow2.f32 %v8367_v63 }
0x3c26   :  { %v10234_v43 = vpop.eup %10233 }
0x3c27   :  { %5824 = vrot.lane.b32.xlu1 %v10234_v43, %s10445_s0  ;;  %v10236_v6 = vpop.eup %10235 }
0x3c28   :  { %v5807_v37 = vadd.f32 1.0, %v10236_v6 }
0x3c2a   :  { %10237 = vrcp.f32 %v5807_v37 }
0x3c34   :  { %v10238_v17 = vpop.eup %10237 }
0x3c35   :  { %v5822_v44 = vsub.f32 1.0, %v10238_v17  ;;  %v5828_v51 = vmul.f32 %v10238_v17, %v11824_v5 }
0x3c74   :  { %v5916_v45 = vpop.f32.mrb[78].mxu0 }
0x3c75   :  { %v5927_v56 = vadd.f32 %v5916_v45, %v11397_v52  ;;  %v9252_v7 = vpop.f32.mrb[79].mxu0  ;;  %v5920_v14 = vadd.f32 %v10385_v41, %v5916_v45 }
0x3c77   :  { %5929 = vrot.lane.b32.xlu0 %v5927_v56, %s10444_s23  ;;  %v8369_v53 = vmul.f32 -1.442695, %v5920_v14  ;;  %v5844_v56 = vld [vmem:[#allocation3 + $0x88] sm:$0xff] }
0x3c79   :  { %10239 = vpow2.f32 %v8369_v53 }
0x3c83   :  { %v10240_v31 = vpop.eup %10239 }
0x3c84   :  { %v5924_v49 = vadd.f32 1.0, %v10240_v31 }
0x3c86   :  { %10241 = vrcp.f32 %v5924_v49 }
0x3c90   :  { %v10242_v32 = vpop.eup %10241 }
0x3c91   :  { %v5939_v29 = vsub.f32 1.0, %v10242_v32  ;;  %v5945_v8 = vmul.f32 %v10242_v32, %v11840_v27 }
0x3c99   :  { %v5825_v50 = vpop.permute.xlu1 %5824 }
0x3c9a   :  { %v5827_v60 = vmul.f32 %v5825_v50, %v5822_v44 }
0x3c9c   :  { %v11859_v26 = vadd.f32 %v5828_v51, %v5827_v60 }
0x3c9e   :  { %9262 = vmatmul.mubr.msk.f32.vlgmr.msra.gmra.mrb[78].mxu1 %vm375_vm2, %v11859_v26 }
0x3c9f   :  { %9768 = vmatpush3.bf16.msra.mxu1 %v11443_v21  ;;  %9283 = vmatprep.mubr.msk.f32.mxu1 %vm10442_vm0, %v10443_v2 }
0x3ca0   :  { %9769 = vmatprep.subr.bf16.mxu1 %v10441_v1 }
0x3ca3   :  { %9771 = vmatpush3.bf16.msra.mxu1 %v11449_v25 }
0x3ca4   :  { %9778 = vmatprep.subr.bf16.mxu1 %v10441_v1 }
0x3ce9   :  { %v5930_v59 = vpop.permute.xlu0 %5929 }
0x3cea   :  { %v5932_v24 = vmul.f32 %v10242_v32, %v5930_v59 }
0x3cec   :  { %5934 = vrot.lane.b32.xlu1 %v5932_v24, %s10444_s23  ;;  %v6070_v24 = vld [vmem:[#allocation3 + $0x80] sm:$0xff] }
0x3d5e   :  { %v5935_v4 = vpop.permute.xlu1 %5934 }
0x3d5f   :  { %v5937_v46 = vadd.f32 %v10385_v41, %v5935_v4 }
0x3d61   :  { %10243 = vtanh.f32 %v5937_v46 }
0x3d6b   :  { %v10244_v9 = vpop.eup %10243 }
0x3d6c   :  { %5941 = vrot.lane.b32.xlu0 %v10244_v9, %s10445_s0 }
0x3d71   :  { %v6016_v23 = vpop.f32.mrb[78].mxu1 }
0x3d72   :  { %v9263_v35 = vpop.f32.mrb[79].mxu1  ;;  %6021 = vrot.lane.b32.xlu0 %v6016_v23, %s10445_s0  ;;  %v6038_v54 = vadd.f32 %v6016_v23, %v11557_v15 }
0x3dde   :  { %v5942_v34 = vpop.permute.xlu0 %5941 }
0x3ddf   :  { %v5944_v18 = vmul.f32 %v5942_v34, %v5939_v29 }
0x3de1   :  { %v11873_v40 = vadd.f32 %v5945_v8, %v5944_v18 }
0x3de3   :  { %6074 = vrot.lane.b32.xlu1 %v11873_v40, %s10445_s0 }
0x3de4   :  { %v6022_v28 = vpop.permute.xlu0 %6021 }
0x3de5   :  { %v6024_v47 = vadd.f32 %v10386_v42, %v6022_v28  ;;  %v6031_v37 = vadd.f32 %v6022_v28, %v5844_v56 }
0x3de7   :  { %6040 = vrot.lane.b32.xlu1 %v6038_v54, %s10446_s4  ;;  %v8371_v39 = vmul.f32 -1.442695, %v6024_v47  ;;  %v8372_v51 = vmul.f32 -1.442695, %v6031_v37 }
0x3de9   :  { %10245 = vpow2.f32 %v8371_v39 }
0x3df3   :  { %v10246_v33 = vpop.eup %10245 }
0x3df4   :  { %v6028_v48 = vadd.f32 1.0, %v10246_v33 }
0x3df6   :  { %10247 = vrcp.f32 %v6028_v48 }
0x3e00   :  { %v10248_v43 = vpop.eup %10247 }
0x3e55   :  { %v6075_v55 = vpop.permute.xlu1 %6074 }
0x3e56   :  { %9273 = vmatmul.mubr.msk.f32.vlgmr.msra.gmra.mrb[80].mxu0 %vm375_vm2, %v6075_v55 }
0x3e57   :  { %9774 = vmatpush3.bf16.msra.mxu0 %v11369_v11  ;;  %9294 = vmatprep.mubr.msk.f32.mxu0 %vm10442_vm0, %v10443_v2 }
0x3e58   :  { %9775 = vmatprep.subr.bf16.mxu0 %v10441_v1 }
0x3e59   :  { %v6041_v36 = vpop.permute.xlu1 %6040 }
0x3e5a   :  { %v6043_v45 = vmul.f32 %v10248_v43, %v6041_v36  ;;  %v6071_v36 = vld [vmem:[#allocation3 + $0x70] sm:$0xff] }
0x3e5b   :  { %9777 = vmatpush3.bf16.msra.mxu0 %v11372_v10 }
0x3e5c   :  { %6045 = vrot.lane.b32.xlu0 %v6043_v45, %s10444_s23  ;;  %9784 = vmatprep.subr.bf16.mxu0 %v10441_v1 }
0x3ece   :  { %v6046_v7 = vpop.permute.xlu0 %6045 }
0x3ecf   :  { %v6048_v63 = vadd.f32 %v6046_v7, %v5844_v56 }
0x3ed1   :  { %10249 = vtanh.f32 %v6048_v63 }
0x3ed2   :  { %10251 = vpow2.f32 %v8372_v51  ;;  %v6072_v51 = vld [vmem:[#allocation3 + $0x78] sm:$0xff] }
0x3edb   :  { %v10250_v6 = vpop.eup %10249 }
0x3edc   :  { %6052 = vrot.lane.b32.xlu1 %v10250_v6, %s10445_s0  ;;  %v10252_v60 = vpop.eup %10251 }
0x3edd   :  { %v6035_v41 = vadd.f32 1.0, %v10252_v60 }
0x3edf   :  { %10253 = vrcp.f32 %v6035_v41 }
0x3ee9   :  { %v10254_v14 = vpop.eup %10253 }
0x3eea   :  { %v6050_v53 = vsub.f32 1.0, %v10254_v14  ;;  %v6056_v49 = vmul.f32 %v10254_v14, %v11859_v26 }
0x3f29   :  { %v6144_v17 = vpop.f32.mrb[80].mxu0 }
0x3f2a   :  { %v6155_v44 = vadd.f32 %v6144_v17, %v11397_v52  ;;  %v9274_v50 = vpop.f32.mrb[81].mxu0  ;;  %v6148_v4 = vadd.f32 %v6144_v17, %v6070_v24 }
0x3f2c   :  { %6157 = vrot.lane.b32.xlu0 %v6155_v44, %s10444_s23  ;;  %v8374_v46 = vmul.f32 -1.442695, %v6148_v4 }
0x3f2e   :  { %10255 = vpow2.f32 %v8374_v46 }
0x3f38   :  { %v10256_v9 = vpop.eup %10255 }
0x3f39   :  { %v6152_v23 = vadd.f32 1.0, %v10256_v9 }
0x3f3b   :  { %10257 = vrcp.f32 %v6152_v23 }
0x3f45   :  { %v10258_v35 = vpop.eup %10257 }
0x3f46   :  { %v6167_v39 = vsub.f32 1.0, %v10258_v35  ;;  %v6173_v48 = vmul.f32 %v10258_v35, %v11873_v40 }
0x3f4e   :  { %v6053_v31 = vpop.permute.xlu1 %6052 }
0x3f4f   :  { %v6055_v32 = vmul.f32 %v6053_v31, %v6050_v53 }
0x3f51   :  { %v11891_v59 = vadd.f32 %v6056_v49, %v6055_v32 }
0x3f53   :  { %9284 = vmatmul.mubr.msk.f32.vlgmr.msra.gmra.mrb[80].mxu1 %vm375_vm2, %v11891_v59 }
0x3f54   :  { %9780 = vmatpush3.bf16.msra.mxu1 %v11443_v21  ;;  %9305 = vmatprep.mubr.msk.f32.mxu1 %vm10442_vm0, %v10443_v2 }
0x3f55   :  { %9781 = vmatprep.subr.bf16.mxu1 %v10441_v1 }
0x3f58   :  { %9783 = vmatpush3.bf16.msra.mxu1 %v11449_v25 }
0x3f59   :  { %9790 = vmatprep.subr.bf16.mxu1 %v10441_v1 }
0x3f9e   :  { %v6158_v29 = vpop.permute.xlu0 %6157 }
0x3f9f   :  { %v6160_v34 = vmul.f32 %v10258_v35, %v6158_v29 }
0x3fa1   :  { %6162 = vrot.lane.b32.xlu1 %v6160_v34, %s10444_s23 }
0x4013   :  { %v6163_v8 = vpop.permute.xlu1 %6162 }
0x4014   :  { %v6165_v18 = vadd.f32 %v6163_v8, %v6070_v24 }
0x4016   :  { %10259 = vtanh.f32 %v6165_v18  ;;  %v6298_v18 = vld [vmem:[#allocation3 + $0x90] sm:$0xff] }
0x4020   :  { %v10260_v54 = vpop.eup %10259 }
0x4021   :  { %6169 = vrot.lane.b32.xlu0 %v10260_v54, %s10445_s0 }
0x4026   :  { %v6244_v28 = vpop.f32.mrb[80].mxu1 }
0x4027   :  { %v9285_v42 = vpop.f32.mrb[81].mxu1  ;;  %6249 = vrot.lane.b32.xlu1 %v6244_v28, %s10445_s0  ;;  %v6266_v47 = vadd.f32 %v6244_v28, %v11557_v15 }
0x402b   :  { %6268 = vrot.lane.b32.xlu1 %v6266_v47, %s10446_s4 }
0x4093   :  { %v6170_v33 = vpop.permute.xlu0 %6169 }
0x4094   :  { %v6172_v55 = vmul.f32 %v6170_v33, %v6167_v39 }
0x4096   :  { %v11907_v43 = vadd.f32 %v6173_v48, %v6172_v55 }
0x4098   :  { %6302 = vrot.lane.b32.xlu0 %v11907_v43, %s10445_s0 }
0x4099   :  { %v6250_v45 = vpop.permute.xlu1 %6249 }
0x409a   :  { %v6252_v56 = vadd.f32 %v6250_v45, %v6071_v36  ;;  %v6259_v53 = vadd.f32 %v6250_v45, %v6072_v51 }
0x409c   :  { %v8376_v7 = vmul.f32 -1.442695, %v6252_v56  ;;  %v8377_v31 = vmul.f32 -1.442695, %v6259_v53 }
0x409d   :  { %v6269_v17 = vpop.permute.xlu1 %6268 }
0x409e   :  { %10261 = vpow2.f32 %v8376_v7 }
0x40a8   :  { %v10262_v63 = vpop.eup %10261 }
0x40a9   :  { %v6256_v6 = vadd.f32 1.0, %v10262_v63 }
0x40ab   :  { %10263 = vrcp.f32 %v6256_v6 }
0x40b5   :  { %v10264_v37 = vpop.eup %10263 }
0x40b6   :  { %v6271_v44 = vmul.f32 %v10264_v37, %v6269_v17  ;;  %v6299_v37 = vld [vmem:[#allocation3 + $0x60] sm:$0xff] }
0x40b8   :  { %6273 = vrot.lane.b32.xlu0 %v6271_v44, %s10444_s23 }
0x410a   :  { %v6303_v50 = vpop.permute.xlu0 %6302 }
0x410b   :  { %9295 = vmatmul.mubr.msk.f32.vlgmr.msra.gmra.mrb[82].mxu0 %vm375_vm2, %v6303_v50 }
0x410c   :  { %9786 = vmatpush3.bf16.msra.mxu0 %v11369_v11  ;;  %9316 = vmatprep.mubr.msk.f32.mxu0 %vm10442_vm0, %v10443_v2 }
0x410d   :  { %9787 = vmatprep.subr.bf16.mxu0 %v10441_v1 }
0x4110   :  { %9789 = vmatpush3.bf16.msra.mxu0 %v11372_v10 }
0x4111   :  { %9796 = vmatprep.subr.bf16.mxu0 %v10441_v1 }
0x412a   :  { %v6274_v60 = vpop.permute.xlu0 %6273 }
0x412b   :  { %v6276_v41 = vadd.f32 %v6274_v60, %v6072_v51 }
0x412d   :  { %10265 = vtanh.f32 %v6276_v41 }
0x412e   :  { %10267 = vpow2.f32 %v8377_v31 }
0x4137   :  { %v10266_v14 = vpop.eup %10265 }
0x4138   :  { %6280 = vrot.lane.b32.xlu1 %v10266_v14, %s10445_s0  ;;  %v10268_v49 = vpop.eup %10267 }
0x4139   :  { %v6263_v32 = vadd.f32 1.0, %v10268_v49 }
0x413b   :  { %10269 = vrcp.f32 %v6263_v32 }
0x4145   :  { %v10270_v24 = vpop.eup %10269 }
0x4146   :  { %v6278_v4 = vsub.f32 1.0, %v10270_v24  ;;  %v6284_v9 = vmul.f32 %v10270_v24, %v11891_v59 }
0x41aa   :  { %v6281_v46 = vpop.permute.xlu1 %6280 }
0x41ab   :  { %v6283_v23 = vmul.f32 %v6281_v46, %v6278_v4  ;;  %v6300_v46 = vld [vmem:[#allocation3 + $0x68] sm:$0xff] }
0x41ad   :  { %v11921_v35 = vadd.f32 %v6284_v9, %v6283_v23 }
0x41af   :  { %9306 = vmatmul.mubr.msk.f32.vlgmr.msra.gmra.mrb[82].mxu1 %vm375_vm2, %v11921_v35 }
0x41b0   :  { %9792 = vmatpush3.bf16.msra.mxu1 %v11443_v21  ;;  %9327 = vmatprep.mubr.msk.f32.mxu1 %vm10442_vm0, %v10443_v2 }
0x41b1   :  { %9793 = vmatprep.subr.bf16.mxu1 %v10441_v1 }
0x41b4   :  { %9795 = vmatpush3.bf16.msra.mxu1 %v11449_v25 }
0x41b5   :  { %9802 = vmatprep.subr.bf16.mxu1 %v10441_v1 }
0x41de   :  { %v6372_v29 = vpop.f32.mrb[82].mxu0 }
0x41df   :  { %v6383_v34 = vadd.f32 %v6372_v29, %v11397_v52  ;;  %v9296_v8 = vpop.f32.mrb[83].mxu0  ;;  %v6376_v54 = vadd.f32 %v6372_v29, %v6298_v18 }
0x41e1   :  { %6385 = vrot.lane.b32.xlu0 %v6383_v34, %s10444_s23  ;;  %v8379_v28 = vmul.f32 -1.442695, %v6376_v54 }
0x41e3   :  { %10271 = vpow2.f32 %v8379_v28 }
0x41ed   :  { %v10272_v42 = vpop.eup %10271 }
0x41ee   :  { %v6380_v47 = vadd.f32 1.0, %v10272_v42 }
0x41f0   :  { %10273 = vrcp.f32 %v6380_v47 }
0x41fa   :  { %v10274_v39 = vpop.eup %10273 }
0x41fb   :  { %v6395_v60 = vsub.f32 1.0, %v10274_v39  ;;  %v6401_v14 = vmul.f32 %v10274_v39, %v11907_v43 }
0x4253   :  { %v6386_v33 = vpop.permute.xlu0 %6385 }
0x4254   :  { %v6388_v48 = vmul.f32 %v10274_v39, %v6386_v33 }
0x4256   :  { %6390 = vrot.lane.b32.xlu1 %v6388_v48, %s10444_s23 }
0x4282   :  { %v6472_v55 = vpop.f32.mrb[82].mxu1 }
0x4283   :  { %v9307_v36 = vpop.f32.mrb[83].mxu1  ;;  %6477 = vrot.lane.b32.xlu1 %v6472_v55, %s10445_s0  ;;  %v6494_v63 = vadd.f32 %v6472_v55, %v11557_v15 }
0x42c8   :  { %v6391_v45 = vpop.permute.xlu1 %6390 }
0x42c9   :  { %v6393_v56 = vadd.f32 %v6391_v45, %v6298_v18 }
0x42cb   :  { %10275 = vtanh.f32 %v6393_v56  ;;  %v6526_v56 = vld [vmem:[#allocation3 + $0xa0] sm:$0xff] }
0x42d5   :  { %v10276_v7 = vpop.eup %10275 }
0x42d6   :  { %6397 = vrot.lane.b32.xlu0 %v10276_v7, %s10445_s0 }
0x42da   :  { %6496 = vrot.lane.b32.xlu0 %v6494_v63, %s10446_s4 }
0x42f5   :  { %v6478_v6 = vpop.permute.xlu1 %6477 }
0x42f6   :  { %v6480_v17 = vadd.f32 %v6478_v6, %v6299_v37  ;;  %v6487_v34 = vadd.f32 %v6478_v6, %v6300_v46 }
0x42f8   :  { %v8381_v44 = vmul.f32 -1.442695, %v6480_v17  ;;  %v8382_v8 = vmul.f32 -1.442695, %v6487_v34 }
0x42fa   :  { %10277 = vpow2.f32 %v8381_v44 }
0x4304   :  { %v10278_v50 = vpop.eup %10277 }
0x4305   :  { %v6484_v51 = vadd.f32 1.0, %v10278_v50 }
0x4307   :  { %10279 = vrcp.f32 %v6484_v51 }
0x4311   :  { %v10280_v49 = vpop.eup %10279 }
0x4348   :  { %v6398_v41 = vpop.permute.xlu0 %6397 }
0x4349   :  { %v6400_v53 = vmul.f32 %v6398_v41, %v6395_v60 }
0x434b   :  { %v11939_v31 = vadd.f32 %v6401_v14, %v6400_v53 }
0x434c   :  { %v6497_v32 = vpop.permute.xlu0 %6496 }
0x434d   :  { %v6499_v24 = vmul.f32 %v10280_v49, %v6497_v32  ;;  %6530 = vrot.lane.b32.xlu1 %v11939_v31, %s10445_s0  ;;  %v6527_v32 = vld [vmem:[#allocation3 + $0x50] sm:$0xff] }
0x434f   :  { %6501 = vrot.lane.b32.xlu0 %v6499_v24, %s10444_s23 }
0x43bf   :  { %v6531_v4 = vpop.permute.xlu1 %6530 }
0x43c0   :  { %9317 = vmatmul.mubr.msk.f32.vlgmr.msra.gmra.mrb[84].mxu0 %vm375_vm2, %v6531_v4 }
0x43c1   :  { %v6502_v9 = vpop.permute.xlu0 %6501  ;;  %9798 = vmatpush3.bf16.msra.mxu0 %v11369_v11  ;;  %9338 = vmatprep.mubr.msk.f32.mxu0 %vm10442_vm0, %v10443_v2 }
0x43c2   :  { %v6504_v23 = vadd.f32 %v6502_v9, %v6300_v46  ;;  %9799 = vmatprep.subr.bf16.mxu0 %v10441_v1 }
0x43c4   :  { %10281 = vtanh.f32 %v6504_v23 }
0x43c5   :  { %9801 = vmatpush3.bf16.msra.mxu0 %v11372_v10  ;;  %10283 = vpow2.f32 %v8382_v8 }
0x43c6   :  { %9808 = vmatprep.subr.bf16.mxu0 %v10441_v1 }
0x43ce   :  { %v10282_v29 = vpop.eup %10281 }
0x43cf   :  { %6508 = vrot.lane.b32.xlu1 %v10282_v29, %s10445_s0  ;;  %v10284_v18 = vpop.eup %10283 }
0x43d0   :  { %v6491_v54 = vadd.f32 1.0, %v10284_v18 }
0x43d2   :  { %10285 = vrcp.f32 %v6491_v54 }
0x43dc   :  { %v10286_v28 = vpop.eup %10285 }
0x43dd   :  { %v6506_v42 = vsub.f32 1.0, %v10286_v28  ;;  %v6512_v39 = vmul.f32 %v10286_v28, %v11921_v35 }
0x4441   :  { %v6509_v47 = vpop.permute.xlu1 %6508 }
0x4442   :  { %v6511_v33 = vmul.f32 %v6509_v47, %v6506_v42 }
0x4444   :  { %v11953_v48 = vadd.f32 %v6512_v39, %v6511_v33  ;;  %v6528_v39 = vld [vmem:[#allocation3 + $0x58] sm:$0xff] }
0x4446   :  { %9328 = vmatmul.mubr.msk.f32.vlgmr.msra.gmra.mrb[84].mxu1 %vm375_vm2, %v11953_v48 }
0x4447   :  { %9804 = vmatpush3.bf16.msra.mxu1 %v11443_v21  ;;  %9349 = vmatprep.mubr.msk.f32.mxu1 %vm10442_vm0, %v10443_v2 }
0x4448   :  { %9805 = vmatprep.subr.bf16.mxu1 %v10441_v1 }
0x444b   :  { %9807 = vmatpush3.bf16.msra.mxu1 %v11449_v25 }
0x444c   :  { %9814 = vmatprep.subr.bf16.mxu1 %v10441_v1 }
0x4493   :  { %v6600_v55 = vpop.f32.mrb[84].mxu0 }
0x4494   :  { %v6611_v36 = vadd.f32 %v6600_v55, %v11397_v52  ;;  %v9318_v45 = vpop.f32.mrb[85].mxu0  ;;  %v6604_v7 = vadd.f32 %v6600_v55, %v6526_v56 }
0x4496   :  { %6613 = vrot.lane.b32.xlu0 %v6611_v36, %s10444_s23  ;;  %v8384_v63 = vmul.f32 -1.442695, %v6604_v7 }
0x4498   :  { %10287 = vpow2.f32 %v8384_v63 }
0x44a2   :  { %v10288_v6 = vpop.eup %10287 }
0x44a3   :  { %v6608_v37 = vadd.f32 1.0, %v10288_v6 }
0x44a5   :  { %10289 = vrcp.f32 %v6608_v37 }
0x44af   :  { %v10290_v17 = vpop.eup %10289 }
0x44b0   :  { %v6623_v18 = vsub.f32 1.0, %v10290_v17  ;;  %v6629_v28 = vmul.f32 %v10290_v17, %v11939_v31 }
0x4508   :  { %v6614_v44 = vpop.permute.xlu0 %6613 }
0x4509   :  { %v6616_v50 = vmul.f32 %v10290_v17, %v6614_v44 }
0x450b   :  { %6618 = vrot.lane.b32.xlu1 %v6616_v50, %s10444_s23 }
0x4519   :  { %v6700_v51 = vpop.f32.mrb[84].mxu1 }
0x451a   :  { %6705 = vrot.lane.b32.xlu0 %v6700_v51, %s10445_s0  ;;  %v9329_v60 = vpop.f32.mrb[85].mxu1  ;;  %v6722_v41 = vadd.f32 %v6700_v51, %v11557_v15 }
0x451e   :  { %6724 = vrot.lane.b32.xlu0 %v6722_v41, %s10446_s4 }
0x457d   :  { %v6619_v14 = vpop.permute.xlu1 %6618 }
0x457e   :  { %v6621_v53 = vadd.f32 %v6619_v14, %v6526_v56 }
0x4580   :  { %10291 = vtanh.f32 %v6621_v53 }
0x458a   :  { %v10292_v49 = vpop.eup %10291 }
0x458b   :  { %6625 = vrot.lane.b32.xlu1 %v10292_v49, %s10445_s0 }
0x458c   :  { %v6706_v24 = vpop.permute.xlu0 %6705 }
0x458d   :  { %v6708_v4 = vadd.f32 %v6706_v24, %v6527_v32  ;;  %v6715_v56 = vadd.f32 %v6706_v24, %v6528_v39  ;;  %v6754_v24 = vld [vmem:[#allocation3 + $0xb0] sm:$0xff] }
0x458f   :  { %v8386_v46 = vmul.f32 -1.442695, %v6708_v4  ;;  %v8387_v7 = vmul.f32 -1.442695, %v6715_v56 }
0x4590   :  { %v6725_v34 = vpop.permute.xlu0 %6724 }
0x4591   :  { %10293 = vpow2.f32 %v8386_v46 }
0x459b   :  { %v10294_v9 = vpop.eup %10293 }
0x459c   :  { %v6712_v23 = vadd.f32 1.0, %v10294_v9 }
0x459e   :  { %10295 = vrcp.f32 %v6712_v23 }
0x45a8   :  { %v10296_v29 = vpop.eup %10295 }
0x45a9   :  { %v6727_v8 = vmul.f32 %v10296_v29, %v6725_v34 }
0x45ab   :  { %6729 = vrot.lane.b32.xlu1 %v6727_v8, %s10444_s23 }
0x45fd   :  { %v6626_v54 = vpop.permute.xlu1 %6625 }
0x45fe   :  { %v6628_v42 = vmul.f32 %v6626_v54, %v6623_v18 }
0x4600   :  { %v11972_v47 = vadd.f32 %v6629_v28, %v6628_v42  ;;  %v6755_v28 = vld [vmem:[#allocation3 + $0x40] sm:$0xff] }
0x4602   :  { %6758 = vrot.lane.b32.xlu0 %v11972_v47, %s10445_s0 }
0x461d   :  { %v6730_v33 = vpop.permute.xlu1 %6729 }
0x461e   :  { %v6732_v55 = vadd.f32 %v6730_v33, %v6528_v39 }
0x4620   :  { %10297 = vtanh.f32 %v6732_v55 }
0x4621   :  { %10299 = vpow2.f32 %v8387_v7 }
0x462a   :  { %v10298_v36 = vpop.eup %10297 }
0x462b   :  { %6736 = vrot.lane.b32.xlu1 %v10298_v36, %s10445_s0  ;;  %v10300_v63 = vpop.eup %10299 }
0x462c   :  { %v6719_v6 = vadd.f32 1.0, %v10300_v63 }
0x462e   :  { %10301 = vrcp.f32 %v6719_v6 }
0x4638   :  { %v10302_v37 = vpop.eup %10301 }
0x4639   :  { %v6734_v17 = vsub.f32 1.0, %v10302_v37  ;;  %v6740_v50 = vmul.f32 %v10302_v37, %v11953_v48  ;;  %v6756_v37 = vld [vmem:[#allocation3 + $0x48] sm:$0xff] }
0x4674   :  { %v6759_v45 = vpop.permute.xlu0 %6758 }
0x4675   :  { %9339 = vmatmul.mubr.msk.f32.vlgmr.msra.gmra.mrb[86].mxu0 %vm375_vm2, %v6759_v45 }
0x4676   :  { %9810 = vmatpush3.bf16.msra.mxu0 %v11369_v11  ;;  %9360 = vmatprep.mubr.msk.f32.mxu0 %vm10442_vm0, %v10443_v2 }
0x4677   :  { %9811 = vmatprep.subr.bf16.mxu0 %v10441_v1 }
0x467a   :  { %9813 = vmatpush3.bf16.msra.mxu0 %v11372_v10 }
0x467b   :  { %9820 = vmatprep.subr.bf16.mxu0 %v10441_v1 }
0x469d   :  { %v6737_v44 = vpop.permute.xlu1 %6736 }
0x469e   :  { %v6739_v51 = vmul.f32 %v6737_v44, %v6734_v17 }
0x46a0   :  { %v11985_v60 = vadd.f32 %v6740_v50, %v6739_v51 }
0x46a2   :  { %9350 = vmatmul.mubr.msk.f32.vlgmr.msra.gmra.mrb[86].mxu1 %vm375_vm2, %v11985_v60 }
0x46a3   :  { %9816 = vmatpush3.bf16.msra.mxu1 %v11443_v21  ;;  %9371 = vmatprep.mubr.msk.f32.mxu1 %vm10442_vm0, %v10443_v2 }
0x46a4   :  { %9817 = vmatprep.subr.bf16.mxu1 %v10441_v1 }
0x46a7   :  { %9819 = vmatpush3.bf16.msra.mxu1 %v11449_v25 }
0x46a8   :  { %9826 = vmatprep.subr.bf16.mxu1 %v10441_v1 }
0x4748   :  { %v6828_v41 = vpop.f32.mrb[86].mxu0 }
0x4749   :  { %v6839_v14 = vadd.f32 %v6828_v41, %v11397_v52  ;;  %v9340_v53 = vpop.f32.mrb[87].mxu0  ;;  %v6832_v4 = vadd.f32 %v6828_v41, %v6754_v24 }
0x474b   :  { %6841 = vrot.lane.b32.xlu0 %v6839_v14, %s10444_s23  ;;  %v8389_v46 = vmul.f32 -1.442695, %v6832_v4 }
0x474d   :  { %10303 = vpow2.f32 %v8389_v46 }
0x4757   :  { %v10304_v9 = vpop.eup %10303 }
0x4758   :  { %v6836_v23 = vadd.f32 1.0, %v10304_v9 }
0x475a   :  { %10305 = vrcp.f32 %v6836_v23 }
0x4764   :  { %v10306_v29 = vpop.eup %10305 }
0x4765   :  { %v6851_v50 = vsub.f32 1.0, %v10306_v29  ;;  %v6857_v41 = vmul.f32 %v10306_v29, %v11972_v47 }
0x4775   :  { %v6928_v49 = vpop.f32.mrb[86].mxu1 }
0x4776   :  { %6933 = vrot.lane.b32.xlu0 %v6928_v49, %s10445_s0  ;;  %v9351_v32 = vpop.f32.mrb[87].mxu1  ;;  %v6950_v18 = vadd.f32 %v6928_v49, %v11557_v15 }
0x47bd   :  { %v6842_v34 = vpop.permute.xlu0 %6841 }
0x47be   :  { %v6844_v8 = vmul.f32 %v10306_v29, %v6842_v34 }
0x47c0   :  { %6846 = vrot.lane.b32.xlu1 %v6844_v8, %s10444_s23 }
0x47c4   :  { %6952 = vrot.lane.b32.xlu1 %v6950_v18, %s10446_s4 }
0x47e8   :  { %v6934_v54 = vpop.permute.xlu0 %6933 }
0x47e9   :  { %v6936_v42 = vadd.f32 %v6934_v54, %v6755_v28  ;;  %v6943_v32 = vadd.f32 %v6934_v54, %v6756_v37 }
0x47eb   :  { %v8391_v39 = vmul.f32 -1.442695, %v6936_v42 }
0x47ed   :  { %10307 = vpow2.f32 %v8391_v39 }
0x47f7   :  { %v10308_v33 = vpop.eup %10307 }
0x47f8   :  { %v6940_v55 = vadd.f32 1.0, %v10308_v33 }
0x47fa   :  { %10309 = vrcp.f32 %v6940_v55 }
0x4804   :  { %v10310_v56 = vpop.eup %10309 }
0x4832   :  { %v6847_v36 = vpop.permute.xlu1 %6846 }
0x4833   :  { %v6849_v45 = vadd.f32 %v6847_v36, %v6754_v24  ;;  %v8392_v24 = vmul.f32 -1.442695, %v6943_v32 }
0x4835   :  { %10311 = vtanh.f32 %v6849_v45  ;;  %v6982_v45 = vld [vmem:[#allocation3 + $0xc0] sm:$0xff] }
0x4836   :  { %v6953_v7 = vpop.permute.xlu1 %6952 }
0x4837   :  { %v6955_v63 = vmul.f32 %v10310_v56, %v6953_v7 }
0x4839   :  { %6957 = vrot.lane.b32.xlu1 %v6955_v63, %s10444_s23 }
0x483f   :  { %v10312_v6 = vpop.eup %10311 }
0x4840   :  { %6853 = vrot.lane.b32.xlu0 %v10312_v6, %s10445_s0 }
0x48ab   :  { %v6958_v17 = vpop.permute.xlu1 %6957 }
0x48ac   :  { %v6960_v44 = vadd.f32 %v6958_v17, %v6756_v37 }
0x48ae   :  { %10313 = vtanh.f32 %v6960_v44 }
0x48af   :  { %10315 = vpow2.f32 %v8392_v24 }
0x48b2   :  { %v6854_v51 = vpop.permute.xlu0 %6853 }
0x48b3   :  { %v6856_v14 = vmul.f32 %v6854_v51, %v6851_v50  ;;  %v6983_v50 = vld [vmem:[#allocation3 + $0x30] sm:$0xff] }
0x48b5   :  { %v12004_v53 = vadd.f32 %v6857_v41, %v6856_v14 }
0x48b7   :  { %6986 = vrot.lane.b32.xlu0 %v12004_v53, %s10445_s0 }
0x48b8   :  { %v10314_v49 = vpop.eup %10313 }
0x48b9   :  { %6964 = vrot.lane.b32.xlu1 %v10314_v49, %s10445_s0  ;;  %v10316_v4 = vpop.eup %10315 }
0x48ba   :  { %v6947_v46 = vadd.f32 1.0, %v10316_v4 }
0x48bc   :  { %10317 = vrcp.f32 %v6947_v46 }
0x48c6   :  { %v10318_v9 = vpop.eup %10317 }
0x48c7   :  { %v6962_v29 = vsub.f32 1.0, %v10318_v9  ;;  %v6968_v8 = vmul.f32 %v10318_v9, %v11985_v60 }
0x4929   :  { %v6987_v23 = vpop.permute.xlu0 %6986 }
0x492a   :  { %9361 = vmatmul.mubr.msk.f32.vlgmr.msra.gmra.mrb[88].mxu0 %vm375_vm2, %v6987_v23 }
0x492b   :  { %v6965_v34 = vpop.permute.xlu1 %6964  ;;  %9822 = vmatpush3.bf16.msra.mxu0 %v11369_v11  ;;  %9382 = vmatprep.mubr.msk.f32.mxu0 %vm10442_vm0, %v10443_v2 }
0x492c   :  { %v6967_v18 = vmul.f32 %v6965_v34, %v6962_v29  ;;  %9823 = vmatprep.subr.bf16.mxu0 %v10441_v1  ;;  %v6984_v34 = vld [vmem:[#allocation3 + $0x38] sm:$0xff] }
0x492e   :  { %v12015_v54 = vadd.f32 %v6968_v8, %v6967_v18 }
0x492f   :  { %9825 = vmatpush3.bf16.msra.mxu0 %v11372_v10 }
0x4930   :  { %9372 = vmatmul.mubr.msk.f32.vlgmr.msra.gmra.mrb[88].mxu1 %vm375_vm2, %v12015_v54  ;;  %9832 = vmatprep.subr.bf16.mxu0 %v10441_v1 }
0x4931   :  { %9828 = vmatpush3.bf16.msra.mxu1 %v11443_v21  ;;  %9393 = vmatprep.mubr.msk.f32.mxu1 %vm10442_vm0, %v10443_v2 }
0x4932   :  { %9829 = vmatprep.subr.bf16.mxu1 %v10441_v1 }
0x4935   :  { %9831 = vmatpush3.bf16.msra.mxu1 %v11449_v25 }
0x4936   :  { %9838 = vmatprep.subr.bf16.mxu1 %v10441_v1 }
0x49fd   :  { %v7056_v28 = vpop.f32.mrb[88].mxu0 }
0x49fe   :  { %v7067_v42 = vadd.f32 %v7056_v28, %v11397_v52  ;;  %v9362_v39 = vpop.f32.mrb[89].mxu0  ;;  %v7060_v56 = vadd.f32 %v7056_v28, %v6982_v45 }
0x4a00   :  { %7069 = vrot.lane.b32.xlu0 %v7067_v42, %s10444_s23  ;;  %v8394_v7 = vmul.f32 -1.442695, %v7060_v56 }
0x4a02   :  { %10319 = vpow2.f32 %v8394_v7 }
0x4a03   :  { %v7156_v33 = vpop.f32.mrb[88].mxu1 }
0x4a04   :  { %7161 = vrot.lane.b32.xlu1 %v7156_v33, %s10445_s0  ;;  %v9373_v55 = vpop.f32.mrb[89].mxu1  ;;  %v7178_v36 = vadd.f32 %v7156_v33, %v11557_v15 }
0x4a08   :  { %7180 = vrot.lane.b32.xlu1 %v7178_v36, %s10446_s4 }
0x4a0c   :  { %v10320_v63 = vpop.eup %10319 }
0x4a0d   :  { %v7064_v6 = vadd.f32 1.0, %v10320_v63 }
0x4a0f   :  { %10321 = vrcp.f32 %v7064_v6 }
0x4a19   :  { %v10322_v37 = vpop.eup %10321 }
0x4a1a   :  { %v7079_v33 = vsub.f32 1.0, %v10322_v37  ;;  %v7085_v36 = vmul.f32 %v10322_v37, %v12004_v53 }
0x4a72   :  { %v7070_v17 = vpop.permute.xlu0 %7069 }
0x4a73   :  { %v7072_v44 = vmul.f32 %v10322_v37, %v7070_v17 }
0x4a75   :  { %7074 = vrot.lane.b32.xlu0 %v7072_v44, %s10444_s23 }
0x4a76   :  { %v7162_v51 = vpop.permute.xlu1 %7161 }
0x4a77   :  { %v7164_v41 = vadd.f32 %v7162_v51, %v6983_v50  ;;  %v7171_v42 = vadd.f32 %v7162_v51, %v6984_v34 }
0x4a79   :  { %v8396_v14 = vmul.f32 -1.442695, %v7164_v41  ;;  %v8397_v39 = vmul.f32 -1.442695, %v7171_v42 }
0x4a7a   :  { %v7181_v4 = vpop.permute.xlu1 %7180 }
0x4a7b   :  { %10323 = vpow2.f32 %v8396_v14 }
0x4a85   :  { %v10324_v49 = vpop.eup %10323 }
0x4a86   :  { %v7168_v32 = vadd.f32 1.0, %v10324_v49 }
0x4a88   :  { %10325 = vrcp.f32 %v7168_v32 }
0x4a92   :  { %v10326_v24 = vpop.eup %10325 }
0x4a93   :  { %v7183_v46 = vmul.f32 %v10326_v24, %v7181_v4 }
0x4a95   :  { %7185 = vrot.lane.b32.xlu0 %v7183_v46, %s10444_s23 }
0x4ae7   :  { %v7075_v9 = vpop.permute.xlu0 %7074 }
0x4ae8   :  { %v7077_v23 = vadd.f32 %v7075_v9, %v6982_v45  ;;  %v7210_v9 = vld [vmem:[#allocation3 + $0xd0] sm:$0xff] }
0x4aea   :  { %10327 = vtanh.f32 %v7077_v23 }
0x4af4   :  { %v10328_v29 = vpop.eup %10327 }
0x4af5   :  { %7081 = vrot.lane.b32.xlu1 %v10328_v29, %s10445_s0 }
0x4b07   :  { %v7186_v8 = vpop.permute.xlu0 %7185 }
0x4b08   :  { %v7188_v18 = vadd.f32 %v7186_v8, %v6984_v34  ;;  %v7211_v34 = vld [vmem:[#allocation3 + $0x20] sm:$0xff] }
0x4b0a   :  { %10329 = vtanh.f32 %v7188_v18 }
0x4b0b   :  { %10331 = vpow2.f32 %v8397_v39 }
0x4b14   :  { %v10330_v28 = vpop.eup %10329 }
0x4b15   :  { %7192 = vrot.lane.b32.xlu1 %v10330_v28, %s10445_s0  ;;  %v10332_v7 = vpop.eup %10331 }
0x4b16   :  { %v7175_v63 = vadd.f32 1.0, %v10332_v7 }
0x4b18   :  { %10333 = vrcp.f32 %v7175_v63 }
0x4b22   :  { %v10334_v6 = vpop.eup %10333 }
0x4b23   :  { %v7190_v17 = vsub.f32 1.0, %v10334_v6  ;;  %v7196_v50 = vmul.f32 %v10334_v6, %v12015_v54 }
0x4b67   :  { %v7082_v55 = vpop.permute.xlu1 %7081 }
0x4b68   :  { %v7084_v56 = vmul.f32 %v7082_v55, %v7079_v33 }
0x4b6a   :  { %v12037_v45 = vadd.f32 %v7085_v36, %v7084_v56 }
0x4b6c   :  { %7214 = vrot.lane.b32.xlu0 %v12037_v45, %s10445_s0 }
0x4b87   :  { %v7193_v44 = vpop.permute.xlu1 %7192 }
0x4b88   :  { %v7195_v51 = vmul.f32 %v7193_v44, %v7190_v17 }
0x4b8a   :  { %v12042_v41 = vadd.f32 %v7196_v50, %v7195_v51  ;;  %v7212_v51 = vld [vmem:[#allocation3 + $0x28] sm:$0xff] }
0x4b8c   :  { %9394 = vmatmul.mubr.msk.f32.vlgmr.msra.gmra.mrb[90].mxu1 %vm375_vm2, %v12042_v41 }
0x4b8d   :  { %9840 = vmatpush3.bf16.msra.mxu1 %v11443_v21  ;;  %9415 = vmatprep.mubr.msk.f32.mxu1 %vm10442_vm0, %v10443_v2 }
0x4b8e   :  { %9841 = vmatprep.subr.bf16.mxu1 %v10441_v1 }
0x4b91   :  { %9843 = vmatpush3.bf16.msra.mxu1 %v11449_v25 }
0x4b92   :  { %9850 = vmatprep.subr.bf16.mxu1 %v10441_v1 }
0x4bde   :  { %v7215_v37 = vpop.permute.xlu0 %7214 }
0x4bdf   :  { %9383 = vmatmul.mubr.msk.f32.vlgmr.msra.gmra.mrb[90].mxu0 %vm375_vm2, %v7215_v37 }
0x4be0   :  { %9834 = vmatpush3.bf16.msra.mxu0 %v11369_v11  ;;  %9404 = vmatprep.mubr.msk.f32.mxu0 %vm10442_vm0, %v10443_v2 }
0x4be1   :  { %9835 = vmatprep.subr.bf16.mxu0 %v10441_v1 }
0x4be4   :  { %9837 = vmatpush3.bf16.msra.mxu0 %v11372_v10 }
0x4be5   :  { %9844 = vmatprep.subr.bf16.mxu0 %v10441_v1 }
0x4c5f   :  { %v7384_v14 = vpop.f32.mrb[90].mxu1 }
0x4c60   :  { %7389 = vrot.lane.b32.xlu1 %v7384_v14, %s10445_s0  ;;  %v9395_v49 = vpop.f32.mrb[91].mxu1  ;;  %v7406_v46 = vadd.f32 %v7384_v14, %v11557_v15 }
0x4cb2   :  { %v7284_v32 = vpop.f32.mrb[90].mxu0 }
0x4cb3   :  { %v7295_v24 = vadd.f32 %v7284_v32, %v11397_v52  ;;  %v9384_v4 = vpop.f32.mrb[91].mxu0  ;;  %v7288_v23 = vadd.f32 %v7284_v32, %v7210_v9 }
0x4cb5   :  { %7297 = vrot.lane.b32.xlu0 %v7295_v24, %s10444_s23  ;;  %v8399_v8 = vmul.f32 -1.442695, %v7288_v23 }
0x4cb7   :  { %10335 = vpow2.f32 %v8399_v8 }
0x4cb9   :  { %7408 = vrot.lane.b32.xlu0 %v7406_v46, %s10446_s4 }
0x4cc1   :  { %v10336_v42 = vpop.eup %10335 }
0x4cc2   :  { %v7292_v39 = vadd.f32 1.0, %v10336_v42 }
0x4cd2   :  { %v7390_v29 = vpop.permute.xlu1 %7389 }
0x4cd3   :  { %v7392_v18 = vadd.f32 %v7390_v29, %v7211_v34  ;;  %v7399_v24 = vadd.f32 %v7390_v29, %v7212_v51 }
0x4cd5   :  { %v8401_v28 = vmul.f32 -1.442695, %v7392_v18  ;;  %v8402_v4 = vmul.f32 -1.442695, %v7399_v24 }
0x4cd7   :  { %10337 = vpow2.f32 %v8401_v28 }
0x4cd8   :  { %10339 = vrcp.f32 %v7292_v39 }
0x4ce1   :  { %v10338_v33 = vpop.eup %10337 }
0x4ce2   :  { %v7396_v55 = vadd.f32 1.0, %v10338_v33  ;;  %v10340_v36 = vpop.eup %10339 }
0x4ce3   :  { %v7307_v34 = vsub.f32 1.0, %v10340_v36  ;;  %v7313_v18 = vmul.f32 %v10340_v36, %v12037_v45 }
0x4ce4   :  { %10341 = vrcp.f32 %v7396_v55 }
0x4cee   :  { %v10342_v63 = vpop.eup %10341 }
0x4d27   :  { %v7298_v56 = vpop.permute.xlu0 %7297 }
0x4d28   :  { %v7300_v7 = vmul.f32 %v10340_v36, %v7298_v56 }
0x4d2a   :  { %7302 = vrot.lane.b32.xlu1 %v7300_v7, %s10444_s23 }
0x4d2b   :  { %v7409_v6 = vpop.permute.xlu0 %7408 }
0x4d2c   :  { %v7411_v17 = vmul.f32 %v10342_v63, %v7409_v6 }
0x4d2e   :  { %7413 = vrot.lane.b32.xlu0 %v7411_v17, %s10444_s23 }
0x4d9c   :  { %v7303_v44 = vpop.permute.xlu1 %7302 }
0x4d9d   :  { %v7305_v50 = vadd.f32 %v7303_v44, %v7210_v9 }
0x4d9f   :  { %10343 = vtanh.f32 %v7305_v50 }
0x4da0   :  { %v7414_v37 = vpop.permute.xlu0 %7413 }
0x4da1   :  { %v7416_v14 = vadd.f32 %v7414_v37, %v7212_v51 }
0x4da3   :  { %10345 = vtanh.f32 %v7416_v14 }
0x4da4   :  { %10347 = vpow2.f32 %v8402_v4 }
0x4da9   :  { %v10344_v49 = vpop.eup %10343 }
0x4daa   :  { %7309 = vrot.lane.b32.xlu1 %v10344_v49, %s10445_s0  ;;  %v7438_v49 = vld [vmem:[#allocation3 + $0xe0] sm:$0xff] }
0x4dad   :  { %v10346_v32 = vpop.eup %10345 }
0x4dae   :  { %7420 = vrot.lane.b32.xlu0 %v10346_v32, %s10445_s0  ;;  %v10348_v46 = vpop.eup %10347 }
0x4daf   :  { %v7403_v23 = vadd.f32 1.0, %v10348_v46 }
0x4db1   :  { %10349 = vrcp.f32 %v7403_v23 }
0x4dbb   :  { %v10350_v8 = vpop.eup %10349 }
0x4dbc   :  { %v7418_v39 = vsub.f32 1.0, %v10350_v8  ;;  %v7424_v55 = vmul.f32 %v10350_v8, %v12042_v41 }
0x4e1c   :  { %v7310_v9 = vpop.permute.xlu1 %7309 }
0x4e1d   :  { %v7312_v28 = vmul.f32 %v7310_v9, %v7307_v34  ;;  %v7440_v9 = vld [vmem:[#allocation3 + $0x18] sm:$0xff] }
0x4e1f   :  { %v12069_v42 = vadd.f32 %v7313_v18, %v7312_v28 }
0x4e20   :  { %v7421_v33 = vpop.permute.xlu0 %7420 }
0x4e21   :  { %v7423_v56 = vmul.f32 %v7421_v33, %v7418_v39  ;;  %7442 = vrot.lane.b32.xlu1 %v12069_v42, %s10445_s0  ;;  %v4463_v33 = vmax.f32 %v11653_v20, 0.0  ;;  %v5602_v20 = vmax.f32 %v11805_v12, 0.0  ;;  %v6742_v12 = vmax.f32 %v11972_v47, 0.0 }
0x4e23   :  { %v12074_v29 = vadd.f32 %v7424_v55, %v7423_v56  ;;  %v4690_v55 = vmax.f32 %v11663_v30, 0.0  ;;  %v4918_v56 = vmax.f32 %v11699_v61, 0.0  ;;  %v5830_v30 = vmax.f32 %v11840_v27, 0.0 }
0x4e24   :  { %v6058_v61 = vmax.f32 %v11873_v40, 0.0  ;;  %v6970_v27 = vmax.f32 %v12004_v53, 0.0  ;;  %v7198_v40 = vmax.f32 %v12037_v45, 0.0  ;;  %v4462_v53 = vmax.f32 %v11479_v19, 0.0 }
0x4e25   :  { %9416 = vmatmul.mubr.msk.f32.vlgmr.msra.gmra.mrb[92].mxu1 %vm375_vm2, %v12074_v29 }
0x4e26   :  { %9852 = vmatpush3.bf16.msra.mxu1 %v11443_v21  ;;  %9437 = vmatprep.mubr.msk.f32.mxu1 %vm10442_vm0, %v10443_v2 }
0x4e27   :  { %9853 = vmatprep.subr.bf16.mxu1 %v10441_v1 }
0x4e2a   :  { %9855 = vmatpush3.bf16.msra.mxu1 %v11449_v25 }
0x4e93   :  { %v7443_v36 = vpop.permute.xlu1 %7442 }
0x4e94   :  { %9405 = vmatmul.mubr.msk.f32.vlgmr.msra.gmra.mrb[92].mxu0 %vm375_vm2, %v7443_v36  ;;  %v5146_v36 = vmax.f32 %v11734_v3, 0.0  ;;  %v6286_v3 = vmax.f32 %v11907_v43, 0.0  ;;  %v7426_v43 = vmax.f32 %v12069_v42, 0.0 }
0x4e95   :  { %9846 = vmatpush3.bf16.msra.mxu0 %v11369_v11  ;;  %9426 = vmatprep.mubr.msk.f32.mxu0 %vm10442_vm0, %v10443_v2  ;;  %v7439_v11 = vld [vmem:[#allocation3 + $0x10] sm:$0xff] }
0x4e96   :  { %9847 = vmatprep.subr.bf16.mxu0 %v10441_v1 }
0x4e99   :  { %9849 = vmatpush3.bf16.msra.mxu0 %v11372_v10 }
0x4ef8   :  { %v7612_v21 = vpop.f32.mrb[92].mxu1 }
0x4ef9   :  { %7617 = vrot.lane.b32.xlu0 %v7612_v21, %s10445_s0  ;;  %v9417_v7 = vpop.f32.mrb[93].mxu1  ;;  %v7634_v63 = vadd.f32 %v7612_v21, %v11557_v15  ;;  %v5374_v21 = vmax.f32 %v11770_v58, 0.0  ;;  %v6514_v58 = vmax.f32 %v11939_v31, 0.0 }
0x4efd   :  { %7636 = vrot.lane.b32.xlu0 %v7634_v63, %s10446_s4 }
0x4f67   :  { %v7512_v25 = vpop.f32.mrb[92].mxu0 }
0x4f68   :  { %v7523_v6 = vadd.f32 %v7512_v25, %v11397_v52  ;;  %v9406_v17 = vpop.f32.mrb[93].mxu0  ;;  %v7516_v32 = vadd.f32 %v7512_v25, %v7438_v49 }
0x4f6a   :  { %7525 = vrot.lane.b32.xlu1 %v7523_v6, %s10444_s23  ;;  %v8404_v24 = vmul.f32 -1.442695, %v7516_v32 }
0x4f6b   :  { %v7618_v2 = vpop.permute.xlu0 %7617 }
0x4f6c   :  { %v7620_v44 = vadd.f32 %v7618_v2, %v7439_v11  ;;  %v7627_v63 = vadd.f32 %v7618_v2, %v7440_v9 }
0x4f6e   :  { %v8406_v1 = vmul.f32 -1.442695, %v7620_v44  ;;  %v8407_v25 = vmul.f32 -1.442695, %v7627_v63 }
0x4f6f   :  { %v7637_v37 = vpop.permute.xlu0 %7636 }
0x4f70   :  { %10351 = vpow2.f32 %v8406_v1 }
0x4f7a   :  { %v10352_v10 = vpop.eup %10351 }
0x4f7b   :  { %v7624_v50 = vadd.f32 1.0, %v10352_v10 }
0x4f7d   :  { %10353 = vrcp.f32 %v7624_v50 }
0x4f7e   :  { %10355 = vpow2.f32 %v8404_v24 }
0x4f87   :  { %v10354_v51 = vpop.eup %10353 }
0x4f88   :  { %v7639_v14 = vmul.f32 %v10354_v51, %v7637_v37  ;;  %v10356_v4 = vpop.eup %10355 }
0x4f89   :  { %v7520_v46 = vadd.f32 1.0, %v10356_v4 }
0x4f8a   :  { %7641 = vrot.lane.b32.xlu0 %v7639_v14, %s10444_s23 }
0x4f8b   :  { %10357 = vrcp.f32 %v7520_v46 }
0x4f95   :  { %v12095_v23 = vpop.eup %10357 }
0x4f96   :  { %v7535_v4 = vsub.f32 1.0, %v12095_v23 }
0x4fdc   :  { %v7526_v34 = vpop.permute.xlu1 %7525 }
0x4fdd   :  { %v7528_v8 = vmul.f32 %v12095_v23, %v7526_v34  ;;  %v7541_v34 = vmul.f32 %v12095_v23, %v12069_v42  ;;  %v5147_v42 = vmax.f32 %v11755_v22, 0.0  ;;  %v5375_v23 = vmax.f32 %v11789_v13, 0.0 }
0x4fde   :  { %v6287_v22 = vmax.f32 %v11921_v35, 0.0  ;;  %v6515_v13 = vmax.f32 %v11953_v48, 0.0  ;;  %v7427_v35 = vmax.f32 %v12074_v29, 0.0 }
0x4fdf   :  { %7530 = vrot.lane.b32.xlu1 %v7528_v8, %s10444_s23 }
0x4ffc   :  { %v7642_v18 = vpop.permute.xlu0 %7641 }
0x4ffd   :  { %v7644_v28 = vadd.f32 %v7642_v18, %v7440_v9 }
0x4fff   :  { %10359 = vtanh.f32 %v7644_v28 }
0x5009   :  { %v10360_v39 = vpop.eup %10359 }
0x500a   :  { %7648 = vrot.lane.b32.xlu0 %v10360_v39, %s10445_s0  ;;  %v4691_v39 = vmax.f32 %v11688_v38, 0.0  ;;  %v5831_v38 = vmax.f32 %v11859_v26, 0.0  ;;  %v6971_v26 = vmax.f32 %v12015_v54, 0.0 }
0x500e   :  { %4470 = vrot.lane.b32.xlu0 %v4463_v33, %s10446_s4  ;;  %v4919_v33 = vmax.f32 %v11721_v16, 0.0  ;;  %v6059_v16 = vmax.f32 %v11891_v59, 0.0  ;;  %v7199_v59 = vmax.f32 %v12042_v41, 0.0 }
0x5012   :  { %4693 = vrot.lane.b32.xlu0 %v4690_v55, %s10445_s0  ;;  %v5603_v55 = vmax.f32 %v11824_v5, 0.0  ;;  %v6743_v5 = vmax.f32 %v11985_v60, 0.0 }
0x5016   :  { %4921 = vrot.lane.b32.xlu0 %v4918_v56, %s10445_s0 }
0x501a   :  { %5149 = vrot.lane.b32.xlu0 %v5146_v36, %s10445_s0 }
0x501e   :  { %5377 = vrot.lane.b32.xlu0 %v5374_v21, %s10445_s0 }
0x5022   :  { %5605 = vrot.lane.b32.xlu0 %v5602_v20, %s10445_s0 }
0x5026   :  { %5833 = vrot.lane.b32.xlu0 %v5830_v30, %s10445_s0 }
0x502a   :  { %6061 = vrot.lane.b32.xlu0 %v6058_v61, %s10445_s0 }
0x502e   :  { %6289 = vrot.lane.b32.xlu0 %v6286_v3, %s10445_s0 }
0x5032   :  { %6517 = vrot.lane.b32.xlu0 %v6514_v58, %s10445_s0 }
0x5036   :  { %6745 = vrot.lane.b32.xlu0 %v6742_v12, %s10445_s0 }
0x503a   :  { %6973 = vrot.lane.b32.xlu0 %v6970_v27, %s10445_s0 }
0x503e   :  { %7201 = vrot.lane.b32.xlu0 %v7198_v40, %s10445_s0 }
0x5042   :  { %7429 = vrot.lane.b32.xlu0 %v7426_v43, %s10445_s0 }
0x5051   :  { %v7531_v7 = vpop.permute.xlu1 %7530 }
0x5052   :  { %v7533_v31 = vadd.f32 %v7531_v7, %v7438_v49 }
0x5054   :  { %10361 = vtanh.f32 %v7533_v31 }
0x5055   :  { %10363 = vpow2.f32 %v8407_v25 }
0x505e   :  { %v10362_v47 = vpop.eup %10361 }
0x505f   :  { %7537 = vrot.lane.b32.xlu1 %v10362_v47, %s10445_s0  ;;  %v10364_v45 = vpop.eup %10363 }
0x5060   :  { %v7631_v6 = vadd.f32 1.0, %v10364_v45 }
0x5062   :  { %10365 = vrcp.f32 %v7631_v6 }
0x5063   :  { %4465 = vrot.lane.b32.xlu1 %v4462_v53, %s10445_s0 }
0x506c   :  { %v10366_v17 = vpop.eup %10365 }
0x506d   :  { %v7646_v11 = vsub.f32 1.0, %v10366_v17  ;;  %v7652_v1 = vmul.f32 %v10366_v17, %v12074_v29 }
0x507c   :  { %v7649_v44 = vpop.permute.xlu0 %7648 }
0x507d   :  { %v7651_v10 = vmul.f32 %v7649_v44, %v7646_v11 }
0x507f   :  { %v12132_v50 = vadd.f32 %v7652_v1, %v7651_v10  ;;  %v7666_v10 = vld [vmem:[#allocation3 + $0xf0] sm:$0xff] }
0x5080   :  { %v4471_v2 = vpop.permute.xlu0 %4470 }
0x5081   :  { %4473 = vst.msk [vmem:[#allocation2 + $0x78] sm:$0xff] %vm609_vm3, %v4471_v2  ;;  %9438 = vmatmul.mubr.msk.f32.vlgmr.msra.gmra.mrb[94].mxu1 %vm375_vm2, %v12132_v50  ;;  %v7655_v48 = vmax.f32 %v12132_v50, 0.0 }
0x5084   :  { %v4694_v19 = vpop.permute.xlu0 %4693 }
0x5085   :  { %4696 = vst.msk [vmem:[#allocation2 + $0x8] sm:$0xff] %vm375_vm2, %v4694_v19 }
0x5088   :  { %v4922_v51 = vpop.permute.xlu0 %4921 }
0x5089   :  { %4924 = vst.msk [vmem:[#allocation2 + $0x10] sm:$0xff] %vm375_vm2, %v4922_v51  ;;  %v7667_v51 = vld [vmem:[#allocation3] sm:$0xff] }
0x508c   :  { %v5150_v37 = vpop.permute.xlu0 %5149 }
0x508d   :  { %5152 = vst.msk [vmem:[#allocation2 + $0x18] sm:$0xff] %vm375_vm2, %v5150_v37 }
0x5090   :  { %v5378_v14 = vpop.permute.xlu0 %5377 }
0x5091   :  { %5380 = vst.msk [vmem:[#allocation2 + $0x20] sm:$0xff] %vm375_vm2, %v5378_v14 }
0x5094   :  { %v5606_v49 = vpop.permute.xlu0 %5605 }
0x5095   :  { %5608 = vst.msk [vmem:[#allocation2 + $0x28] sm:$0xff] %vm375_vm2, %v5606_v49 }
0x5098   :  { %v5834_v32 = vpop.permute.xlu0 %5833 }
0x5099   :  { %5836 = vst.msk [vmem:[#allocation2 + $0x30] sm:$0xff] %vm375_vm2, %v5834_v32 }
0x509c   :  { %v6062_v24 = vpop.permute.xlu0 %6061 }
0x509d   :  { %6064 = vst.msk [vmem:[#allocation2 + $0x38] sm:$0xff] %vm375_vm2, %v6062_v24 }
0x50a0   :  { %v6290_v56 = vpop.permute.xlu0 %6289 }
0x50a4   :  { %v6518_v60 = vpop.permute.xlu0 %6517 }
0x50a8   :  { %v6746_v36 = vpop.permute.xlu0 %6745 }
0x50ac   :  { %v6974_v21 = vpop.permute.xlu0 %6973 }
0x50b0   :  { %v7202_v20 = vpop.permute.xlu0 %7201 }
0x50b4   :  { %v7430_v30 = vpop.permute.xlu0 %7429 }
0x50d1   :  { %v7538_v46 = vpop.permute.xlu1 %7537 }
0x50d2   :  { %v7540_v8 = vmul.f32 %v7538_v46, %v7535_v4 }
0x50d4   :  { %v12147_v9 = vadd.f32 %v7541_v34, %v7540_v8 }
0x50d5   :  { %v4466_v18 = vpop.permute.xlu1 %4465 }
0x50d6   :  { %v7654_v28 = vmax.f32 %v12147_v9, 0.0  ;;  %4468 = vst.msk [vmem:[#allocation2] sm:$0xff] %vm375_vm2, %v4466_v18  ;;  %7670 = vrot.lane.b32.xlu1 %v12147_v9, %s10445_s0 }
0x50d8   :  { %7657 = vrot.lane.b32.xlu0 %v7654_v28, %s10445_s0 }
0x50da   :  { %4698 = vrot.lane.b32.xlu1 %v4691_v39, %s10446_s4 }
0x50de   :  { %4926 = vrot.lane.b32.xlu1 %v4919_v33, %s10446_s4 }
0x50e2   :  { %5154 = vrot.lane.b32.xlu1 %v5147_v42, %s10446_s4  ;;  %v7668_v42 = vld [vmem:[#allocation3 + $0x8] sm:$0xff] }
0x50e6   :  { %5382 = vrot.lane.b32.xlu1 %v5375_v23, %s10446_s4 }
0x50ea   :  { %5610 = vrot.lane.b32.xlu1 %v5603_v55, %s10446_s4 }
0x50ee   :  { %5838 = vrot.lane.b32.xlu1 %v5831_v38, %s10446_s4 }
0x50f2   :  { %6066 = vrot.lane.b32.xlu1 %v6059_v16, %s10446_s4 }
0x50f6   :  { %6294 = vrot.lane.b32.xlu1 %v6287_v22, %s10446_s4 }
0x50fa   :  { %6522 = vrot.lane.b32.xlu1 %v6515_v13, %s10446_s4 }
0x50fe   :  { %6750 = vrot.lane.b32.xlu1 %v6743_v5, %s10446_s4 }
0x5102   :  { %6978 = vrot.lane.b32.xlu1 %v6971_v26, %s10446_s4 }
0x5106   :  { %7206 = vrot.lane.b32.xlu1 %v7199_v59, %s10446_s4 }
0x510a   :  { %7434 = vrot.lane.b32.xlu1 %v7427_v35, %s10446_s4 }
0x510e   :  { %7662 = vrot.lane.b32.xlu1 %v7655_v48, %s10446_s4 }
0x5148   :  { %v7671_v54 = vpop.permute.xlu1 %7670 }
0x5149   :  { %9427 = vmatmul.mubr.msk.f32.vlgmr.msra.gmra.mrb[94].mxu0 %vm375_vm2, %v7671_v54 }
0x514a   :  { %v7658_v61 = vpop.permute.xlu0 %7657 }
0x514c   :  { %v4699_v41 = vpop.permute.xlu1 %4698 }
0x514d   :  { %4701 = vst.msk [vmem:[#allocation2 + $0x70] sm:$0xff] %vm609_vm3, %v4699_v41 }
0x514e   :  { %7660 = vst.msk [vmem:[#allocation2 + $0x70] sm:$0xff] %vm375_vm2, %v7658_v61 }
0x5150   :  { %v4927_v29 = vpop.permute.xlu1 %4926 }
0x5151   :  { %4929 = vst.msk [vmem:[#allocation2 + $0x68] sm:$0xff] %vm609_vm3, %v4927_v29 }
0x5152   :  { %7432 = vst.msk [vmem:[#allocation2 + $0x68] sm:$0xff] %vm375_vm2, %v7430_v30  ;;  %v12218_v30 = vld [vmem:[%s12323_s9] ss:$0 sm:$0xff] }
0x5154   :  { %v5155_v3 = vpop.permute.xlu1 %5154  ;;  %v7840_v58 = vpop.f32.mrb[94].mxu1 }
0x5155   :  { %5157 = vst.msk [vmem:[#allocation2 + $0x60] sm:$0xff] %vm609_vm3, %v5155_v3  ;;  %v9439_v12 = vpop.f32.mrb[95].mxu1  ;;  %7845 = vrot.lane.b32.xlu1 %v7840_v58, %s10445_s0  ;;  %v7862_v1 = vadd.f32 %v7840_v58, %v11557_v15  ;;  %v10447_v58 = vmov 0  }
0x5156   :  { %7204 = vst.msk [vmem:[#allocation2 + $0x60] sm:$0xff] %vm375_vm2, %v7202_v20  ;;  %9870 = vset.pattern.permute.xlu1 %v10447_v58  ;;  %9869 = vset.pattern.permute.xlu0 %v10447_v58 }
0x5158   :  { %v5383_v27 = vpop.permute.xlu1 %5382 }
0x5159   :  { %5385 = vst.msk [vmem:[#allocation2 + $0x58] sm:$0xff] %vm609_vm3, %v5383_v27 }
0x515a   :  { %6976 = vst.msk [vmem:[#allocation2 + $0x58] sm:$0xff] %vm375_vm2, %v6974_v21 }
0x515c   :  { %v5611_v40 = vpop.permute.xlu1 %5610 }
0x515d   :  { %5613 = vst.msk [vmem:[#allocation2 + $0x50] sm:$0xff] %vm609_vm3, %v5611_v40 }
0x515e   :  { %6748 = vst.msk [vmem:[#allocation2 + $0x50] sm:$0xff] %vm375_vm2, %v6746_v36 }
0x5160   :  { %v5839_v43 = vpop.permute.xlu1 %5838 }
0x5161   :  { %5841 = vst.msk [vmem:[#allocation2 + $0x48] sm:$0xff] %vm609_vm3, %v5839_v43 }
0x5162   :  { %6520 = vst.msk [vmem:[#allocation2 + $0x48] sm:$0xff] %vm375_vm2, %v6518_v60 }
0x5164   :  { %v6067_v7 = vpop.permute.xlu1 %6066 }
0x5165   :  { %6069 = vst.msk [vmem:[#allocation2 + $0x40] sm:$0xff] %vm609_vm3, %v6067_v7 }
0x5166   :  { %6292 = vst.msk [vmem:[#allocation2 + $0x40] sm:$0xff] %vm375_vm2, %v6290_v56 }
0x5168   :  { %v6295_v31 = vpop.permute.xlu1 %6294 }
0x5169   :  { %6297 = vst.msk [vmem:[#allocation2 + $0x38] sm:$0xff] %vm609_vm3, %v6295_v31 }
0x516c   :  { %v6523_v63 = vpop.permute.xlu1 %6522 }
0x516d   :  { %6525 = vst.msk [vmem:[#allocation2 + $0x30] sm:$0xff] %vm609_vm3, %v6523_v63 }
0x5170   :  { %v6751_v25 = vpop.permute.xlu1 %6750 }
0x5171   :  { %6753 = vst.msk [vmem:[#allocation2 + $0x28] sm:$0xff] %vm609_vm3, %v6751_v25 }
0x5174   :  { %v6979_v47 = vpop.permute.xlu1 %6978 }
0x5175   :  { %6981 = vst.msk [vmem:[#allocation2 + $0x20] sm:$0xff] %vm609_vm3, %v6979_v47 }
0x5178   :  { %v7207_v53 = vpop.permute.xlu1 %7206 }
0x5179   :  { %7209 = vst.msk [vmem:[#allocation2 + $0x18] sm:$0xff] %vm609_vm3, %v7207_v53 }
0x517c   :  { %v7435_v45 = vpop.permute.xlu1 %7434 }
0x517d   :  { %7437 = vst.msk [vmem:[#allocation2 + $0x10] sm:$0xff] %vm609_vm3, %v7435_v45 }
0x5180   :  { %v7663_v6 = vpop.permute.xlu1 %7662  ;;  %v7964_v53 = vld [vmem:[#allocation2 + $0x18] sm:$0xff] }
0x5181   :  { %7665 = vst.msk [vmem:[#allocation2 + $0x8] sm:$0xff] %vm609_vm3, %v7663_v6  ;;  %v7965_v45 = vmul.f32 %v12218_v30, %v7964_v53 }
0x5183   :  { %v7966_v6 = vsel %vm118_vm1, %v7965_v45, 0.0 }
0x5184   :  { %v7946_v61 = vld [vmem:[#allocation2 + $0x10] sm:$0xff] }
0x5185   :  { %v7947_v3 = vmul.f32 %v12218_v30, %v7946_v61 }
0x5188   :  { %v7928_v54 = vld [vmem:[#allocation2 + $0x8] sm:$0xff] }
0x5189   :  { %v7929_v41 = vmul.f32 %v12218_v30, %v7928_v54 }
0x518b   :  { %v7930_v29 = vsel %vm118_vm1, %v7929_v41, 0.0 }
0x51c7   :  { %v7846_v19 = vpop.permute.xlu1 %7845 }
0x51c8   :  { %v7848_v37 = vadd.f32 %v7846_v19, %v7667_v51  ;;  %v7855_v22 = vadd.f32 %v7846_v19, %v7668_v42 }
0x51ca   :  { %v8411_v49 = vmul.f32 -1.442695, %v7848_v37  ;;  %v8412_v13 = vmul.f32 -1.442695, %v7855_v22 }
0x521c   :  { %v7740_v17 = vpop.f32.mrb[94].mxu0 }
0x521d   :  { %v7751_v11 = vadd.f32 %v7740_v17, %v11397_v52  ;;  %v9428_v44 = vpop.f32.mrb[95].mxu0  ;;  %v7744_v2 = vadd.f32 %v7740_v17, %v7666_v10  ;;  %v12231_v17 = vld [vmem:[#allocation4] ss:$0 sm:$0xff] }
0x521f   :  { %7753 = vrot.lane.b32.xlu0 %v7751_v11, %s10444_s23  ;;  %v8409_v14 = vmul.f32 -1.442695, %v7744_v2 }
0x5221   :  { %10367 = vpow2.f32 %v8409_v14 }
0x5222   :  { %10369 = vpow2.f32 %v8411_v49 }
0x5223   :  { %7864 = vrot.lane.b32.xlu0 %v7862_v1, %s10446_s4 }
0x522b   :  { %v10368_v32 = vpop.eup %10367 }
0x522c   :  { %v7748_v24 = vadd.f32 1.0, %v10368_v32  ;;  %v10370_v4 = vpop.eup %10369 }
0x522d   :  { %v7852_v52 = vadd.f32 1.0, %v10370_v4  ;;  %v7982_v4 = vld [vmem:[#allocation2 + $0x20] sm:$0xff] }
0x522e   :  { %10371 = vrcp.f32 %v7748_v24 }
0x522f   :  { %10373 = vrcp.f32 %v7852_v52  ;;  %v7983_v52 = vmul.f32 %v12218_v30, %v7982_v4 }
0x5238   :  { %v10372_v46 = vpop.eup %10371 }
0x5239   :  { %v10374_v8 = vpop.eup %10373  ;;  %v7763_v7 = vsub.f32 1.0, %v10372_v46  ;;  %v7769_v63 = vmul.f32 %v10372_v46, %v12147_v9 }
0x5291   :  { %v7754_v34 = vpop.permute.xlu0 %7753 }
0x5292   :  { %v7756_v15 = vmul.f32 %v10372_v46, %v7754_v34  ;;  %v8000_v46 = vld [vmem:[#allocation2 + $0x28] sm:$0xff]  ;;  %v7984_v34 = vsel %vm118_vm1, %v7983_v52, 0.0 }
0x5294   :  { %7758 = vrot.lane.b32.xlu1 %v7756_v15, %s10444_s23  ;;  %v8001_v15 = vmul.f32 %v12218_v30, %v8000_v46 }
0x5295   :  { %v7865_v18 = vpop.permute.xlu0 %7864 }
0x5296   :  { %v7867_v28 = vmul.f32 %v10374_v8, %v7865_v18  ;;  %v8018_v8 = vld [vmem:[#allocation2 + $0x30] sm:$0xff]  ;;  %v8002_v18 = vsel %vm118_vm1, %v8001_v15, 0.0 }
0x5298   :  { %7869 = vrot.lane.b32.xlu1 %v7867_v28, %s10444_s23  ;;  %v8019_v28 = vmul.f32 %v12218_v30, %v8018_v8 }
0x5306   :  { %v7759_v39 = vpop.permute.xlu1 %7758 }
0x5307   :  { %v7761_v33 = vadd.f32 %v7759_v39, %v7666_v10  ;;  %v8036_v39 = vld [vmem:[#allocation2 + $0x38] sm:$0xff] }
0x5309   :  { %10375 = vtanh.f32 %v7761_v33  ;;  %v8020_v33 = vsel %vm118_vm1, %v8019_v28, 0.0 }
0x530a   :  { %v7870_v23 = vpop.permute.xlu1 %7869 }
0x530b   :  { %v7872_v55 = vadd.f32 %v7870_v23, %v7668_v42  ;;  %v8037_v42 = vmul.f32 %v12218_v30, %v8036_v39  ;;  %v8054_v23 = vld [vmem:[#allocation2 + $0x40] sm:$0xff] }
0x530d   :  { %10377 = vtanh.f32 %v7872_v55  ;;  %v8038_v55 = vsel %vm118_vm1, %v8037_v42, 0.0 }
0x530e   :  { %10379 = vpow2.f32 %v8412_v13 }
0x5313   :  { %v10376_v38 = vpop.eup %10375 }
0x5314   :  { %7765 = vrot.lane.b32.xlu0 %v10376_v38, %s10445_s0  ;;  %v8055_v38 = vmul.f32 %v12218_v30, %v8054_v23 }
0x5316   :  { %v8056_v22 = vsel %vm118_vm1, %v8055_v38, 0.0 }
0x5317   :  { %v10378_v16 = vpop.eup %10377 }
0x5318   :  { %7876 = vrot.lane.b32.xlu0 %v10378_v16, %s10445_s0  ;;  %v10380_v5 = vpop.eup %10379  ;;  %v8072_v16 = vld [vmem:[#allocation2 + $0x48] sm:$0xff] }
0x5319   :  { %v7859_v26 = vadd.f32 1.0, %v10380_v5  ;;  %v8073_v13 = vmul.f32 %v12218_v30, %v8072_v16  ;;  %v8090_v5 = vld [vmem:[#allocation2 + $0x50] sm:$0xff] }
0x531b   :  { %10381 = vrcp.f32 %v7859_v26  ;;  %v8074_v26 = vsel %vm118_vm1, %v8073_v13, 0.0 }
0x5325   :  { %v10382_v59 = vpop.eup %10381 }
0x5326   :  { %v7874_v48 = vsub.f32 1.0, %v10382_v59  ;;  %v7880_v60 = vmul.f32 %v10382_v59, %v12132_v50  ;;  %v7948_v50 = vsel %vm118_vm1, %v7947_v3, 0.0  ;;  %v8091_v59 = vmul.f32 %v12218_v30, %v8090_v5 }
0x5386   :  { %v7766_v35 = vpop.permute.xlu0 %7765 }
0x5387   :  { %v7768_v31 = vmul.f32 %v7766_v35, %v7763_v7  ;;  %v8108_v35 = vld [vmem:[#allocation2 + $0x58] sm:$0xff] }
0x5389   :  { %v7770_v25 = vadd.f32 %v7769_v63, %v7768_v31 }
0x538a   :  { %v7877_v56 = vpop.permute.xlu0 %7876 }
0x538b   :  { %v7879_v36 = vmul.f32 %v7877_v56, %v7874_v48  ;;  %v7882_v47 = vmax.f32 %v7770_v25, 0.0  ;;  %v8092_v48 = vsel %vm118_vm1, %v8091_v59, 0.0  ;;  %v8109_v56 = vmul.f32 %v12218_v30, %v8108_v35  ;;  %v8144_v59 = vld [vmem:[#allocation2 + $0x68] sm:$0xff] }
0x538c   :  { %v8145_v35 = vmul.f32 %v12218_v30, %v8144_v59 }
0x538d   :  { %v7881_v21 = vadd.f32 %v7880_v60, %v7879_v36  ;;  %v8126_v60 = vld [vmem:[#allocation2 + $0x60] sm:$0xff]  ;;  %v8110_v36 = vsel %vm118_vm1, %v8109_v56, 0.0 }
0x538f   :  { %v7883_v20 = vmax.f32 %v7881_v21, 0.0  ;;  %v8127_v21 = vmul.f32 %v12218_v30, %v8126_v60 }
0x5391   :  { %7890 = vrot.lane.b32.xlu0 %v7883_v20, %s10446_s4  ;;  %v8162_v20 = vld [vmem:[#allocation2 + $0x70] sm:$0xff]  ;;  %v8128_v54 = vsel %vm118_vm1, %v8127_v21, 0.0 }
0x5392   :  { %v8163_v41 = vmul.f32 %v12218_v30, %v8162_v20  ;;  %v7996_v20 = vsub.s32 4, %v10737_v57 }
0x53b0   :  { %7931 = vadd.xlane.f32.xlu0 %v7930_v29  ;;  %v8164_v29 = vsel %vm118_vm1, %v8163_v41, 0.0  ;;  %v8014_v41 = vsub.s32 5, %v10737_v57 }
0x53b4   :  { %7949 = vadd.xlane.f32.xlu0 %v7948_v50  ;;  %v12262_v50 = vld [vmem:[%s12325_s11] sm:$0xff] }
0x5403   :  { %v7891_v12 = vpop.permute.xlu0 %7890 }
0x5404   :  { %7893 = vst.msk [vmem:[#allocation2] sm:$0xff] %vm609_vm3, %v7891_v12  ;;  %v7925_v12 = vrot.slane %v12262_v50, %v10743_v62 }
0x540b   :  { %v7898_v27 = vld [vmem:[#allocation2] sm:$0xff] }
0x540c   :  { %v7905_v40 = vmul.f32 %v12218_v30, %v7898_v27  ;;  %v7960_v27 = vsub.s32 2, %v10737_v57 }
0x540e   :  { %v7906_v43 = vsel %vm118_vm1, %v7905_v40, 0.0  ;;  %v7943_v40 = vrot.slane %v12262_v50, %v10749_v0  ;;  %v7961_v63 = vrot.slane %v12262_v50, %v7960_v27 }
0x540f   :  { %7907 = vadd.xlane.f32.xlu1 %v7906_v43 }
0x5420   :  { %7885 = vrot.lane.b32.xlu1 %v7882_v47, %s10445_s0 }
0x543d   :  { %v7932_v11 = vpop.xlane.xlu0 %7931 }
0x543e   :  { %v7933_v44 = vadd.f32 %v12231_v17, %v7932_v11  ;;  %v7978_v11 = vsub.s32 3, %v10737_v57 }
0x5440   :  { %v7934_v1 = vmax.f32 %v7933_v44, 0.0  ;;  %v7979_v44 = vrot.slane %v12262_v50, %v7978_v11 }
0x5441   :  { %v7950_v10 = vpop.xlane.xlu0 %7949 }
0x5442   :  { %v7951_v19 = vadd.f32 %v12231_v17, %v7950_v10 }
0x5444   :  { %7967 = vadd.xlane.f32.xlu1 %v7966_v6  ;;  %v7952_v14 = vmax.f32 %v7951_v19, 0.0 }
0x5455   :  { %7937 = vperm.xlu1 %9870, %v7934_v1  }
0x549c   :  { %v7908_v2 = vpop.xlane.xlu1 %7907 }
0x549d   :  { %v7915_v9 = vadd.f32 %v12231_v17, %v7908_v2 }
0x549f   :  { %v7916_v51 = vmax.f32 %v7915_v9, 0.0 }
0x54a0   :  { %v7886_v37 = vpop.permute.xlu1 %7885 }
0x54a1   :  { %7888 = vst.msk [vmem:[#allocation2 + $0x78] sm:$0xff] %vm375_vm2, %v7886_v37  ;;  %7919 = vperm.xlu0 %9869, %v7916_v51  }
0x54a5   :  { %7955 = vperm.xlu0 %9869, %v7952_v14  }
0x54a8   :  { %v8180_v61 = vld [vmem:[#allocation2 + $0x78] sm:$0xff] }
0x54a9   :  { %v8181_v3 = vmul.f32 %v12218_v30, %v8180_v61  ;;  %v8032_v30 = vsub.s32 6, %v10737_v57 }
0x54ab   :  { %v8182_v58 = vsel %vm118_vm1, %v8181_v3, 0.0  ;;  %v8015_v3 = vrot.slane %v12262_v50, %v8014_v41 }
0x54d1   :  { %v7968_v49 = vpop.xlane.xlu1 %7967 }
0x54d2   :  { %v7969_v32 = vadd.f32 %v12231_v17, %v7968_v49 }
0x54d4   :  { %v7970_v24 = vmax.f32 %v7969_v32, 0.0 }
0x54d5   :  { %v7938_v43 = vpop.permute.xlu1 %7937 }
0x54d6   :  { %7973 = vperm.xlu0 %9869, %v7970_v24   ;;  %v7944_v25 = vmul.f32 %v7943_v40, %v7938_v43  ;;  %v8033_v43 = vrot.slane %v12262_v50, %v8032_v30 }
0x54f5   :  { %7985 = vadd.xlane.f32.xlu0 %v7984_v34 }
0x54f9   :  { %8003 = vadd.xlane.f32.xlu0 %v8002_v18 }
0x54fd   :  { %8021 = vadd.xlane.f32.xlu0 %v8020_v33 }
0x5501   :  { %8039 = vadd.xlane.f32.xlu0 %v8038_v55 }
0x5505   :  { %8057 = vadd.xlane.f32.xlu0 %v8056_v22 }
0x5509   :  { %8075 = vadd.xlane.f32.xlu0 %v8074_v26 }
0x550d   :  { %8093 = vadd.xlane.f32.xlu0 %v8092_v48  ;;  %v8146_v48 = vsel %vm118_vm1, %v8145_v35, 0.0 }
0x5511   :  { %8111 = vadd.xlane.f32.xlu0 %v8110_v36 }
0x5515   :  { %8129 = vadd.xlane.f32.xlu0 %v8128_v54  ;;  %v7997_v54 = vrot.slane %v12262_v50, %v7996_v20 }
0x5519   :  { %8165 = vadd.xlane.f32.xlu0 %v8164_v29 }
0x551d   :  { %8183 = vadd.xlane.f32.xlu0 %v8182_v58 }
0x5520   :  { %v7920_v7 = vpop.permute.xlu0 %7919 }
0x5521   :  { %v7926_v31 = vmul.f32 %v7925_v12, %v7920_v7  ;;  %v8050_v7 = vsub.s32 7, %v10737_v57 }
0x5523   :  { %v7945_v53 = vadd.f32 %v7944_v25, %v7926_v31 }
0x5524   :  { %v7956_v47 = vpop.permute.xlu0 %7955 }
0x5525   :  { %v7962_v45 = vmul.f32 %v7961_v63, %v7956_v47  ;;  %v8051_v47 = vrot.slane %v12262_v50, %v8050_v7 }
0x5527   :  { %v7963_v6 = vadd.f32 %v7962_v45, %v7945_v53  ;;  %v7897_v53 = vld [vmem:[%s12325_s11 + $0x8] sm:$0xff] }
0x5528   :  { %v8105_v50 = vrot.slane %v7897_v53, %v7960_v27  ;;  %v8141_v27 = vrot.slane %v7897_v53, %v7996_v20 }
0x5555   :  { %v7974_v1 = vpop.permute.xlu0 %7973 }
0x5556   :  { %v7980_v10 = vmul.f32 %v7979_v44, %v7974_v1  ;;  %v8069_v1 = vrot.slane %v7897_v53, %v10743_v62 }
0x5558   :  { %v7981_v2 = vadd.f32 %v7980_v10, %v7963_v6 }
0x5582   :  { %v7986_v9 = vpop.xlane.xlu0 %7985 }
0x5583   :  { %v7987_v19 = vadd.f32 %v12231_v17, %v7986_v9 }
0x5585   :  { %v7988_v51 = vmax.f32 %v7987_v19, 0.0  ;;  %v8087_v19 = vrot.slane %v7897_v53, %v10749_v0 }
0x5586   :  { %v8004_v37 = vpop.xlane.xlu0 %8003 }
0x5587   :  { %v8005_v14 = vadd.f32 %v12231_v17, %v8004_v37  ;;  %7991 = vperm.xlu1 %9870, %v7988_v51  }
0x5589   :  { %v8006_v49 = vmax.f32 %v8005_v14, 0.0 }
0x558a   :  { %v8022_v32 = vpop.xlane.xlu0 %8021 }
0x558b   :  { %v8023_v24 = vadd.f32 %v12231_v17, %v8022_v32  ;;  %8009 = vperm.xlu1 %9870, %v8006_v49  }
0x558d   :  { %v8024_v4 = vmax.f32 %v8023_v24, 0.0 }
0x558e   :  { %v8040_v52 = vpop.xlane.xlu0 %8039 }
0x558f   :  { %v8041_v46 = vadd.f32 %v12231_v17, %v8040_v52  ;;  %8027 = vperm.xlu1 %9870, %v8024_v4   ;;  %v8123_v4 = vrot.slane %v7897_v53, %v7978_v11  ;;  %v8177_v11 = vrot.slane %v7897_v53, %v8032_v30 }
0x5591   :  { %v8042_v34 = vmax.f32 %v8041_v46, 0.0 }
0x5592   :  { %v8058_v15 = vpop.xlane.xlu0 %8057 }
0x5593   :  { %v8059_v8 = vadd.f32 %v12231_v17, %v8058_v15  ;;  %8045 = vperm.xlu1 %9870, %v8042_v34  }
0x5595   :  { %v8060_v18 = vmax.f32 %v8059_v8, 0.0 }
0x5596   :  { %v8076_v28 = vpop.xlane.xlu0 %8075 }
0x5597   :  { %v8077_v39 = vadd.f32 %v12231_v17, %v8076_v28  ;;  %8063 = vperm.xlu1 %9870, %v8060_v18  }
0x5599   :  { %v8078_v33 = vmax.f32 %v8077_v39, 0.0 }
0x559a   :  { %v8094_v42 = vpop.xlane.xlu0 %8093 }
0x559b   :  { %v8095_v23 = vadd.f32 %v12231_v17, %v8094_v42  ;;  %8081 = vperm.xlu1 %9870, %v8078_v33   ;;  %v8159_v33 = vrot.slane %v7897_v53, %v8014_v41 }
0x559d   :  { %v8096_v55 = vmax.f32 %v8095_v23, 0.0 }
0x559e   :  { %v8112_v38 = vpop.xlane.xlu0 %8111 }
0x559f   :  { %v8113_v16 = vadd.f32 %v12231_v17, %v8112_v38  ;;  %8099 = vperm.xlu1 %9870, %v8096_v55   ;;  %v8195_v38 = vrot.slane %v7897_v53, %v8050_v7 }
0x55a1   :  { %v8114_v22 = vmax.f32 %v8113_v16, 0.0 }
0x55a2   :  { %v8130_v13 = vpop.xlane.xlu0 %8129 }
0x55a3   :  { %v8131_v5 = vadd.f32 %v12231_v17, %v8130_v13  ;;  %8117 = vperm.xlu1 %9870, %v8114_v22  }
0x55a5   :  { %v8132_v26 = vmax.f32 %v8131_v5, 0.0 }
0x55a6   :  { %v8166_v56 = vpop.xlane.xlu0 %8165 }
0x55a7   :  { %8135 = vperm.xlu0 %9869, %v8132_v26   ;;  %v8167_v0 = vadd.f32 %v12231_v17, %v8166_v56 }
0x55a9   :  { %v8168_v28 = vmax.f32 %v8167_v0, 0.0 }
0x55aa   :  { %v8184_v60 = vpop.xlane.xlu0 %8183 }
0x55ab   :  { %v8185_v36 = vadd.f32 %v12231_v17, %v8184_v60 }
0x55ad   :  { %v8186_v21 = vmax.f32 %v8185_v36, 0.0 }
0x55c7   :  { %8147 = vadd.xlane.f32.xlu1 %v8146_v48 }
0x55d8   :  { %8189 = vperm.xlu1 %9870, %v8186_v21  }
0x5606   :  { %v7992_v61 = vpop.permute.xlu1 %7991 }
0x5607   :  { %v7998_v29 = vmul.f32 %v7997_v54, %v7992_v61 }
0x5609   :  { %v7999_v58 = vadd.f32 %v7998_v29, %v7981_v2 }
0x560a   :  { %v8010_v12 = vpop.permute.xlu1 %8009 }
0x560b   :  { %v8016_v40 = vmul.f32 %v8015_v3, %v8010_v12 }
0x560d   :  { %v8017_v31 = vadd.f32 %v8016_v40, %v7999_v58 }
0x560e   :  { %v8028_v63 = vpop.permute.xlu1 %8027 }
0x560f   :  { %v8034_v25 = vmul.f32 %v8033_v43, %v8028_v63 }
0x5611   :  { %v8035_v45 = vadd.f32 %v8034_v25, %v8017_v31 }
0x5612   :  { %v8046_v6 = vpop.permute.xlu1 %8045 }
0x5613   :  { %v8052_v44 = vmul.f32 %v8051_v47, %v8046_v6 }
0x5615   :  { %v8053_v10 = vadd.f32 %v8052_v44, %v8035_v45 }
0x5616   :  { %v8064_v2 = vpop.permute.xlu1 %8063 }
0x5617   :  { %v8070_v9 = vmul.f32 %v8069_v1, %v8064_v2 }
0x5619   :  { %v8071_v51 = vadd.f32 %v8070_v9, %v8053_v10 }
0x561a   :  { %v8082_v37 = vpop.permute.xlu1 %8081 }
0x561b   :  { %v8088_v14 = vmul.f32 %v8087_v19, %v8082_v37 }
0x561d   :  { %v8089_v49 = vadd.f32 %v8088_v14, %v8071_v51 }
0x561e   :  { %v8100_v32 = vpop.permute.xlu1 %8099 }
0x561f   :  { %v8106_v24 = vmul.f32 %v8105_v50, %v8100_v32 }
0x5621   :  { %v8107_v52 = vadd.f32 %v8106_v24, %v8089_v49 }
0x5622   :  { %v8118_v46 = vpop.permute.xlu1 %8117 }
0x5623   :  { %v8124_v62 = vmul.f32 %v8123_v4, %v8118_v46 }
0x5625   :  { %v8125_v34 = vadd.f32 %v8124_v62, %v8107_v52 }
0x5626   :  { %v8136_v39 = vpop.permute.xlu0 %8135 }
0x5627   :  { %v8142_v42 = vmul.f32 %v8141_v27, %v8136_v39 }
0x5629   :  { %v8143_v55 = vadd.f32 %v8142_v42, %v8125_v34 }
0x5654   :  { %v8148_v15 = vpop.xlane.xlu1 %8147 }
0x5655   :  { %v8149_v8 = vadd.f32 %v12231_v17, %v8148_v15  ;;  %v8415_v17 = vld [vmem:[%s12326_s12] ss:$0 sm:$0xff] }
0x5657   :  { %v8150_v18 = vmax.f32 %v8149_v8, 0.0 }
0x5658   :  { %v8190_v16 = vpop.permute.xlu1 %8189 }
0x5659   :  { %8153 = vperm.xlu0 %9869, %v8150_v18   ;;  %v8196_v26 = vmul.f32 %v8195_v38, %v8190_v16 }
0x565d   :  { %8171 = vperm.xlu0 %9869, %v8168_v28  }
0x56d8   :  { %v8154_v23 = vpop.permute.xlu0 %8153 }
0x56d9   :  { %v8160_v57 = vmul.f32 %v8159_v33, %v8154_v23 }
0x56db   :  { %v8161_v13 = vadd.f32 %v8160_v57, %v8143_v55 }
0x56dc   :  { %v8172_v22 = vpop.permute.xlu0 %8171 }
0x56dd   :  { %v8178_v5 = vmul.f32 %v8177_v11, %v8172_v22 }
0x56df   :  { %v8179_v59 = vadd.f32 %v8178_v5, %v8161_v13 }
0x56e1   :  { %v8197_v35 = vadd.f32 %v8196_v26, %v8179_v59 }
0x56e3   :  { %v8205_v48 = vadd.f32 %v8415_v17, %v8197_v35 }
0x56e5   :  { %v8206_v56 = vmax.f32 %v8205_v48, 0.0 }
0x56e7   :  { %8208 = vst.msk [vmem:[%s12327_s13] sm:$0xff] %vm8207_vm4, %v8206_v56 }
0x56e8   :  { %8213 = vsyncpa [#allocation6], 1 }
0x56e9   :  { %8214 = vsyncpa [#allocation8], 1 }

</bundles_post_ra>
